<compile_context>
chip_gen: v7x
topology: tpu7x:2x2x1
jax: 0.10.0
libtpu: 0.0.40
codegen_flags: <defaults>
</compile_context>

<pallas_src>
import math

import jax
import jax.numpy as jnp
from jax.experimental import pallas as pl
from jax.experimental.pallas import tpu as pltpu

FORECAST_HORIZON = 14
PATCH_SIZE = 4
WINDOW_SIZE = 56
D_MODEL = 128
NHEAD = 4
HEAD_DIM = D_MODEL // NHEAD
DIM_FF = 2048          # nn.TransformerEncoderLayer default
NUM_LAYERS = 3
LN_EPS = 1e-5


# ---------------------------------------------------------------------------
# Fused Pallas kernel: embedding -> 3 encoder layers -> fc (one batch element
# per grid step; everything stays in VMEM / vregs).
# ---------------------------------------------------------------------------
def _patchtst_fused_kernel(patches_ref, emb_w_ref, emb_b_ref,
                           wqkv_ref, bqkv_ref, wo_ref, bo_ref,
                           g1_ref, bt1_ref, w1_ref, b1_ref,
                           w2_ref, b2_ref, g2_ref, bt2_ref,
                           fc_w_ref, fc_b_ref,
                           o_ref,
                           heads_ref):
    scale = 1.0 / math.sqrt(HEAD_DIM)

    # ---- patch embedding: (S, P*Din) @ (P*Din, D) + b ----
    x = jnp.dot(patches_ref[...], emb_w_ref[...],
                preferred_element_type=jnp.float32) + emb_b_ref[...]

    # ---- transformer encoder layers (post-norm), statically unrolled ----
    for l in range(NUM_LAYERS):
        # fused QKV projection: one (S,128)@(128,384) matmul
        qkv = jnp.dot(x, wqkv_ref[l],
                      preferred_element_type=jnp.float32) + bqkv_ref[l]
        q_all = qkv[:, :D_MODEL] * scale          # fold 1/sqrt(hd) once
        k_all = qkv[:, D_MODEL:2 * D_MODEL]
        v_all = qkv[:, 2 * D_MODEL:]

        for h in range(NHEAD):
            sl = slice(h * HEAD_DIM, (h + 1) * HEAD_DIM)
            q = q_all[:, sl]
            k = k_all[:, sl]
            v = v_all[:, sl]
            # transpose-free scores: contract feature dim of q and k
            s = jax.lax.dot_general(q, k, (((1,), (1,)), ((), ())),
                                    preferred_element_type=jnp.float32)
            s = s - jnp.max(s, axis=-1, keepdims=True)
            p = jnp.exp(s)
            inv = pl.reciprocal(jnp.sum(p, axis=-1, keepdims=True), approx=True)
            p = p * inv
            # head output lands in its 32-lane slice of the scratch
            heads_ref[:, sl] = jnp.dot(p, v, preferred_element_type=jnp.float32)

        # single full-width (K=128) output projection
        attn = jnp.dot(heads_ref[...], wo_ref[l],
                       preferred_element_type=jnp.float32) + bo_ref[l]

        # residual + LayerNorm1 (biased variance, eps=1e-5)
        y = x + attn
        mu = jnp.mean(y, axis=-1, keepdims=True)
        var = jnp.mean(jnp.square(y - mu), axis=-1, keepdims=True)
        y = (y - mu) * jax.lax.rsqrt(var + LN_EPS) * g1_ref[l] + bt1_ref[l]

        # feed-forward: ReLU(y @ W1 + b1) @ W2 + b2
        h1 = jnp.dot(y, w1_ref[l], preferred_element_type=jnp.float32) + b1_ref[l]
        h1 = jnp.maximum(h1, 0.0)
        h2 = jnp.dot(h1, w2_ref[l], preferred_element_type=jnp.float32) + b2_ref[l]

        # residual + LayerNorm2
        z = y + h2
        mu2 = jnp.mean(z, axis=-1, keepdims=True)
        var2 = jnp.mean(jnp.square(z - mu2), axis=-1, keepdims=True)
        x = (z - mu2) * jax.lax.rsqrt(var2 + LN_EPS) * g2_ref[l] + bt2_ref[l]

    # ---- final fc, lane-padded to 128 output columns ----
    out = jnp.dot(x, fc_w_ref[...],
                  preferred_element_type=jnp.float32) + fc_b_ref[...]
    o_ref[...] = out.astype(o_ref.dtype)


# ---------------------------------------------------------------------------
# Parameters
# ---------------------------------------------------------------------------
def init_params(key, input_dim, output_dim):
    keys = iter(jax.random.split(key, 64))

    def w(shape, scale=0.02):
        return scale * jax.random.normal(next(keys), shape, dtype=jnp.float32)

    L = NUM_LAYERS
    return {
        "emb_w": w((PATCH_SIZE * input_dim, D_MODEL)),
        "emb_b": jnp.zeros((D_MODEL,), jnp.float32),
        # per-layer weights stacked along a leading layer axis
        "wqkv": w((L, D_MODEL, 3 * D_MODEL)),
        "bqkv": jnp.zeros((L, 3 * D_MODEL), jnp.float32),
        "wo": w((L, D_MODEL, D_MODEL)),
        "bo": jnp.zeros((L, D_MODEL), jnp.float32),
        "ln1_g": jnp.ones((L, D_MODEL), jnp.float32),
        "ln1_b": jnp.zeros((L, D_MODEL), jnp.float32),
        "w1": w((L, D_MODEL, DIM_FF)),
        "b1": jnp.zeros((L, DIM_FF), jnp.float32),
        "w2": w((L, DIM_FF, D_MODEL)),
        "b2": jnp.zeros((L, D_MODEL), jnp.float32),
        "ln2_g": jnp.ones((L, D_MODEL), jnp.float32),
        "ln2_b": jnp.zeros((L, D_MODEL), jnp.float32),
        "fc_w": w((D_MODEL, output_dim)),
        "fc_b": jnp.zeros((output_dim,), jnp.float32),
    }


# ---------------------------------------------------------------------------
# Forward pass (single fused pallas_call)
# ---------------------------------------------------------------------------
def patchtst_forward(params, x):
    B, T, Din = x.shape
    n_p = T // PATCH_SIZE
    L = NUM_LAYERS
    out_dim = params["fc_w"].shape[1]
    n_pad = ((out_dim + 127) // 128) * 128      # lane-dense output width

    # Reproduce torch: x.unfold(1, p, p).permute(0, 2, 1, 3).contiguous()
    #                   .view(B, -1, p * D)   (tiny host-side regroup)
    u = x.reshape(B, n_p, PATCH_SIZE, Din)       # [b, i, k, d] = x[b, i*p+k, d]
    u = jnp.transpose(u, (0, 3, 1, 2))           # [b, d, i, k]
    patches = u.reshape(B, n_p, PATCH_SIZE * Din)

    # Pad final fc to 128 lanes so the kernel output store is unmasked.
    fc_w_pad = jnp.zeros((D_MODEL, n_pad), x.dtype).at[:, :out_dim].set(params["fc_w"])
    fc_b_pad = jnp.zeros((1, n_pad), x.dtype).at[:, :out_dim].set(params["fc_b"])

    args = [
        patches,
        params["emb_w"], params["emb_b"].reshape(1, D_MODEL),
        params["wqkv"], params["bqkv"].reshape(L, 1, 3 * D_MODEL),
        params["wo"], params["bo"].reshape(L, 1, D_MODEL),
        params["ln1_g"].reshape(L, 1, D_MODEL), params["ln1_b"].reshape(L, 1, D_MODEL),
        params["w1"], params["b1"].reshape(L, 1, DIM_FF),
        params["w2"], params["b2"].reshape(L, 1, D_MODEL),
        params["ln2_g"].reshape(L, 1, D_MODEL), params["ln2_b"].reshape(L, 1, D_MODEL),
        fc_w_pad, fc_b_pad,
    ]

    in_specs = [pl.BlockSpec((None, n_p, PATCH_SIZE * Din), lambda b: (b, 0, 0))]
    for a in args[1:]:
        nd = a.ndim
        # whole array resident in VMEM, same block for every grid step
        in_specs.append(pl.BlockSpec(a.shape, lambda b, _nd=nd: (0,) * _nd))

    out = pl.pallas_call(
        _patchtst_fused_kernel,
        out_shape=jax.ShapeDtypeStruct((B, n_p, n_pad), x.dtype),
        grid=(B,),
        in_specs=in_specs,
        out_specs=pl.BlockSpec((None, n_p, n_pad), lambda b: (b, 0, 0)),
        scratch_shapes=[pltpu.VMEM((n_p, D_MODEL), jnp.float32)],  # head concat buf
        compiler_params=pltpu.CompilerParams(
            dimension_semantics=("parallel",),
            # ~7 MB f32 weights, double-buffered by the pipeliner -> ~14 MB.
            # Raise the scoped VMEM limit so this fits on v5e (16 MiB default)
            # while staying well under v7x's 64 MiB physical VMEM.
            vmem_limit_bytes=48 * 1024 * 1024,
        ),
    )(*args)

    return out[:, :FORECAST_HORIZON, :out_dim]


if __name__ == "__main__":
    input_dim = 8
    output_dim = 4
    batch = 2

    x = jax.random.normal(jax.random.PRNGKey(0),
                          (batch, WINDOW_SIZE, input_dim), dtype=jnp.float32)
    params = init_params(jax.random.PRNGKey(42), input_dim, output_dim)

    out = jax.jit(patchtst_forward)(params, x)
    out = jax.block_until_ready(out)
    assert out.shape == (batch, FORECAST_HORIZON, output_dim), out.shape
    assert bool(jnp.all(jnp.isfinite(out)))
    print("KERNEL_OK")
</pallas_src>

<mosaic_0001>
module attributes {stable_mosaic.version = 11 : i64} {
  func.func @_patchtst_fused_kernel(%arg0: i32, %arg1: memref<1x14x32xf32, #tpu.memory_space<vmem>>, %arg2: memref<32x128xf32, #tpu.memory_space<vmem>>, %arg3: memref<1x128xf32, #tpu.memory_space<vmem>>, %arg4: memref<3x128x384xf32, #tpu.memory_space<vmem>>, %arg5: memref<3x1x384xf32, #tpu.memory_space<vmem>>, %arg6: memref<3x128x128xf32, #tpu.memory_space<vmem>>, %arg7: memref<3x1x128xf32, #tpu.memory_space<vmem>>, %arg8: memref<3x1x128xf32, #tpu.memory_space<vmem>>, %arg9: memref<3x1x128xf32, #tpu.memory_space<vmem>>, %arg10: memref<3x128x2048xf32, #tpu.memory_space<vmem>>, %arg11: memref<3x1x2048xf32, #tpu.memory_space<vmem>>, %arg12: memref<3x2048x128xf32, #tpu.memory_space<vmem>>, %arg13: memref<3x1x128xf32, #tpu.memory_space<vmem>>, %arg14: memref<3x1x128xf32, #tpu.memory_space<vmem>>, %arg15: memref<3x1x128xf32, #tpu.memory_space<vmem>>, %arg16: memref<128x128xf32, #tpu.memory_space<vmem>>, %arg17: memref<1x128xf32, #tpu.memory_space<vmem>>, %arg18: memref<1x14x128xf32, #tpu.memory_space<vmem>>, %arg19: memref<14x128xf32, #tpu.memory_space<vmem>>) attributes {dimension_semantics = [#tpu.dimension_semantics<parallel>], iteration_bounds = array<i64: 2>, scalar_prefetch = 0 : i64, scratch_operands = 1 : i64, tpu.core_type = #tpu.core_type<tc>, window_params = [{transform_indices = @transform_0, window_bounds = array<i64: 1, 14, 32>}, {pipeline_mode = #tpu.pipeline_mode<synchronous>, transform_indices = @transform_1, window_bounds = array<i64: 32, 128>}, {pipeline_mode = #tpu.pipeline_mode<synchronous>, transform_indices = @transform_2, window_bounds = array<i64: 1, 128>}, {pipeline_mode = #tpu.pipeline_mode<synchronous>, transform_indices = @transform_3, window_bounds = array<i64: 3, 128, 384>}, {pipeline_mode = #tpu.pipeline_mode<synchronous>, transform_indices = @transform_4, window_bounds = array<i64: 3, 1, 384>}, {pipeline_mode = #tpu.pipeline_mode<synchronous>, transform_indices = @transform_5, window_bounds = array<i64: 3, 128, 128>}, {pipeline_mode = #tpu.pipeline_mode<synchronous>, transform_indices = @transform_6, window_bounds = array<i64: 3, 1, 128>}, {pipeline_mode = #tpu.pipeline_mode<synchronous>, transform_indices = @transform_7, window_bounds = array<i64: 3, 1, 128>}, {pipeline_mode = #tpu.pipeline_mode<synchronous>, transform_indices = @transform_8, window_bounds = array<i64: 3, 1, 128>}, {pipeline_mode = #tpu.pipeline_mode<synchronous>, transform_indices = @transform_9, window_bounds = array<i64: 3, 128, 2048>}, {pipeline_mode = #tpu.pipeline_mode<synchronous>, transform_indices = @transform_10, window_bounds = array<i64: 3, 1, 2048>}, {pipeline_mode = #tpu.pipeline_mode<synchronous>, transform_indices = @transform_11, window_bounds = array<i64: 3, 2048, 128>}, {pipeline_mode = #tpu.pipeline_mode<synchronous>, transform_indices = @transform_12, window_bounds = array<i64: 3, 1, 128>}, {pipeline_mode = #tpu.pipeline_mode<synchronous>, transform_indices = @transform_13, window_bounds = array<i64: 3, 1, 128>}, {pipeline_mode = #tpu.pipeline_mode<synchronous>, transform_indices = @transform_14, window_bounds = array<i64: 3, 1, 128>}, {pipeline_mode = #tpu.pipeline_mode<synchronous>, transform_indices = @transform_15, window_bounds = array<i64: 128, 128>}, {pipeline_mode = #tpu.pipeline_mode<synchronous>, transform_indices = @transform_16, window_bounds = array<i64: 1, 128>}, {transform_indices = @transform_17, window_bounds = array<i64: 1, 14, 128>}]} {
    %c0 = arith.constant 0 : index
    %c0_0 = arith.constant 0 : index
    %c0_1 = arith.constant 0 : index
    %0 = vector.load %arg1[%c0, %c0_0, %c0_1] : memref<1x14x32xf32, #tpu.memory_space<vmem>>, vector<1x14x32xf32>
    %1 = vector.shape_cast %0 : vector<1x14x32xf32> to vector<14x32xf32>
    %c0_2 = arith.constant 0 : index
    %c0_3 = arith.constant 0 : index
    %2 = vector.load %arg2[%c0_2, %c0_3] : memref<32x128xf32, #tpu.memory_space<vmem>>, vector<32x128xf32>
    %cst = arith.constant dense<0.000000e+00> : vector<14x128xf32>
    %3 = tpu.matmul %1, %2, %cst {dimension_numbers = #tpu.dot_dimension_numbers<[1], [0], [0], [1], [0, 0, 1, 1], [], []>} : vector<14x32xf32>, vector<32x128xf32>, vector<14x128xf32> -> vector<14x128xf32>
    %c0_4 = arith.constant 0 : index
    %c0_5 = arith.constant 0 : index
    %4 = vector.load %arg3[%c0_4, %c0_5] : memref<1x128xf32, #tpu.memory_space<vmem>>, vector<1x128xf32>
    %5 = vector.broadcast %4 : vector<1x128xf32> to vector<14x128xf32>
    %6 = arith.addf %3, %5 : vector<14x128xf32>
    %c0_6 = arith.constant 0 : index
    %c0_7 = arith.constant 0 : index
    %c0_8 = arith.constant 0 : index
    %7 = vector.load %arg4[%c0_6, %c0_7, %c0_8] : memref<3x128x384xf32, #tpu.memory_space<vmem>>, vector<1x128x384xf32>
    %8 = vector.shape_cast %7 : vector<1x128x384xf32> to vector<128x384xf32>
    %cst_9 = arith.constant dense<0.000000e+00> : vector<14x384xf32>
    %9 = tpu.matmul %6, %8, %cst_9 {dimension_numbers = #tpu.dot_dimension_numbers<[1], [0], [0], [1], [0, 0, 1, 1], [], []>} : vector<14x128xf32>, vector<128x384xf32>, vector<14x384xf32> -> vector<14x384xf32>
    %c0_10 = arith.constant 0 : index
    %c0_11 = arith.constant 0 : index
    %c0_12 = arith.constant 0 : index
    %10 = vector.load %arg5[%c0_10, %c0_11, %c0_12] : memref<3x1x384xf32, #tpu.memory_space<vmem>>, vector<1x1x384xf32>
    %11 = vector.shape_cast %10 : vector<1x1x384xf32> to vector<1x384xf32>
    %12 = vector.broadcast %11 : vector<1x384xf32> to vector<14x384xf32>
    %13 = arith.addf %9, %12 : vector<14x384xf32>
    %14 = vector.extract_strided_slice %13 {offsets = [0, 0], sizes = [14, 128], strides = [1, 1]} : vector<14x384xf32> to vector<14x128xf32>
    %cst_13 = arith.constant 0.176776692 : f32
    %15 = vector.broadcast %cst_13 : f32 to vector<14x128xf32>
    %16 = arith.mulf %14, %15 : vector<14x128xf32>
    %17 = vector.extract_strided_slice %13 {offsets = [0, 128], sizes = [14, 128], strides = [1, 1]} : vector<14x384xf32> to vector<14x128xf32>
    %18 = vector.extract_strided_slice %13 {offsets = [0, 256], sizes = [14, 128], strides = [1, 1]} : vector<14x384xf32> to vector<14x128xf32>
    %19 = vector.extract_strided_slice %16 {offsets = [0, 0], sizes = [14, 32], strides = [1, 1]} : vector<14x128xf32> to vector<14x32xf32>
    %20 = vector.extract_strided_slice %17 {offsets = [0, 0], sizes = [14, 32], strides = [1, 1]} : vector<14x128xf32> to vector<14x32xf32>
    %21 = vector.extract_strided_slice %18 {offsets = [0, 0], sizes = [14, 32], strides = [1, 1]} : vector<14x128xf32> to vector<14x32xf32>
    %cst_14 = arith.constant dense<0.000000e+00> : vector<14x14xf32>
    %22 = tpu.matmul %19, %20, %cst_14 {dimension_numbers = #tpu.dot_dimension_numbers<[1], [1], [0], [0], [0, 0, 1, 0], [], []>} : vector<14x32xf32>, vector<14x32xf32>, vector<14x14xf32> -> vector<14x14xf32>
    %cst_15 = arith.constant dense<0xFF800000> : vector<14xf32>
    %23 = vector.multi_reduction <maximumf>, %22, %cst_15 [1] : vector<14x14xf32> to vector<14xf32>
    %24 = vector.shape_cast %23 : vector<14xf32> to vector<14x1xf32>
    %25 = vector.broadcast %24 : vector<14x1xf32> to vector<14x14xf32>
    %26 = arith.subf %22, %25 : vector<14x14xf32>
    %27 = math.exp %26 : vector<14x14xf32>
    %cst_16 = arith.constant dense<0.000000e+00> : vector<14xf32>
    %28 = vector.multi_reduction <add>, %27, %cst_16 [1] : vector<14x14xf32> to vector<14xf32>
    %29 = vector.shape_cast %28 : vector<14xf32> to vector<14x1xf32>
    %30 = tpu.reciprocal %29 {approx = true} : vector<14x1xf32> -> vector<14x1xf32>
    %31 = vector.broadcast %30 : vector<14x1xf32> to vector<14x14xf32>
    %32 = arith.mulf %27, %31 : vector<14x14xf32>
    %cst_17 = arith.constant dense<0.000000e+00> : vector<14x32xf32>
    %33 = tpu.matmul %32, %21, %cst_17 {dimension_numbers = #tpu.dot_dimension_numbers<[1], [0], [0], [1], [0, 0, 1, 1], [], []>} : vector<14x14xf32>, vector<14x32xf32>, vector<14x32xf32> -> vector<14x32xf32>
    %c0_18 = arith.constant 0 : index
    %c0_19 = arith.constant 0 : index
    %34 = vector.load %arg19[%c0_18, %c0_19] : memref<14x128xf32, #tpu.memory_space<vmem>>, vector<14x32xf32>
    tpu.vector_store %arg19[%c0_18, %c0_19], %33 {strides = array<i32>} : memref<14x128xf32, #tpu.memory_space<vmem>>, vector<14x32xf32>,
    %35 = vector.extract_strided_slice %16 {offsets = [0, 32], sizes = [14, 32], strides = [1, 1]} : vector<14x128xf32> to vector<14x32xf32>
    %36 = vector.extract_strided_slice %17 {offsets = [0, 32], sizes = [14, 32], strides = [1, 1]} : vector<14x128xf32> to vector<14x32xf32>
    %37 = vector.extract_strided_slice %18 {offsets = [0, 32], sizes = [14, 32], strides = [1, 1]} : vector<14x128xf32> to vector<14x32xf32>
    %cst_20 = arith.constant dense<0.000000e+00> : vector<14x14xf32>
    %38 = tpu.matmul %35, %36, %cst_20 {dimension_numbers = #tpu.dot_dimension_numbers<[1], [1], [0], [0], [0, 0, 1, 0], [], []>} : vector<14x32xf32>, vector<14x32xf32>, vector<14x14xf32> -> vector<14x14xf32>
    %cst_21 = arith.constant dense<0xFF800000> : vector<14xf32>
    %39 = vector.multi_reduction <maximumf>, %38, %cst_21 [1] : vector<14x14xf32> to vector<14xf32>
    %40 = vector.shape_cast %39 : vector<14xf32> to vector<14x1xf32>
    %41 = vector.broadcast %40 : vector<14x1xf32> to vector<14x14xf32>
    %42 = arith.subf %38, %41 : vector<14x14xf32>
    %43 = math.exp %42 : vector<14x14xf32>
    %cst_22 = arith.constant dense<0.000000e+00> : vector<14xf32>
    %44 = vector.multi_reduction <add>, %43, %cst_22 [1] : vector<14x14xf32> to vector<14xf32>
    %45 = vector.shape_cast %44 : vector<14xf32> to vector<14x1xf32>
    %46 = tpu.reciprocal %45 {approx = true} : vector<14x1xf32> -> vector<14x1xf32>
    %47 = vector.broadcast %46 : vector<14x1xf32> to vector<14x14xf32>
    %48 = arith.mulf %43, %47 : vector<14x14xf32>
    %cst_23 = arith.constant dense<0.000000e+00> : vector<14x32xf32>
    %49 = tpu.matmul %48, %37, %cst_23 {dimension_numbers = #tpu.dot_dimension_numbers<[1], [0], [0], [1], [0, 0, 1, 1], [], []>} : vector<14x14xf32>, vector<14x32xf32>, vector<14x32xf32> -> vector<14x32xf32>
    %c0_24 = arith.constant 0 : index
    %c32 = arith.constant 32 : index
    %50 = vector.load %arg19[%c0_24, %c32] : memref<14x128xf32, #tpu.memory_space<vmem>>, vector<14x32xf32>
    tpu.vector_store %arg19[%c0_24, %c32], %49 {strides = array<i32>} : memref<14x128xf32, #tpu.memory_space<vmem>>, vector<14x32xf32>,
    %51 = vector.extract_strided_slice %16 {offsets = [0, 64], sizes = [14, 32], strides = [1, 1]} : vector<14x128xf32> to vector<14x32xf32>
    %52 = vector.extract_strided_slice %17 {offsets = [0, 64], sizes = [14, 32], strides = [1, 1]} : vector<14x128xf32> to vector<14x32xf32>
    %53 = vector.extract_strided_slice %18 {offsets = [0, 64], sizes = [14, 32], strides = [1, 1]} : vector<14x128xf32> to vector<14x32xf32>
    %cst_25 = arith.constant dense<0.000000e+00> : vector<14x14xf32>
    %54 = tpu.matmul %51, %52, %cst_25 {dimension_numbers = #tpu.dot_dimension_numbers<[1], [1], [0], [0], [0, 0, 1, 0], [], []>} : vector<14x32xf32>, vector<14x32xf32>, vector<14x14xf32> -> vector<14x14xf32>
    %cst_26 = arith.constant dense<0xFF800000> : vector<14xf32>
    %55 = vector.multi_reduction <maximumf>, %54, %cst_26 [1] : vector<14x14xf32> to vector<14xf32>
    %56 = vector.shape_cast %55 : vector<14xf32> to vector<14x1xf32>
    %57 = vector.broadcast %56 : vector<14x1xf32> to vector<14x14xf32>
    %58 = arith.subf %54, %57 : vector<14x14xf32>
    %59 = math.exp %58 : vector<14x14xf32>
    %cst_27 = arith.constant dense<0.000000e+00> : vector<14xf32>
    %60 = vector.multi_reduction <add>, %59, %cst_27 [1] : vector<14x14xf32> to vector<14xf32>
    %61 = vector.shape_cast %60 : vector<14xf32> to vector<14x1xf32>
    %62 = tpu.reciprocal %61 {approx = true} : vector<14x1xf32> -> vector<14x1xf32>
    %63 = vector.broadcast %62 : vector<14x1xf32> to vector<14x14xf32>
    %64 = arith.mulf %59, %63 : vector<14x14xf32>
    %cst_28 = arith.constant dense<0.000000e+00> : vector<14x32xf32>
    %65 = tpu.matmul %64, %53, %cst_28 {dimension_numbers = #tpu.dot_dimension_numbers<[1], [0], [0], [1], [0, 0, 1, 1], [], []>} : vector<14x14xf32>, vector<14x32xf32>, vector<14x32xf32> -> vector<14x32xf32>
    %c0_29 = arith.constant 0 : index
    %c64 = arith.constant 64 : index
    %66 = vector.load %arg19[%c0_29, %c64] : memref<14x128xf32, #tpu.memory_space<vmem>>, vector<14x32xf32>
    tpu.vector_store %arg19[%c0_29, %c64], %65 {strides = array<i32>} : memref<14x128xf32, #tpu.memory_space<vmem>>, vector<14x32xf32>,
    %67 = vector.extract_strided_slice %16 {offsets = [0, 96], sizes = [14, 32], strides = [1, 1]} : vector<14x128xf32> to vector<14x32xf32>
    %68 = vector.extract_strided_slice %17 {offsets = [0, 96], sizes = [14, 32], strides = [1, 1]} : vector<14x128xf32> to vector<14x32xf32>
    %69 = vector.extract_strided_slice %18 {offsets = [0, 96], sizes = [14, 32], strides = [1, 1]} : vector<14x128xf32> to vector<14x32xf32>
    %cst_30 = arith.constant dense<0.000000e+00> : vector<14x14xf32>
    %70 = tpu.matmul %67, %68, %cst_30 {dimension_numbers = #tpu.dot_dimension_numbers<[1], [1], [0], [0], [0, 0, 1, 0], [], []>} : vector<14x32xf32>, vector<14x32xf32>, vector<14x14xf32> -> vector<14x14xf32>
    %cst_31 = arith.constant dense<0xFF800000> : vector<14xf32>
    %71 = vector.multi_reduction <maximumf>, %70, %cst_31 [1] : vector<14x14xf32> to vector<14xf32>
    %72 = vector.shape_cast %71 : vector<14xf32> to vector<14x1xf32>
    %73 = vector.broadcast %72 : vector<14x1xf32> to vector<14x14xf32>
    %74 = arith.subf %70, %73 : vector<14x14xf32>
    %75 = math.exp %74 : vector<14x14xf32>
    %cst_32 = arith.constant dense<0.000000e+00> : vector<14xf32>
    %76 = vector.multi_reduction <add>, %75, %cst_32 [1] : vector<14x14xf32> to vector<14xf32>
    %77 = vector.shape_cast %76 : vector<14xf32> to vector<14x1xf32>
    %78 = tpu.reciprocal %77 {approx = true} : vector<14x1xf32> -> vector<14x1xf32>
    %79 = vector.broadcast %78 : vector<14x1xf32> to vector<14x14xf32>
    %80 = arith.mulf %75, %79 : vector<14x14xf32>
    %cst_33 = arith.constant dense<0.000000e+00> : vector<14x32xf32>
    %81 = tpu.matmul %80, %69, %cst_33 {dimension_numbers = #tpu.dot_dimension_numbers<[1], [0], [0], [1], [0, 0, 1, 1], [], []>} : vector<14x14xf32>, vector<14x32xf32>, vector<14x32xf32> -> vector<14x32xf32>
    %c0_34 = arith.constant 0 : index
    %c96 = arith.constant 96 : index
    %82 = vector.load %arg19[%c0_34, %c96] : memref<14x128xf32, #tpu.memory_space<vmem>>, vector<14x32xf32>
    tpu.vector_store %arg19[%c0_34, %c96], %81 {strides = array<i32>} : memref<14x128xf32, #tpu.memory_space<vmem>>, vector<14x32xf32>,
    %c0_35 = arith.constant 0 : index
    %c0_36 = arith.constant 0 : index
    %83 = vector.load %arg19[%c0_35, %c0_36] : memref<14x128xf32, #tpu.memory_space<vmem>>, vector<14x128xf32>
    %c0_37 = arith.constant 0 : index
    %c0_38 = arith.constant 0 : index
    %c0_39 = arith.constant 0 : index
    %84 = vector.load %arg6[%c0_37, %c0_38, %c0_39] : memref<3x128x128xf32, #tpu.memory_space<vmem>>, vector<1x128x128xf32>
    %85 = vector.shape_cast %84 : vector<1x128x128xf32> to vector<128x128xf32>
    %cst_40 = arith.constant dense<0.000000e+00> : vector<14x128xf32>
    %86 = tpu.matmul %83, %85, %cst_40 {dimension_numbers = #tpu.dot_dimension_numbers<[1], [0], [0], [1], [0, 0, 1, 1], [], []>} : vector<14x128xf32>, vector<128x128xf32>, vector<14x128xf32> -> vector<14x128xf32>
    %c0_41 = arith.constant 0 : index
    %c0_42 = arith.constant 0 : index
    %c0_43 = arith.constant 0 : index
    %87 = vector.load %arg7[%c0_41, %c0_42, %c0_43] : memref<3x1x128xf32, #tpu.memory_space<vmem>>, vector<1x1x128xf32>
    %88 = vector.shape_cast %87 : vector<1x1x128xf32> to vector<1x128xf32>
    %89 = vector.broadcast %88 : vector<1x128xf32> to vector<14x128xf32>
    %90 = arith.addf %86, %89 : vector<14x128xf32>
    %91 = arith.addf %6, %90 : vector<14x128xf32>
    %cst_44 = arith.constant dense<0.000000e+00> : vector<14xf32>
    %92 = vector.multi_reduction <add>, %91, %cst_44 [1] : vector<14x128xf32> to vector<14xf32>
    %93 = vector.shape_cast %92 : vector<14xf32> to vector<14x1xf32>
    %cst_45 = arith.constant 1.280000e+02 : f32
    %94 = vector.broadcast %cst_45 : f32 to vector<14x1xf32>
    %95 = arith.divf %93, %94 : vector<14x1xf32>
    %96 = vector.broadcast %95 : vector<14x1xf32> to vector<14x128xf32>
    %97 = arith.subf %91, %96 : vector<14x128xf32>
    %98 = arith.mulf %97, %97 : vector<14x128xf32>
    %cst_46 = arith.constant dense<0.000000e+00> : vector<14xf32>
    %99 = vector.multi_reduction <add>, %98, %cst_46 [1] : vector<14x128xf32> to vector<14xf32>
    %100 = vector.shape_cast %99 : vector<14xf32> to vector<14x1xf32>
    %cst_47 = arith.constant 1.280000e+02 : f32
    %101 = vector.broadcast %cst_47 : f32 to vector<14x1xf32>
    %102 = arith.divf %100, %101 : vector<14x1xf32>
    %103 = vector.broadcast %95 : vector<14x1xf32> to vector<14x128xf32>
    %104 = arith.subf %91, %103 : vector<14x128xf32>
    %cst_48 = arith.constant 9.99999974E-6 : f32
    %105 = vector.broadcast %cst_48 : f32 to vector<14x1xf32>
    %106 = arith.addf %102, %105 : vector<14x1xf32>
    %107 = math.rsqrt %106 : vector<14x1xf32>
    %108 = vector.broadcast %107 : vector<14x1xf32> to vector<14x128xf32>
    %109 = arith.mulf %104, %108 : vector<14x128xf32>
    %c0_49 = arith.constant 0 : index
    %c0_50 = arith.constant 0 : index
    %c0_51 = arith.constant 0 : index
    %110 = vector.load %arg8[%c0_49, %c0_50, %c0_51] : memref<3x1x128xf32, #tpu.memory_space<vmem>>, vector<1x1x128xf32>
    %111 = vector.shape_cast %110 : vector<1x1x128xf32> to vector<1x128xf32>
    %112 = vector.broadcast %111 : vector<1x128xf32> to vector<14x128xf32>
    %113 = arith.mulf %109, %112 : vector<14x128xf32>
    %c0_52 = arith.constant 0 : index
    %c0_53 = arith.constant 0 : index
    %c0_54 = arith.constant 0 : index
    %114 = vector.load %arg9[%c0_52, %c0_53, %c0_54] : memref<3x1x128xf32, #tpu.memory_space<vmem>>, vector<1x1x128xf32>
    %115 = vector.shape_cast %114 : vector<1x1x128xf32> to vector<1x128xf32>
    %116 = vector.broadcast %115 : vector<1x128xf32> to vector<14x128xf32>
    %117 = arith.addf %113, %116 : vector<14x128xf32>
    %c0_55 = arith.constant 0 : index
    %c0_56 = arith.constant 0 : index
    %c0_57 = arith.constant 0 : index
    %118 = vector.load %arg10[%c0_55, %c0_56, %c0_57] : memref<3x128x2048xf32, #tpu.memory_space<vmem>>, vector<1x128x2048xf32>
    %119 = vector.shape_cast %118 : vector<1x128x2048xf32> to vector<128x2048xf32>
    %cst_58 = arith.constant dense<0.000000e+00> : vector<14x2048xf32>
    %120 = tpu.matmul %117, %119, %cst_58 {dimension_numbers = #tpu.dot_dimension_numbers<[1], [0], [0], [1], [0, 0, 1, 1], [], []>} : vector<14x128xf32>, vector<128x2048xf32>, vector<14x2048xf32> -> vector<14x2048xf32>
    %c0_59 = arith.constant 0 : index
    %c0_60 = arith.constant 0 : index
    %c0_61 = arith.constant 0 : index
    %121 = vector.load %arg11[%c0_59, %c0_60, %c0_61] : memref<3x1x2048xf32, #tpu.memory_space<vmem>>, vector<1x1x2048xf32>
    %122 = vector.shape_cast %121 : vector<1x1x2048xf32> to vector<1x2048xf32>
    %123 = vector.broadcast %122 : vector<1x2048xf32> to vector<14x2048xf32>
    %124 = arith.addf %120, %123 : vector<14x2048xf32>
    %cst_62 = arith.constant 0.000000e+00 : f32
    %125 = vector.broadcast %cst_62 : f32 to vector<14x2048xf32>
    %126 = arith.maximumf %124, %125 : vector<14x2048xf32>
    %c0_63 = arith.constant 0 : index
    %c0_64 = arith.constant 0 : index
    %c0_65 = arith.constant 0 : index
    %127 = vector.load %arg12[%c0_63, %c0_64, %c0_65] : memref<3x2048x128xf32, #tpu.memory_space<vmem>>, vector<1x2048x128xf32>
    %128 = vector.shape_cast %127 : vector<1x2048x128xf32> to vector<2048x128xf32>
    %cst_66 = arith.constant dense<0.000000e+00> : vector<14x128xf32>
    %129 = tpu.matmul %126, %128, %cst_66 {dimension_numbers = #tpu.dot_dimension_numbers<[1], [0], [0], [1], [0, 0, 1, 1], [], []>} : vector<14x2048xf32>, vector<2048x128xf32>, vector<14x128xf32> -> vector<14x128xf32>
    %c0_67 = arith.constant 0 : index
    %c0_68 = arith.constant 0 : index
    %c0_69 = arith.constant 0 : index
    %130 = vector.load %arg13[%c0_67, %c0_68, %c0_69] : memref<3x1x128xf32, #tpu.memory_space<vmem>>, vector<1x1x128xf32>
    %131 = vector.shape_cast %130 : vector<1x1x128xf32> to vector<1x128xf32>
    %132 = vector.broadcast %131 : vector<1x128xf32> to vector<14x128xf32>
    %133 = arith.addf %129, %132 : vector<14x128xf32>
    %134 = arith.addf %117, %133 : vector<14x128xf32>
    %cst_70 = arith.constant dense<0.000000e+00> : vector<14xf32>
    %135 = vector.multi_reduction <add>, %134, %cst_70 [1] : vector<14x128xf32> to vector<14xf32>
    %136 = vector.shape_cast %135 : vector<14xf32> to vector<14x1xf32>
    %cst_71 = arith.constant 1.280000e+02 : f32
    %137 = vector.broadcast %cst_71 : f32 to vector<14x1xf32>
    %138 = arith.divf %136, %137 : vector<14x1xf32>
    %139 = vector.broadcast %138 : vector<14x1xf32> to vector<14x128xf32>
    %140 = arith.subf %134, %139 : vector<14x128xf32>
    %141 = arith.mulf %140, %140 : vector<14x128xf32>
    %cst_72 = arith.constant dense<0.000000e+00> : vector<14xf32>
    %142 = vector.multi_reduction <add>, %141, %cst_72 [1] : vector<14x128xf32> to vector<14xf32>
    %143 = vector.shape_cast %142 : vector<14xf32> to vector<14x1xf32>
    %cst_73 = arith.constant 1.280000e+02 : f32
    %144 = vector.broadcast %cst_73 : f32 to vector<14x1xf32>
    %145 = arith.divf %143, %144 : vector<14x1xf32>
    %146 = vector.broadcast %138 : vector<14x1xf32> to vector<14x128xf32>
    %147 = arith.subf %134, %146 : vector<14x128xf32>
    %cst_74 = arith.constant 9.99999974E-6 : f32
    %148 = vector.broadcast %cst_74 : f32 to vector<14x1xf32>
    %149 = arith.addf %145, %148 : vector<14x1xf32>
    %150 = math.rsqrt %149 : vector<14x1xf32>
    %151 = vector.broadcast %150 : vector<14x1xf32> to vector<14x128xf32>
    %152 = arith.mulf %147, %151 : vector<14x128xf32>
    %c0_75 = arith.constant 0 : index
    %c0_76 = arith.constant 0 : index
    %c0_77 = arith.constant 0 : index
    %153 = vector.load %arg14[%c0_75, %c0_76, %c0_77] : memref<3x1x128xf32, #tpu.memory_space<vmem>>, vector<1x1x128xf32>
    %154 = vector.shape_cast %153 : vector<1x1x128xf32> to vector<1x128xf32>
    %155 = vector.broadcast %154 : vector<1x128xf32> to vector<14x128xf32>
    %156 = arith.mulf %152, %155 : vector<14x128xf32>
    %c0_78 = arith.constant 0 : index
    %c0_79 = arith.constant 0 : index
    %c0_80 = arith.constant 0 : index
    %157 = vector.load %arg15[%c0_78, %c0_79, %c0_80] : memref<3x1x128xf32, #tpu.memory_space<vmem>>, vector<1x1x128xf32>
    %158 = vector.shape_cast %157 : vector<1x1x128xf32> to vector<1x128xf32>
    %159 = vector.broadcast %158 : vector<1x128xf32> to vector<14x128xf32>
    %160 = arith.addf %156, %159 : vector<14x128xf32>
    %c1 = arith.constant 1 : index
    %c0_81 = arith.constant 0 : index
    %c0_82 = arith.constant 0 : index
    %161 = vector.load %arg4[%c1, %c0_81, %c0_82] : memref<3x128x384xf32, #tpu.memory_space<vmem>>, vector<1x128x384xf32>
    %162 = vector.shape_cast %161 : vector<1x128x384xf32> to vector<128x384xf32>
    %cst_83 = arith.constant dense<0.000000e+00> : vector<14x384xf32>
    %163 = tpu.matmul %160, %162, %cst_83 {dimension_numbers = #tpu.dot_dimension_numbers<[1], [0], [0], [1], [0, 0, 1, 1], [], []>} : vector<14x128xf32>, vector<128x384xf32>, vector<14x384xf32> -> vector<14x384xf32>
    %c1_84 = arith.constant 1 : index
    %c0_85 = arith.constant 0 : index
    %c0_86 = arith.constant 0 : index
    %164 = vector.load %arg5[%c1_84, %c0_85, %c0_86] : memref<3x1x384xf32, #tpu.memory_space<vmem>>, vector<1x1x384xf32>
    %165 = vector.shape_cast %164 : vector<1x1x384xf32> to vector<1x384xf32>
    %166 = vector.broadcast %165 : vector<1x384xf32> to vector<14x384xf32>
    %167 = arith.addf %163, %166 : vector<14x384xf32>
    %168 = vector.extract_strided_slice %167 {offsets = [0, 0], sizes = [14, 128], strides = [1, 1]} : vector<14x384xf32> to vector<14x128xf32>
    %cst_87 = arith.constant 0.176776692 : f32
    %169 = vector.broadcast %cst_87 : f32 to vector<14x128xf32>
    %170 = arith.mulf %168, %169 : vector<14x128xf32>
    %171 = vector.extract_strided_slice %167 {offsets = [0, 128], sizes = [14, 128], strides = [1, 1]} : vector<14x384xf32> to vector<14x128xf32>
    %172 = vector.extract_strided_slice %167 {offsets = [0, 256], sizes = [14, 128], strides = [1, 1]} : vector<14x384xf32> to vector<14x128xf32>
    %173 = vector.extract_strided_slice %170 {offsets = [0, 0], sizes = [14, 32], strides = [1, 1]} : vector<14x128xf32> to vector<14x32xf32>
    %174 = vector.extract_strided_slice %171 {offsets = [0, 0], sizes = [14, 32], strides = [1, 1]} : vector<14x128xf32> to vector<14x32xf32>
    %175 = vector.extract_strided_slice %172 {offsets = [0, 0], sizes = [14, 32], strides = [1, 1]} : vector<14x128xf32> to vector<14x32xf32>
    %cst_88 = arith.constant dense<0.000000e+00> : vector<14x14xf32>
    %176 = tpu.matmul %173, %174, %cst_88 {dimension_numbers = #tpu.dot_dimension_numbers<[1], [1], [0], [0], [0, 0, 1, 0], [], []>} : vector<14x32xf32>, vector<14x32xf32>, vector<14x14xf32> -> vector<14x14xf32>
    %cst_89 = arith.constant dense<0xFF800000> : vector<14xf32>
    %177 = vector.multi_reduction <maximumf>, %176, %cst_89 [1] : vector<14x14xf32> to vector<14xf32>
    %178 = vector.shape_cast %177 : vector<14xf32> to vector<14x1xf32>
    %179 = vector.broadcast %178 : vector<14x1xf32> to vector<14x14xf32>
    %180 = arith.subf %176, %179 : vector<14x14xf32>
    %181 = math.exp %180 : vector<14x14xf32>
    %cst_90 = arith.constant dense<0.000000e+00> : vector<14xf32>
    %182 = vector.multi_reduction <add>, %181, %cst_90 [1] : vector<14x14xf32> to vector<14xf32>
    %183 = vector.shape_cast %182 : vector<14xf32> to vector<14x1xf32>
    %184 = tpu.reciprocal %183 {approx = true} : vector<14x1xf32> -> vector<14x1xf32>
    %185 = vector.broadcast %184 : vector<14x1xf32> to vector<14x14xf32>
    %186 = arith.mulf %181, %185 : vector<14x14xf32>
    %cst_91 = arith.constant dense<0.000000e+00> : vector<14x32xf32>
    %187 = tpu.matmul %186, %175, %cst_91 {dimension_numbers = #tpu.dot_dimension_numbers<[1], [0], [0], [1], [0, 0, 1, 1], [], []>} : vector<14x14xf32>, vector<14x32xf32>, vector<14x32xf32> -> vector<14x32xf32>
    %c0_92 = arith.constant 0 : index
    %c0_93 = arith.constant 0 : index
    %188 = vector.load %arg19[%c0_92, %c0_93] : memref<14x128xf32, #tpu.memory_space<vmem>>, vector<14x32xf32>
    tpu.vector_store %arg19[%c0_92, %c0_93], %187 {strides = array<i32>} : memref<14x128xf32, #tpu.memory_space<vmem>>, vector<14x32xf32>,
    %189 = vector.extract_strided_slice %170 {offsets = [0, 32], sizes = [14, 32], strides = [1, 1]} : vector<14x128xf32> to vector<14x32xf32>
    %190 = vector.extract_strided_slice %171 {offsets = [0, 32], sizes = [14, 32], strides = [1, 1]} : vector<14x128xf32> to vector<14x32xf32>
    %191 = vector.extract_strided_slice %172 {offsets = [0, 32], sizes = [14, 32], strides = [1, 1]} : vector<14x128xf32> to vector<14x32xf32>
    %cst_94 = arith.constant dense<0.000000e+00> : vector<14x14xf32>
    %192 = tpu.matmul %189, %190, %cst_94 {dimension_numbers = #tpu.dot_dimension_numbers<[1], [1], [0], [0], [0, 0, 1, 0], [], []>} : vector<14x32xf32>, vector<14x32xf32>, vector<14x14xf32> -> vector<14x14xf32>
    %cst_95 = arith.constant dense<0xFF800000> : vector<14xf32>
    %193 = vector.multi_reduction <maximumf>, %192, %cst_95 [1] : vector<14x14xf32> to vector<14xf32>
    %194 = vector.shape_cast %193 : vector<14xf32> to vector<14x1xf32>
    %195 = vector.broadcast %194 : vector<14x1xf32> to vector<14x14xf32>
    %196 = arith.subf %192, %195 : vector<14x14xf32>
    %197 = math.exp %196 : vector<14x14xf32>
    %cst_96 = arith.constant dense<0.000000e+00> : vector<14xf32>
    %198 = vector.multi_reduction <add>, %197, %cst_96 [1] : vector<14x14xf32> to vector<14xf32>
    %199 = vector.shape_cast %198 : vector<14xf32> to vector<14x1xf32>
    %200 = tpu.reciprocal %199 {approx = true} : vector<14x1xf32> -> vector<14x1xf32>
    %201 = vector.broadcast %200 : vector<14x1xf32> to vector<14x14xf32>
    %202 = arith.mulf %197, %201 : vector<14x14xf32>
    %cst_97 = arith.constant dense<0.000000e+00> : vector<14x32xf32>
    %203 = tpu.matmul %202, %191, %cst_97 {dimension_numbers = #tpu.dot_dimension_numbers<[1], [0], [0], [1], [0, 0, 1, 1], [], []>} : vector<14x14xf32>, vector<14x32xf32>, vector<14x32xf32> -> vector<14x32xf32>
    %c0_98 = arith.constant 0 : index
    %c32_99 = arith.constant 32 : index
    %204 = vector.load %arg19[%c0_98, %c32_99] : memref<14x128xf32, #tpu.memory_space<vmem>>, vector<14x32xf32>
    tpu.vector_store %arg19[%c0_98, %c32_99], %203 {strides = array<i32>} : memref<14x128xf32, #tpu.memory_space<vmem>>, vector<14x32xf32>,
    %205 = vector.extract_strided_slice %170 {offsets = [0, 64], sizes = [14, 32], strides = [1, 1]} : vector<14x128xf32> to vector<14x32xf32>
    %206 = vector.extract_strided_slice %171 {offsets = [0, 64], sizes = [14, 32], strides = [1, 1]} : vector<14x128xf32> to vector<14x32xf32>
    %207 = vector.extract_strided_slice %172 {offsets = [0, 64], sizes = [14, 32], strides = [1, 1]} : vector<14x128xf32> to vector<14x32xf32>
    %cst_100 = arith.constant dense<0.000000e+00> : vector<14x14xf32>
    %208 = tpu.matmul %205, %206, %cst_100 {dimension_numbers = #tpu.dot_dimension_numbers<[1], [1], [0], [0], [0, 0, 1, 0], [], []>} : vector<14x32xf32>, vector<14x32xf32>, vector<14x14xf32> -> vector<14x14xf32>
    %cst_101 = arith.constant dense<0xFF800000> : vector<14xf32>
    %209 = vector.multi_reduction <maximumf>, %208, %cst_101 [1] : vector<14x14xf32> to vector<14xf32>
    %210 = vector.shape_cast %209 : vector<14xf32> to vector<14x1xf32>
    %211 = vector.broadcast %210 : vector<14x1xf32> to vector<14x14xf32>
    %212 = arith.subf %208, %211 : vector<14x14xf32>
    %213 = math.exp %212 : vector<14x14xf32>
    %cst_102 = arith.constant dense<0.000000e+00> : vector<14xf32>
    %214 = vector.multi_reduction <add>, %213, %cst_102 [1] : vector<14x14xf32> to vector<14xf32>
    %215 = vector.shape_cast %214 : vector<14xf32> to vector<14x1xf32>
    %216 = tpu.reciprocal %215 {approx = true} : vector<14x1xf32> -> vector<14x1xf32>
    %217 = vector.broadcast %216 : vector<14x1xf32> to vector<14x14xf32>
    %218 = arith.mulf %213, %217 : vector<14x14xf32>
    %cst_103 = arith.constant dense<0.000000e+00> : vector<14x32xf32>
    %219 = tpu.matmul %218, %207, %cst_103 {dimension_numbers = #tpu.dot_dimension_numbers<[1], [0], [0], [1], [0, 0, 1, 1], [], []>} : vector<14x14xf32>, vector<14x32xf32>, vector<14x32xf32> -> vector<14x32xf32>
    %c0_104 = arith.constant 0 : index
    %c64_105 = arith.constant 64 : index
    %220 = vector.load %arg19[%c0_104, %c64_105] : memref<14x128xf32, #tpu.memory_space<vmem>>, vector<14x32xf32>
    tpu.vector_store %arg19[%c0_104, %c64_105], %219 {strides = array<i32>} : memref<14x128xf32, #tpu.memory_space<vmem>>, vector<14x32xf32>,
    %221 = vector.extract_strided_slice %170 {offsets = [0, 96], sizes = [14, 32], strides = [1, 1]} : vector<14x128xf32> to vector<14x32xf32>
    %222 = vector.extract_strided_slice %171 {offsets = [0, 96], sizes = [14, 32], strides = [1, 1]} : vector<14x128xf32> to vector<14x32xf32>
    %223 = vector.extract_strided_slice %172 {offsets = [0, 96], sizes = [14, 32], strides = [1, 1]} : vector<14x128xf32> to vector<14x32xf32>
    %cst_106 = arith.constant dense<0.000000e+00> : vector<14x14xf32>
    %224 = tpu.matmul %221, %222, %cst_106 {dimension_numbers = #tpu.dot_dimension_numbers<[1], [1], [0], [0], [0, 0, 1, 0], [], []>} : vector<14x32xf32>, vector<14x32xf32>, vector<14x14xf32> -> vector<14x14xf32>
    %cst_107 = arith.constant dense<0xFF800000> : vector<14xf32>
    %225 = vector.multi_reduction <maximumf>, %224, %cst_107 [1] : vector<14x14xf32> to vector<14xf32>
    %226 = vector.shape_cast %225 : vector<14xf32> to vector<14x1xf32>
    %227 = vector.broadcast %226 : vector<14x1xf32> to vector<14x14xf32>
    %228 = arith.subf %224, %227 : vector<14x14xf32>
    %229 = math.exp %228 : vector<14x14xf32>
    %cst_108 = arith.constant dense<0.000000e+00> : vector<14xf32>
    %230 = vector.multi_reduction <add>, %229, %cst_108 [1] : vector<14x14xf32> to vector<14xf32>
    %231 = vector.shape_cast %230 : vector<14xf32> to vector<14x1xf32>
    %232 = tpu.reciprocal %231 {approx = true} : vector<14x1xf32> -> vector<14x1xf32>
    %233 = vector.broadcast %232 : vector<14x1xf32> to vector<14x14xf32>
    %234 = arith.mulf %229, %233 : vector<14x14xf32>
    %cst_109 = arith.constant dense<0.000000e+00> : vector<14x32xf32>
    %235 = tpu.matmul %234, %223, %cst_109 {dimension_numbers = #tpu.dot_dimension_numbers<[1], [0], [0], [1], [0, 0, 1, 1], [], []>} : vector<14x14xf32>, vector<14x32xf32>, vector<14x32xf32> -> vector<14x32xf32>
    %c0_110 = arith.constant 0 : index
    %c96_111 = arith.constant 96 : index
    %236 = vector.load %arg19[%c0_110, %c96_111] : memref<14x128xf32, #tpu.memory_space<vmem>>, vector<14x32xf32>
    tpu.vector_store %arg19[%c0_110, %c96_111], %235 {strides = array<i32>} : memref<14x128xf32, #tpu.memory_space<vmem>>, vector<14x32xf32>,
    %c0_112 = arith.constant 0 : index
    %c0_113 = arith.constant 0 : index
    %237 = vector.load %arg19[%c0_112, %c0_113] : memref<14x128xf32, #tpu.memory_space<vmem>>, vector<14x128xf32>
    %c1_114 = arith.constant 1 : index
    %c0_115 = arith.constant 0 : index
    %c0_116 = arith.constant 0 : index
    %238 = vector.load %arg6[%c1_114, %c0_115, %c0_116] : memref<3x128x128xf32, #tpu.memory_space<vmem>>, vector<1x128x128xf32>
    %239 = vector.shape_cast %238 : vector<1x128x128xf32> to vector<128x128xf32>
    %cst_117 = arith.constant dense<0.000000e+00> : vector<14x128xf32>
    %240 = tpu.matmul %237, %239, %cst_117 {dimension_numbers = #tpu.dot_dimension_numbers<[1], [0], [0], [1], [0, 0, 1, 1], [], []>} : vector<14x128xf32>, vector<128x128xf32>, vector<14x128xf32> -> vector<14x128xf32>
    %c1_118 = arith.constant 1 : index
    %c0_119 = arith.constant 0 : index
    %c0_120 = arith.constant 0 : index
    %241 = vector.load %arg7[%c1_118, %c0_119, %c0_120] : memref<3x1x128xf32, #tpu.memory_space<vmem>>, vector<1x1x128xf32>
    %242 = vector.shape_cast %241 : vector<1x1x128xf32> to vector<1x128xf32>
    %243 = vector.broadcast %242 : vector<1x128xf32> to vector<14x128xf32>
    %244 = arith.addf %240, %243 : vector<14x128xf32>
    %245 = arith.addf %160, %244 : vector<14x128xf32>
    %cst_121 = arith.constant dense<0.000000e+00> : vector<14xf32>
    %246 = vector.multi_reduction <add>, %245, %cst_121 [1] : vector<14x128xf32> to vector<14xf32>
    %247 = vector.shape_cast %246 : vector<14xf32> to vector<14x1xf32>
    %cst_122 = arith.constant 1.280000e+02 : f32
    %248 = vector.broadcast %cst_122 : f32 to vector<14x1xf32>
    %249 = arith.divf %247, %248 : vector<14x1xf32>
    %250 = vector.broadcast %249 : vector<14x1xf32> to vector<14x128xf32>
    %251 = arith.subf %245, %250 : vector<14x128xf32>
    %252 = arith.mulf %251, %251 : vector<14x128xf32>
    %cst_123 = arith.constant dense<0.000000e+00> : vector<14xf32>
    %253 = vector.multi_reduction <add>, %252, %cst_123 [1] : vector<14x128xf32> to vector<14xf32>
    %254 = vector.shape_cast %253 : vector<14xf32> to vector<14x1xf32>
    %cst_124 = arith.constant 1.280000e+02 : f32
    %255 = vector.broadcast %cst_124 : f32 to vector<14x1xf32>
    %256 = arith.divf %254, %255 : vector<14x1xf32>
    %257 = vector.broadcast %249 : vector<14x1xf32> to vector<14x128xf32>
    %258 = arith.subf %245, %257 : vector<14x128xf32>
    %cst_125 = arith.constant 9.99999974E-6 : f32
    %259 = vector.broadcast %cst_125 : f32 to vector<14x1xf32>
    %260 = arith.addf %256, %259 : vector<14x1xf32>
    %261 = math.rsqrt %260 : vector<14x1xf32>
    %262 = vector.broadcast %261 : vector<14x1xf32> to vector<14x128xf32>
    %263 = arith.mulf %258, %262 : vector<14x128xf32>
    %c1_126 = arith.constant 1 : index
    %c0_127 = arith.constant 0 : index
    %c0_128 = arith.constant 0 : index
    %264 = vector.load %arg8[%c1_126, %c0_127, %c0_128] : memref<3x1x128xf32, #tpu.memory_space<vmem>>, vector<1x1x128xf32>
    %265 = vector.shape_cast %264 : vector<1x1x128xf32> to vector<1x128xf32>
    %266 = vector.broadcast %265 : vector<1x128xf32> to vector<14x128xf32>
    %267 = arith.mulf %263, %266 : vector<14x128xf32>
    %c1_129 = arith.constant 1 : index
    %c0_130 = arith.constant 0 : index
    %c0_131 = arith.constant 0 : index
    %268 = vector.load %arg9[%c1_129, %c0_130, %c0_131] : memref<3x1x128xf32, #tpu.memory_space<vmem>>, vector<1x1x128xf32>
    %269 = vector.shape_cast %268 : vector<1x1x128xf32> to vector<1x128xf32>
    %270 = vector.broadcast %269 : vector<1x128xf32> to vector<14x128xf32>
    %271 = arith.addf %267, %270 : vector<14x128xf32>
    %c1_132 = arith.constant 1 : index
    %c0_133 = arith.constant 0 : index
    %c0_134 = arith.constant 0 : index
    %272 = vector.load %arg10[%c1_132, %c0_133, %c0_134] : memref<3x128x2048xf32, #tpu.memory_space<vmem>>, vector<1x128x2048xf32>
    %273 = vector.shape_cast %272 : vector<1x128x2048xf32> to vector<128x2048xf32>
    %cst_135 = arith.constant dense<0.000000e+00> : vector<14x2048xf32>
    %274 = tpu.matmul %271, %273, %cst_135 {dimension_numbers = #tpu.dot_dimension_numbers<[1], [0], [0], [1], [0, 0, 1, 1], [], []>} : vector<14x128xf32>, vector<128x2048xf32>, vector<14x2048xf32> -> vector<14x2048xf32>
    %c1_136 = arith.constant 1 : index
    %c0_137 = arith.constant 0 : index
    %c0_138 = arith.constant 0 : index
    %275 = vector.load %arg11[%c1_136, %c0_137, %c0_138] : memref<3x1x2048xf32, #tpu.memory_space<vmem>>, vector<1x1x2048xf32>
    %276 = vector.shape_cast %275 : vector<1x1x2048xf32> to vector<1x2048xf32>
    %277 = vector.broadcast %276 : vector<1x2048xf32> to vector<14x2048xf32>
    %278 = arith.addf %274, %277 : vector<14x2048xf32>
    %cst_139 = arith.constant 0.000000e+00 : f32
    %279 = vector.broadcast %cst_139 : f32 to vector<14x2048xf32>
    %280 = arith.maximumf %278, %279 : vector<14x2048xf32>
    %c1_140 = arith.constant 1 : index
    %c0_141 = arith.constant 0 : index
    %c0_142 = arith.constant 0 : index
    %281 = vector.load %arg12[%c1_140, %c0_141, %c0_142] : memref<3x2048x128xf32, #tpu.memory_space<vmem>>, vector<1x2048x128xf32>
    %282 = vector.shape_cast %281 : vector<1x2048x128xf32> to vector<2048x128xf32>
    %cst_143 = arith.constant dense<0.000000e+00> : vector<14x128xf32>
    %283 = tpu.matmul %280, %282, %cst_143 {dimension_numbers = #tpu.dot_dimension_numbers<[1], [0], [0], [1], [0, 0, 1, 1], [], []>} : vector<14x2048xf32>, vector<2048x128xf32>, vector<14x128xf32> -> vector<14x128xf32>
    %c1_144 = arith.constant 1 : index
    %c0_145 = arith.constant 0 : index
    %c0_146 = arith.constant 0 : index
    %284 = vector.load %arg13[%c1_144, %c0_145, %c0_146] : memref<3x1x128xf32, #tpu.memory_space<vmem>>, vector<1x1x128xf32>
    %285 = vector.shape_cast %284 : vector<1x1x128xf32> to vector<1x128xf32>
    %286 = vector.broadcast %285 : vector<1x128xf32> to vector<14x128xf32>
    %287 = arith.addf %283, %286 : vector<14x128xf32>
    %288 = arith.addf %271, %287 : vector<14x128xf32>
    %cst_147 = arith.constant dense<0.000000e+00> : vector<14xf32>
    %289 = vector.multi_reduction <add>, %288, %cst_147 [1] : vector<14x128xf32> to vector<14xf32>
    %290 = vector.shape_cast %289 : vector<14xf32> to vector<14x1xf32>
    %cst_148 = arith.constant 1.280000e+02 : f32
    %291 = vector.broadcast %cst_148 : f32 to vector<14x1xf32>
    %292 = arith.divf %290, %291 : vector<14x1xf32>
    %293 = vector.broadcast %292 : vector<14x1xf32> to vector<14x128xf32>
    %294 = arith.subf %288, %293 : vector<14x128xf32>
    %295 = arith.mulf %294, %294 : vector<14x128xf32>
    %cst_149 = arith.constant dense<0.000000e+00> : vector<14xf32>
    %296 = vector.multi_reduction <add>, %295, %cst_149 [1] : vector<14x128xf32> to vector<14xf32>
    %297 = vector.shape_cast %296 : vector<14xf32> to vector<14x1xf32>
    %cst_150 = arith.constant 1.280000e+02 : f32
    %298 = vector.broadcast %cst_150 : f32 to vector<14x1xf32>
    %299 = arith.divf %297, %298 : vector<14x1xf32>
    %300 = vector.broadcast %292 : vector<14x1xf32> to vector<14x128xf32>
    %301 = arith.subf %288, %300 : vector<14x128xf32>
    %cst_151 = arith.constant 9.99999974E-6 : f32
    %302 = vector.broadcast %cst_151 : f32 to vector<14x1xf32>
    %303 = arith.addf %299, %302 : vector<14x1xf32>
    %304 = math.rsqrt %303 : vector<14x1xf32>
    %305 = vector.broadcast %304 : vector<14x1xf32> to vector<14x128xf32>
    %306 = arith.mulf %301, %305 : vector<14x128xf32>
    %c1_152 = arith.constant 1 : index
    %c0_153 = arith.constant 0 : index
    %c0_154 = arith.constant 0 : index
    %307 = vector.load %arg14[%c1_152, %c0_153, %c0_154] : memref<3x1x128xf32, #tpu.memory_space<vmem>>, vector<1x1x128xf32>
    %308 = vector.shape_cast %307 : vector<1x1x128xf32> to vector<1x128xf32>
    %309 = vector.broadcast %308 : vector<1x128xf32> to vector<14x128xf32>
    %310 = arith.mulf %306, %309 : vector<14x128xf32>
    %c1_155 = arith.constant 1 : index
    %c0_156 = arith.constant 0 : index
    %c0_157 = arith.constant 0 : index
    %311 = vector.load %arg15[%c1_155, %c0_156, %c0_157] : memref<3x1x128xf32, #tpu.memory_space<vmem>>, vector<1x1x128xf32>
    %312 = vector.shape_cast %311 : vector<1x1x128xf32> to vector<1x128xf32>
    %313 = vector.broadcast %312 : vector<1x128xf32> to vector<14x128xf32>
    %314 = arith.addf %310, %313 : vector<14x128xf32>
    %c2 = arith.constant 2 : index
    %c0_158 = arith.constant 0 : index
    %c0_159 = arith.constant 0 : index
    %315 = vector.load %arg4[%c2, %c0_158, %c0_159] : memref<3x128x384xf32, #tpu.memory_space<vmem>>, vector<1x128x384xf32>
    %316 = vector.shape_cast %315 : vector<1x128x384xf32> to vector<128x384xf32>
    %cst_160 = arith.constant dense<0.000000e+00> : vector<14x384xf32>
    %317 = tpu.matmul %314, %316, %cst_160 {dimension_numbers = #tpu.dot_dimension_numbers<[1], [0], [0], [1], [0, 0, 1, 1], [], []>} : vector<14x128xf32>, vector<128x384xf32>, vector<14x384xf32> -> vector<14x384xf32>
    %c2_161 = arith.constant 2 : index
    %c0_162 = arith.constant 0 : index
    %c0_163 = arith.constant 0 : index
    %318 = vector.load %arg5[%c2_161, %c0_162, %c0_163] : memref<3x1x384xf32, #tpu.memory_space<vmem>>, vector<1x1x384xf32>
    %319 = vector.shape_cast %318 : vector<1x1x384xf32> to vector<1x384xf32>
    %320 = vector.broadcast %319 : vector<1x384xf32> to vector<14x384xf32>
    %321 = arith.addf %317, %320 : vector<14x384xf32>
    %322 = vector.extract_strided_slice %321 {offsets = [0, 0], sizes = [14, 128], strides = [1, 1]} : vector<14x384xf32> to vector<14x128xf32>
    %cst_164 = arith.constant 0.176776692 : f32
    %323 = vector.broadcast %cst_164 : f32 to vector<14x128xf32>
    %324 = arith.mulf %322, %323 : vector<14x128xf32>
    %325 = vector.extract_strided_slice %321 {offsets = [0, 128], sizes = [14, 128], strides = [1, 1]} : vector<14x384xf32> to vector<14x128xf32>
    %326 = vector.extract_strided_slice %321 {offsets = [0, 256], sizes = [14, 128], strides = [1, 1]} : vector<14x384xf32> to vector<14x128xf32>
    %327 = vector.extract_strided_slice %324 {offsets = [0, 0], sizes = [14, 32], strides = [1, 1]} : vector<14x128xf32> to vector<14x32xf32>
    %328 = vector.extract_strided_slice %325 {offsets = [0, 0], sizes = [14, 32], strides = [1, 1]} : vector<14x128xf32> to vector<14x32xf32>
    %329 = vector.extract_strided_slice %326 {offsets = [0, 0], sizes = [14, 32], strides = [1, 1]} : vector<14x128xf32> to vector<14x32xf32>
    %cst_165 = arith.constant dense<0.000000e+00> : vector<14x14xf32>
    %330 = tpu.matmul %327, %328, %cst_165 {dimension_numbers = #tpu.dot_dimension_numbers<[1], [1], [0], [0], [0, 0, 1, 0], [], []>} : vector<14x32xf32>, vector<14x32xf32>, vector<14x14xf32> -> vector<14x14xf32>
    %cst_166 = arith.constant dense<0xFF800000> : vector<14xf32>
    %331 = vector.multi_reduction <maximumf>, %330, %cst_166 [1] : vector<14x14xf32> to vector<14xf32>
    %332 = vector.shape_cast %331 : vector<14xf32> to vector<14x1xf32>
    %333 = vector.broadcast %332 : vector<14x1xf32> to vector<14x14xf32>
    %334 = arith.subf %330, %333 : vector<14x14xf32>
    %335 = math.exp %334 : vector<14x14xf32>
    %cst_167 = arith.constant dense<0.000000e+00> : vector<14xf32>
    %336 = vector.multi_reduction <add>, %335, %cst_167 [1] : vector<14x14xf32> to vector<14xf32>
    %337 = vector.shape_cast %336 : vector<14xf32> to vector<14x1xf32>
    %338 = tpu.reciprocal %337 {approx = true} : vector<14x1xf32> -> vector<14x1xf32>
    %339 = vector.broadcast %338 : vector<14x1xf32> to vector<14x14xf32>
    %340 = arith.mulf %335, %339 : vector<14x14xf32>
    %cst_168 = arith.constant dense<0.000000e+00> : vector<14x32xf32>
    %341 = tpu.matmul %340, %329, %cst_168 {dimension_numbers = #tpu.dot_dimension_numbers<[1], [0], [0], [1], [0, 0, 1, 1], [], []>} : vector<14x14xf32>, vector<14x32xf32>, vector<14x32xf32> -> vector<14x32xf32>
    %c0_169 = arith.constant 0 : index
    %c0_170 = arith.constant 0 : index
    %342 = vector.load %arg19[%c0_169, %c0_170] : memref<14x128xf32, #tpu.memory_space<vmem>>, vector<14x32xf32>
    tpu.vector_store %arg19[%c0_169, %c0_170], %341 {strides = array<i32>} : memref<14x128xf32, #tpu.memory_space<vmem>>, vector<14x32xf32>,
    %343 = vector.extract_strided_slice %324 {offsets = [0, 32], sizes = [14, 32], strides = [1, 1]} : vector<14x128xf32> to vector<14x32xf32>
    %344 = vector.extract_strided_slice %325 {offsets = [0, 32], sizes = [14, 32], strides = [1, 1]} : vector<14x128xf32> to vector<14x32xf32>
    %345 = vector.extract_strided_slice %326 {offsets = [0, 32], sizes = [14, 32], strides = [1, 1]} : vector<14x128xf32> to vector<14x32xf32>
    %cst_171 = arith.constant dense<0.000000e+00> : vector<14x14xf32>
    %346 = tpu.matmul %343, %344, %cst_171 {dimension_numbers = #tpu.dot_dimension_numbers<[1], [1], [0], [0], [0, 0, 1, 0], [], []>} : vector<14x32xf32>, vector<14x32xf32>, vector<14x14xf32> -> vector<14x14xf32>
    %cst_172 = arith.constant dense<0xFF800000> : vector<14xf32>
    %347 = vector.multi_reduction <maximumf>, %346, %cst_172 [1] : vector<14x14xf32> to vector<14xf32>
    %348 = vector.shape_cast %347 : vector<14xf32> to vector<14x1xf32>
    %349 = vector.broadcast %348 : vector<14x1xf32> to vector<14x14xf32>
    %350 = arith.subf %346, %349 : vector<14x14xf32>
    %351 = math.exp %350 : vector<14x14xf32>
    %cst_173 = arith.constant dense<0.000000e+00> : vector<14xf32>
    %352 = vector.multi_reduction <add>, %351, %cst_173 [1] : vector<14x14xf32> to vector<14xf32>
    %353 = vector.shape_cast %352 : vector<14xf32> to vector<14x1xf32>
    %354 = tpu.reciprocal %353 {approx = true} : vector<14x1xf32> -> vector<14x1xf32>
    %355 = vector.broadcast %354 : vector<14x1xf32> to vector<14x14xf32>
    %356 = arith.mulf %351, %355 : vector<14x14xf32>
    %cst_174 = arith.constant dense<0.000000e+00> : vector<14x32xf32>
    %357 = tpu.matmul %356, %345, %cst_174 {dimension_numbers = #tpu.dot_dimension_numbers<[1], [0], [0], [1], [0, 0, 1, 1], [], []>} : vector<14x14xf32>, vector<14x32xf32>, vector<14x32xf32> -> vector<14x32xf32>
    %c0_175 = arith.constant 0 : index
    %c32_176 = arith.constant 32 : index
    %358 = vector.load %arg19[%c0_175, %c32_176] : memref<14x128xf32, #tpu.memory_space<vmem>>, vector<14x32xf32>
    tpu.vector_store %arg19[%c0_175, %c32_176], %357 {strides = array<i32>} : memref<14x128xf32, #tpu.memory_space<vmem>>, vector<14x32xf32>,
    %359 = vector.extract_strided_slice %324 {offsets = [0, 64], sizes = [14, 32], strides = [1, 1]} : vector<14x128xf32> to vector<14x32xf32>
    %360 = vector.extract_strided_slice %325 {offsets = [0, 64], sizes = [14, 32], strides = [1, 1]} : vector<14x128xf32> to vector<14x32xf32>
    %361 = vector.extract_strided_slice %326 {offsets = [0, 64], sizes = [14, 32], strides = [1, 1]} : vector<14x128xf32> to vector<14x32xf32>
    %cst_177 = arith.constant dense<0.000000e+00> : vector<14x14xf32>
    %362 = tpu.matmul %359, %360, %cst_177 {dimension_numbers = #tpu.dot_dimension_numbers<[1], [1], [0], [0], [0, 0, 1, 0], [], []>} : vector<14x32xf32>, vector<14x32xf32>, vector<14x14xf32> -> vector<14x14xf32>
    %cst_178 = arith.constant dense<0xFF800000> : vector<14xf32>
    %363 = vector.multi_reduction <maximumf>, %362, %cst_178 [1] : vector<14x14xf32> to vector<14xf32>
    %364 = vector.shape_cast %363 : vector<14xf32> to vector<14x1xf32>
    %365 = vector.broadcast %364 : vector<14x1xf32> to vector<14x14xf32>
    %366 = arith.subf %362, %365 : vector<14x14xf32>
    %367 = math.exp %366 : vector<14x14xf32>
    %cst_179 = arith.constant dense<0.000000e+00> : vector<14xf32>
    %368 = vector.multi_reduction <add>, %367, %cst_179 [1] : vector<14x14xf32> to vector<14xf32>
    %369 = vector.shape_cast %368 : vector<14xf32> to vector<14x1xf32>
    %370 = tpu.reciprocal %369 {approx = true} : vector<14x1xf32> -> vector<14x1xf32>
    %371 = vector.broadcast %370 : vector<14x1xf32> to vector<14x14xf32>
    %372 = arith.mulf %367, %371 : vector<14x14xf32>
    %cst_180 = arith.constant dense<0.000000e+00> : vector<14x32xf32>
    %373 = tpu.matmul %372, %361, %cst_180 {dimension_numbers = #tpu.dot_dimension_numbers<[1], [0], [0], [1], [0, 0, 1, 1], [], []>} : vector<14x14xf32>, vector<14x32xf32>, vector<14x32xf32> -> vector<14x32xf32>
    %c0_181 = arith.constant 0 : index
    %c64_182 = arith.constant 64 : index
    %374 = vector.load %arg19[%c0_181, %c64_182] : memref<14x128xf32, #tpu.memory_space<vmem>>, vector<14x32xf32>
    tpu.vector_store %arg19[%c0_181, %c64_182], %373 {strides = array<i32>} : memref<14x128xf32, #tpu.memory_space<vmem>>, vector<14x32xf32>,
    %375 = vector.extract_strided_slice %324 {offsets = [0, 96], sizes = [14, 32], strides = [1, 1]} : vector<14x128xf32> to vector<14x32xf32>
    %376 = vector.extract_strided_slice %325 {offsets = [0, 96], sizes = [14, 32], strides = [1, 1]} : vector<14x128xf32> to vector<14x32xf32>
    %377 = vector.extract_strided_slice %326 {offsets = [0, 96], sizes = [14, 32], strides = [1, 1]} : vector<14x128xf32> to vector<14x32xf32>
    %cst_183 = arith.constant dense<0.000000e+00> : vector<14x14xf32>
    %378 = tpu.matmul %375, %376, %cst_183 {dimension_numbers = #tpu.dot_dimension_numbers<[1], [1], [0], [0], [0, 0, 1, 0], [], []>} : vector<14x32xf32>, vector<14x32xf32>, vector<14x14xf32> -> vector<14x14xf32>
    %cst_184 = arith.constant dense<0xFF800000> : vector<14xf32>
    %379 = vector.multi_reduction <maximumf>, %378, %cst_184 [1] : vector<14x14xf32> to vector<14xf32>
    %380 = vector.shape_cast %379 : vector<14xf32> to vector<14x1xf32>
    %381 = vector.broadcast %380 : vector<14x1xf32> to vector<14x14xf32>
    %382 = arith.subf %378, %381 : vector<14x14xf32>
    %383 = math.exp %382 : vector<14x14xf32>
    %cst_185 = arith.constant dense<0.000000e+00> : vector<14xf32>
    %384 = vector.multi_reduction <add>, %383, %cst_185 [1] : vector<14x14xf32> to vector<14xf32>
    %385 = vector.shape_cast %384 : vector<14xf32> to vector<14x1xf32>
    %386 = tpu.reciprocal %385 {approx = true} : vector<14x1xf32> -> vector<14x1xf32>
    %387 = vector.broadcast %386 : vector<14x1xf32> to vector<14x14xf32>
    %388 = arith.mulf %383, %387 : vector<14x14xf32>
    %cst_186 = arith.constant dense<0.000000e+00> : vector<14x32xf32>
    %389 = tpu.matmul %388, %377, %cst_186 {dimension_numbers = #tpu.dot_dimension_numbers<[1], [0], [0], [1], [0, 0, 1, 1], [], []>} : vector<14x14xf32>, vector<14x32xf32>, vector<14x32xf32> -> vector<14x32xf32>
    %c0_187 = arith.constant 0 : index
    %c96_188 = arith.constant 96 : index
    %390 = vector.load %arg19[%c0_187, %c96_188] : memref<14x128xf32, #tpu.memory_space<vmem>>, vector<14x32xf32>
    tpu.vector_store %arg19[%c0_187, %c96_188], %389 {strides = array<i32>} : memref<14x128xf32, #tpu.memory_space<vmem>>, vector<14x32xf32>,
    %c0_189 = arith.constant 0 : index
    %c0_190 = arith.constant 0 : index
    %391 = vector.load %arg19[%c0_189, %c0_190] : memref<14x128xf32, #tpu.memory_space<vmem>>, vector<14x128xf32>
    %c2_191 = arith.constant 2 : index
    %c0_192 = arith.constant 0 : index
    %c0_193 = arith.constant 0 : index
    %392 = vector.load %arg6[%c2_191, %c0_192, %c0_193] : memref<3x128x128xf32, #tpu.memory_space<vmem>>, vector<1x128x128xf32>
    %393 = vector.shape_cast %392 : vector<1x128x128xf32> to vector<128x128xf32>
    %cst_194 = arith.constant dense<0.000000e+00> : vector<14x128xf32>
    %394 = tpu.matmul %391, %393, %cst_194 {dimension_numbers = #tpu.dot_dimension_numbers<[1], [0], [0], [1], [0, 0, 1, 1], [], []>} : vector<14x128xf32>, vector<128x128xf32>, vector<14x128xf32> -> vector<14x128xf32>
    %c2_195 = arith.constant 2 : index
    %c0_196 = arith.constant 0 : index
    %c0_197 = arith.constant 0 : index
    %395 = vector.load %arg7[%c2_195, %c0_196, %c0_197] : memref<3x1x128xf32, #tpu.memory_space<vmem>>, vector<1x1x128xf32>
    %396 = vector.shape_cast %395 : vector<1x1x128xf32> to vector<1x128xf32>
    %397 = vector.broadcast %396 : vector<1x128xf32> to vector<14x128xf32>
    %398 = arith.addf %394, %397 : vector<14x128xf32>
    %399 = arith.addf %314, %398 : vector<14x128xf32>
    %cst_198 = arith.constant dense<0.000000e+00> : vector<14xf32>
    %400 = vector.multi_reduction <add>, %399, %cst_198 [1] : vector<14x128xf32> to vector<14xf32>
    %401 = vector.shape_cast %400 : vector<14xf32> to vector<14x1xf32>
    %cst_199 = arith.constant 1.280000e+02 : f32
    %402 = vector.broadcast %cst_199 : f32 to vector<14x1xf32>
    %403 = arith.divf %401, %402 : vector<14x1xf32>
    %404 = vector.broadcast %403 : vector<14x1xf32> to vector<14x128xf32>
    %405 = arith.subf %399, %404 : vector<14x128xf32>
    %406 = arith.mulf %405, %405 : vector<14x128xf32>
    %cst_200 = arith.constant dense<0.000000e+00> : vector<14xf32>
    %407 = vector.multi_reduction <add>, %406, %cst_200 [1] : vector<14x128xf32> to vector<14xf32>
    %408 = vector.shape_cast %407 : vector<14xf32> to vector<14x1xf32>
    %cst_201 = arith.constant 1.280000e+02 : f32
    %409 = vector.broadcast %cst_201 : f32 to vector<14x1xf32>
    %410 = arith.divf %408, %409 : vector<14x1xf32>
    %411 = vector.broadcast %403 : vector<14x1xf32> to vector<14x128xf32>
    %412 = arith.subf %399, %411 : vector<14x128xf32>
    %cst_202 = arith.constant 9.99999974E-6 : f32
    %413 = vector.broadcast %cst_202 : f32 to vector<14x1xf32>
    %414 = arith.addf %410, %413 : vector<14x1xf32>
    %415 = math.rsqrt %414 : vector<14x1xf32>
    %416 = vector.broadcast %415 : vector<14x1xf32> to vector<14x128xf32>
    %417 = arith.mulf %412, %416 : vector<14x128xf32>
    %c2_203 = arith.constant 2 : index
    %c0_204 = arith.constant 0 : index
    %c0_205 = arith.constant 0 : index
    %418 = vector.load %arg8[%c2_203, %c0_204, %c0_205] : memref<3x1x128xf32, #tpu.memory_space<vmem>>, vector<1x1x128xf32>
    %419 = vector.shape_cast %418 : vector<1x1x128xf32> to vector<1x128xf32>
    %420 = vector.broadcast %419 : vector<1x128xf32> to vector<14x128xf32>
    %421 = arith.mulf %417, %420 : vector<14x128xf32>
    %c2_206 = arith.constant 2 : index
    %c0_207 = arith.constant 0 : index
    %c0_208 = arith.constant 0 : index
    %422 = vector.load %arg9[%c2_206, %c0_207, %c0_208] : memref<3x1x128xf32, #tpu.memory_space<vmem>>, vector<1x1x128xf32>
    %423 = vector.shape_cast %422 : vector<1x1x128xf32> to vector<1x128xf32>
    %424 = vector.broadcast %423 : vector<1x128xf32> to vector<14x128xf32>
    %425 = arith.addf %421, %424 : vector<14x128xf32>
    %c2_209 = arith.constant 2 : index
    %c0_210 = arith.constant 0 : index
    %c0_211 = arith.constant 0 : index
    %426 = vector.load %arg10[%c2_209, %c0_210, %c0_211] : memref<3x128x2048xf32, #tpu.memory_space<vmem>>, vector<1x128x2048xf32>
    %427 = vector.shape_cast %426 : vector<1x128x2048xf32> to vector<128x2048xf32>
    %cst_212 = arith.constant dense<0.000000e+00> : vector<14x2048xf32>
    %428 = tpu.matmul %425, %427, %cst_212 {dimension_numbers = #tpu.dot_dimension_numbers<[1], [0], [0], [1], [0, 0, 1, 1], [], []>} : vector<14x128xf32>, vector<128x2048xf32>, vector<14x2048xf32> -> vector<14x2048xf32>
    %c2_213 = arith.constant 2 : index
    %c0_214 = arith.constant 0 : index
    %c0_215 = arith.constant 0 : index
    %429 = vector.load %arg11[%c2_213, %c0_214, %c0_215] : memref<3x1x2048xf32, #tpu.memory_space<vmem>>, vector<1x1x2048xf32>
    %430 = vector.shape_cast %429 : vector<1x1x2048xf32> to vector<1x2048xf32>
    %431 = vector.broadcast %430 : vector<1x2048xf32> to vector<14x2048xf32>
    %432 = arith.addf %428, %431 : vector<14x2048xf32>
    %cst_216 = arith.constant 0.000000e+00 : f32
    %433 = vector.broadcast %cst_216 : f32 to vector<14x2048xf32>
    %434 = arith.maximumf %432, %433 : vector<14x2048xf32>
    %c2_217 = arith.constant 2 : index
    %c0_218 = arith.constant 0 : index
    %c0_219 = arith.constant 0 : index
    %435 = vector.load %arg12[%c2_217, %c0_218, %c0_219] : memref<3x2048x128xf32, #tpu.memory_space<vmem>>, vector<1x2048x128xf32>
    %436 = vector.shape_cast %435 : vector<1x2048x128xf32> to vector<2048x128xf32>
    %cst_220 = arith.constant dense<0.000000e+00> : vector<14x128xf32>
    %437 = tpu.matmul %434, %436, %cst_220 {dimension_numbers = #tpu.dot_dimension_numbers<[1], [0], [0], [1], [0, 0, 1, 1], [], []>} : vector<14x2048xf32>, vector<2048x128xf32>, vector<14x128xf32> -> vector<14x128xf32>
    %c2_221 = arith.constant 2 : index
    %c0_222 = arith.constant 0 : index
    %c0_223 = arith.constant 0 : index
    %438 = vector.load %arg13[%c2_221, %c0_222, %c0_223] : memref<3x1x128xf32, #tpu.memory_space<vmem>>, vector<1x1x128xf32>
    %439 = vector.shape_cast %438 : vector<1x1x128xf32> to vector<1x128xf32>
    %440 = vector.broadcast %439 : vector<1x128xf32> to vector<14x128xf32>
    %441 = arith.addf %437, %440 : vector<14x128xf32>
    %442 = arith.addf %425, %441 : vector<14x128xf32>
    %cst_224 = arith.constant dense<0.000000e+00> : vector<14xf32>
    %443 = vector.multi_reduction <add>, %442, %cst_224 [1] : vector<14x128xf32> to vector<14xf32>
    %444 = vector.shape_cast %443 : vector<14xf32> to vector<14x1xf32>
    %cst_225 = arith.constant 1.280000e+02 : f32
    %445 = vector.broadcast %cst_225 : f32 to vector<14x1xf32>
    %446 = arith.divf %444, %445 : vector<14x1xf32>
    %447 = vector.broadcast %446 : vector<14x1xf32> to vector<14x128xf32>
    %448 = arith.subf %442, %447 : vector<14x128xf32>
    %449 = arith.mulf %448, %448 : vector<14x128xf32>
    %cst_226 = arith.constant dense<0.000000e+00> : vector<14xf32>
    %450 = vector.multi_reduction <add>, %449, %cst_226 [1] : vector<14x128xf32> to vector<14xf32>
    %451 = vector.shape_cast %450 : vector<14xf32> to vector<14x1xf32>
    %cst_227 = arith.constant 1.280000e+02 : f32
    %452 = vector.broadcast %cst_227 : f32 to vector<14x1xf32>
    %453 = arith.divf %451, %452 : vector<14x1xf32>
    %454 = vector.broadcast %446 : vector<14x1xf32> to vector<14x128xf32>
    %455 = arith.subf %442, %454 : vector<14x128xf32>
    %cst_228 = arith.constant 9.99999974E-6 : f32
    %456 = vector.broadcast %cst_228 : f32 to vector<14x1xf32>
    %457 = arith.addf %453, %456 : vector<14x1xf32>
    %458 = math.rsqrt %457 : vector<14x1xf32>
    %459 = vector.broadcast %458 : vector<14x1xf32> to vector<14x128xf32>
    %460 = arith.mulf %455, %459 : vector<14x128xf32>
    %c2_229 = arith.constant 2 : index
    %c0_230 = arith.constant 0 : index
    %c0_231 = arith.constant 0 : index
    %461 = vector.load %arg14[%c2_229, %c0_230, %c0_231] : memref<3x1x128xf32, #tpu.memory_space<vmem>>, vector<1x1x128xf32>
    %462 = vector.shape_cast %461 : vector<1x1x128xf32> to vector<1x128xf32>
    %463 = vector.broadcast %462 : vector<1x128xf32> to vector<14x128xf32>
    %464 = arith.mulf %460, %463 : vector<14x128xf32>
    %c2_232 = arith.constant 2 : index
    %c0_233 = arith.constant 0 : index
    %c0_234 = arith.constant 0 : index
    %465 = vector.load %arg15[%c2_232, %c0_233, %c0_234] : memref<3x1x128xf32, #tpu.memory_space<vmem>>, vector<1x1x128xf32>
    %466 = vector.shape_cast %465 : vector<1x1x128xf32> to vector<1x128xf32>
    %467 = vector.broadcast %466 : vector<1x128xf32> to vector<14x128xf32>
    %468 = arith.addf %464, %467 : vector<14x128xf32>
    %c0_235 = arith.constant 0 : index
    %c0_236 = arith.constant 0 : index
    %469 = vector.load %arg16[%c0_235, %c0_236] : memref<128x128xf32, #tpu.memory_space<vmem>>, vector<128x128xf32>
    %cst_237 = arith.constant dense<0.000000e+00> : vector<14x128xf32>
    %470 = tpu.matmul %468, %469, %cst_237 {dimension_numbers = #tpu.dot_dimension_numbers<[1], [0], [0], [1], [0, 0, 1, 1], [], []>} : vector<14x128xf32>, vector<128x128xf32>, vector<14x128xf32> -> vector<14x128xf32>
    %c0_238 = arith.constant 0 : index
    %c0_239 = arith.constant 0 : index
    %471 = vector.load %arg17[%c0_238, %c0_239] : memref<1x128xf32, #tpu.memory_space<vmem>>, vector<1x128xf32>
    %472 = vector.broadcast %471 : vector<1x128xf32> to vector<14x128xf32>
    %473 = arith.addf %470, %472 : vector<14x128xf32>
    %c0_240 = arith.constant 0 : index
    %c0_241 = arith.constant 0 : index
    %c0_242 = arith.constant 0 : index
    %474 = vector.load %arg18[%c0_240, %c0_241, %c0_242] : memref<1x14x128xf32, #tpu.memory_space<vmem>>, vector<1x14x128xf32>
    %475 = vector.shape_cast %474 : vector<1x14x128xf32> to vector<14x128xf32>
    %476 = vector.shape_cast %473 : vector<14x128xf32> to vector<1x14x128xf32>
    tpu.vector_store %arg18[%c0_240, %c0_241, %c0_242], %476 {strides = array<i32>} : memref<1x14x128xf32, #tpu.memory_space<vmem>>, vector<1x14x128xf32>,
    return
  }
  func.func @transform_0(%arg0: i32) -> (i32, i32, i32) {
    %c0_i32 = arith.constant 0 : i32
    %c0_i32_0 = arith.constant 0 : i32
    %c0_i32_1 = arith.constant 0 : i32
    return %arg0, %c0_i32, %c0_i32_0 : i32, i32, i32
  }
  func.func @transform_1(%arg0: i32) -> (i32, i32) {
    %c0_i32 = arith.constant 0 : i32
    %c0_i32_0 = arith.constant 0 : i32
    %c0_i32_1 = arith.constant 0 : i32
    return %c0_i32, %c0_i32_0 : i32, i32
  }
  func.func @transform_2(%arg0: i32) -> (i32, i32) {
    %c0_i32 = arith.constant 0 : i32
    %c0_i32_0 = arith.constant 0 : i32
    %c0_i32_1 = arith.constant 0 : i32
    return %c0_i32, %c0_i32_0 : i32, i32
  }
  func.func @transform_3(%arg0: i32) -> (i32, i32, i32) {
    %c0_i32 = arith.constant 0 : i32
    %c0_i32_0 = arith.constant 0 : i32
    %c0_i32_1 = arith.constant 0 : i32
    %c0_i32_2 = arith.constant 0 : i32
    return %c0_i32, %c0_i32_0, %c0_i32_1 : i32, i32, i32
  }
  func.func @transform_4(%arg0: i32) -> (i32, i32, i32) {
    %c0_i32 = arith.constant 0 : i32
    %c0_i32_0 = arith.constant 0 : i32
    %c0_i32_1 = arith.constant 0 : i32
    %c0_i32_2 = arith.constant 0 : i32
    return %c0_i32, %c0_i32_0, %c0_i32_1 : i32, i32, i32
  }
  func.func @transform_5(%arg0: i32) -> (i32, i32, i32) {
    %c0_i32 = arith.constant 0 : i32
    %c0_i32_0 = arith.constant 0 : i32
    %c0_i32_1 = arith.constant 0 : i32
    %c0_i32_2 = arith.constant 0 : i32
    return %c0_i32, %c0_i32_0, %c0_i32_1 : i32, i32, i32
  }
  func.func @transform_6(%arg0: i32) -> (i32, i32, i32) {
    %c0_i32 = arith.constant 0 : i32
    %c0_i32_0 = arith.constant 0 : i32
    %c0_i32_1 = arith.constant 0 : i32
    %c0_i32_2 = arith.constant 0 : i32
    return %c0_i32, %c0_i32_0, %c0_i32_1 : i32, i32, i32
  }
  func.func @transform_7(%arg0: i32) -> (i32, i32, i32) {
    %c0_i32 = arith.constant 0 : i32
    %c0_i32_0 = arith.constant 0 : i32
    %c0_i32_1 = arith.constant 0 : i32
    %c0_i32_2 = arith.constant 0 : i32
    return %c0_i32, %c0_i32_0, %c0_i32_1 : i32, i32, i32
  }
  func.func @transform_8(%arg0: i32) -> (i32, i32, i32) {
    %c0_i32 = arith.constant 0 : i32
    %c0_i32_0 = arith.constant 0 : i32
    %c0_i32_1 = arith.constant 0 : i32
    %c0_i32_2 = arith.constant 0 : i32
    return %c0_i32, %c0_i32_0, %c0_i32_1 : i32, i32, i32
  }
  func.func @transform_9(%arg0: i32) -> (i32, i32, i32) {
    %c0_i32 = arith.constant 0 : i32
    %c0_i32_0 = arith.constant 0 : i32
    %c0_i32_1 = arith.constant 0 : i32
    %c0_i32_2 = arith.constant 0 : i32
    return %c0_i32, %c0_i32_0, %c0_i32_1 : i32, i32, i32
  }
  func.func @transform_10(%arg0: i32) -> (i32, i32, i32) {
    %c0_i32 = arith.constant 0 : i32
    %c0_i32_0 = arith.constant 0 : i32
    %c0_i32_1 = arith.constant 0 : i32
    %c0_i32_2 = arith.constant 0 : i32
    return %c0_i32, %c0_i32_0, %c0_i32_1 : i32, i32, i32
  }
  func.func @transform_11(%arg0: i32) -> (i32, i32, i32) {
    %c0_i32 = arith.constant 0 : i32
    %c0_i32_0 = arith.constant 0 : i32
    %c0_i32_1 = arith.constant 0 : i32
    %c0_i32_2 = arith.constant 0 : i32
    return %c0_i32, %c0_i32_0, %c0_i32_1 : i32, i32, i32
  }
  func.func @transform_12(%arg0: i32) -> (i32, i32, i32) {
    %c0_i32 = arith.constant 0 : i32
    %c0_i32_0 = arith.constant 0 : i32
    %c0_i32_1 = arith.constant 0 : i32
    %c0_i32_2 = arith.constant 0 : i32
    return %c0_i32, %c0_i32_0, %c0_i32_1 : i32, i32, i32
  }
  func.func @transform_13(%arg0: i32) -> (i32, i32, i32) {
    %c0_i32 = arith.constant 0 : i32
    %c0_i32_0 = arith.constant 0 : i32
    %c0_i32_1 = arith.constant 0 : i32
    %c0_i32_2 = arith.constant 0 : i32
    return %c0_i32, %c0_i32_0, %c0_i32_1 : i32, i32, i32
  }
  func.func @transform_14(%arg0: i32) -> (i32, i32, i32) {
    %c0_i32 = arith.constant 0 : i32
    %c0_i32_0 = arith.constant 0 : i32
    %c0_i32_1 = arith.constant 0 : i32
    %c0_i32_2 = arith.constant 0 : i32
    return %c0_i32, %c0_i32_0, %c0_i32_1 : i32, i32, i32
  }
  func.func @transform_15(%arg0: i32) -> (i32, i32) {
    %c0_i32 = arith.constant 0 : i32
    %c0_i32_0 = arith.constant 0 : i32
    %c0_i32_1 = arith.constant 0 : i32
    return %c0_i32, %c0_i32_0 : i32, i32
  }
  func.func @transform_16(%arg0: i32) -> (i32, i32) {
    %c0_i32 = arith.constant 0 : i32
    %c0_i32_0 = arith.constant 0 : i32
    %c0_i32_1 = arith.constant 0 : i32
    return %c0_i32, %c0_i32_0 : i32, i32
  }
  func.func @transform_17(%arg0: i32) -> (i32, i32, i32) {
    %c0_i32 = arith.constant 0 : i32
    %c0_i32_0 = arith.constant 0 : i32
    %c0_i32_1 = arith.constant 0 : i32
    return %arg0, %c0_i32, %c0_i32_0 : i32, i32, i32
  }
}

</mosaic_0001>

<bundles_post_ra>
// kernel: patchtst_forward.1
= control target key start
LH: loop header
LB: loop body
LE: loop exit
PB: predicated region body
PF: predicated region fallthrough
CT: control target
= control target key end

     0   :  { %s15603_s0 = inlined_call_operand.vmem [shape: f32[2,14,32], index: 0, kind: input, shape index: {}]   ;;  %s15604_s1 = inlined_call_operand.hbm [shape: f32[32,128], index: 1, kind: input, shape index: {}]   ;;  %s15605_s2 = inlined_call_operand.hbm [shape: f32[1,128], index: 2, kind: input, shape index: {}]   ;;  %s15606_s3 = inlined_call_operand.hbm [shape: f32[3,128,384], index: 3, kind: input, shape index: {}]   ;;  %s15607_s4 = inlined_call_operand.vmem [shape: f32[3,1,384], index: 4, kind: input, shape index: {}]   ;;  %s15608_s5 = inlined_call_operand.hbm [shape: f32[3,128,128], index: 5, kind: input, shape index: {}]   ;;  %s15609_s6 = inlined_call_operand.vmem [shape: f32[3,1,128], index: 6, kind: input, shape index: {}]   ;;  %s15610_s7 = inlined_call_operand.vmem [shape: f32[3,1,128], index: 7, kind: input, shape index: {}]   ;;  %s15611_s8 = inlined_call_operand.vmem [shape: f32[3,1,128], index: 8, kind: input, shape index: {}]   ;;  %s15612_s9 = inlined_call_operand.hbm [shape: f32[3,128,2048], index: 9, kind: input, shape index: {}]   ;;  %s15613_s10 = inlined_call_operand.vmem [shape: f32[3,1,2048], index: 10, kind: input, shape index: {}]   ;;  %s15614_s11 = inlined_call_operand.hbm [shape: f32[3,2048,128], index: 11, kind: input, shape index: {}]   ;;  %s15615_s12 = inlined_call_operand.vmem [shape: f32[3,1,128], index: 12, kind: input, shape index: {}]   ;;  %s15616_s13 = inlined_call_operand.vmem [shape: f32[3,1,128], index: 13, kind: input, shape index: {}]   ;;  %s15617_s14 = inlined_call_operand.vmem [shape: f32[3,1,128], index: 14, kind: input, shape index: {}]   ;;  %s15618_s15 = inlined_call_operand.vmem [shape: f32[128,128], index: 15, kind: input, shape index: {}]   ;;  %s15619_s16 = inlined_call_operand.vmem [shape: f32[1,128], index: 16, kind: input, shape index: {}]   ;;  %s15620_s17 = inlined_call_operand.vmem [shape: f32[2,14,128], index: 17, kind: output, shape index: {}]  }
   0x1   :  { %15629 = sst [smem:[#allocation18_spill]] %s15603_s0 }
   0x2   :  { %15630 = sst [smem:[#allocation19_spill]] %s15604_s1 }
   0x3   :  { %15631 = sst [smem:[#allocation20_spill]] %s15605_s2 }
   0x4   :  { %15632 = sst [smem:[#allocation21_spill]] %s15618_s15 }
   0x5   :  { %15633 = sst [smem:[#allocation22_spill]] %s15619_s16 }
   0x6   :  { %15634 = sst [smem:[#allocation23_spill]] %s15620_s17 }
   0x7   :  { %22 = vsyncpa [#allocation4], 0 }
   0x8   :  { %23 = vsyncpa [#allocation6], 0 }
   0x9   :  { %24 = vsyncpa [#allocation9], 0 }
   0xa   :  { %25 = vsyncpa [#allocation12], 0  ;;  %s14549_s24 = smov 0  }
   0xb LB: > { %15635 = sst [smem:[#allocation17_spill]] %s14441_s24  ;;  %s14443_s25 = smov [#allocation5]   ;;  %s14441_s24 = sphi %s14549_s24, %s31_s24  }
   0xc   : > { %s450_s26 = sshll.u32 %s14443_s25, 4  ;;  %s14555_s27 = sadd.s32 4294967295, %s14441_s24   ;;  %s14560_s26 = int_to_ptr.vmem [resolvable:$true] %s450_s26 }
   0xd   : > { %p10243_p0 = scmp.ge.s32.totalorder %s14441_s24, 1  ;;  %p424_p1 = scmp.lt.s32.totalorder %s14441_s24, 3 }
   0xe   : > { %p15624_p2 = scmp.eq.s32.totalorder %s14555_s27, 0  ;;  %s14444_s29 = smov [#allocation8]  }
   0xf   : > { %p14562_p3 = pnand %p10243_p0, %p424_p1  ;;  %s476_s0 = sshll.u32 %s14444_s29, 4  ;;  %s14568_s0 = int_to_ptr.vmem [resolvable:$true] %s476_s0 }
  0x10   : > { %s14445_s18 = smov [#allocation3]   ;;  %s14446_s1 = smov [#allocation7]  }
  0x11   : > { %s15636_s28 = scalar_select %p14562_p3, 1, 0 }
  0x12   : > { %p13986_p4 = pneg %p14562_p3  ;;  %s436_s19 = sshll.u32 %s14445_s18, 4  ;;  %s14576_s19 = int_to_ptr.vmem [resolvable:$true] %s436_s19 }
  0x13   : > { %s14578_s20 = sshll.u32 %s14446_s1, 4  ;;  %s15638_s2 = sld [smem:[#allocation20_spill]]  ;;  %s461_s20 = int_to_ptr.vmem [resolvable:$true] %s14578_s20 }
  0x14   : > { %p14572_p5 = pnand %p15624_p2, %p13986_p4 }
  0x16   : > { %p14588_p7 = pneg %p14572_p5 }
  0x19   : > { %s14251_s23 = scalar_lea.hbm %s15638_s2, 16 }
  0x1a   : > { %p14252_p6 = scmp.ne.s32.totalorder %s15638_s2, %s14251_s23  ;;  %p14258_p10 = scmp.lt.u32.totalorder %s14251_s23, %s15638_s2 }
  0x1c   : > { %p14254_p8 = pnand %p14588_p7, %p14252_p6 }
  0x1e   : > { %p14255_p9 = pneg %p14254_p8 }
  0x20   : > { %p14260_p11 = pnand %p14258_p10, %p14255_p9 }
  0x22   : > { %14263 = shalt.err (!%p14260_p11)
}
  0x23   : > { %s14264_s21 = scalar_lea.vmem %s14560_s26, 16  ;;  %s14271_s22 = scalar_lea.vmem %s14560_s26, 32 }
  0x24   : > { %p14265_p12 = scmp.ne.s32.totalorder %s14560_s26, %s14264_s21  ;;  %p14272_p1 = scmp.lt.s32.totalorder %s14560_s26, %s14560_s26 }
  0x25   : > { %p14273_p4 = scmp.lt.s32.totalorder %s14271_s22, %s14264_s21 }
  0x26   : > { %p14267_p13 = pnand %p14265_p12, %p14588_p7 }
  0x27   : > { %p14274_p6 = por %p14273_p4, %p14272_p1 }
  0x28   : > { %p14268_p0 = pneg %p14267_p13 }
  0x2a   : > { %p14275_p8 = pnand %p14274_p6, %p14268_p0 }
  0x2c   : > { %14278 = shalt.err (!%p14275_p8)
}
  0x2d   : > { %13992 = dma.hbm_to_vmem [thread:$0]  (!%p14572_p5), %s15638_s2, 16, %s14560_s26, [#allocation6]  }
  0x2e   : > { %s14279_s1 = scalar_lea.hbm %s15608_s5, 6144 }
  0x2f   : > { %p14280_p9 = scmp.ne.s32.totalorder %s15608_s5, %s14279_s1  ;;  %p14286_p12 = scmp.lt.u32.totalorder %s14279_s1, %s15608_s5 }
  0x31   : > { %p14282_p10 = pnand %p14280_p9, %p14588_p7 }
  0x33   : > { %p14283_p11 = pneg %p14282_p10 }
  0x35   : > { %p14288_p13 = pnand %p14286_p12, %p14283_p11 }
  0x37   : > { %14291 = shalt.err (!%p14288_p13)
}
  0x38   : > { %s14292_s26 = scalar_lea.vmem %s14568_s0, 6144  ;;  %p14300_p6 = scmp.lt.s32.totalorder %s14568_s0, %s14568_s0 }
  0x39   : > { %p14293_p0 = scmp.ne.s32.totalorder %s14568_s0, %s14292_s26  ;;  %p14301_p8 = scmp.lt.s32.totalorder %s14292_s26, %s14292_s26 }
  0x3b   : > { %p14295_p1 = pnand %p14293_p0, %p14588_p7  ;;  %p14302_p9 = por %p14301_p8, %p14300_p6 }
  0x3d   : > { %p14296_p4 = pneg %p14295_p1 }
  0x3f   : > { %p14303_p10 = pnand %p14302_p9, %p14296_p4 }
  0x41   : > { %14306 = shalt.err (!%p14303_p10)
}
  0x42   : > { %s15627_s16 = smov 128   ;;  %s15626_s17 = smov 8  }
  0x43   : > { %13998 = dma.hbm_to_vmem [thread:$0]  (!%p14572_p5), %s15608_s5, 6144, %s14568_s0, [#allocation9], %s15627_s16, %s15627_s16, %s15626_s17  }
  0x44   : > { %s15640_s1 = sld [smem:[#allocation19_spill]] }
  0x4a   : > { %s14307_s21 = scalar_lea.hbm %s15640_s1, 512 }
  0x4b   : > { %p14308_p11 = scmp.ne.s32.totalorder %s15640_s1, %s14307_s21  ;;  %p14314_p0 = scmp.lt.u32.totalorder %s14307_s21, %s15640_s1 }
  0x4d   : > { %p14310_p12 = pnand %p14308_p11, %p14588_p7 }
  0x4f   : > { %p14311_p13 = pneg %p14310_p12 }
  0x51   : > { %p14316_p1 = pnand %p14314_p0, %p14311_p13 }
  0x53   : > { %14319 = shalt.err (!%p14316_p1)
}
  0x54   : > { %s14320_s0 = scalar_lea.vmem %s14576_s19, 512  ;;  %p14328_p9 = scmp.lt.s32.totalorder %s14576_s19, %s14576_s19 }
  0x55   : > { %p14321_p4 = scmp.ne.s32.totalorder %s14576_s19, %s14320_s0  ;;  %p14329_p10 = scmp.lt.s32.totalorder %s14320_s0, %s14320_s0 }
  0x57   : > { %p14323_p6 = pnand %p14321_p4, %p14588_p7  ;;  %p14330_p11 = por %p14329_p10, %p14328_p9 }
  0x59   : > { %p14324_p8 = pneg %p14323_p6 }
  0x5b   : > { %p14331_p12 = pnand %p14330_p11, %p14324_p8 }
  0x5d   : > { %14334 = shalt.err (!%p14331_p12)
}
  0x5e   : > { %13989 = dma.hbm_to_vmem [thread:$0]  (!%p14572_p5), %s15640_s1, 512, %s14576_s19, [#allocation4], %s15627_s16, %s15627_s16, %s15626_s17  }
  0x5f   : > { %s14335_s29 = scalar_lea.hbm %s15606_s3, 18432 }
  0x60   : > { %p14336_p13 = scmp.ne.s32.totalorder %s15606_s3, %s14335_s29  ;;  %p14342_p4 = scmp.lt.u32.totalorder %s14335_s29, %s15606_s3 }
  0x62   : > { %p14338_p0 = pnand %p14336_p13, %p14588_p7 }
  0x64   : > { %p14339_p1 = pneg %p14338_p0 }
  0x66   : > { %p14344_p6 = pnand %p14342_p4, %p14339_p1 }
  0x68   : > { %14347 = shalt.err (!%p14344_p6)
}
  0x69   : > { %s14348_s0 = scalar_lea.vmem %s461_s20, 18432  ;;  %p14356_p11 = scmp.lt.s32.totalorder %s461_s20, %s461_s20 }
  0x6a   : > { %p14349_p8 = scmp.ne.s32.totalorder %s461_s20, %s14348_s0  ;;  %p14357_p12 = scmp.lt.s32.totalorder %s14348_s0, %s14348_s0 }
  0x6c   : > { %p14351_p9 = pnand %p14349_p8, %p14588_p7  ;;  %p14358_p2 = por %p14357_p12, %p14356_p11 }
  0x6e   : > { %p14352_p10 = pneg %p14351_p9 }
  0x70   : > { %p14359_p3 = pnand %p14358_p2, %p14352_p10 }
  0x72   : > { %14362 = shalt.err (!%p14359_p3)
}
  0x73   : > { %s14449_s19 = smov 384   ;;  %s14450_s2 = smov 24  }
  0x74   : > { %13995 = dma.hbm_to_vmem [thread:$0]  (!%p14572_p5), %s15606_s3, 18432, %s461_s20, [#allocation6], %s14449_s19, %s14449_s19, %s14450_s2  }
  0x75   : > { %s14451_s25 = smov [#allocation10]   ;;  %s14363_s22 = scalar_lea.hbm %s15612_s9, 98304 }
  0x76   : > { %s498_s29 = sshll.u32 %s14451_s25, 4  ;;  %p14364_p2 = scmp.ne.s32.totalorder %s15612_s9, %s14363_s22  ;;  %s499_s29 = int_to_ptr.vmem [resolvable:$true] %s498_s29 }
  0x77   : > { %p14370_p0 = scmp.lt.u32.totalorder %s14363_s22, %s15612_s9 }
  0x78   : > { %p14366_p3 = pnand %p14364_p2, %p14588_p7 }
  0x7a   : > { %p14367_p13 = pneg %p14366_p3 }
  0x7c   : > { %p14372_p1 = pnand %p14370_p0, %p14367_p13 }
  0x7e   : > { %14375 = shalt.err (!%p14372_p1)
}
  0x7f   : > { %s14376_s20 = scalar_lea.vmem %s499_s29, 98304  ;;  %p14384_p9 = scmp.lt.s32.totalorder %s499_s29, %s499_s29 }
  0x80   : > { %p14377_p4 = scmp.ne.s32.totalorder %s499_s29, %s14376_s20  ;;  %p14385_p10 = scmp.lt.s32.totalorder %s14376_s20, %s14376_s20 }
  0x82   : > { %p14379_p6 = pnand %p14377_p4, %p14588_p7  ;;  %p14386_p11 = por %p14385_p10, %p14384_p9 }
  0x84   : > { %p14380_p8 = pneg %p14379_p6 }
  0x86   : > { %p14387_p12 = pnand %p14386_p11, %p14380_p8 }
  0x88   : > { %14390 = shalt.err (!%p14387_p12)
}
  0x89   : > { %s14452_s19 = smov 2048   ;;  %s15641_s2 = smov 128  }
  0x8a   : > { %14001 = dma.hbm_to_vmem [thread:$0]  (!%p14572_p5), %s15612_s9, 98304, %s499_s29, [#allocation9], %s14452_s19, %s14452_s19, %s15641_s2  }
  0x8b   : > { %s14453_s17 = smov [#allocation11]   ;;  %s14391_s21 = scalar_lea.hbm %s15614_s11, 98304 }
  0x8c   : > { %s514_s23 = sshll.u32 %s14453_s17, 4  ;;  %p14392_p2 = scmp.ne.s32.totalorder %s15614_s11, %s14391_s21  ;;  %s515_s23 = int_to_ptr.vmem [resolvable:$true] %s514_s23 }
  0x8d   : > { %p14398_p0 = scmp.lt.u32.totalorder %s14391_s21, %s15614_s11 }
  0x8e   : > { %p14394_p3 = pnand %p14392_p2, %p14588_p7 }
  0x90   : > { %p14395_p13 = pneg %p14394_p3 }
  0x92   : > { %p14400_p1 = pnand %p14398_p0, %p14395_p13 }
  0x94   : > { %14403 = shalt.err (!%p14400_p1)
}
  0x95   : > { %s14404_s29 = scalar_lea.vmem %s515_s23, 98304  ;;  %p14412_p9 = scmp.lt.s32.totalorder %s515_s23, %s515_s23 }
  0x96   : > { %p14405_p4 = scmp.ne.s32.totalorder %s515_s23, %s14404_s29  ;;  %p14413_p10 = scmp.lt.s32.totalorder %s14404_s29, %s14404_s29 }
  0x98   : > { %p14407_p6 = pnand %p14405_p4, %p14588_p7  ;;  %p14414_p11 = por %p14413_p10, %p14412_p9 }
  0x9a   : > { %p14408_p8 = pneg %p14407_p6 }
  0x9c   : > { %p14415_p12 = pnand %p14414_p11, %p14408_p8 }
  0x9e   : > { %14418 = shalt.err (!%p14415_p12)
}
  0x9f   : > { %s15642_s19 = smov 8   ;;  %p15643_p2 = scmp.ne.s32.totalorder %s15636_s28, 0 }
  0xa0   : > { %14004 = dma.hbm_to_vmem [thread:$0]  (!%p14572_p5), %s15614_s11, 98304, %s515_s23, [#allocation12], %s15641_s2, %s15641_s2, %s15642_s19  }
  0xa1   : > { %553 = sbr.rel (%p15643_p2) target bundleno = 11405 (0x2c8d), region = 88  ;;  %p15644_p7 = scmp.eq.s32.totalorder (!%p15643_p2), %s14555_s27, 0 }
  0xa8   : > { %14424 = dma.done.wait (%p15644_p7), [#allocation4], 512   ;;  %p15645_p3 = pmov %p15644_p7 }
  0xaa   : > { %14426 = vsyncadd (%p15645_p3), [#allocation4], 4294966784  ;;  %p15646_p13 = pmov %p15645_p3 }
  0xab   : > { %p15647_p0 = pmov %p15645_p3 }
  0xac   : > { %14428 = dma.done.wait (%p15646_p13), [#allocation6], 18448  }
  0xad   : > { %14430 = vsyncadd (%p15647_p0), [#allocation6], 4294948848  ;;  %p15648_p1 = pmov %p15647_p0 }
  0xae   : > { %p15649_p5 = pmov %p15647_p0 }
  0xaf   : > { %14432 = dma.done.wait (%p15648_p1), [#allocation9], 104448  }
  0xb0   : > { %14434 = vsyncadd (%p15649_p5), [#allocation9], 4294862848  ;;  %p15650_p4 = pmov %p15647_p0 }
  0xb1   : > { %p15651_p6 = pmov %p15647_p0 }
  0xb2   : > { %14436 = dma.done.wait (%p15650_p4), [#allocation12], 98304  }
  0xb3   : > { %14438 = vsyncadd (%p15651_p6), [#allocation12], 4294868992  ;;  %p625_p8 = scmp.lt.s32.totalorder %s14555_s27, 1  ;;  %s15652_s2 = sld [smem:[#allocation18_spill]]  ;;  %vm648_vm0 = vcmask 261120   ;;  %v637_v0 = vld [vmem:[#allocation3] sm:$0xff] }
  0xb4   : > { %v638_v1 = vld [vmem:[#allocation3 + $0x8] sm:$0xff]  ;;  %v639_v2 = vld [vmem:[#allocation3 + $0x10] sm:$0xff]  ;;  %v640_v4 = vld [vmem:[#allocation3 + $0x18] sm:$0xff]  ;;  %vm1066_vm1 = vcmask 1045504   ;;  %vm14455_vm2 = vmmov 1   ;;  %s14456_s18 = smov 96  }
  0xb5   : > { %s15662_s27 = smov (!%p625_p8, %s14555_s27), 1  ;;  %v11954_v3 = vpack.c.bf16 %v638_v1, %v637_v0  ;;  %v11958_v6 = vpack.c.bf16 %v640_v4, %v639_v2  ;;  %v731_v7 = vld [vmem:[#allocation7 + $0x8] sm:$0xff]  ;;  %v734_v8 = vld [vmem:[#allocation7 + $0x20] sm:$0xff]  ;;  %v733_v11 = vld [vmem:[#allocation7 + $0x18] sm:$0xff]  ;;  %vm1040_vm5 = vcmask 111616   ;;  %vm1036_vm6 = vcmask 113664  }
  0xb6   : > { %s10388_s24 = sshll.u32 %s15662_s27, 4  ;;  %v730_v9 = vld [vmem:[#allocation7] sm:$0xff]  ;;  %v11962_v10 = vpack.c.bf16 %v734_v8, %v731_v7  ;;  %v732_v12 = vld [vmem:[#allocation7 + $0x10] sm:$0xff]  ;;  %v735_v13 = vld [vmem:[#allocation7 + $0x28] sm:$0xff]  ;;  %s14457_s21 = smov 64   ;;  %vm1146_vm7 = vcmask 259072  }
  0xb7   : > { %11955 = vmatprep.subr.bf16.mxu0 %v11954_v3  ;;  %v11964_v14 = vpack.c.bf16 %v733_v11, %v730_v9  ;;  %v737_v15 = vld [vmem:[#allocation7 + $0x38] sm:$0xff]  ;;  %v740_v16 = vld [vmem:[#allocation7 + $0x50] sm:$0xff]  ;;  %v11994_v18 = vpack.c.bf16 %v735_v13, %v732_v12  ;;  %v739_v20 = vld [vmem:[#allocation7 + $0x48] sm:$0xff]  ;;  %s14458_s22 = smov 32   ;;  %vm1358_vm8 = vcmask 523520   ;;  %vm1360_vm9 = vcmask 521472  }
  0xb8   : > { %11957 = vmatpush3.bf16.msra.mxu0 %v11954_v3  ;;  %v736_v17 = vld [vmem:[#allocation7 + $0x30] sm:$0xff]  ;;  %11963 = vmatprep.subr.bf16.mxu1 %v11962_v10  ;;  %v11966_v19 = vpack.c.bf16 %v740_v16, %v737_v15  ;;  %v738_v21 = vld [vmem:[#allocation7 + $0x40] sm:$0xff]  ;;  %v741_v23 = vld [vmem:[#allocation7 + $0x58] sm:$0xff]  ;;  %v14454_v16 = vmov 0.0   ;;  %vm1571_vm10 = vcmask 785920   ;;  %vm1573_vm11 = vcmask 783872  }
  0xb9   : > { %s14749_s17 = scalar_lea.vmem %s15652_s2, %s10388_s24  ;;  %11959 = vmatprep.subr.bf16.mxu0 %v11958_v6  ;;  %11965 = vmatpush1.bf16.msra.mxu1 %v11964_v14  ;;  %v11968_v22 = vpack.c.bf16 %v739_v20, %v736_v17  ;;  %v743_v24 = vld [vmem:[#allocation7 + $0x68] sm:$0xff]  ;;  %v746_v25 = vld [vmem:[#allocation7 + $0x80] sm:$0xff]  ;;  %v745_v28 = vld [vmem:[#allocation7 + $0x78] sm:$0xff]  ;;  %v11998_v32 = vpack.c.bf16 %v741_v23, %v738_v21  ;;  %vm1786_vm12 = vcmask 1046272   ;;  %vm1784_vm13 = vcmask 1048320   ;;  %s15657_s30 = sld [smem:[#allocation21_spill]] }
  0xba   : > { %v635_v5 = vld [vmem:[%s14749_s17] sm:$0xff]  ;;  %11967 = vmatprep.subr.bf16.mxu1 %v11966_v19  ;;  %v11970_v26 = vpack.c.bf16 %v746_v25, %v743_v24  ;;  %v742_v27 = vld [vmem:[#allocation7 + $0x60] sm:$0xff]  ;;  %v636_v29 = vld [vmem:[%s14749_s17 + $0x8] sm:$0x3f]  ;;  %859 = vmatprep.mubr.f32.mxu1 %v14454_v16  ;;  %s15658_s25 = sld [smem:[#allocation22_spill]]  ;;  %s15659_s20 = sld [smem:[#allocation23_spill]] }
  0xbb   : > { %11538 = vmatprep.mubr.msk.f32.mxu0 %vm648_vm0, %v635_v5  ;;  %v749_v30 = vld [vmem:[#allocation7 + $0x98] sm:$0xff]  ;;  %v752_v31 = vld [vmem:[#allocation7 + $0xb0] sm:$0xff]  ;;  %v11972_v33 = vpack.c.bf16 %v745_v28, %v742_v27  ;;  %v747_v35 = vld [vmem:[#allocation7 + $0x88] sm:$0xff] }
  0xbc   : > { %11961 = vmatpush3.bf16.msra.mxu0 %v11958_v6  ;;  %v744_v34 = vld [vmem:[#allocation7 + $0x70] sm:$0xff]  ;;  %v11974_v36 = vpack.c.bf16 %v752_v31, %v749_v30  ;;  %v751_v38 = vld [vmem:[#allocation7 + $0xa8] sm:$0xff]  ;;  %v758_v40 = vld [vmem:[#allocation7 + $0xe0] sm:$0xff] }
  0xbd   : > { %11995 = vmatprep.subr.bf16.mxu0 %v11994_v18  ;;  %11969 = vmatpush1.bf16.msra.mxu1 %v11968_v22  ;;  %v748_v37 = vld [vmem:[#allocation7 + $0x90] sm:$0xff]  ;;  %v755_v39 = vld [vmem:[#allocation7 + $0xc8] sm:$0xff]  ;;  %v12002_v41 = vpack.c.bf16 %v747_v35, %v744_v34  ;;  %v750_v43 = vld [vmem:[#allocation7 + $0xa0] sm:$0xff]  ;;  %v780_v22 = vlaneseq }
  0xbe   : > { %11971 = vmatprep.subr.bf16.mxu1 %v11970_v26  ;;  %v11976_v42 = vpack.c.bf16 %v751_v38, %v748_v37  ;;  %v753_v44 = vld [vmem:[#allocation7 + $0xb8] sm:$0xff]  ;;  %v11978_v45 = vpack.c.bf16 %v758_v40, %v755_v39  ;;  %v754_v46 = vld [vmem:[#allocation7 + $0xc0] sm:$0xff]  ;;  %v764_v49 = vld [vmem:[#allocation7 + $0x110] sm:$0xff] }
  0xbf   : > { %11539 = vmatmul.mubr.msk.f32.vlgmr.msra.gmra.mrb[0].mxu0 %vm648_vm0, %v636_v29  ;;  %v757_v47 = vld [vmem:[#allocation7 + $0xd8] sm:$0xff]  ;;  %v12006_v50 = vpack.c.bf16 %v753_v44, %v750_v43  ;;  %v756_v52 = vld [vmem:[#allocation7 + $0xd0] sm:$0xff]  ;;  %v759_v53 = vld [vmem:[#allocation7 + $0xe8] sm:$0xff]  ;;  %v14765_v23 = vshrl.u32 %v780_v22, 7 }
  0xc0   : > { %11997 = vmatpush3.bf16.msra.mxu0 %v11994_v18  ;;  %v761_v48 = vld [vmem:[#allocation7 + $0xf8] sm:$0xff]  ;;  %v11980_v51 = vpack.c.bf16 %v757_v47, %v754_v46  ;;  %v760_v55 = vld [vmem:[#allocation7 + $0xf0] sm:$0xff]  ;;  %v763_v56 = vld [vmem:[#allocation7 + $0x108] sm:$0xff]  ;;  %v12010_v59 = vpack.c.bf16 %v759_v53, %v756_v52  ;;  %s634_s29 = scalar_lea.vmem %s15659_s20, %s10388_s24 }
  0xc1   : > { %11999 = vmatprep.subr.bf16.mxu0 %v11998_v32  ;;  %11973 = vmatpush1.bf16.msra.mxu1 %v11972_v33  ;;  %v11982_v54 = vpack.c.bf16 %v764_v49, %v761_v48  ;;  %v767_v57 = vld [vmem:[#allocation7 + $0x128] sm:$0xff]  ;;  %v770_v58 = vld [vmem:[#allocation7 + $0x140] sm:$0xff]  ;;  %v11984_v60 = vpack.c.bf16 %v763_v56, %v760_v55  ;;  %v765_v62 = vld [vmem:[#allocation7 + $0x118] sm:$0xff]  ;;  %v14768_v24 = vsub.s32 0, %v14765_v23  ;;  %v14774_v26 = vsub.s32 2, %v14765_v23 }
  0xc2   : > { %11975 = vmatprep.subr.bf16.mxu1 %v11974_v36  ;;  %v762_v61 = vld [vmem:[#allocation7 + $0x100] sm:$0xff]  ;;  %v11986_v63 = vpack.c.bf16 %v770_v58, %v767_v57  ;;  %v769_v1 = vld [vmem:[#allocation7 + $0x138] sm:$0xff]  ;;  %v768_v4 = vld [vmem:[#allocation7 + $0x130] sm:$0xff]  ;;  %v14778_v28 = vsub.s32 1, %v14765_v23 }
  0xc3   : > { %v766_v0 = vld [vmem:[#allocation7 + $0x120] sm:$0xff]  ;;  %v12014_v2 = vpack.c.bf16 %v765_v62, %v762_v61  ;;  %v771_v5 = vld [vmem:[#allocation7 + $0x148] sm:$0xff]  ;;  %v773_v7 = vld [vmem:[#allocation7 + $0x158] sm:$0xff] }
  0xc4   : > { %12001 = vmatpush3.bf16.msra.mxu0 %v11998_v32  ;;  %v11988_v3 = vpack.c.bf16 %v769_v1, %v766_v0  ;;  %v12018_v6 = vpack.c.bf16 %v771_v5, %v768_v4  ;;  %v776_v8 = vld [vmem:[#allocation7 + $0x170] sm:$0xff]  ;;  %v775_v11 = vld [vmem:[#allocation7 + $0x168] sm:$0xff]  ;;  %v774_v12 = vld [vmem:[#allocation7 + $0x160] sm:$0xff] }
  0xc5   : > { %12003 = vmatprep.subr.bf16.mxu0 %v12002_v41  ;;  %11977 = vmatpush1.bf16.msra.mxu1 %v11976_v42  ;;  %v11990_v9 = vpack.c.bf16 %v776_v8, %v773_v7  ;;  %v772_v10 = vld [vmem:[#allocation7 + $0x150] sm:$0xff]  ;;  %v777_v14 = vld [vmem:[#allocation7 + $0x178] sm:$0xff]  ;;  %vm14785_vm3 = vmpackc.low %vm1066_vm1, %vm14455_vm2 }
  0xc6   : > { %11979 = vmatprep.subr.bf16.mxu1 %v11978_v45  ;;  %v11992_v13 = vpack.c.bf16 %v775_v11, %v772_v10  ;;  %v12022_v15 = vpack.c.bf16 %v777_v14, %v774_v12  ;;  %v10262_v17 = vld [vmem:[#allocation5] ss:$0 sm:$0xff]  ;;  %v778_v25 = vld [vmem:[%s15607_s4] sm:$0x7]  ;;  %vm14799_vm4 = vmpackc.low %vm648_vm0, %vm648_vm0 }
  0xc7   : > { %v783_v27 = vrot.slane %v778_v25, %v14768_v24  ;;  %v791_v29 = vrot.slane %v778_v25, %v14774_v26  ;;  %v787_v34 = vrot.slane %v778_v25, %v14778_v28  ;;  %v7986_v40 = vld [vmem:[#allocation8 + $0x130] sm:$0xff] }
  0xc8   : > { %12005 = vmatpush3.bf16.msra.mxu0 %v12002_v41 }
  0xc9   : > { %12007 = vmatprep.subr.bf16.mxu0 %v12006_v50  ;;  %11981 = vmatpush1.bf16.msra.mxu1 %v11980_v51 }
  0xca   : > { %11983 = vmatprep.subr.bf16.mxu1 %v11982_v54 }
  0xcc   : > { %12009 = vmatpush3.bf16.msra.mxu0 %v12006_v50 }
  0xcd   : > { %12011 = vmatprep.subr.bf16.mxu0 %v12010_v59  ;;  %11985 = vmatpush1.bf16.msra.mxu1 %v11984_v60 }
  0xce   : > { %11987 = vmatprep.subr.bf16.mxu1 %v11986_v63 }
  0xd0   : > { %12013 = vmatpush3.bf16.msra.mxu0 %v12010_v59 }
  0xd1   : > { %12015 = vmatprep.subr.bf16.mxu0 %v12014_v2  ;;  %11989 = vmatpush1.bf16.msra.mxu1 %v11988_v3 }
  0xd2   : > { %11991 = vmatprep.subr.bf16.mxu1 %v11990_v9 }
  0xd4   : > { %12017 = vmatpush3.bf16.msra.mxu0 %v12014_v2 }
  0xd5   : > { %12019 = vmatprep.subr.bf16.mxu0 %v12018_v6  ;;  %11993 = vmatpush1.bf16.msra.mxu1 %v11992_v13 }
  0xd8   : > { %12021 = vmatpush3.bf16.msra.mxu0 %v12018_v6 }
  0xd9   : > { %12023 = vmatprep.subr.bf16.mxu0 %v12022_v15 }
  0xdc   : > { %12025 = vmatpush3.bf16.msra.mxu0 %v12022_v15 }
 0x192   : > { %v11540_v18 = vpop.f32.mrb[0].mxu0 }
 0x193   : > { %v721_v19 = vpop.f32.mrb[1].mxu0  ;;  %v14758_v21 = vadd.f32 %v11540_v18, %v10262_v17 }
 0x194   : > { %v14756_v20 = vadd.f32 %v10262_v17, %v721_v19 }
 0x196   : > { %860 = vmatmul.mubr.f32.vlgmr.msra.gmra.mrb[0].mxu1 %v14756_v20  ;;  %11573 = vmatprep.mubr.f32.mxu0 %v14756_v20 }
 0x197   : > { %11574 = vmatmul.mubr.f32.vlgmr.msra.gmra.mrb[2].mxu0 %v14758_v21  ;;  %865 = vmatprep.mubr.f32.mxu1 %v14454_v16 }
 0x19a   : > { %866 = vmatmul.mubr.f32.gmra.mrb[2].mxu1 %v14758_v21 }
 0x269   : > { %v861_v30 = vpop.f32.mrb[0].mxu1 }
 0x26a   : > { %v862_v31 = vadd.f32 %v861_v30, %v783_v27  ;;  %v863_v32 = vpop.f32.mrb[1].mxu1  ;;  %v11575_v33 = vpop.f32.mrb[2].mxu0 }
 0x26b   : > { %v944_v35 = vadd.f32 %v11575_v33, %v791_v29  ;;  %v938_v36 = vpop.f32.mrb[3].mxu0  ;;  %v864_v45 = vadd.f32 %v863_v32, %v787_v34 }
 0x26c   : > { %v14782_v37 = vmul.f32 0.17677669, %v862_v31  ;;  %v939_v38 = vadd.f32 %v938_v36, %v791_v29 }
 0x26d   : > { %v867_v39 = vpop.f32.mrb[2].mxu1 }
 0x26e   : > { %v868_v41 = vadd.f32 %v867_v39, %v783_v27  ;;  %v869_v42 = vpop.f32.mrb[3].mxu1  ;;  %11580 = vmatprep.mubr.msk.f32.mxu1 %vm648_vm0, %v14782_v37  ;;  %v12032_v43 = vpack.c.bf16 %v944_v35, %v939_v38  ;;  %v14791_v44 = vpack.i.bf16 %v944_v35, %v939_v38 }
 0x26f   : > { %v870_v46 = vadd.f32 %v869_v42, %v787_v34 }
 0x270   : > { %v14793_v47 = vmul.f32 0.17677669, %v868_v41  ;;  %12034 = vmatprep.subr.msk.bf16.mxu0 %vm14785_vm3, %v12032_v43 }
 0x271   : > { %12037 = vmatpush3.bf16.msk.msra.mxu0 %vm14785_vm3, %v12032_v43  ;;  %v14805_v49 = vpack.i.bf16 %v870_v46, %v864_v45  ;;  %v12026_v50 = vpack.c.bf16 %v870_v46, %v864_v45 }
 0x272   : > { %1150 = vrot.lane.b32.xlu1 %v14793_v47, %s14456_s18 }
 0x273   : > { %14042 = vrot.lane.b32.xlu0 %v14805_v49, %s14456_s18  ;;  %12028 = vmatprep.subr.msk.bf16.mxu1 %vm14799_vm4, %v12026_v50 }
 0x274   : > { %12031 = vmatpush3.bf16.xpose.msk.msra.mxu1 %vm14799_vm4, %v12026_v50 }
 0x277   : > { %1148 = vrot.lane.b32.xlu0 %v14782_v37, %s14456_s18 }
 0x27b   : > { %11581 = vmatmul.mubr.msk.f32.vlgmr.msra.gmra.mrb[4].mxu1 %vm648_vm0, %v14793_v47 }
 0x2e4   : > { %v1151_v56 = vpop.permute.xlu1 %1150 }
 0x2e5   : > { %v14043_v51 = vpop.permute.xlu0 %14042 }
 0x2e6   : > { %v14045_v52 = vunpack.i.h.bf16 %v14043_v51  ;;  %v14044_v53 = vunpack.i.l.bf16 %v14043_v51 }
 0x2e8   : > { %v12038_v54 = vpack.c.bf16 %v14045_v52, %v14044_v53 }
 0x2e9   : > { %v1149_v55 = vpop.permute.xlu0 %1148 }
 0x2ea   : > { %12040 = vmatprep.subr.msk.bf16.mxu1 %vm14799_vm4, %v12038_v54  ;;  %11594 = vmatprep.mubr.msk.f32.mxu1 %vm648_vm0, %v1149_v55 }
 0x2eb   : > { %12043 = vmatpush3.bf16.xpose.msk.msra.mxu1 %vm14799_vm4, %v12038_v54 }
 0x2f2   : > { %11595 = vmatmul.mubr.msk.f32.vlgmr.msra.gmra.mrb[6].mxu1 %vm648_vm0, %v1151_v56 }
 0x34e   : > { %v11582_v57 = vpop.f32.mrb[4].mxu1 }
 0x34f   : > { %v1027_v58 = vpop.f32.mrb[5].mxu1  ;;  %v1041_v59 = vsel %vm1040_vm5, %v11582_v57, -inf }
 0x350   : > { %1042 = vmax.xlane.f32.xlu0 %v1041_v59  ;;  %v1037_v60 = vsel %vm1036_vm6, %v1027_v58, -inf }
 0x351   : > { %1038 = vmax.xlane.f32.xlu1 %v1037_v60 }
 0x3c5   : > { %v11596_v61 = vpop.f32.mrb[6].mxu1 }
 0x3c6   : > { %v1230_v62 = vpop.f32.mrb[7].mxu1  ;;  %v1242_v63 = vsel %vm1040_vm5, %v11596_v61, -inf }
 0x3c7   : > { %1243 = vmax.xlane.f32.xlu1 %v1242_v63  ;;  %v1239_v0 = vsel %vm1036_vm6, %v1230_v62, -inf }
 0x3c8   : > { %1240 = vmax.xlane.f32.xlu0 %v1239_v0 }
 0x3dd   : > { %v1043_v1 = vpop.xlane.xlu0 %1042 }
 0x3de   : > { %v1045_v2 = vsub.f32 %v11582_v57, %v1043_v1  ;;  %v1039_v3 = vpop.xlane.xlu1 %1038 }
 0x3df   : > { %v1044_v4 = vsub.f32 %v1027_v58, %v1039_v3 }
 0x3e0   : > { %v1048_v5 = vmul.f32 1.442695, %v1045_v2 }
 0x3e1   : > { %v1046_v6 = vmul.f32 1.442695, %v1044_v4 }
 0x3e2   : > { %14131 = vpow2.f32 %v1048_v5 }
 0x3e3   : > { %14133 = vpow2.f32 %v1046_v6 }
 0x3ec   : > { %v14132_v7 = vpop.eup %14131 }
 0x3ed   : > { %v14134_v8 = vpop.eup %14133  ;;  %v1053_v9 = vsel %vm1040_vm5, %v14132_v7, 0.0 }
 0x3ee   : > { %1054 = vadd.xlane.f32.xlu1 %v1053_v9  ;;  %v1050_v10 = vsel %vm1036_vm6, %v14134_v8, 0.0 }
 0x3ef   : > { %1051 = vadd.xlane.f32.xlu0 %v1050_v10 }
 0x454   : > { %v1244_v11 = vpop.xlane.xlu1 %1243 }
 0x455   : > { %v1246_v12 = vsub.f32 %v11596_v61, %v1244_v11  ;;  %v1241_v13 = vpop.xlane.xlu0 %1240 }
 0x456   : > { %v1245_v14 = vsub.f32 %v1230_v62, %v1241_v13 }
 0x457   : > { %v1249_v15 = vmul.f32 1.442695, %v1246_v12 }
 0x458   : > { %v1247_v17 = vmul.f32 1.442695, %v1245_v14 }
 0x459   : > { %14135 = vpow2.f32 %v1249_v15 }
 0x45a   : > { %14137 = vpow2.f32 %v1247_v17 }
 0x463   : > { %v14136_v18 = vpop.eup %14135 }
 0x464   : > { %v14138_v19 = vpop.eup %14137  ;;  %v1254_v22 = vsel %vm1040_vm5, %v14136_v18, 0.0 }
 0x465   : > { %1255 = vadd.xlane.f32.xlu1 %v1254_v22  ;;  %v1251_v25 = vsel %vm1036_vm6, %v14138_v19, 0.0 }
 0x466   : > { %1252 = vadd.xlane.f32.xlu0 %v1251_v25 }
 0x476   : > { %14052 = vrot.lane.b32.xlu1 %v14805_v49, %s14457_s21 }
 0x47a   : > { %1362 = vrot.lane.b32.xlu1 %v14782_v37, %s14457_s21 }
 0x47b   : > { %v1055_v27 = vpop.xlane.xlu1 %1054 }
 0x47c   : > { %14139 = vrcp.f32 %v1055_v27  ;;  %14047 = vrot.lane.b32.xlu0 %v14791_v44, %s14456_s18  ;;  %v1052_v29 = vpop.xlane.xlu0 %1051 }
 0x47d   : > { %14141 = vrcp.f32 %v1052_v29 }
 0x480   : > { %1364 = vrot.lane.b32.xlu0 %v14793_v47, %s14457_s21 }
 0x486   : > { %v14140_v30 = vpop.eup %14139 }
 0x487   : > { %v14142_v31 = vpop.eup %14141  ;;  %v1059_v33 = vmul.f32 %v14140_v30, %v14132_v7 }
 0x488   : > { %v1058_v32 = vmul.f32 %v14142_v31, %v14134_v8 }
 0x48a   : > { %11587 = vmatprep.mubr.msk.f32.mxu0 %vm1036_vm6, %v1058_v32 }
 0x48b   : > { %11588 = vmatmul.mubr.msk.f32.vlgmr.msra.gmra.mrb[4].mxu0 %vm1036_vm6, %v1059_v33 }
 0x4f2   : > { %v1256_v34 = vpop.xlane.xlu1 %1255 }
 0x4f3   : > { %14143 = vrcp.f32 %v1256_v34  ;;  %v1253_v35 = vpop.xlane.xlu0 %1252 }
 0x4f4   : > { %14145 = vrcp.f32 %v1253_v35 }
 0x4f6   : > { %v14053_v36 = vpop.permute.xlu1 %14052 }
 0x4f7   : > { %v14048_v38 = vpop.permute.xlu0 %14047  ;;  %v14055_v39 = vunpack.i.h.bf16 %v14053_v36  ;;  %v14054_v41 = vunpack.i.l.bf16 %v14053_v36 }
 0x4f8   : > { %v14050_v42 = vunpack.i.h.bf16 %v14048_v38  ;;  %v14049_v43 = vunpack.i.l.bf16 %v14048_v38 }
 0x4f9   : > { %v12050_v46 = vpack.c.bf16 %v14055_v39, %v14054_v41 }
 0x4fa   : > { %v12044_v45 = vpack.c.bf16 %v14050_v42, %v14049_v43  ;;  %v1363_v54 = vpop.permute.xlu1 %1362 }
 0x4fb   : > { %v1365_v55 = vpop.permute.xlu0 %1364 }
 0x4fc   : > { %12046 = vmatprep.subr.msk.bf16.mxu0 %vm14785_vm3, %v12044_v45 }
 0x4fd   : > { %v14144_v50 = vpop.eup %14143  ;;  %12049 = vmatpush3.bf16.msk.msra.mxu0 %vm14785_vm3, %v12044_v45 }
 0x4fe   : > { %v14146_v51 = vpop.eup %14145  ;;  %12052 = vmatprep.subr.msk.bf16.mxu0 %vm14799_vm4, %v12050_v46  ;;  %v1260_v53 = vmul.f32 %v14144_v50, %v14136_v18 }
 0x4ff   : > { %v1259_v52 = vmul.f32 %v14146_v51, %v14138_v19 }
 0x501   : > { %11601 = vmatprep.mubr.msk.f32.mxu0 %vm1036_vm6, %v1259_v52 }
 0x502   : > { %11602 = vmatmul.mubr.msk.f32.vlgmr.msra.gmra.mrb[6].mxu0 %vm1036_vm6, %v1260_v53 }
 0x503   : > { %11608 = vmatprep.mubr.msk.f32.mxu0 %vm648_vm0, %v1363_v54 }
 0x506   : > { %12055 = vmatpush3.bf16.xpose.msk.msra.mxu0 %vm14799_vm4, %v12050_v46 }
 0x50d   : > { %11609 = vmatmul.mubr.msk.f32.vlgmr.msra.gmra.mrb[8].mxu0 %vm648_vm0, %v1365_v55 }
 0x55e   : > { %v11589_v56 = vpop.f32.mrb[4].mxu0 }
 0x55f   : > { %1147 = vst.msk [vmem:[#allocation2 + $0x8] sm:$0x3f] %vm1146_vm7, %v11589_v56  ;;  %v1136_v57 = vpop.f32.mrb[5].mxu0 }
 0x560   : > { %1145 = vst.msk [vmem:[#allocation2] sm:$0xff] %vm648_vm0, %v1136_v57 }
 0x5d5   : > { %v14857_v58 = vpop.f32.mrb[6].mxu0 }
 0x5d6   : > { %v14859_v59 = vpop.f32.mrb[7].mxu0 }
 0x5e0   : > { %v11610_v60 = vpop.f32.mrb[8].mxu0 }
 0x5e1   : > { %v1444_v61 = vpop.f32.mrb[9].mxu0  ;;  %v1456_v62 = vsel %vm1040_vm5, %v11610_v60, -inf }
 0x5e2   : > { %1457 = vmax.xlane.f32.xlu0 %v1456_v62  ;;  %v1453_v63 = vsel %vm1036_vm6, %v1444_v61, -inf }
 0x5e3   : > { %1454 = vmax.xlane.f32.xlu1 %v1453_v63 }
 0x66f   : > { %v1458_v0 = vpop.xlane.xlu0 %1457 }
 0x670   : > { %v1460_v1 = vsub.f32 %v11610_v60, %v1458_v0  ;;  %v1455_v2 = vpop.xlane.xlu1 %1454 }
 0x671   : > { %v1459_v3 = vsub.f32 %v1444_v61, %v1455_v2  ;;  %v1791_v2 = vld [vmem:[#allocation8 + $0x8] sm:$0xff] }
 0x672   : > { %v1463_v4 = vmul.f32 1.442695, %v1460_v1  ;;  %v1790_v1 = vld [vmem:[#allocation8] sm:$0xff] }
 0x673   : > { %v1461_v5 = vmul.f32 1.442695, %v1459_v3  ;;  %v1792_v3 = vld [vmem:[#allocation8 + $0x10] sm:$0xff] }
 0x674   : > { %14147 = vpow2.f32 %v1463_v4  ;;  %v12074_v4 = vpack.c.bf16 %v1791_v2, %v1790_v1  ;;  %v1981_v1 = vld [vmem:[#allocation10 + $0x180] sm:$0xff]  ;;  %v1967_v2 = vld [vmem:[#allocation10 + $0x110] sm:$0xff] }
 0x675   : > { %14149 = vpow2.f32 %v1461_v5  ;;  %v1793_v5 = vld [vmem:[#allocation8 + $0x18] sm:$0xff] }
 0x67e   : > { %v14148_v6 = vpop.eup %14147 }
 0x67f   : > { %v14150_v7 = vpop.eup %14149  ;;  %v1468_v8 = vsel %vm1040_vm5, %v14148_v6, 0.0 }
 0x680   : > { %1469 = vadd.xlane.f32.xlu1 %v1468_v8  ;;  %v1465_v9 = vsel %vm1036_vm6, %v14150_v7, 0.0  ;;  %v1795_v8 = vld [vmem:[#allocation8 + $0x28] sm:$0xff] }
 0x681   : > { %1466 = vadd.xlane.f32.xlu0 %v1465_v9 }
 0x691   : > { %14062 = vrot.lane.b32.xlu1 %v14805_v49, %s14458_s22 }
 0x695   : > { %1575 = vrot.lane.b32.xlu1 %v14782_v37, %s14458_s22 }
 0x697   : > { %14057 = vrot.lane.b32.xlu0 %v14791_v44, %s14457_s21 }
 0x69b   : > { %1577 = vrot.lane.b32.xlu0 %v14793_v47, %s14458_s22 }
 0x70d   : > { %v1470_v10 = vpop.xlane.xlu1 %1469 }
 0x70e   : > { %14151 = vrcp.f32 %v1470_v10  ;;  %v1467_v11 = vpop.xlane.xlu0 %1466  ;;  %v1796_v10 = vld [vmem:[#allocation8 + $0x30] sm:$0xff] }
 0x70f   : > { %14153 = vrcp.f32 %v1467_v11  ;;  %v1797_v11 = vld [vmem:[#allocation8 + $0x38] sm:$0xff] }
 0x711   : > { %v14063_v12 = vpop.permute.xlu1 %14062 }
 0x712   : > { %v14058_v13 = vpop.permute.xlu0 %14057  ;;  %v14065_v14 = vunpack.i.h.bf16 %v14063_v12  ;;  %v14064_v15 = vunpack.i.l.bf16 %v14063_v12  ;;  %v12086_v12 = vpack.c.bf16 %v1797_v11, %v1796_v10  ;;  %v2016_v10 = vld [vmem:[#allocation10 + $0x298] sm:$0xff]  ;;  %v1997_v11 = vld [vmem:[#allocation10 + $0x200] sm:$0xff] }
 0x713   : > { %v14060_v17 = vunpack.i.h.bf16 %v14058_v13  ;;  %v14059_v18 = vunpack.i.l.bf16 %v14058_v13  ;;  %v1798_v13 = vld [vmem:[#allocation8 + $0x40] sm:$0xff] }
 0x714   : > { %v12062_v19 = vpack.c.bf16 %v14065_v14, %v14064_v15  ;;  %v1799_v14 = vld [vmem:[#allocation8 + $0x48] sm:$0xff] }
 0x715   : > { %v12056_v49 = vpack.c.bf16 %v14060_v17, %v14059_v18  ;;  %v1576_v27 = vpop.permute.xlu1 %1575  ;;  %v12090_v15 = vpack.c.bf16 %v1799_v14, %v1798_v13  ;;  %v1800_v17 = vld [vmem:[#allocation8 + $0x50] sm:$0xff]  ;;  %v1801_v18 = vld [vmem:[#allocation8 + $0x58] sm:$0xff]  ;;  %v2013_v13 = vld [vmem:[#allocation10 + $0x280] sm:$0xff] }
 0x716   : > { %v1578_v29 = vpop.permute.xlu0 %1577  ;;  %v1999_v14 = vld [vmem:[#allocation10 + $0x210] sm:$0xff] }
 0x717   : > { %12058 = vmatprep.subr.msk.bf16.mxu1 %vm14785_vm3, %v12056_v49 }
 0x718   : > { %v14152_v37 = vpop.eup %14151  ;;  %12061 = vmatpush3.bf16.msk.msra.mxu1 %vm14785_vm3, %v12056_v49  ;;  %v12094_v49 = vpack.c.bf16 %v1801_v18, %v1800_v17  ;;  %v12116_v17 = vpack.c.bf16 %v2013_v13, %v1997_v11  ;;  %v2125_v11 = vld [vmem:[#allocation10 + $0x600] sm:$0xff] }
 0x719   : > { %v14154_v47 = vpop.eup %14153  ;;  %12064 = vmatprep.subr.msk.bf16.mxu1 %vm14799_vm4, %v12062_v19  ;;  %v1474_v25 = vmul.f32 %v14152_v37, %v14148_v6  ;;  %v12078_v6 = vpack.c.bf16 %v1793_v5, %v1792_v3  ;;  %v1803_v37 = vld [vmem:[#allocation8 + $0x68] sm:$0xff] }
 0x71a   : > { %v1473_v22 = vmul.f32 %v14154_v47, %v14150_v7  ;;  %v1794_v7 = vld [vmem:[#allocation8 + $0x20] sm:$0xff]  ;;  %v1998_v5 = vld [vmem:[#allocation10 + $0x208] sm:$0xff] }
 0x71b   : > { %v12082_v9 = vpack.c.bf16 %v1795_v8, %v1794_v7 }
 0x71c   : > { %11615 = vmatprep.mubr.msk.f32.mxu1 %vm1036_vm6, %v1473_v22  ;;  %v1804_v22 = vld [vmem:[#allocation8 + $0x70] sm:$0xff] }
 0x71d   : > { %11616 = vmatmul.mubr.msk.f32.vlgmr.msra.gmra.mrb[8].mxu1 %vm1036_vm6, %v1474_v25  ;;  %v1805_v25 = vld [vmem:[#allocation8 + $0x78] sm:$0xff] }
 0x71e   : > { %11622 = vmatprep.mubr.msk.f32.mxu1 %vm648_vm0, %v1576_v27  ;;  %v12102_v27 = vpack.c.bf16 %v1805_v25, %v1804_v22 }
 0x721   : > { %12067 = vmatpush3.bf16.xpose.msk.msra.mxu1 %vm14799_vm4, %v12062_v19  ;;  %v1802_v19 = vld [vmem:[#allocation8 + $0x60] sm:$0xff] }
 0x722   : > { %v12098_v47 = vpack.c.bf16 %v1803_v37, %v1802_v19 }
 0x728   : > { %11623 = vmatmul.mubr.msk.f32.vlgmr.msra.gmra.mrb[10].mxu1 %vm648_vm0, %v1578_v29 }
 0x729   : > { %2337 = vmatprep.mubr.f32.mxu1 %v14454_v16 }
 0x7f0   : > { %v11617_v30 = vpop.f32.mrb[8].mxu1 }
 0x7f1   : > { %v1554_v31 = vpop.f32.mrb[9].mxu1 }
 0x7fb   : > { %v11624_v32 = vpop.f32.mrb[10].mxu1 }
 0x7fc   : > { %v1657_v33 = vpop.f32.mrb[11].mxu1  ;;  %v1669_v34 = vsel %vm1040_vm5, %v11624_v32, -inf }
 0x7fd   : > { %1670 = vmax.xlane.f32.xlu0 %v1669_v34  ;;  %v1666_v35 = vsel %vm1036_vm6, %v1657_v33, -inf }
 0x7fe   : > { %1667 = vmax.xlane.f32.xlu1 %v1666_v35  ;;  %v10293_v35 = vld [vmem:[%s15609_s6] ss:$0 sm:$0xff] }
 0x88a   : > { %v1671_v36 = vpop.xlane.xlu0 %1670 }
 0x88b   : > { %v1673_v38 = vsub.f32 %v11624_v32, %v1671_v36  ;;  %v1668_v39 = vpop.xlane.xlu1 %1667 }
 0x88c   : > { %v1672_v41 = vsub.f32 %v1657_v33, %v1668_v39 }
 0x88d   : > { %v1676_v42 = vmul.f32 1.442695, %v1673_v38 }
 0x88e   : > { %v1674_v43 = vmul.f32 1.442695, %v1672_v41 }
 0x88f   : > { %14155 = vpow2.f32 %v1676_v42 }
 0x890   : > { %14157 = vpow2.f32 %v1674_v43 }
 0x899   : > { %v14156_v45 = vpop.eup %14155 }
 0x89a   : > { %v14158_v46 = vpop.eup %14157  ;;  %v1681_v50 = vsel %vm1040_vm5, %v14156_v45, 0.0 }
 0x89b   : > { %1682 = vadd.xlane.f32.xlu1 %v1681_v50  ;;  %v1678_v51 = vsel %vm1036_vm6, %v14158_v46, 0.0  ;;  %v1950_v50 = vld [vmem:[#allocation10 + $0x88] sm:$0xff] }
 0x89c   : > { %1679 = vadd.xlane.f32.xlu0 %v1678_v51  ;;  %v1936_v51 = vld [vmem:[#allocation10 + $0x18] sm:$0xff] }
 0x8ac   : > { %1352 = vrot.lane.b32.xlu1 %v14859_v59, %s14458_s22 }
 0x8b0   : > { %1354 = vrot.lane.b32.xlu1 %v14857_v58, %s14458_s22 }
 0x8b2   : > { %14067 = vrot.lane.b32.xlu0 %v14791_v44, %s14458_s22 }
 0x8b4   : > { %1567 = vrot.lane.b32.xlu1 %v11617_v30, %s14457_s21 }
 0x8b6   : > { %1565 = vrot.lane.b32.xlu0 %v1554_v31, %s14457_s21 }
 0x928   : > { %v1683_v52 = vpop.xlane.xlu1 %1682 }
 0x929   : > { %14159 = vrcp.f32 %v1683_v52  ;;  %v1680_v53 = vpop.xlane.xlu0 %1679 }
 0x92a   : > { %14161 = vrcp.f32 %v1680_v53  ;;  %v1952_v53 = vld [vmem:[#allocation10 + $0x98] sm:$0xff] }
 0x92c   : > { %v1353_v54 = vpop.permute.xlu1 %1352 }
 0x92d   : > { %1359 = vst.msk [vmem:[#allocation2] sm:$0xff] %vm1358_vm8, %v1353_v54  ;;  %v14068_v55 = vpop.permute.xlu0 %14067  ;;  %v1933_v54 = vld [vmem:[#allocation10] sm:$0xff] }
 0x92e   : > { %v14070_v56 = vunpack.i.h.bf16 %v14068_v55  ;;  %v14069_v57 = vunpack.i.l.bf16 %v14068_v55  ;;  %v1949_v55 = vld [vmem:[#allocation10 + $0x80] sm:$0xff] }
 0x930   : > { %v12068_v58 = vpack.c.bf16 %v14070_v56, %v14069_v57  ;;  %v1355_v59 = vpop.permute.xlu1 %1354  ;;  %v12138_v56 = vpack.c.bf16 %v1952_v53, %v1936_v51  ;;  %v12108_v57 = vpack.c.bf16 %v1949_v55, %v1933_v54  ;;  %v2064_v51 = vld [vmem:[#allocation10 + $0x418] sm:$0xff]  ;;  %v2061_v54 = vld [vmem:[#allocation10 + $0x400] sm:$0xff] }
 0x931   : > { %1361 = vst.msk [vmem:[#allocation2 + $0x8] sm:$0x3f] %vm1360_vm9, %v1355_v59  ;;  %v1566_v44 = vpop.permute.xlu0 %1565  ;;  %v1951_v59 = vld [vmem:[#allocation10 + $0x90] sm:$0xff]  ;;  %v2080_v53 = vld [vmem:[#allocation10 + $0x498] sm:$0xff]  ;;  %v2077_v55 = vld [vmem:[#allocation10 + $0x480] sm:$0xff] }
 0x932   : > { %1572 = vst.msk [vmem:[#allocation2] sm:$0xff] %vm1571_vm10, %v1566_v44  ;;  %12070 = vmatprep.subr.msk.bf16.mxu0 %vm14785_vm3, %v12068_v58  ;;  %v1966_v44 = vld [vmem:[#allocation10 + $0x108] sm:$0xff] }
 0x933   : > { %v14160_v60 = vpop.eup %14159  ;;  %12073 = vmatpush3.bf16.msk.msra.mxu0 %vm14785_vm3, %v12068_v58  ;;  %v1935_v58 = vld [vmem:[#allocation10 + $0x10] sm:$0xff] }
 0x934   : > { %v14162_v61 = vpop.eup %14161  ;;  %v1568_v62 = vpop.permute.xlu1 %1567  ;;  %v1687_v0 = vmul.f32 %v14160_v60, %v14156_v45  ;;  %12075 = vmatprep.subr.bf16.mxu0 %v12074_v4  ;;  %v1982_v60 = vld [vmem:[#allocation10 + $0x188] sm:$0xff] }
 0x935   : > { %1574 = vst.msk [vmem:[#allocation2 + $0x8] sm:$0x3f] %vm1573_vm11, %v1568_v62  ;;  %v1686_v63 = vmul.f32 %v14162_v61, %v14158_v46  ;;  %v1934_v46 = vld [vmem:[#allocation10 + $0x8] sm:$0xff]  ;;  %v1984_v61 = vld [vmem:[#allocation10 + $0x198] sm:$0xff]  ;;  %v12110_v62 = vpack.c.bf16 %v1982_v60, %v1966_v44 }
 0x936   : > { %v12106_v52 = vpack.c.bf16 %v1950_v50, %v1934_v46  ;;  %v2062_v46 = vld [vmem:[#allocation10 + $0x408] sm:$0xff] }
 0x937   : > { %11629 = vmatprep.mubr.msk.f32.mxu0 %vm1036_vm6, %v1686_v63  ;;  %v2078_v50 = vld [vmem:[#allocation10 + $0x488] sm:$0xff] }
 0x938   : > { %11630 = vmatmul.mubr.msk.f32.vlgmr.msra.gmra.mrb[10].mxu0 %vm1036_vm6, %v1687_v0  ;;  %12107 = vmatprep.subr.bf16.mxu1 %v12106_v52  ;;  %v1965_v0 = vld [vmem:[#allocation10 + $0x100] sm:$0xff]  ;;  %v12122_v52 = vpack.c.bf16 %v2078_v50, %v2062_v46  ;;  %v2110_v60 = vld [vmem:[#allocation10 + $0x588] sm:$0xff] }
 0x939   : > { %12077 = vmatpush3.bf16.msra.mxu0 %v12074_v4  ;;  %12109 = vmatpush1.bf16.msra.mxu1 %v12108_v57  ;;  %v12112_v3 = vpack.c.bf16 %v1981_v1, %v1965_v0  ;;  %v1983_v4 = vld [vmem:[#allocation10 + $0x190] sm:$0xff]  ;;  %v12124_v57 = vpack.c.bf16 %v2077_v55, %v2061_v54  ;;  %v2109_v0 = vld [vmem:[#allocation10 + $0x580] sm:$0xff]  ;;  %v10294_v55 = vld [vmem:[%s15610_s7] ss:$0 sm:$0xff] }
 0x93a   : > { %12079 = vmatprep.subr.bf16.mxu0 %v12078_v6  ;;  %12111 = vmatprep.subr.bf16.mxu1 %v12110_v62  ;;  %v12144_v7 = vpack.c.bf16 %v1983_v4, %v1967_v2  ;;  %v2112_v62 = vld [vmem:[#allocation10 + $0x598] sm:$0xff]  ;;  %v2111_v4 = vld [vmem:[#allocation10 + $0x590] sm:$0xff] }
 0x93d   : > { %12081 = vmatpush3.bf16.msra.mxu0 %v12078_v6  ;;  %v2014_v6 = vld [vmem:[#allocation10 + $0x288] sm:$0xff]  ;;  %12113 = vmatpush1.bf16.msra.mxu1 %v12112_v3  ;;  %v2095_v3 = vld [vmem:[#allocation10 + $0x510] sm:$0xff] }
 0x93e   : > { %12083 = vmatprep.subr.bf16.mxu0 %v12082_v9  ;;  %v12114_v8 = vpack.c.bf16 %v2014_v6, %v1998_v5  ;;  %v12160_v5 = vpack.c.bf16 %v2111_v4, %v2095_v3  ;;  %v2126_v6 = vld [vmem:[#allocation10 + $0x608] sm:$0xff]  ;;  %v1969_v3 = vld [vmem:[#allocation10 + $0x120] sm:$0xff] }
 0x93f   : > { %v1985_v4 = vld [vmem:[#allocation10 + $0x1a0] sm:$0xff] }
 0x940   : > { %12115 = vmatprep.subr.bf16.mxu1 %v12114_v8  ;;  %v2128_v8 = vld [vmem:[#allocation10 + $0x618] sm:$0xff] }
 0x941   : > { %12085 = vmatpush3.bf16.msra.mxu0 %v12082_v9  ;;  %v2000_v9 = vld [vmem:[#allocation10 + $0x218] sm:$0xff]  ;;  %12117 = vmatpush1.bf16.msra.mxu1 %v12116_v17  ;;  %v2143_v17 = vld [vmem:[#allocation10 + $0x690] sm:$0xff] }
 0x942   : > { %12087 = vmatprep.subr.bf16.mxu0 %v12086_v12 }
 0x945   : > { %12089 = vmatpush3.bf16.msra.mxu0 %v12086_v12  ;;  %v12146_v12 = vpack.c.bf16 %v2016_v10, %v2000_v9  ;;  %v2144_v10 = vld [vmem:[#allocation10 + $0x698] sm:$0xff] }
 0x946   : > { %12091 = vmatprep.subr.bf16.mxu0 %v12090_v15  ;;  %v12162_v13 = vpack.c.bf16 %v2144_v10, %v2128_v8  ;;  %v2002_v8 = vld [vmem:[#allocation10 + $0x228] sm:$0xff] }
 0x949   : > { %12093 = vmatpush3.bf16.msra.mxu0 %v12090_v15  ;;  %v2015_v15 = vld [vmem:[#allocation10 + $0x290] sm:$0xff] }
 0x94a   : > { %12095 = vmatprep.subr.bf16.mxu0 %v12094_v49  ;;  %v12148_v18 = vpack.c.bf16 %v2015_v15, %v1999_v14  ;;  %v2127_v15 = vld [vmem:[#allocation10 + $0x610] sm:$0xff] }
 0x94d   : > { %12097 = vmatpush3.bf16.msra.mxu0 %v12094_v49 }
 0x94e   : > { %12099 = vmatprep.subr.bf16.mxu0 %v12098_v47 }
 0x951   : > { %12101 = vmatpush3.bf16.msra.mxu0 %v12098_v47 }
 0x952   : > { %12103 = vmatprep.subr.bf16.mxu0 %v12102_v27 }
 0x955   : > { %12105 = vmatpush3.bf16.msra.mxu0 %v12102_v27 }
 0x956   : > { %12139 = vmatprep.subr.bf16.mxu0 %v12138_v56  ;;  %v12154_v56 = vpack.c.bf16 %v2080_v53, %v2064_v51 }
 0xa0b   : > { %v11631_v29 = vpop.f32.mrb[10].mxu0 }
 0xa0c   : > { %1780 = vrot.lane.b32.xlu1 %v11631_v29, %s14456_s18  ;;  %v1767_v30 = vpop.f32.mrb[11].mxu0 }
 0xa0d   : > { %1778 = vrot.lane.b32.xlu0 %v1767_v30, %s14456_s18 }
 0xa7e   : > { %v1781_v31 = vpop.permute.xlu1 %1780 }
 0xa7f   : > { %1787 = vst.msk [vmem:[#allocation2 + $0x8] sm:$0x3f] %vm1786_vm12, %v1781_v31  ;;  %v1779_v32 = vpop.permute.xlu0 %1778  ;;  %v2030_v31 = vld [vmem:[#allocation10 + $0x308] sm:$0xff] }
 0xa80   : > { %1785 = vst.msk [vmem:[#allocation2] sm:$0xff] %vm1784_vm13, %v1779_v32  ;;  %v2046_v32 = vld [vmem:[#allocation10 + $0x388] sm:$0xff] }
 0xa86   : > { %v1789_v34 = vld [vmem:[#allocation2 + $0x8] sm:$0x3f] }
 0xa87   : > { %v1788_v33 = vld [vmem:[#allocation2] sm:$0xff] }
 0xa88   : > { %11664 = vmatprep.mubr.f32.mxu0 %v1788_v33  ;;  %v2032_v33 = vld [vmem:[#allocation10 + $0x318] sm:$0xff] }
 0xa89   : > { %11665 = vmatmul.mubr.f32.vlgmr.msra.gmra.mrb[12].mxu0 %v1789_v34  ;;  %v12118_v34 = vpack.c.bf16 %v2046_v32, %v2030_v31 }
 0xa8a   : > { %2414 = vmatprep.mubr.f32.mxu0 %v14454_v16 }
 0xa8b   : > { %12119 = vmatprep.subr.bf16.mxu1 %v12118_v34  ;;  %v2175_v34 = vld [vmem:[#allocation10 + $0x790] sm:$0xff] }
 0xb5c   : > { %v11666_v36 = vpop.f32.mrb[12].mxu0 }
 0xb5d   : > { %v1885_v38 = vadd.f32 %v11666_v36, %v10293_v35  ;;  %v1879_v39 = vpop.f32.mrb[13].mxu0  ;;  %v2029_v36 = vld [vmem:[#allocation10 + $0x300] sm:$0xff] }
 0xb5e   : > { %v1880_v41 = vadd.f32 %v10293_v35, %v1879_v39  ;;  %v2048_v35 = vld [vmem:[#allocation10 + $0x398] sm:$0xff] }
 0xb5f   : > { %v1889_v42 = vadd.f32 %v1885_v38, %v14758_v21  ;;  %v12140_v21 = vpack.c.bf16 %v1951_v59, %v1935_v58  ;;  %v2045_v38 = vld [vmem:[#allocation10 + $0x380] sm:$0xff]  ;;  %v12150_v39 = vpack.c.bf16 %v2048_v35, %v2032_v33  ;;  %v2063_v58 = vld [vmem:[#allocation10 + $0x410] sm:$0xff] }
 0xb60   : > { %v1888_v43 = vadd.f32 %v1880_v41, %v14756_v20  ;;  %v1968_v20 = vld [vmem:[#allocation10 + $0x118] sm:$0xff]  ;;  %v12120_v41 = vpack.c.bf16 %v2045_v38, %v2029_v36  ;;  %v2079_v59 = vld [vmem:[#allocation10 + $0x490] sm:$0xff]  ;;  %v1938_v36 = vld [vmem:[#allocation10 + $0x28] sm:$0xff] }
 0xb61   : > { %v1892_v45 = vsel %vm1066_vm1, %v1889_v42, 0.0  ;;  %v12142_v63 = vpack.c.bf16 %v1984_v61, %v1968_v20  ;;  %12141 = vmatpush1.bf16.msra.mxu0 %v12140_v21  ;;  %v12156_v44 = vpack.c.bf16 %v2079_v59, %v2063_v58  ;;  %v2094_v21 = vld [vmem:[#allocation10 + $0x508] sm:$0xff]  ;;  %v2096_v20 = vld [vmem:[#allocation10 + $0x518] sm:$0xff]  ;;  %v2159_v33 = vld [vmem:[#allocation10 + $0x710] sm:$0xff] }
 0xb62   : > { %1893 = vadd.xlane.f32.xlu1 %v1892_v45  ;;  %1890 = vadd.xlane.f32.xlu0 %v1888_v43  ;;  %v12126_v61 = vpack.c.bf16 %v2110_v60, %v2094_v21  ;;  %v12158_v1 = vpack.c.bf16 %v2112_v62, %v2096_v20  ;;  %v12168_v35 = vpack.c.bf16 %v2175_v34, %v2159_v33  ;;  %v1954_v38 = vld [vmem:[#allocation10 + $0xa8] sm:$0xff]  ;;  %v1953_v58 = vld [vmem:[#allocation10 + $0xa0] sm:$0xff]  ;;  %v1939_v59 = vld [vmem:[#allocation10 + $0x30] sm:$0xff] }
 0xb63   : > { %12143 = vmatprep.subr.bf16.mxu0 %v12142_v63  ;;  %12121 = vmatpush1.bf16.msra.mxu1 %v12120_v41  ;;  %v2093_v63 = vld [vmem:[#allocation10 + $0x500] sm:$0xff]  ;;  %v12170_v41 = vpack.c.bf16 %v1954_v38, %v1938_v36  ;;  %v10295_v21 = vld [vmem:[%s15611_s8] ss:$0 sm:$0xff]  ;;  %v1972_v62 = vld [vmem:[#allocation10 + $0x138] sm:$0xff] }
 0xb64   : > { %12123 = vmatprep.subr.bf16.mxu1 %v12122_v52  ;;  %v12128_v2 = vpack.c.bf16 %v2109_v0, %v2093_v63  ;;  %v1970_v60 = vld [vmem:[#allocation10 + $0x128] sm:$0xff]  ;;  %v1988_v63 = vld [vmem:[#allocation10 + $0x1b8] sm:$0xff]  ;;  %v2049_v36 = vld [vmem:[#allocation10 + $0x3a0] sm:$0xff] }
 0xb65   : > { %12145 = vmatpush1.bf16.msra.mxu0 %v12144_v7  ;;  %v2142_v7 = vld [vmem:[#allocation10 + $0x688] sm:$0xff]  ;;  %v12206_v10 = vpack.c.bf16 %v1988_v63, %v1972_v62  ;;  %v2097_v62 = vld [vmem:[#allocation10 + $0x520] sm:$0xff] }
 0xb66   : > { %12147 = vmatprep.subr.bf16.mxu0 %v12146_v12  ;;  %v12130_v9 = vpack.c.bf16 %v2142_v7, %v2126_v6  ;;  %v2141_v12 = vld [vmem:[#allocation10 + $0x680] sm:$0xff]  ;;  %v1971_v6 = vld [vmem:[#allocation10 + $0x130] sm:$0xff] }
 0xb67   : > { %12125 = vmatpush1.bf16.msra.mxu1 %v12124_v57  ;;  %v12132_v14 = vpack.c.bf16 %v2141_v12, %v2125_v11  ;;  %v1987_v7 = vld [vmem:[#allocation10 + $0x1b0] sm:$0xff]  ;;  %v2018_v11 = vld [vmem:[#allocation10 + $0x2a8] sm:$0xff]  ;;  %v2004_v12 = vld [vmem:[#allocation10 + $0x238] sm:$0xff] }
 0xb68   : > { %12127 = vmatprep.subr.bf16.mxu1 %v12126_v61  ;;  %v1986_v61 = vld [vmem:[#allocation10 + $0x1a8] sm:$0xff]  ;;  %v2113_v63 = vld [vmem:[#allocation10 + $0x5a0] sm:$0xff] }
 0xb69   : > { %12149 = vmatpush1.bf16.msra.mxu0 %v12148_v18  ;;  %v12164_v18 = vpack.c.bf16 %v2143_v17, %v2127_v15  ;;  %v12176_v15 = vpack.c.bf16 %v1985_v4, %v1969_v3  ;;  %v12208_v17 = vpack.c.bf16 %v1987_v7, %v1971_v6  ;;  %v2115_v3 = vld [vmem:[#allocation10 + $0x5b0] sm:$0xff]  ;;  %v2130_v4 = vld [vmem:[#allocation10 + $0x628] sm:$0xff]  ;;  %v2132_v6 = vld [vmem:[#allocation10 + $0x638] sm:$0xff] }
 0xb6a   : > { %12151 = vmatprep.subr.bf16.mxu0 %v12150_v39  ;;  %v1940_v39 = vld [vmem:[#allocation10 + $0x38] sm:$0xff] }
 0xb6b   : > { %12129 = vmatpush1.bf16.msra.mxu1 %v12128_v2  ;;  %v2148_v7 = vld [vmem:[#allocation10 + $0x6b8] sm:$0xff] }
 0xb6c   : > { %12131 = vmatprep.subr.bf16.mxu1 %v12130_v9  ;;  %v12174_v9 = vpack.c.bf16 %v1986_v61, %v1970_v60  ;;  %v2116_v60 = vld [vmem:[#allocation10 + $0x5b8] sm:$0xff] }
 0xb6f   : > { %12133 = vmatpush1.bf16.msra.mxu1 %v12132_v14 }
 0xbef   : > { %v1894_v49 = vpop.xlane.xlu1 %1893  ;;  %v1891_v19 = vpop.xlane.xlu0 %1890 }
 0xbf0   : > { %v1897_v37 = vmul.f32 0.0078125, %v1894_v49  ;;  %v1896_v47 = vmul.f32 0.0078125, %v1891_v19  ;;  %v2158_v49 = vld [vmem:[#allocation10 + $0x708] sm:$0xff] }
 0xbf1   : > { %v2174_v19 = vld [vmem:[#allocation10 + $0x788] sm:$0xff] }
 0xbf2   : > { %v14919_v22 = vsub.f32 %v1889_v42, %v1897_v37  ;;  %v14921_v25 = vsub.f32 %v1888_v43, %v1896_v47  ;;  %v2031_v42 = vld [vmem:[#allocation10 + $0x310] sm:$0xff]  ;;  %v2160_v37 = vld [vmem:[#allocation10 + $0x718] sm:$0xff]  ;;  %v12134_v47 = vpack.c.bf16 %v2174_v19, %v2158_v49  ;;  %v2017_v49 = vld [vmem:[#allocation10 + $0x2a0] sm:$0xff]  ;;  %v12178_v19 = vpack.c.bf16 %v2018_v11, %v2002_v8 }
 0xbf3   : > { %v2047_v43 = vld [vmem:[#allocation10 + $0x390] sm:$0xff]  ;;  %v12192_v8 = vpack.c.bf16 %v2113_v63, %v2097_v62  ;;  %v2145_v11 = vld [vmem:[#allocation10 + $0x6a0] sm:$0xff]  ;;  %v2022_v62 = vld [vmem:[#allocation10 + $0x2c8] sm:$0xff] }
 0xbf4   : > { %v1900_v27 = vmul.f32 %v14921_v25, %v14921_v25  ;;  %v1901_v29 = vmul.f32 %v14919_v22, %v14919_v22  ;;  %v12152_v45 = vpack.c.bf16 %v2047_v43, %v2031_v42  ;;  %12135 = vmatprep.subr.bf16.mxu1 %v12134_v47  ;;  %v1956_v42 = vld [vmem:[#allocation10 + $0xb8] sm:$0xff]  ;;  %v2003_v47 = vld [vmem:[#allocation10 + $0x230] sm:$0xff] }
 0xbf5   : > { %v12202_v43 = vpack.c.bf16 %v1956_v42, %v1940_v39  ;;  %v2051_v42 = vld [vmem:[#allocation10 + $0x3b0] sm:$0xff]  ;;  %v2008_v63 = vld [vmem:[#allocation10 + $0x258] sm:$0xff] }
 0xbf6   : > { %1902 = vadd.xlane.f32.xlu0 %v1900_v27  ;;  %v1904_v30 = vsel %vm1066_vm1, %v1901_v29, 0.0  ;;  %12153 = vmatpush1.bf16.msra.mxu0 %v12152_v45  ;;  %v2176_v27 = vld [vmem:[#allocation10 + $0x798] sm:$0xff]  ;;  %v2157_v29 = vld [vmem:[#allocation10 + $0x700] sm:$0xff] }
 0xbf7   : > { %12155 = vmatprep.subr.bf16.mxu0 %v12154_v56  ;;  %v12166_v31 = vpack.c.bf16 %v2176_v27, %v2160_v37  ;;  %v1937_v56 = vld [vmem:[#allocation10 + $0x20] sm:$0xff]  ;;  %v2019_v27 = vld [vmem:[#allocation10 + $0x2b0] sm:$0xff] }
 0xbf8   : > { %v12212_v34 = vpack.c.bf16 %v2019_v27, %v2003_v47  ;;  %v2161_v27 = vld [vmem:[#allocation10 + $0x720] sm:$0xff] }
 0xbfa   : > { %1905 = vadd.xlane.f32.xlu0 %v1904_v30  ;;  %12157 = vmatpush1.bf16.msra.mxu0 %v12156_v44  ;;  %v2173_v30 = vld [vmem:[#allocation10 + $0x780] sm:$0xff]  ;;  %v1955_v44 = vld [vmem:[#allocation10 + $0xb0] sm:$0xff] }
 0xbfb   : > { %12159 = vmatprep.subr.bf16.mxu0 %v12158_v1  ;;  %v12136_v32 = vpack.c.bf16 %v2173_v30, %v2157_v29  ;;  %v12172_v1 = vpack.c.bf16 %v1953_v58, %v1937_v56  ;;  %v12204_v2 = vpack.c.bf16 %v1955_v44, %v1939_v59  ;;  %v2034_v29 = vld [vmem:[#allocation10 + $0x328] sm:$0xff]  ;;  %v2083_v58 = vld [vmem:[#allocation10 + $0x4b0] sm:$0xff] }
 0xbfc   : > { %v2050_v30 = vld [vmem:[#allocation10 + $0x3a8] sm:$0xff] }
 0xbfd   : > { %12137 = vmatpush1.bf16.msra.mxu1 %v12136_v32  ;;  %v2052_v32 = vld [vmem:[#allocation10 + $0x3b8] sm:$0xff]  ;;  %v12182_v38 = vpack.c.bf16 %v2050_v30, %v2034_v29  ;;  %v2098_v59 = vld [vmem:[#allocation10 + $0x528] sm:$0xff]  ;;  %v2177_v29 = vld [vmem:[#allocation10 + $0x7a0] sm:$0xff] }
 0xbfe   : > { %12161 = vmatpush1.bf16.msra.mxu0 %v12160_v5  ;;  %12171 = vmatprep.subr.bf16.mxu1 %v12170_v41  ;;  %v2035_v41 = vld [vmem:[#allocation10 + $0x330] sm:$0xff]  ;;  %v2114_v44 = vld [vmem:[#allocation10 + $0x5a8] sm:$0xff] }
 0xbff   : > { %12163 = vmatprep.subr.bf16.mxu0 %v12162_v13  ;;  %v2020_v13 = vld [vmem:[#allocation10 + $0x2b8] sm:$0xff] }
 0xc00   : > { %v12210_v37 = vpack.c.bf16 %v2020_v13, %v2004_v12  ;;  %v12226_v13 = vpack.c.bf16 %v2148_v7, %v2132_v6  ;;  %v2007_v7 = vld [vmem:[#allocation10 + $0x250] sm:$0xff] }
 0xc02   : > { %12165 = vmatpush1.bf16.msra.mxu0 %v12164_v18  ;;  %v2001_v18 = vld [vmem:[#allocation10 + $0x220] sm:$0xff] }
 0xc03   : > { %12167 = vmatprep.subr.bf16.mxu0 %v12166_v31  ;;  %v2036_v31 = vld [vmem:[#allocation10 + $0x338] sm:$0xff]  ;;  %v12180_v33 = vpack.c.bf16 %v2017_v49, %v2001_v18  ;;  %v2178_v18 = vld [vmem:[#allocation10 + $0x7a8] sm:$0xff] }
 0xc04   : > { %v12214_v39 = vpack.c.bf16 %v2052_v32, %v2036_v31  ;;  %v2164_v49 = vld [vmem:[#allocation10 + $0x738] sm:$0xff]  ;;  %v2163_v32 = vld [vmem:[#allocation10 + $0x730] sm:$0xff] }
 0xc06   : > { %12169 = vmatpush1.bf16.msra.mxu0 %v12168_v35  ;;  %v2033_v35 = vld [vmem:[#allocation10 + $0x320] sm:$0xff] }
 0xc07   : > { %12203 = vmatprep.subr.bf16.mxu0 %v12202_v43  ;;  %v2066_v43 = vld [vmem:[#allocation10 + $0x428] sm:$0xff] }
 0xc83   : > { %v1903_v45 = vpop.xlane.xlu0 %1902 }
 0xc84   : > { %v1907_v46 = vmul.f32 0.0078125, %v1903_v45  ;;  %v2082_v45 = vld [vmem:[#allocation10 + $0x4a8] sm:$0xff] }
 0xc86   : > { %v1909_v50 = vadd.f32 1e-05, %v1907_v46  ;;  %v2068_v46 = vld [vmem:[#allocation10 + $0x438] sm:$0xff] }
 0xc87   : > { %v1906_v51 = vpop.xlane.xlu0 %1905 }
 0xc88   : > { %14163 = vrsqrt.f32 %v1909_v50  ;;  %v1908_v52 = vmul.f32 0.0078125, %v1906_v51  ;;  %v2084_v50 = vld [vmem:[#allocation10 + $0x4b8] sm:$0xff]  ;;  %v12184_v51 = vpack.c.bf16 %v2049_v36, %v2033_v35  ;;  %v1958_v35 = vld [vmem:[#allocation10 + $0xc8] sm:$0xff] }
 0xc89   : > { %v12218_v56 = vpack.c.bf16 %v2084_v50, %v2068_v46  ;;  %v1944_v36 = vld [vmem:[#allocation10 + $0x58] sm:$0xff]  ;;  %v1957_v46 = vld [vmem:[#allocation10 + $0xc0] sm:$0xff]  ;;  %v1943_v50 = vld [vmem:[#allocation10 + $0x50] sm:$0xff] }
 0xc8a   : > { %v1910_v53 = vadd.f32 1e-05, %v1908_v52  ;;  %v12216_v52 = vpack.c.bf16 %v2051_v42, %v2035_v41  ;;  %v1941_v42 = vld [vmem:[#allocation10 + $0x40] sm:$0xff] }
 0xc8c   : > { %14165 = vrsqrt.f32 %v1910_v53  ;;  %v2065_v53 = vld [vmem:[#allocation10 + $0x420] sm:$0xff] }
 0xc92   : > { %v14164_v54 = vpop.eup %14163 }
 0xc93   : > { %v1913_v57 = vmul.f32 %v14164_v54, %v14921_v25  ;;  %v2081_v54 = vld [vmem:[#allocation10 + $0x4a0] sm:$0xff] }
 0xc95   : > { %v1922_v20 = vmul.f32 %v10294_v55, %v1913_v57  ;;  %v2067_v57 = vld [vmem:[#allocation10 + $0x430] sm:$0xff] }
 0xc96   : > { %v14166_v0 = vpop.eup %14165  ;;  %v12220_v61 = vpack.c.bf16 %v2083_v58, %v2067_v57  ;;  %v1973_v58 = vld [vmem:[#allocation10 + $0x140] sm:$0xff] }
 0xc97   : > { %v14935_v5 = vadd.f32 %v10295_v21, %v1922_v20  ;;  %v1914_v25 = vmul.f32 %v14166_v0, %v14919_v22  ;;  %v12188_v20 = vpack.c.bf16 %v2081_v54, %v2065_v53  ;;  %v12190_v0 = vpack.c.bf16 %v2114_v44, %v2098_v59  ;;  %v1990_v53 = vld [vmem:[#allocation10 + $0x1c8] sm:$0xff]  ;;  %v1976_v54 = vld [vmem:[#allocation10 + $0x158] sm:$0xff]  ;;  %v1989_v59 = vld [vmem:[#allocation10 + $0x1c0] sm:$0xff] }
 0xc98   : > { %v1975_v44 = vld [vmem:[#allocation10 + $0x150] sm:$0xff] }
 0xc99   : > { %v1923_v14 = vmul.f32 %v10294_v55, %v1914_v25  ;;  %2338 = vmatmul.mubr.f32.vlgmr.msra.gmra.mrb[12].mxu1 %v14935_v5  ;;  %2415 = vmatmul.mubr.f32.vlgmr.msra.gmra.mrb[14].mxu0 %v14935_v5  ;;  %v12186_v55 = vpack.c.bf16 %v2082_v45, %v2066_v43  ;;  %v2146_v25 = vld [vmem:[#allocation10 + $0x6a8] sm:$0xff] }
 0xc9a   : > { %12173 = vmatpush1.bf16.msra.mxu1 %v12172_v1  ;;  %12205 = vmatpush1.bf16.msra.mxu0 %v12204_v2  ;;  %v2099_v2 = vld [vmem:[#allocation10 + $0x530] sm:$0xff]  ;;  %v12194_v12 = vpack.c.bf16 %v2146_v25, %v2130_v4  ;;  %v2021_v4 = vld [vmem:[#allocation10 + $0x2c0] sm:$0xff] }
 0xc9b   : > { %v14940_v22 = vadd.f32 %v10295_v21, %v1923_v14  ;;  %2343 = vmatprep.mubr.f32.mxu1 %v14454_v16  ;;  %2420 = vmatprep.mubr.f32.mxu0 %v14454_v16  ;;  %v2100_v21 = vld [vmem:[#allocation10 + $0x538] sm:$0xff]  ;;  %v2131_v14 = vld [vmem:[#allocation10 + $0x630] sm:$0xff] }
 0xc9c   : > { %12175 = vmatprep.subr.bf16.mxu1 %v12174_v9  ;;  %12207 = vmatprep.subr.bf16.mxu0 %v12206_v10  ;;  %v12222_v1 = vpack.c.bf16 %v2116_v60, %v2100_v21  ;;  %v12224_v9 = vpack.c.bf16 %v2115_v3, %v2099_v2  ;;  %v2129_v10 = vld [vmem:[#allocation10 + $0x620] sm:$0xff]  ;;  %v1991_v21 = vld [vmem:[#allocation10 + $0x1d0] sm:$0xff]  ;;  %v2006_v60 = vld [vmem:[#allocation10 + $0x248] sm:$0xff] }
 0xc9d   : > { %2344 = vmatmul.mubr.f32.gmra.mrb[14].mxu1 %v14940_v22  ;;  %2421 = vmatmul.mubr.f32.gmra.mrb[16].mxu0 %v14940_v22  ;;  %v12272_v2 = vpack.c.bf16 %v1991_v21, %v1975_v44  ;;  %v2005_v3 = vld [vmem:[#allocation10 + $0x240] sm:$0xff]  ;;  %v12242_v25 = vpack.c.bf16 %v2022_v62, %v2006_v60  ;;  %v2152_v44 = vld [vmem:[#allocation10 + $0x6d8] sm:$0xff] }
 0xc9e   : > { %12177 = vmatpush1.bf16.msra.mxu1 %v12176_v15  ;;  %12209 = vmatpush1.bf16.msra.mxu0 %v12208_v17  ;;  %v2147_v15 = vld [vmem:[#allocation10 + $0x6b0] sm:$0xff]  ;;  %v2162_v17 = vld [vmem:[#allocation10 + $0x728] sm:$0xff] }
 0xc9f   : > { %12179 = vmatprep.subr.bf16.mxu1 %v12178_v19  ;;  %12211 = vmatprep.subr.bf16.mxu0 %v12210_v37  ;;  %v2180_v19 = vld [vmem:[#allocation10 + $0x7b8] sm:$0xff]  ;;  %v12196_v37 = vpack.c.bf16 %v2145_v11, %v2129_v10  ;;  %v12228_v47 = vpack.c.bf16 %v2147_v15, %v2131_v14  ;;  %v12198_v30 = vpack.c.bf16 %v2178_v18, %v2162_v17  ;;  %v2054_v10 = vld [vmem:[#allocation10 + $0x3c8] sm:$0xff]  ;;  %v2037_v15 = vld [vmem:[#allocation10 + $0x340] sm:$0xff] }
 0xca0   : > { %2491 = vmatprep.mubr.f32.mxu1 %v14454_v16  ;;  %2568 = vmatprep.mubr.f32.mxu0 %v14454_v16  ;;  %v12230_v31 = vpack.c.bf16 %v2180_v19, %v2164_v49  ;;  %v2040_v11 = vld [vmem:[#allocation10 + $0x358] sm:$0xff]  ;;  %v2053_v17 = vld [vmem:[#allocation10 + $0x3c0] sm:$0xff]  ;;  %v2039_v19 = vld [vmem:[#allocation10 + $0x350] sm:$0xff] }
 0xca2   : > { %12181 = vmatpush1.bf16.msra.mxu1 %v12180_v33  ;;  %12213 = vmatpush1.bf16.msra.mxu0 %v12212_v34  ;;  %v2179_v33 = vld [vmem:[#allocation10 + $0x7b0] sm:$0xff]  ;;  %v1942_v34 = vld [vmem:[#allocation10 + $0x48] sm:$0xff] }
 0xca3   : > { %12183 = vmatprep.subr.bf16.mxu1 %v12182_v38  ;;  %12215 = vmatprep.subr.bf16.mxu0 %v12214_v39  ;;  %v1960_v38 = vld [vmem:[#allocation10 + $0xd8] sm:$0xff]  ;;  %v12200_v39 = vpack.c.bf16 %v2177_v29, %v2161_v27  ;;  %v12232_v41 = vpack.c.bf16 %v2179_v33, %v2163_v32  ;;  %v12234_v43 = vpack.c.bf16 %v1958_v35, %v1942_v34  ;;  %v2086_v27 = vld [vmem:[#allocation10 + $0x4c8] sm:$0xff]  ;;  %v2069_v33 = vld [vmem:[#allocation10 + $0x440] sm:$0xff] }
 0xca4   : > { %v12266_v45 = vpack.c.bf16 %v1960_v38, %v1944_v36  ;;  %v2072_v29 = vld [vmem:[#allocation10 + $0x458] sm:$0xff]  ;;  %v2085_v34 = vld [vmem:[#allocation10 + $0x4c0] sm:$0xff]  ;;  %v2071_v38 = vld [vmem:[#allocation10 + $0x450] sm:$0xff] }
 0xca6   : > { %12185 = vmatpush1.bf16.msra.mxu1 %v12184_v51  ;;  %12217 = vmatpush1.bf16.msra.mxu0 %v12216_v52  ;;  %v1959_v51 = vld [vmem:[#allocation10 + $0xd0] sm:$0xff]  ;;  %v1974_v52 = vld [vmem:[#allocation10 + $0x148] sm:$0xff] }
 0xca7   : > { %12187 = vmatprep.subr.bf16.mxu1 %v12186_v55  ;;  %12219 = vmatprep.subr.bf16.mxu0 %v12218_v56  ;;  %v1992_v55 = vld [vmem:[#allocation10 + $0x1d8] sm:$0xff]  ;;  %v12236_v56 = vpack.c.bf16 %v1957_v46, %v1941_v42  ;;  %v12268_v57 = vpack.c.bf16 %v1959_v51, %v1943_v50  ;;  %v2118_v42 = vld [vmem:[#allocation10 + $0x5c8] sm:$0xff]  ;;  %v12252_v46 = vpack.c.bf16 %v2085_v34, %v2069_v33  ;;  %v2101_v51 = vld [vmem:[#allocation10 + $0x540] sm:$0xff] }
 0xca8   : > { %v1994_v33 = vld [vmem:[#allocation10 + $0x1e8] sm:$0xff]  ;;  %v1980_v34 = vld [vmem:[#allocation10 + $0x178] sm:$0xff] }
 0xcaa   : > { %12189 = vmatpush1.bf16.msra.mxu1 %v12188_v20  ;;  %12221 = vmatpush1.bf16.msra.mxu0 %v12220_v61  ;;  %v12238_v20 = vpack.c.bf16 %v1990_v53, %v1974_v52  ;;  %v12270_v61 = vpack.c.bf16 %v1992_v55, %v1976_v54  ;;  %v2117_v52 = vld [vmem:[#allocation10 + $0x5c0] sm:$0xff]  ;;  %v2103_v55 = vld [vmem:[#allocation10 + $0x550] sm:$0xff] }
 0xcab   : > { %12191 = vmatprep.subr.bf16.mxu1 %v12190_v0  ;;  %12223 = vmatprep.subr.bf16.mxu0 %v12222_v1  ;;  %v2024_v0 = vld [vmem:[#allocation10 + $0x2d8] sm:$0xff]  ;;  %v12240_v1 = vpack.c.bf16 %v1989_v59, %v1973_v58  ;;  %v2150_v58 = vld [vmem:[#allocation10 + $0x6c8] sm:$0xff]  ;;  %v12256_v21 = vpack.c.bf16 %v2117_v52, %v2101_v51 }
 0xcac   : > { %v12274_v6 = vpack.c.bf16 %v2024_v0, %v2008_v63  ;;  %v2136_v59 = vld [vmem:[#allocation10 + $0x658] sm:$0xff]  ;;  %v2135_v0 = vld [vmem:[#allocation10 + $0x650] sm:$0xff]  ;;  %v2026_v51 = vld [vmem:[#allocation10 + $0x2e8] sm:$0xff] }
 0xcad   : > { %v12290_v63 = vpack.c.bf16 %v2152_v44, %v2136_v59  ;;  %v2012_v52 = vld [vmem:[#allocation10 + $0x278] sm:$0xff]  ;;  %v2011_v44 = vld [vmem:[#allocation10 + $0x270] sm:$0xff] }
 0xcae   : > { %12193 = vmatpush1.bf16.msra.mxu1 %v12192_v8  ;;  %12225 = vmatpush1.bf16.msra.mxu0 %v12224_v9  ;;  %v2023_v8 = vld [vmem:[#allocation10 + $0x2d0] sm:$0xff]  ;;  %v2038_v9 = vld [vmem:[#allocation10 + $0x348] sm:$0xff] }
 0xcaf   : > { %12195 = vmatprep.subr.bf16.mxu1 %v12194_v12  ;;  %12227 = vmatprep.subr.bf16.mxu0 %v12226_v13  ;;  %v2056_v12 = vld [vmem:[#allocation10 + $0x3d8] sm:$0xff]  ;;  %v12244_v13 = vpack.c.bf16 %v2021_v4, %v2005_v3  ;;  %v12276_v14 = vpack.c.bf16 %v2023_v8, %v2007_v7  ;;  %v12246_v18 = vpack.c.bf16 %v2054_v10, %v2038_v9  ;;  %v2182_v3 = vld [vmem:[#allocation10 + $0x7c8] sm:$0xff]  ;;  %v2165_v8 = vld [vmem:[#allocation10 + $0x740] sm:$0xff] }
 0xcb0   : > { %v12278_v49 = vpack.c.bf16 %v2056_v12, %v2040_v11  ;;  %v2168_v4 = vld [vmem:[#allocation10 + $0x758] sm:$0xff]  ;;  %v2181_v9 = vld [vmem:[#allocation10 + $0x7c0] sm:$0xff]  ;;  %v2167_v12 = vld [vmem:[#allocation10 + $0x750] sm:$0xff] }
 0xcb2   : > { %12197 = vmatpush1.bf16.msra.mxu1 %v12196_v37  ;;  %12229 = vmatpush1.bf16.msra.mxu0 %v12228_v47  ;;  %v2055_v37 = vld [vmem:[#allocation10 + $0x3d0] sm:$0xff]  ;;  %v2070_v47 = vld [vmem:[#allocation10 + $0x448] sm:$0xff] }
 0xcb3   : > { %12199 = vmatprep.subr.bf16.mxu1 %v12198_v30  ;;  %12231 = vmatprep.subr.bf16.mxu0 %v12230_v31  ;;  %v2088_v30 = vld [vmem:[#allocation10 + $0x4d8] sm:$0xff]  ;;  %v12248_v31 = vpack.c.bf16 %v2053_v17, %v2037_v15  ;;  %v12280_v32 = vpack.c.bf16 %v2055_v37, %v2039_v19  ;;  %v12250_v35 = vpack.c.bf16 %v2086_v27, %v2070_v47  ;;  %v1962_v15 = vld [vmem:[#allocation10 + $0xe8] sm:$0xff]  ;;  %v1945_v37 = vld [vmem:[#allocation10 + $0x60] sm:$0xff] }
 0xcb4   : > { %v12282_v36 = vpack.c.bf16 %v2088_v30, %v2072_v29  ;;  %v1948_v17 = vld [vmem:[#allocation10 + $0x78] sm:$0xff]  ;;  %v1961_v29 = vld [vmem:[#allocation10 + $0xe0] sm:$0xff]  ;;  %v1947_v30 = vld [vmem:[#allocation10 + $0x70] sm:$0xff] }
 0xcb6   : > { %12201 = vmatpush1.bf16.msra.mxu1 %v12200_v39  ;;  %12233 = vmatpush1.bf16.msra.mxu0 %v12232_v41  ;;  %v2087_v39 = vld [vmem:[#allocation10 + $0x4d0] sm:$0xff]  ;;  %v2102_v41 = vld [vmem:[#allocation10 + $0x548] sm:$0xff] }
 0xcb7   : > { %12235 = vmatprep.subr.bf16.mxu1 %v12234_v43  ;;  %12267 = vmatprep.subr.bf16.mxu0 %v12266_v45  ;;  %v2104_v43 = vld [vmem:[#allocation10 + $0x558] sm:$0xff]  ;;  %v12284_v50 = vpack.c.bf16 %v2087_v39, %v2071_v38  ;;  %v12254_v53 = vpack.c.bf16 %v2118_v42, %v2102_v41  ;;  %v1977_v39 = vld [vmem:[#allocation10 + $0x160] sm:$0xff]  ;;  %v1979_v42 = vld [vmem:[#allocation10 + $0x170] sm:$0xff] }
 0xcb8   : > { %v2120_v45 = vld [vmem:[#allocation10 + $0x5d8] sm:$0xff]  ;;  %v1993_v41 = vld [vmem:[#allocation10 + $0x1e0] sm:$0xff] }
 0xcb9   : > { %2492 = vmatmul.mubr.f32.vlgmr.msra.gmra.mrb[16].mxu1 %v14935_v5  ;;  %2569 = vmatmul.mubr.f32.vlgmr.msra.gmra.mrb[18].mxu0 %v14935_v5  ;;  %v12286_v54 = vpack.c.bf16 %v2120_v45, %v2104_v43  ;;  %v1995_v43 = vld [vmem:[#allocation10 + $0x1f0] sm:$0xff]  ;;  %v2010_v45 = vld [vmem:[#allocation10 + $0x268] sm:$0xff] }
 0xcba   : > { %12237 = vmatpush1.bf16.msra.mxu1 %v12236_v56  ;;  %12269 = vmatpush1.bf16.msra.mxu0 %v12268_v57  ;;  %v2119_v56 = vld [vmem:[#allocation10 + $0x5d0] sm:$0xff]  ;;  %v2134_v57 = vld [vmem:[#allocation10 + $0x648] sm:$0xff] }
 0xcbb   : > { %2497 = vmatprep.mubr.f32.mxu1 %v14454_v16  ;;  %2574 = vmatprep.mubr.f32.mxu0 %v14454_v16  ;;  %v12288_v60 = vpack.c.bf16 %v2119_v56, %v2103_v55  ;;  %v12258_v62 = vpack.c.bf16 %v2150_v58, %v2134_v57  ;;  %v12336_v55 = vpack.c.bf16 %v1995_v43, %v1979_v42  ;;  %v2009_v56 = vld [vmem:[#allocation10 + $0x260] sm:$0xff]  ;;  %v2156_v42 = vld [vmem:[#allocation10 + $0x6f8] sm:$0xff] }
 0xcbc   : > { %12239 = vmatprep.subr.bf16.mxu1 %v12238_v20  ;;  %12271 = vmatprep.subr.bf16.mxu0 %v12270_v61  ;;  %v2133_v20 = vld [vmem:[#allocation10 + $0x640] sm:$0xff]  ;;  %v12306_v58 = vpack.c.bf16 %v2026_v51, %v2010_v45 }
 0xcbd   : > { %2498 = vmatmul.mubr.f32.gmra.mrb[18].mxu1 %v14940_v22  ;;  %2575 = vmatmul.mubr.f32.gmra.mrb[20].mxu0 %v14940_v22  ;;  %v2149_v61 = vld [vmem:[#allocation10 + $0x6c0] sm:$0xff] }
 0xcbe   : > { %12241 = vmatpush1.bf16.msra.mxu1 %v12240_v1  ;;  %12273 = vmatpush1.bf16.msra.mxu0 %v12272_v2  ;;  %v2151_v1 = vld [vmem:[#allocation10 + $0x6d0] sm:$0xff]  ;;  %v2166_v2 = vld [vmem:[#allocation10 + $0x748] sm:$0xff]  ;;  %v2025_v57 = vld [vmem:[#allocation10 + $0x2e0] sm:$0xff] }
 0xcbf   : > { %12243 = vmatprep.subr.bf16.mxu1 %v12242_v25  ;;  %12275 = vmatprep.subr.bf16.mxu0 %v12274_v6  ;;  %v2184_v25 = vld [vmem:[#allocation10 + $0x7d8] sm:$0xff]  ;;  %v12260_v6 = vpack.c.bf16 %v2149_v61, %v2133_v20  ;;  %v12292_v7 = vpack.c.bf16 %v2151_v1, %v2135_v0  ;;  %v12262_v10 = vpack.c.bf16 %v2182_v3, %v2166_v2  ;;  %v2058_v20 = vld [vmem:[#allocation10 + $0x3e8] sm:$0xff]  ;;  %v2041_v1 = vld [vmem:[#allocation10 + $0x360] sm:$0xff] }
 0xcc0   : > { %2645 = vmatprep.mubr.f32.mxu1 %v14454_v16  ;;  %2722 = vmatprep.mubr.f32.mxu0 %v14454_v16  ;;  %v12294_v11 = vpack.c.bf16 %v2184_v25, %v2168_v4  ;;  %v2044_v61 = vld [vmem:[#allocation10 + $0x378] sm:$0xff]  ;;  %v2057_v2 = vld [vmem:[#allocation10 + $0x3e0] sm:$0xff]  ;;  %v2043_v25 = vld [vmem:[#allocation10 + $0x370] sm:$0xff] }
 0xcc2   : > { %12245 = vmatpush1.bf16.msra.mxu1 %v12244_v13  ;;  %12277 = vmatpush1.bf16.msra.mxu0 %v12276_v14  ;;  %v2183_v13 = vld [vmem:[#allocation10 + $0x7d0] sm:$0xff]  ;;  %v1946_v14 = vld [vmem:[#allocation10 + $0x68] sm:$0xff] }
 0xcc3   : > { %12247 = vmatprep.subr.bf16.mxu1 %v12246_v18  ;;  %12279 = vmatprep.subr.bf16.mxu0 %v12278_v49  ;;  %v1964_v18 = vld [vmem:[#allocation10 + $0xf8] sm:$0xff]  ;;  %v12264_v49 = vpack.c.bf16 %v2181_v9, %v2165_v8  ;;  %v12296_v19 = vpack.c.bf16 %v2183_v13, %v2167_v12  ;;  %v12298_v47 = vpack.c.bf16 %v1962_v15, %v1946_v14  ;;  %v2090_v8 = vld [vmem:[#allocation10 + $0x4e8] sm:$0xff]  ;;  %v2073_v13 = vld [vmem:[#allocation10 + $0x460] sm:$0xff] }
 0xcc4   : > { %v12330_v27 = vpack.c.bf16 %v1964_v18, %v1948_v17  ;;  %v2076_v9 = vld [vmem:[#allocation10 + $0x478] sm:$0xff]  ;;  %v2089_v14 = vld [vmem:[#allocation10 + $0x4e0] sm:$0xff]  ;;  %v2075_v18 = vld [vmem:[#allocation10 + $0x470] sm:$0xff] }
 0xcc6   : > { %12249 = vmatpush1.bf16.msra.mxu1 %v12248_v31  ;;  %12281 = vmatpush1.bf16.msra.mxu0 %v12280_v32  ;;  %v1963_v31 = vld [vmem:[#allocation10 + $0xf0] sm:$0xff]  ;;  %v1978_v32 = vld [vmem:[#allocation10 + $0x168] sm:$0xff] }
 0xcc7   : > { %12251 = vmatprep.subr.bf16.mxu1 %v12250_v35  ;;  %12283 = vmatprep.subr.bf16.mxu0 %v12282_v36  ;;  %v1996_v35 = vld [vmem:[#allocation10 + $0x1f8] sm:$0xff]  ;;  %v12300_v36 = vpack.c.bf16 %v1961_v29, %v1945_v37  ;;  %v12332_v38 = vpack.c.bf16 %v1963_v31, %v1947_v30  ;;  %v2122_v37 = vld [vmem:[#allocation10 + $0x5e8] sm:$0xff]  ;;  %v12316_v29 = vpack.c.bf16 %v2089_v14, %v2073_v13  ;;  %v2105_v31 = vld [vmem:[#allocation10 + $0x560] sm:$0xff] }
 0xcc8   : > { %v2940_v13 = vld [vmem:[#allocation11 + $0x98] sm:$0xff]  ;;  %v2971_v14 = vld [vmem:[#allocation11 + $0x190] sm:$0xff] }
 0xcca   : > { %12253 = vmatpush1.bf16.msra.mxu1 %v12252_v46  ;;  %12285 = vmatpush1.bf16.msra.mxu0 %v12284_v50  ;;  %v12302_v46 = vpack.c.bf16 %v1994_v33, %v1978_v32  ;;  %v12334_v50 = vpack.c.bf16 %v1996_v35, %v1980_v34  ;;  %v2121_v32 = vld [vmem:[#allocation10 + $0x5e0] sm:$0xff]  ;;  %v2107_v35 = vld [vmem:[#allocation10 + $0x570] sm:$0xff] }
 0xccb   : > { %12255 = vmatprep.subr.bf16.mxu1 %v12254_v53  ;;  %12287 = vmatprep.subr.bf16.mxu0 %v12286_v54  ;;  %v2028_v53 = vld [vmem:[#allocation10 + $0x2f8] sm:$0xff]  ;;  %v12304_v54 = vpack.c.bf16 %v1993_v41, %v1977_v39  ;;  %v2154_v39 = vld [vmem:[#allocation10 + $0x6e8] sm:$0xff]  ;;  %v12320_v43 = vpack.c.bf16 %v2121_v32, %v2105_v31  ;;  %v2973_v32 = vld [vmem:[#allocation11 + $0x1a0] sm:$0xff] }
 0xccc   : > { %v12338_v59 = vpack.c.bf16 %v2028_v53, %v2012_v52  ;;  %v2140_v41 = vld [vmem:[#allocation10 + $0x678] sm:$0xff]  ;;  %v2139_v53 = vld [vmem:[#allocation10 + $0x670] sm:$0xff]  ;;  %v2942_v31 = vld [vmem:[#allocation11 + $0xa8] sm:$0xff] }
 0xccd   : > { %v12354_v52 = vpack.c.bf16 %v2156_v42, %v2140_v41  ;;  %v2957_v42 = vld [vmem:[#allocation11 + $0x120] sm:$0xff] }
 0xcce   : > { %12257 = vmatpush1.bf16.msra.mxu1 %v12256_v21  ;;  %12289 = vmatpush1.bf16.msra.mxu0 %v12288_v60  ;;  %v2027_v21 = vld [vmem:[#allocation10 + $0x2f0] sm:$0xff]  ;;  %v2042_v60 = vld [vmem:[#allocation10 + $0x368] sm:$0xff] }
 0xccf   : > { %12259 = vmatprep.subr.bf16.mxu1 %v12258_v62  ;;  %12291 = vmatprep.subr.bf16.mxu0 %v12290_v63  ;;  %v2060_v62 = vld [vmem:[#allocation10 + $0x3f8] sm:$0xff]  ;;  %v12308_v63 = vpack.c.bf16 %v2025_v57, %v2009_v56  ;;  %v12340_v0 = vpack.c.bf16 %v2027_v21, %v2011_v44  ;;  %v12310_v3 = vpack.c.bf16 %v2058_v20, %v2042_v60  ;;  %v2186_v56 = vld [vmem:[#allocation10 + $0x7e8] sm:$0xff]  ;;  %v2169_v21 = vld [vmem:[#allocation10 + $0x760] sm:$0xff] }
 0xcd0   : > { %v12342_v4 = vpack.c.bf16 %v2060_v62, %v2044_v61  ;;  %v2172_v57 = vld [vmem:[#allocation10 + $0x778] sm:$0xff]  ;;  %v2185_v60 = vld [vmem:[#allocation10 + $0x7e0] sm:$0xff]  ;;  %v2171_v62 = vld [vmem:[#allocation10 + $0x770] sm:$0xff] }
 0xcd2   : > { %12261 = vmatpush1.bf16.msra.mxu1 %v12260_v6  ;;  %12293 = vmatpush1.bf16.msra.mxu0 %v12292_v7  ;;  %v2059_v6 = vld [vmem:[#allocation10 + $0x3f0] sm:$0xff]  ;;  %v2074_v7 = vld [vmem:[#allocation10 + $0x468] sm:$0xff] }
 0xcd3   : > { %12263 = vmatprep.subr.bf16.mxu1 %v12262_v10  ;;  %12295 = vmatprep.subr.bf16.mxu0 %v12294_v11  ;;  %v2092_v10 = vld [vmem:[#allocation10 + $0x4f8] sm:$0xff]  ;;  %v12312_v11 = vpack.c.bf16 %v2057_v2, %v2041_v1  ;;  %v12344_v12 = vpack.c.bf16 %v2059_v6, %v2043_v25  ;;  %v12314_v15 = vpack.c.bf16 %v2090_v8, %v2074_v7  ;;  %v2938_v1 = vld [vmem:[#allocation11 + $0x88] sm:$0xff]  ;;  %v2969_v2 = vld [vmem:[#allocation11 + $0x180] sm:$0xff] }
 0xcd4   : > { %v12346_v17 = vpack.c.bf16 %v2092_v10, %v2076_v9  ;;  %v2921_v8 = vld [vmem:[#allocation11] sm:$0xff]  ;;  %v2922_v9 = vld [vmem:[#allocation11 + $0x8] sm:$0xff] }
 0xcd5   : > { %v2953_v10 = vld [vmem:[#allocation11 + $0x100] sm:$0xff] }
 0xcd6   : > { %12265 = vmatpush1.bf16.msra.mxu1 %v12264_v49  ;;  %12297 = vmatpush1.bf16.msra.mxu0 %v12296_v19  ;;  %v2091_v49 = vld [vmem:[#allocation10 + $0x4f0] sm:$0xff]  ;;  %v2106_v19 = vld [vmem:[#allocation10 + $0x568] sm:$0xff] }
 0xcd7   : > { %12299 = vmatprep.subr.bf16.mxu1 %v12298_v47  ;;  %12331 = vmatprep.subr.bf16.mxu0 %v12330_v27  ;;  %v2108_v47 = vld [vmem:[#allocation10 + $0x578] sm:$0xff]  ;;  %v12348_v30 = vpack.c.bf16 %v2091_v49, %v2075_v18  ;;  %v12318_v33 = vpack.c.bf16 %v2122_v37, %v2106_v19  ;;  %v2923_v49 = vld [vmem:[#allocation11 + $0x10] sm:$0xff] }
 0xcd8   : > { %v2124_v27 = vld [vmem:[#allocation10 + $0x5f8] sm:$0xff] }
 0xcd9   : > { %2646 = vmatmul.mubr.f32.vlgmr.msra.gmra.mrb[20].mxu1 %v14935_v5  ;;  %2723 = vmatmul.mubr.f32.vlgmr.msra.gmra.mrb[22].mxu0 %v14935_v5  ;;  %v12350_v34 = vpack.c.bf16 %v2124_v27, %v2108_v47  ;;  %v2924_v19 = vld [vmem:[#allocation11 + $0x18] sm:$0xff]  ;;  %v2955_v27 = vld [vmem:[#allocation11 + $0x110] sm:$0xff] }
 0xcda   : > { %12301 = vmatpush1.bf16.msra.mxu1 %v12300_v36  ;;  %12333 = vmatpush1.bf16.msra.mxu0 %v12332_v38  ;;  %v2123_v36 = vld [vmem:[#allocation10 + $0x5f0] sm:$0xff]  ;;  %v2138_v38 = vld [vmem:[#allocation10 + $0x668] sm:$0xff] }
 0xcdb   : > { %2651 = vmatprep.mubr.f32.mxu1 %v14454_v16  ;;  %2728 = vmatprep.mubr.f32.mxu0 %v14454_v16  ;;  %v12352_v45 = vpack.c.bf16 %v2123_v36, %v2107_v35  ;;  %v12322_v51 = vpack.c.bf16 %v2154_v39, %v2138_v38  ;;  %v2925_v36 = vld [vmem:[#allocation11 + $0x20] sm:$0xff]  ;;  %v2926_v38 = vld [vmem:[#allocation11 + $0x28] sm:$0xff] }
 0xcdc   : > { %12303 = vmatprep.subr.bf16.mxu1 %v12302_v46  ;;  %12335 = vmatprep.subr.bf16.mxu0 %v12334_v50  ;;  %v2137_v46 = vld [vmem:[#allocation10 + $0x660] sm:$0xff] }
 0xcdd   : > { %2652 = vmatmul.mubr.f32.gmra.mrb[22].mxu1 %v14940_v22  ;;  %2729 = vmatmul.mubr.f32.gmra.mrb[24].mxu0 %v14940_v22  ;;  %v2153_v50 = vld [vmem:[#allocation10 + $0x6e0] sm:$0xff] }
 0xcde   : > { %12305 = vmatpush1.bf16.msra.mxu1 %v12304_v54  ;;  %12337 = vmatpush1.bf16.msra.mxu0 %v12336_v55  ;;  %v2155_v54 = vld [vmem:[#allocation10 + $0x6f0] sm:$0xff]  ;;  %v2170_v55 = vld [vmem:[#allocation10 + $0x768] sm:$0xff] }
 0xcdf   : > { %12307 = vmatprep.subr.bf16.mxu1 %v12306_v58  ;;  %12339 = vmatprep.subr.bf16.mxu0 %v12338_v59  ;;  %v2188_v58 = vld [vmem:[#allocation10 + $0x7f8] sm:$0xff]  ;;  %v12324_v59 = vpack.c.bf16 %v2153_v50, %v2137_v46  ;;  %v12356_v44 = vpack.c.bf16 %v2155_v54, %v2139_v53  ;;  %v12326_v20 = vpack.c.bf16 %v2186_v56, %v2170_v55  ;;  %v2975_v50 = vld [vmem:[#allocation11 + $0x1b0] sm:$0xff] }
 0xce0   : > { %2799 = vmatprep.mubr.f32.mxu1 %v14454_v16  ;;  %2876 = vmatprep.mubr.f32.mxu0 %v14454_v16  ;;  %v12358_v61 = vpack.c.bf16 %v2188_v58, %v2172_v57  ;;  %v2944_v46 = vld [vmem:[#allocation11 + $0xb8] sm:$0xff]  ;;  %v2927_v54 = vld [vmem:[#allocation11 + $0x30] sm:$0xff] }
 0xce1   : > { %v2928_v55 = vld [vmem:[#allocation11 + $0x38] sm:$0xff]  ;;  %v2959_v58 = vld [vmem:[#allocation11 + $0x130] sm:$0xff] }
 0xce2   : > { %12309 = vmatpush1.bf16.msra.mxu1 %v12308_v63  ;;  %12341 = vmatpush1.bf16.msra.mxu0 %v12340_v0  ;;  %v2187_v63 = vld [vmem:[#allocation10 + $0x7f0] sm:$0xff]  ;;  %v2937_v0 = vld [vmem:[#allocation11 + $0x80] sm:$0xff] }
 0xce3   : > { %12311 = vmatprep.subr.bf16.mxu1 %v12310_v3  ;;  %12343 = vmatprep.subr.bf16.mxu0 %v12342_v4  ;;  %v2970_v3 = vld [vmem:[#allocation11 + $0x188] sm:$0xff]  ;;  %v12328_v4 = vpack.c.bf16 %v2185_v60, %v2169_v21  ;;  %v12360_v25 = vpack.c.bf16 %v2187_v63, %v2171_v62  ;;  %v12362_v6 = vpack.c.bf16 %v2938_v1, %v2937_v0  ;;  %v2977_v60 = vld [vmem:[#allocation11 + $0x1c0] sm:$0xff] }
 0xce4   : > { %v12394_v7 = vpack.c.bf16 %v2970_v3, %v2969_v2  ;;  %v2946_v21 = vld [vmem:[#allocation11 + $0xc8] sm:$0xff]  ;;  %v2929_v63 = vld [vmem:[#allocation11 + $0x40] sm:$0xff] }
 0xce5   : > { %v2930_v0 = vld [vmem:[#allocation11 + $0x48] sm:$0xff]  ;;  %v2961_v3 = vld [vmem:[#allocation11 + $0x140] sm:$0xff] }
 0xce6   : > { %12313 = vmatpush1.bf16.msra.mxu1 %v12312_v11  ;;  %12345 = vmatpush1.bf16.msra.mxu0 %v12344_v12  ;;  %v2954_v11 = vld [vmem:[#allocation11 + $0x108] sm:$0xff]  ;;  %v2939_v12 = vld [vmem:[#allocation11 + $0x90] sm:$0xff] }
 0xce7   : > { %12315 = vmatprep.subr.bf16.mxu1 %v12314_v15  ;;  %12347 = vmatprep.subr.bf16.mxu0 %v12346_v17  ;;  %v2972_v15 = vld [vmem:[#allocation11 + $0x198] sm:$0xff]  ;;  %v12364_v17 = vpack.c.bf16 %v2922_v9, %v2921_v8  ;;  %v12396_v18 = vpack.c.bf16 %v2954_v11, %v2953_v10  ;;  %v12366_v37 = vpack.c.bf16 %v2940_v13, %v2939_v12  ;;  %v2931_v11 = vld [vmem:[#allocation11 + $0x50] sm:$0xff] }
 0xce8   : > { %v12398_v47 = vpack.c.bf16 %v2972_v15, %v2971_v14  ;;  %v2980_v8 = vld [vmem:[#allocation11 + $0x1d8] sm:$0xff]  ;;  %v12380_v9 = vpack.c.bf16 %v2930_v0, %v2929_v63  ;;  %v2963_v15 = vld [vmem:[#allocation11 + $0x150] sm:$0xff]  ;;  %v2985_v0 = vld [vmem:[#allocation11 + $0x200] sm:$0xff] }
 0xce9   : > { %v2932_v12 = vld [vmem:[#allocation11 + $0x58] sm:$0xff] }
 0xcea   : > { %12317 = vmatpush1.bf16.msra.mxu1 %v12316_v29  ;;  %12349 = vmatpush1.bf16.msra.mxu0 %v12348_v30  ;;  %v2956_v29 = vld [vmem:[#allocation11 + $0x118] sm:$0xff]  ;;  %v2941_v30 = vld [vmem:[#allocation11 + $0xa0] sm:$0xff] }
 0xceb   : > { %12319 = vmatprep.subr.bf16.mxu1 %v12318_v33  ;;  %12351 = vmatprep.subr.bf16.mxu0 %v12350_v34  ;;  %v2974_v33 = vld [vmem:[#allocation11 + $0x1a8] sm:$0xff]  ;;  %v12368_v34 = vpack.c.bf16 %v2924_v19, %v2923_v49  ;;  %v12400_v35 = vpack.c.bf16 %v2956_v29, %v2955_v27  ;;  %v12370_v39 = vpack.c.bf16 %v2942_v31, %v2941_v30  ;;  %v2981_v19 = vld [vmem:[#allocation11 + $0x1e0] sm:$0xff] }
 0xcec   : > { %v12402_v41 = vpack.c.bf16 %v2974_v33, %v2973_v32  ;;  %v2950_v49 = vld [vmem:[#allocation11 + $0xe8] sm:$0xff]  ;;  %v2933_v29 = vld [vmem:[#allocation11 + $0x60] sm:$0xff] }
 0xced   : > { %v2934_v30 = vld [vmem:[#allocation11 + $0x68] sm:$0xff]  ;;  %v2965_v33 = vld [vmem:[#allocation11 + $0x160] sm:$0xff] }
 0xcee   : > { %12321 = vmatpush1.bf16.msra.mxu1 %v12320_v43  ;;  %12353 = vmatpush1.bf16.msra.mxu0 %v12352_v45  ;;  %v2958_v43 = vld [vmem:[#allocation11 + $0x128] sm:$0xff]  ;;  %v2943_v45 = vld [vmem:[#allocation11 + $0xb0] sm:$0xff] }
 0xcef   : > { %12323 = vmatprep.subr.bf16.mxu1 %v12322_v51  ;;  %12355 = vmatprep.subr.bf16.mxu0 %v12354_v52  ;;  %v2976_v51 = vld [vmem:[#allocation11 + $0x1b8] sm:$0xff]  ;;  %v12372_v52 = vpack.c.bf16 %v2926_v38, %v2925_v36  ;;  %v12404_v53 = vpack.c.bf16 %v2958_v43, %v2957_v42  ;;  %v12374_v56 = vpack.c.bf16 %v2944_v46, %v2943_v45  ;;  %v2983_v38 = vld [vmem:[#allocation11 + $0x1f0] sm:$0xff] }
 0xcf0   : > { %v12406_v57 = vpack.c.bf16 %v2976_v51, %v2975_v50  ;;  %v2952_v36 = vld [vmem:[#allocation11 + $0xf8] sm:$0xff]  ;;  %v2935_v43 = vld [vmem:[#allocation11 + $0x70] sm:$0xff] }
 0xcf1   : > { %v2936_v45 = vld [vmem:[#allocation11 + $0x78] sm:$0xff]  ;;  %v2967_v51 = vld [vmem:[#allocation11 + $0x170] sm:$0xff] }
 0xcf2   : > { %12325 = vmatpush1.bf16.msra.mxu1 %v12324_v59  ;;  %12357 = vmatpush1.bf16.msra.mxu0 %v12356_v44  ;;  %v2960_v59 = vld [vmem:[#allocation11 + $0x138] sm:$0xff]  ;;  %v2945_v44 = vld [vmem:[#allocation11 + $0xc0] sm:$0xff] }
 0xcf3   : > { %12327 = vmatprep.subr.bf16.mxu1 %v12326_v20  ;;  %12359 = vmatprep.subr.bf16.mxu0 %v12358_v61  ;;  %v2978_v20 = vld [vmem:[#allocation11 + $0x1c8] sm:$0xff]  ;;  %v12376_v61 = vpack.c.bf16 %v2928_v55, %v2927_v54  ;;  %v12408_v62 = vpack.c.bf16 %v2960_v59, %v2959_v58  ;;  %v12378_v1 = vpack.c.bf16 %v2946_v21, %v2945_v44  ;;  %v3033_v55 = vld [vmem:[#allocation11 + $0x380] sm:$0xff] }
 0xcf4   : > { %v12410_v2 = vpack.c.bf16 %v2978_v20, %v2977_v60  ;;  %v3002_v54 = vld [vmem:[#allocation11 + $0x288] sm:$0xff]  ;;  %v14976_v60 = vsub.s32 3, %v14765_v23 }
 0xcf5   : > { %v14973_v21 = vld [vmem:[%s15613_s10] sm:$0xff] }
 0xcf6   : > { %12329 = vmatpush1.bf16.msra.mxu1 %v12328_v4  ;;  %12361 = vmatpush1.bf16.msra.mxu0 %v12360_v25  ;;  %v2962_v4 = vld [vmem:[#allocation11 + $0x148] sm:$0xff]  ;;  %v2947_v25 = vld [vmem:[#allocation11 + $0xd0] sm:$0xff]  ;;  %v2196_v20 = vrot.slane %v14973_v21, %v14768_v24  ;;  %v2208_v63 = vrot.slane %v14973_v21, %v14976_v60 }
 0xcf7   : > { %12363 = vmatprep.subr.bf16.mxu1 %v12362_v6  ;;  %12395 = vmatprep.subr.bf16.mxu0 %v12394_v7  ;;  %v2948_v6 = vld [vmem:[#allocation11 + $0xd8] sm:$0xff]  ;;  %v2979_v7 = vld [vmem:[#allocation11 + $0x1d0] sm:$0xff]  ;;  %v12412_v10 = vpack.c.bf16 %v2962_v4, %v2961_v3  ;;  %v3017_v4 = vld [vmem:[#allocation11 + $0x300] sm:$0xff] }
 0xcf8   : > { %v12382_v13 = vpack.c.bf16 %v2948_v6, %v2947_v25  ;;  %v12414_v14 = vpack.c.bf16 %v2980_v8, %v2979_v7  ;;  %v3018_v25 = vld [vmem:[#allocation11 + $0x308] sm:$0xff]  ;;  %v3003_v6 = vld [vmem:[#allocation11 + $0x290] sm:$0xff] }
 0xcf9   : > { %2800 = vmatmul.mubr.f32.vlgmr.msra.gmra.mrb[24].mxu1 %v14935_v5  ;;  %2877 = vmatmul.mubr.f32.vlgmr.msra.gmra.mrb[26].mxu0 %v14935_v5 }
 0xcfa   : > { %2805 = vmatprep.mubr.f32.mxu1 %v14454_v16  ;;  %2882 = vmatprep.mubr.f32.mxu0 %v14454_v16 }
 0xcfb   : > { %12365 = vmatpush3.bf16.msra.mxu1 %v12364_v17  ;;  %12397 = vmatpush3.bf16.msra.mxu0 %v12396_v18  ;;  %v2964_v17 = vld [vmem:[#allocation11 + $0x158] sm:$0xff]  ;;  %v2949_v18 = vld [vmem:[#allocation11 + $0xe0] sm:$0xff] }
 0xcfc   : > { %12367 = vmatprep.subr.bf16.mxu1 %v12366_v37  ;;  %12399 = vmatprep.subr.bf16.mxu0 %v12398_v47  ;;  %v2982_v37 = vld [vmem:[#allocation11 + $0x1e8] sm:$0xff]  ;;  %v12384_v47 = vpack.c.bf16 %v2932_v12, %v2931_v11  ;;  %v12416_v27 = vpack.c.bf16 %v2964_v17, %v2963_v15  ;;  %v12386_v31 = vpack.c.bf16 %v2950_v49, %v2949_v18  ;;  %v3004_v11 = vld [vmem:[#allocation11 + $0x298] sm:$0xff]  ;;  %v3035_v12 = vld [vmem:[#allocation11 + $0x390] sm:$0xff] }
 0xcfd   : > { %2806 = vmatmul.mubr.f32.gmra.mrb[26].mxu1 %v14940_v22  ;;  %2883 = vmatmul.mubr.f32.gmra.mrb[28].mxu0 %v14940_v22  ;;  %v12418_v32 = vpack.c.bf16 %v2982_v37, %v2981_v19  ;;  %v12460_v18 = vpack.c.bf16 %v3018_v25, %v3017_v4  ;;  %v2987_v49 = vld [vmem:[#allocation11 + $0x210] sm:$0xff] }
 0xcfe   : > { %v2991_v25 = vld [vmem:[#allocation11 + $0x230] sm:$0xff] }
 0xcff   : > { %12369 = vmatpush3.bf16.msra.mxu1 %v12368_v34  ;;  %12401 = vmatpush3.bf16.msra.mxu0 %v12400_v35  ;;  %v2966_v34 = vld [vmem:[#allocation11 + $0x168] sm:$0xff]  ;;  %v2951_v35 = vld [vmem:[#allocation11 + $0xf0] sm:$0xff] }
 0xd00   : > { %12371 = vmatprep.subr.bf16.mxu1 %v12370_v39  ;;  %12403 = vmatprep.subr.bf16.mxu0 %v12402_v41  ;;  %v2984_v39 = vld [vmem:[#allocation11 + $0x1f8] sm:$0xff]  ;;  %v12388_v41 = vpack.c.bf16 %v2934_v30, %v2933_v29  ;;  %v12420_v42 = vpack.c.bf16 %v2966_v34, %v2965_v33  ;;  %v12390_v46 = vpack.c.bf16 %v2952_v36, %v2951_v35 }
 0xd01   : > { %v12422_v50 = vpack.c.bf16 %v2984_v39, %v2983_v38  ;;  %v12430_v29 = vpack.c.bf16 %v3004_v11, %v3003_v6  ;;  %v2992_v6 = vld [vmem:[#allocation11 + $0x238] sm:$0xff]  ;;  %v3009_v11 = vld [vmem:[#allocation11 + $0x2c0] sm:$0xff] }
 0xd03   : > { %12373 = vmatpush3.bf16.msra.mxu1 %v12372_v52  ;;  %12405 = vmatpush3.bf16.msra.mxu0 %v12404_v53  ;;  %v2968_v52 = vld [vmem:[#allocation11 + $0x178] sm:$0xff]  ;;  %v3001_v53 = vld [vmem:[#allocation11 + $0x280] sm:$0xff] }
 0xd04   : > { %12375 = vmatprep.subr.bf16.mxu1 %v12374_v56  ;;  %12407 = vmatprep.subr.bf16.mxu0 %v12406_v57  ;;  %v3034_v56 = vld [vmem:[#allocation11 + $0x388] sm:$0xff]  ;;  %v12392_v57 = vpack.c.bf16 %v2936_v45, %v2935_v43  ;;  %v12424_v58 = vpack.c.bf16 %v2968_v52, %v2967_v51  ;;  %v12426_v59 = vpack.c.bf16 %v3002_v54, %v3001_v53 }
 0xd05   : > { %v12458_v44 = vpack.c.bf16 %v3034_v56, %v3033_v55  ;;  %v3038_v51 = vld [vmem:[#allocation11 + $0x3a8] sm:$0xff]  ;;  %v2989_v56 = vld [vmem:[#allocation11 + $0x220] sm:$0xff] }
 0xd07   : > { %12377 = vmatpush3.bf16.msra.mxu1 %v12376_v61  ;;  %12409 = vmatpush3.bf16.msra.mxu0 %v12408_v62  ;;  %v2204_v61 = vrot.slane %v14973_v21, %v14774_v26  ;;  %v2200_v62 = vrot.slane %v14973_v21, %v14778_v28 }
 0xd08   : > { %12379 = vmatprep.subr.bf16.mxu1 %v12378_v1  ;;  %12411 = vmatprep.subr.bf16.mxu0 %v12410_v2  ;;  %v2986_v1 = vld [vmem:[#allocation11 + $0x208] sm:$0xff] }
 0xd09   : > { %v12428_v17 = vpack.c.bf16 %v2986_v1, %v2985_v0  ;;  %v3008_v0 = vld [vmem:[#allocation11 + $0x2b8] sm:$0xff]  ;;  %v3039_v1 = vld [vmem:[#allocation11 + $0x3b0] sm:$0xff] }
 0xd0b   : > { %12381 = vmatpush3.bf16.msra.mxu1 %v12380_v9  ;;  %12413 = vmatpush3.bf16.msra.mxu0 %v12412_v10 }
 0xd0c   : > { %12383 = vmatprep.subr.bf16.mxu1 %v12382_v13  ;;  %12415 = vmatprep.subr.bf16.mxu0 %v12414_v14  ;;  %v3036_v13 = vld [vmem:[#allocation11 + $0x398] sm:$0xff] }
 0xd0d   : > { %v12462_v30 = vpack.c.bf16 %v3036_v13, %v3035_v12  ;;  %v3010_v12 = vld [vmem:[#allocation11 + $0x2c8] sm:$0xff]  ;;  %v3041_v13 = vld [vmem:[#allocation11 + $0x3c0] sm:$0xff] }
 0xd0f   : > { %12385 = vmatpush3.bf16.msra.mxu1 %v12384_v47  ;;  %12417 = vmatpush3.bf16.msra.mxu0 %v12416_v27 }
 0xd10   : > { %12387 = vmatprep.subr.bf16.mxu1 %v12386_v31  ;;  %12419 = vmatprep.subr.bf16.mxu0 %v12418_v32  ;;  %v2988_v31 = vld [vmem:[#allocation11 + $0x218] sm:$0xff]  ;;  %v3019_v32 = vld [vmem:[#allocation11 + $0x310] sm:$0xff] }
 0xd11   : > { %v12432_v54 = vpack.c.bf16 %v2988_v31, %v2987_v49  ;;  %v2994_v49 = vld [vmem:[#allocation11 + $0x248] sm:$0xff]  ;;  %v3043_v31 = vld [vmem:[#allocation11 + $0x3d0] sm:$0xff] }
 0xd13   : > { %12389 = vmatpush3.bf16.msra.mxu1 %v12388_v41  ;;  %12421 = vmatpush3.bf16.msra.mxu0 %v12420_v42  ;;  %v3020_v41 = vld [vmem:[#allocation11 + $0x318] sm:$0xff]  ;;  %v3005_v42 = vld [vmem:[#allocation11 + $0x2a0] sm:$0xff] }
 0xd14   : > { %12391 = vmatprep.subr.bf16.mxu1 %v12390_v46  ;;  %12423 = vmatprep.subr.bf16.mxu0 %v12422_v50  ;;  %v3006_v46 = vld [vmem:[#allocation11 + $0x2a8] sm:$0xff]  ;;  %v3037_v50 = vld [vmem:[#allocation11 + $0x3a0] sm:$0xff]  ;;  %v12464_v55 = vpack.c.bf16 %v3020_v41, %v3019_v32  ;;  %v3044_v32 = vld [vmem:[#allocation11 + $0x3d8] sm:$0xff] }
 0xd15   : > { %v3027_v41 = vld [vmem:[#allocation11 + $0x350] sm:$0xff] }
 0xd17   : > { %12393 = vmatpush3.bf16.msra.mxu1 %v12392_v57  ;;  %12425 = vmatpush3.bf16.msra.mxu0 %v12424_v58  ;;  %v2990_v57 = vld [vmem:[#allocation11 + $0x228] sm:$0xff] }
 0xd18   : > { %12427 = vmatprep.subr.bf16.mxu1 %v12426_v59  ;;  %12459 = vmatprep.subr.bf16.mxu0 %v12458_v44  ;;  %v12434_v44 = vpack.c.bf16 %v3006_v46, %v3005_v42  ;;  %v3028_v42 = vld [vmem:[#allocation11 + $0x358] sm:$0xff]  ;;  %v3045_v46 = vld [vmem:[#allocation11 + $0x3e0] sm:$0xff] }
 0xd6c   : > { %v2339_v2 = vpop.f32.mrb[12].mxu1  ;;  %v2416_v3 = vpop.f32.mrb[14].mxu0 }
 0xd6d   : > { %v2340_v7 = vadd.f32 %v2339_v2, %v2196_v20  ;;  %v2417_v8 = vadd.f32 %v2416_v3, %v2204_v61  ;;  %v2341_v9 = vpop.f32.mrb[13].mxu1  ;;  %v2418_v10 = vpop.f32.mrb[15].mxu0  ;;  %v3040_v2 = vld [vmem:[#allocation11 + $0x3b8] sm:$0xff]  ;;  %v12436_v3 = vpack.c.bf16 %v2990_v57, %v2989_v56 }
 0xd6e   : > { %v2342_v14 = vadd.f32 %v2341_v9, %v2200_v62  ;;  %v2419_v15 = vadd.f32 %v2418_v10, %v2208_v63  ;;  %v3023_v9 = vld [vmem:[#allocation11 + $0x330] sm:$0xff]  ;;  %v3024_v10 = vld [vmem:[#allocation11 + $0x338] sm:$0xff] }
 0xd6f   : > { %v2889_v33 = vmax.f32 %v2340_v7, 0.0  ;;  %v2891_v34 = vmax.f32 %v2417_v8, 0.0  ;;  %v12470_v8 = vpack.c.bf16 %v3040_v2, %v3039_v1  ;;  %v3048_v1 = vld [vmem:[#allocation11 + $0x3f8] sm:$0xff] }
 0xd70   : > { %v2890_v19 = vmax.f32 %v2342_v14, 0.0  ;;  %v2892_v37 = vmax.f32 %v2419_v15, 0.0  ;;  %v2345_v47 = vpop.f32.mrb[14].mxu1  ;;  %v2422_v27 = vpop.f32.mrb[16].mxu0  ;;  %v3042_v14 = vld [vmem:[#allocation11 + $0x3c8] sm:$0xff]  ;;  %v12440_v15 = vpack.c.bf16 %v2992_v6, %v2991_v25  ;;  %v2999_v25 = vld [vmem:[#allocation11 + $0x270] sm:$0xff] }
 0xd71   : > { %v2346_v35 = vadd.f32 %v2345_v47, %v2196_v20  ;;  %v2423_v36 = vadd.f32 %v2422_v27, %v2204_v61  ;;  %v2347_v38 = vpop.f32.mrb[15].mxu1  ;;  %v2424_v39 = vpop.f32.mrb[17].mxu0  ;;  %v12466_v20 = vpack.c.bf16 %v3038_v51, %v3037_v50  ;;  %v3021_v61 = vld [vmem:[#allocation11 + $0x320] sm:$0xff]  ;;  %v3026_v27 = vld [vmem:[#allocation11 + $0x348] sm:$0xff]  ;;  %v3000_v6 = vld [vmem:[#allocation11 + $0x278] sm:$0xff] }
 0xd72   : > { %v2348_v43 = vadd.f32 %v2347_v38, %v2200_v62  ;;  %v2425_v45 = vadd.f32 %v2424_v39, %v2208_v63  ;;  %3248 = vmatprep.mubr.f32.mxu1 %v2890_v19  ;;  %3323 = vmatprep.mubr.f32.mxu0 %v2892_v37  ;;  %v3022_v62 = vld [vmem:[#allocation11 + $0x328] sm:$0xff]  ;;  %v3007_v63 = vld [vmem:[#allocation11 + $0x2b0] sm:$0xff]  ;;  %v12442_v19 = vpack.c.bf16 %v3010_v12, %v3009_v11  ;;  %v3025_v47 = vld [vmem:[#allocation11 + $0x340] sm:$0xff] }
 0xd73   : > { %3249 = vmatmul.mubr.f32.vlgmr.msra.gmra.mrb[28].mxu1 %v2889_v33  ;;  %3324 = vmatmul.mubr.f32.vlgmr.msra.gmra.mrb[30].mxu0 %v2891_v34  ;;  %v2905_v58 = vmax.f32 %v2346_v35, 0.0  ;;  %v2907_v59 = vmax.f32 %v2423_v36, 0.0  ;;  %v12468_v4 = vpack.c.bf16 %v3022_v62, %v3021_v61  ;;  %v12438_v7 = vpack.c.bf16 %v3008_v0, %v3007_v63  ;;  %v2995_v35 = vld [vmem:[#allocation11 + $0x250] sm:$0xff]  ;;  %v2996_v36 = vld [vmem:[#allocation11 + $0x258] sm:$0xff]  ;;  %v3046_v50 = vld [vmem:[#allocation11 + $0x3e8] sm:$0xff] }
 0xd74   : > { %v2906_v52 = vmax.f32 %v2348_v43, 0.0  ;;  %v2908_v53 = vmax.f32 %v2425_v45, 0.0  ;;  %12429 = vmatpush3.bf16.msra.mxu1 %v12428_v17  ;;  %12461 = vmatpush3.bf16.msra.mxu0 %v12460_v18  ;;  %v12472_v17 = vpack.c.bf16 %v3024_v10, %v3023_v9  ;;  %v2993_v18 = vld [vmem:[#allocation11 + $0x240] sm:$0xff]  ;;  %v12474_v37 = vpack.c.bf16 %v3042_v14, %v3041_v13  ;;  %v3014_v45 = vld [vmem:[#allocation11 + $0x2e8] sm:$0xff]  ;;  %v3016_v63 = vld [vmem:[#allocation11 + $0x2f8] sm:$0xff] }
 0xd75   : > { %12431 = vmatprep.subr.bf16.mxu1 %v12430_v29  ;;  %12463 = vmatprep.subr.bf16.mxu0 %v12462_v30  ;;  %v3011_v29 = vld [vmem:[#allocation11 + $0x2d0] sm:$0xff]  ;;  %v3012_v30 = vld [vmem:[#allocation11 + $0x2d8] sm:$0xff]  ;;  %v12444_v33 = vpack.c.bf16 %v2994_v49, %v2993_v18  ;;  %v12476_v34 = vpack.c.bf16 %v3026_v27, %v3025_v47  ;;  %v12478_v39 = vpack.c.bf16 %v3044_v32, %v3043_v31  ;;  %v3013_v43 = vld [vmem:[#allocation11 + $0x2e0] sm:$0xff]  ;;  %v14993_v61 = vsub.s32 5, %v14765_v23 }
 0xd76   : > { %3253 = vmatprep.mubr.f32.mxu1 %v2906_v52  ;;  %3328 = vmatprep.mubr.f32.mxu0 %v2908_v53  ;;  %v12446_v38 = vpack.c.bf16 %v3012_v30, %v3011_v29  ;;  %v12448_v51 = vpack.c.bf16 %v2996_v36, %v2995_v35  ;;  %v12480_v52 = vpack.c.bf16 %v3028_v42, %v3027_v41  ;;  %v14987_v53 = vsub.s32 4, %v14765_v23  ;;  %v3047_v0 = vld [vmem:[#allocation11 + $0x3f0] sm:$0xff]  ;;  %v3032_v10 = vld [vmem:[#allocation11 + $0x378] sm:$0xff]  ;;  %v3065_v11 = vld [vmem:[#allocation11 + $0x480] sm:$0xff] }
 0xd77   : > { %3254 = vmatmul.mubr.f32.gmra.mrb[30].mxu1 %v2905_v58  ;;  %3329 = vmatmul.mubr.f32.gmra.mrb[32].mxu0 %v2907_v59  ;;  %v12450_v56 = vpack.c.bf16 %v3014_v45, %v3013_v43  ;;  %v12482_v57 = vpack.c.bf16 %v3046_v50, %v3045_v46  ;;  %v14990_v58 = vsub.s32 6, %v14765_v23  ;;  %v3029_v59 = vld [vmem:[#allocation11 + $0x360] sm:$0xff]  ;;  %v14996_v62 = vsub.s32 7, %v14765_v23  ;;  %v3066_v12 = vld [vmem:[#allocation11 + $0x488] sm:$0xff]  ;;  %v3067_v32 = vld [vmem:[#allocation11 + $0x490] sm:$0xff] }
 0xd78   : > { %12433 = vmatpush3.bf16.msra.mxu1 %v12432_v54  ;;  %12465 = vmatpush3.bf16.msra.mxu0 %v12464_v55  ;;  %v2997_v54 = vld [vmem:[#allocation11 + $0x260] sm:$0xff]  ;;  %v2998_v55 = vld [vmem:[#allocation11 + $0x268] sm:$0xff]  ;;  %v2212_v2 = vrot.slane %v14973_v21, %v14987_v53  ;;  %v12486_v9 = vpack.c.bf16 %v3048_v1, %v3047_v0  ;;  %v2216_v13 = vrot.slane %v14973_v21, %v14993_v61  ;;  %v3100_v41 = vld [vmem:[#allocation11 + $0x598] sm:$0xff] }
 0xd79   : > { %12435 = vmatprep.subr.bf16.mxu1 %v12434_v44  ;;  %12467 = vmatprep.subr.bf16.mxu0 %v12466_v20  ;;  %v3030_v44 = vld [vmem:[#allocation11 + $0x368] sm:$0xff]  ;;  %v3015_v20 = vld [vmem:[#allocation11 + $0x2f0] sm:$0xff]  ;;  %v2224_v14 = vrot.slane %v14973_v21, %v14996_v62  ;;  %v3049_v18 = vld [vmem:[#allocation11 + $0x400] sm:$0xff]  ;;  %v12456_v47 = vpack.c.bf16 %v3000_v6, %v2999_v25  ;;  %v12490_v29 = vpack.c.bf16 %v3066_v12, %v3065_v11 }
 0xd7a   : > { %v12454_v23 = vpack.c.bf16 %v3016_v63, %v3015_v20  ;;  %v3050_v49 = vld [vmem:[#allocation11 + $0x408] sm:$0xff]  ;;  %v3081_v30 = vld [vmem:[#allocation11 + $0x500] sm:$0xff]  ;;  %v3051_v50 = vld [vmem:[#allocation11 + $0x410] sm:$0xff] }
 0xd7b   : > { %v3082_v31 = vld [vmem:[#allocation11 + $0x508] sm:$0xff]  ;;  %v12492_v45 = vpack.c.bf16 %v3050_v49, %v3049_v18  ;;  %v3084_v25 = vld [vmem:[#allocation11 + $0x518] sm:$0xff]  ;;  %v3069_v6 = vld [vmem:[#allocation11 + $0x4a0] sm:$0xff] }
 0xd7c   : > { %12437 = vmatpush3.bf16.msra.mxu1 %v12436_v3  ;;  %12469 = vmatpush3.bf16.msra.mxu0 %v12468_v4  ;;  %v12452_v3 = vpack.c.bf16 %v2998_v55, %v2997_v54  ;;  %v12484_v4 = vpack.c.bf16 %v3030_v44, %v3029_v59  ;;  %v12524_v46 = vpack.c.bf16 %v3082_v31, %v3081_v30  ;;  %v3052_v59 = vld [vmem:[#allocation11 + $0x418] sm:$0xff]  ;;  %v3083_v44 = vld [vmem:[#allocation11 + $0x510] sm:$0xff]  ;;  %v3102_v11 = vld [vmem:[#allocation11 + $0x5a8] sm:$0xff] }
 0xd7d   : > { %12439 = vmatprep.subr.bf16.mxu1 %v12438_v7  ;;  %12471 = vmatprep.subr.bf16.mxu0 %v12470_v8  ;;  %v3031_v7 = vld [vmem:[#allocation11 + $0x370] sm:$0xff]  ;;  %v2220_v8 = vrot.slane %v14973_v21, %v14990_v58  ;;  %v3054_v18 = vld [vmem:[#allocation11 + $0x428] sm:$0xff]  ;;  %v3104_v31 = vld [vmem:[#allocation11 + $0x5b8] sm:$0xff] }
 0xd7e   : > { %v12488_v27 = vpack.c.bf16 %v3032_v10, %v3031_v7  ;;  %v3101_v10 = vld [vmem:[#allocation11 + $0x5a0] sm:$0xff]  ;;  %v3103_v30 = vld [vmem:[#allocation11 + $0x5b0] sm:$0xff] }
 0xd80   : > { %12441 = vmatpush3.bf16.msra.mxu1 %v12440_v15  ;;  %12473 = vmatpush3.bf16.msra.mxu0 %v12472_v17  ;;  %v3097_v15 = vld [vmem:[#allocation11 + $0x580] sm:$0xff]  ;;  %v3098_v17 = vld [vmem:[#allocation11 + $0x588] sm:$0xff] }
 0xd81   : > { %12443 = vmatprep.subr.bf16.mxu1 %v12442_v19  ;;  %12475 = vmatprep.subr.bf16.mxu0 %v12474_v37  ;;  %v12522_v21 = vpack.c.bf16 %v3098_v17, %v3097_v15  ;;  %v3053_v17 = vld [vmem:[#allocation11 + $0x420] sm:$0xff] }
 0xd84   : > { %12445 = vmatpush3.bf16.msra.mxu1 %v12444_v33  ;;  %12477 = vmatpush3.bf16.msra.mxu0 %v12476_v34 }
 0xd85   : > { %12447 = vmatprep.subr.bf16.mxu1 %v12446_v38  ;;  %12479 = vmatprep.subr.bf16.mxu0 %v12478_v39  ;;  %v3068_v38 = vld [vmem:[#allocation11 + $0x498] sm:$0xff]  ;;  %v3099_v39 = vld [vmem:[#allocation11 + $0x590] sm:$0xff] }
 0xd88   : > { %12449 = vmatpush3.bf16.msra.mxu1 %v12448_v51  ;;  %12481 = vmatpush3.bf16.msra.mxu0 %v12480_v52 }
 0xd89   : > { %12451 = vmatprep.subr.bf16.mxu1 %v12450_v56  ;;  %12483 = vmatprep.subr.bf16.mxu0 %v12482_v57  ;;  %v12494_v56 = vpack.c.bf16 %v3068_v38, %v3067_v32  ;;  %v12526_v57 = vpack.c.bf16 %v3100_v41, %v3099_v39  ;;  %v12500_v32 = vpack.c.bf16 %v3054_v18, %v3053_v17  ;;  %v3087_v38 = vld [vmem:[#allocation11 + $0x530] sm:$0xff]  ;;  %v3088_v39 = vld [vmem:[#allocation11 + $0x538] sm:$0xff]  ;;  %v3073_v41 = vld [vmem:[#allocation11 + $0x4c0] sm:$0xff] }
 0xd8a   : > { %v3061_v17 = vld [vmem:[#allocation11 + $0x460] sm:$0xff]  ;;  %v3062_v18 = vld [vmem:[#allocation11 + $0x468] sm:$0xff] }
 0xd8c   : > { %v2493_v19 = vpop.f32.mrb[16].mxu1  ;;  %v2570_v37 = vpop.f32.mrb[18].mxu0  ;;  %12453 = vmatpush3.bf16.msra.mxu1 %v12452_v3  ;;  %12485 = vmatpush3.bf16.msra.mxu0 %v12484_v4 }
 0xd8d   : > { %v2494_v33 = vadd.f32 %v2493_v19, %v2212_v2  ;;  %v2571_v34 = vadd.f32 %v2570_v37, %v2220_v8  ;;  %v2495_v35 = vpop.f32.mrb[17].mxu1  ;;  %v2572_v36 = vpop.f32.mrb[19].mxu0  ;;  %12455 = vmatprep.subr.bf16.mxu1 %v12454_v23  ;;  %12487 = vmatprep.subr.bf16.mxu0 %v12486_v9  ;;  %v3070_v9 = vld [vmem:[#allocation11 + $0x4a8] sm:$0xff]  ;;  %v3085_v37 = vld [vmem:[#allocation11 + $0x520] sm:$0xff] }
 0xd8e   : > { %v2496_v42 = vadd.f32 %v2495_v35, %v2216_v13  ;;  %v2573_v43 = vadd.f32 %v2572_v36, %v2224_v14  ;;  %v3056_v35 = vld [vmem:[#allocation11 + $0x438] sm:$0xff] }
 0xd8f   : > { %v2893_v20 = vmax.f32 %v2494_v33, 0.0  ;;  %v2895_v63 = vmax.f32 %v2571_v34, 0.0  ;;  %v3055_v34 = vld [vmem:[#allocation11 + $0x430] sm:$0xff] }
 0xd90   : > { %v2894_v51 = vmax.f32 %v2496_v42, 0.0  ;;  %v2896_v52 = vmax.f32 %v2573_v43, 0.0  ;;  %v2499_v54 = vpop.f32.mrb[18].mxu1  ;;  %v2576_v55 = vpop.f32.mrb[20].mxu0  ;;  %12457 = vmatpush3.bf16.msra.mxu1 %v12456_v47  ;;  %12489 = vmatpush3.bf16.msra.mxu0 %v12488_v27  ;;  %v3086_v47 = vld [vmem:[#allocation11 + $0x528] sm:$0xff]  ;;  %v3071_v27 = vld [vmem:[#allocation11 + $0x4b0] sm:$0xff] }
 0xd91   : > { %v2500_v0 = vadd.f32 %v2499_v54, %v2212_v2  ;;  %v2577_v1 = vadd.f32 %v2576_v55, %v2220_v8  ;;  %v2501_v3 = vpop.f32.mrb[19].mxu1  ;;  %v2578_v4 = vpop.f32.mrb[21].mxu0  ;;  %12491 = vmatprep.subr.bf16.mxu1 %v12490_v29  ;;  %12523 = vmatprep.subr.bf16.mxu0 %v12522_v21  ;;  %v12496_v2 = vpack.c.bf16 %v3052_v59, %v3051_v50  ;;  %v3072_v29 = vld [vmem:[#allocation11 + $0x4b8] sm:$0xff]  ;;  %v3074_v42 = vld [vmem:[#allocation11 + $0x4c8] sm:$0xff]  ;;  %v3105_v43 = vld [vmem:[#allocation11 + $0x5c0] sm:$0xff] }
 0xd92   : > { %v2502_v7 = vadd.f32 %v2501_v3, %v2216_v13  ;;  %v2579_v23 = vadd.f32 %v2578_v4, %v2224_v14  ;;  %3398 = vmatprep.mubr.f32.mxu1 %v2894_v51  ;;  %3473 = vmatprep.mubr.f32.mxu0 %v2896_v52  ;;  %v12528_v8 = vpack.c.bf16 %v3084_v25, %v3083_v44  ;;  %v3057_v51 = vld [vmem:[#allocation11 + $0x440] sm:$0xff]  ;;  %v3058_v52 = vld [vmem:[#allocation11 + $0x448] sm:$0xff]  ;;  %v3075_v59 = vld [vmem:[#allocation11 + $0x4d0] sm:$0xff] }
 0xd93   : > { %3399 = vmatmul.mubr.f32.vlgmr.msra.gmra.mrb[32].mxu1 %v2893_v20  ;;  %3474 = vmatmul.mubr.f32.vlgmr.msra.gmra.mrb[34].mxu0 %v2895_v63  ;;  %v2909_v49 = vmax.f32 %v2500_v0, 0.0  ;;  %v2911_v19 = vmax.f32 %v2577_v1, 0.0  ;;  %v12498_v13 = vpack.c.bf16 %v3070_v9, %v3069_v6  ;;  %v12530_v14 = vpack.c.bf16 %v3102_v11, %v3101_v10  ;;  %v3076_v44 = vld [vmem:[#allocation11 + $0x4d8] sm:$0xff]  ;;  %v3107_v20 = vld [vmem:[#allocation11 + $0x5d0] sm:$0xff]  ;;  %v3077_v9 = vld [vmem:[#allocation11 + $0x4e0] sm:$0xff] }
 0xd94   : > { %v2910_v12 = vmax.f32 %v2502_v7, 0.0  ;;  %v2912_v15 = vmax.f32 %v2579_v23, 0.0  ;;  %12493 = vmatpush3.bf16.msra.mxu1 %v12492_v45  ;;  %12525 = vmatpush3.bf16.msra.mxu0 %v12524_v46  ;;  %v12532_v33 = vpack.c.bf16 %v3086_v47, %v3085_v37  ;;  %v12502_v36 = vpack.c.bf16 %v3072_v29, %v3071_v27  ;;  %v3106_v45 = vld [vmem:[#allocation11 + $0x5c8] sm:$0xff]  ;;  %v3108_v63 = vld [vmem:[#allocation11 + $0x5d8] sm:$0xff]  ;;  %v3059_v3 = vld [vmem:[#allocation11 + $0x450] sm:$0xff] }
 0xd95   : > { %12495 = vmatprep.subr.bf16.mxu1 %v12494_v56  ;;  %12527 = vmatprep.subr.bf16.mxu0 %v12526_v57  ;;  %v12534_v21 = vpack.c.bf16 %v3104_v31, %v3103_v30  ;;  %v12504_v46 = vpack.c.bf16 %v3056_v35, %v3055_v34  ;;  %v12536_v50 = vpack.c.bf16 %v3088_v39, %v3087_v38  ;;  %v3089_v56 = vld [vmem:[#allocation11 + $0x540] sm:$0xff]  ;;  %v3090_v57 = vld [vmem:[#allocation11 + $0x548] sm:$0xff]  ;;  %v3060_v4 = vld [vmem:[#allocation11 + $0x458] sm:$0xff] }
 0xd96   : > { %3403 = vmatprep.mubr.f32.mxu1 %v2910_v12  ;;  %3478 = vmatprep.mubr.f32.mxu0 %v2912_v15  ;;  %v12506_v54 = vpack.c.bf16 %v3074_v42, %v3073_v41  ;;  %v12538_v55 = vpack.c.bf16 %v3106_v45, %v3105_v43  ;;  %v12508_v0 = vpack.c.bf16 %v3058_v52, %v3057_v51  ;;  %v3091_v7 = vld [vmem:[#allocation11 + $0x550] sm:$0xff]  ;;  %v3092_v23 = vld [vmem:[#allocation11 + $0x558] sm:$0xff]  ;;  %v3078_v10 = vld [vmem:[#allocation11 + $0x4e8] sm:$0xff] }
 0xd97   : > { %3404 = vmatmul.mubr.f32.gmra.mrb[34].mxu1 %v2909_v49  ;;  %3479 = vmatmul.mubr.f32.gmra.mrb[36].mxu0 %v2911_v19  ;;  %v12540_v1 = vpack.c.bf16 %v3090_v57, %v3089_v56  ;;  %v12510_v25 = vpack.c.bf16 %v3076_v44, %v3075_v59  ;;  %v12542_v6 = vpack.c.bf16 %v3108_v63, %v3107_v20  ;;  %v3109_v11 = vld [vmem:[#allocation11 + $0x5e0] sm:$0xff]  ;;  %v3110_v12 = vld [vmem:[#allocation11 + $0x5e8] sm:$0xff]  ;;  %v3079_v37 = vld [vmem:[#allocation11 + $0x4f0] sm:$0xff] }
 0xd98   : > { %12497 = vmatpush3.bf16.msra.mxu1 %v12496_v2  ;;  %12529 = vmatpush3.bf16.msra.mxu0 %v12528_v8  ;;  %v12512_v15 = vpack.c.bf16 %v3060_v4, %v3059_v3  ;;  %v12544_v2 = vpack.c.bf16 %v3092_v23, %v3091_v7  ;;  %v15009_v8 = vld [vmem:[%s15613_s10 + $0x8] sm:$0xff]  ;;  %v12514_v49 = vpack.c.bf16 %v3078_v10, %v3077_v9  ;;  %v3129_v41 = vld [vmem:[#allocation11 + $0x680] sm:$0xff]  ;;  %v3130_v42 = vld [vmem:[#allocation11 + $0x688] sm:$0xff] }
 0xd99   : > { %12499 = vmatprep.subr.bf16.mxu1 %v12498_v13  ;;  %12531 = vmatprep.subr.bf16.mxu0 %v12530_v14  ;;  %v12546_v19 = vpack.c.bf16 %v3110_v12, %v3109_v11  ;;  %v3093_v13 = vld [vmem:[#allocation11 + $0x560] sm:$0xff]  ;;  %v3094_v14 = vld [vmem:[#allocation11 + $0x568] sm:$0xff]  ;;  %v3080_v47 = vld [vmem:[#allocation11 + $0x4f8] sm:$0xff]  ;;  %v2228_v30 = vrot.slane %v15009_v8, %v14768_v24  ;;  %v12516_v31 = vpack.c.bf16 %v3062_v18, %v3061_v17 }
 0xd9a   : > { %v3111_v27 = vld [vmem:[#allocation11 + $0x5f0] sm:$0xff]  ;;  %v3112_v29 = vld [vmem:[#allocation11 + $0x5f8] sm:$0xff]  ;;  %v2232_v43 = vrot.slane %v15009_v8, %v14778_v28  ;;  %v2240_v45 = vrot.slane %v15009_v8, %v14976_v60  ;;  %v3113_v51 = vld [vmem:[#allocation11 + $0x600] sm:$0xff]  ;;  %v12554_v59 = vpack.c.bf16 %v3130_v42, %v3129_v41 }
 0xd9b   : > { %v3064_v34 = vld [vmem:[#allocation11 + $0x478] sm:$0xff]  ;;  %v3095_v35 = vld [vmem:[#allocation11 + $0x570] sm:$0xff]  ;;  %v12550_v38 = vpack.c.bf16 %v3112_v29, %v3111_v27  ;;  %v3114_v52 = vld [vmem:[#allocation11 + $0x608] sm:$0xff] }
 0xd9c   : > { %12501 = vmatpush3.bf16.msra.mxu1 %v12500_v32  ;;  %12533 = vmatpush3.bf16.msra.mxu0 %v12532_v33  ;;  %v12548_v32 = vpack.c.bf16 %v3094_v14, %v3093_v13  ;;  %v3063_v33 = vld [vmem:[#allocation11 + $0x470] sm:$0xff]  ;;  %v3096_v39 = vld [vmem:[#allocation11 + $0x578] sm:$0xff]  ;;  %v3145_v44 = vld [vmem:[#allocation11 + $0x700] sm:$0xff]  ;;  %v12556_v11 = vpack.c.bf16 %v3114_v52, %v3113_v51 }
 0xd9d   : > { %12503 = vmatprep.subr.bf16.mxu1 %v12502_v36  ;;  %12535 = vmatprep.subr.bf16.mxu0 %v12534_v21  ;;  %v2236_v36 = vrot.slane %v15009_v8, %v14774_v26  ;;  %v12518_v21 = vpack.c.bf16 %v3080_v47, %v3079_v37  ;;  %v12520_v56 = vpack.c.bf16 %v3064_v34, %v3063_v33  ;;  %v3146_v20 = vld [vmem:[#allocation11 + $0x708] sm:$0xff]  ;;  %v3131_v63 = vld [vmem:[#allocation11 + $0x690] sm:$0xff]  ;;  %v3164_v23 = vld [vmem:[#allocation11 + $0x798] sm:$0xff] }
 0xd9e   : > { %v12552_v57 = vpack.c.bf16 %v3096_v39, %v3095_v35  ;;  %v3163_v7 = vld [vmem:[#allocation11 + $0x790] sm:$0xff]  ;;  %v12588_v12 = vpack.c.bf16 %v3146_v20, %v3145_v44  ;;  %v3116_v14 = vld [vmem:[#allocation11 + $0x618] sm:$0xff]  ;;  %v3133_v35 = vld [vmem:[#allocation11 + $0x6a0] sm:$0xff] }
 0xd9f   : > { %v12590_v13 = vpack.c.bf16 %v3164_v23, %v3163_v7  ;;  %v3147_v37 = vld [vmem:[#allocation11 + $0x710] sm:$0xff]  ;;  %v3148_v34 = vld [vmem:[#allocation11 + $0x718] sm:$0xff]  ;;  %v3134_v39 = vld [vmem:[#allocation11 + $0x6a8] sm:$0xff] }
 0xda0   : > { %12505 = vmatpush3.bf16.msra.mxu1 %v12504_v46  ;;  %12537 = vmatpush3.bf16.msra.mxu0 %v12536_v50  ;;  %v3161_v46 = vld [vmem:[#allocation11 + $0x780] sm:$0xff]  ;;  %v3162_v50 = vld [vmem:[#allocation11 + $0x788] sm:$0xff]  ;;  %v3136_v44 = vld [vmem:[#allocation11 + $0x6b8] sm:$0xff] }
 0xda1   : > { %12507 = vmatprep.subr.bf16.mxu1 %v12506_v54  ;;  %12539 = vmatprep.subr.bf16.mxu0 %v12538_v55  ;;  %v3165_v41 = vld [vmem:[#allocation11 + $0x7a0] sm:$0xff]  ;;  %v3166_v42 = vld [vmem:[#allocation11 + $0x7a8] sm:$0xff]  ;;  %v3167_v20 = vld [vmem:[#allocation11 + $0x7b0] sm:$0xff] }
 0xda2   : > { %v3117_v51 = vld [vmem:[#allocation11 + $0x620] sm:$0xff]  ;;  %v3118_v52 = vld [vmem:[#allocation11 + $0x628] sm:$0xff]  ;;  %v3151_v7 = vld [vmem:[#allocation11 + $0x730] sm:$0xff] }
 0xda3   : > { %v3152_v23 = vld [vmem:[#allocation11 + $0x738] sm:$0xff] }
 0xda4   : > { %12509 = vmatpush3.bf16.msra.mxu1 %v12508_v0  ;;  %12541 = vmatpush3.bf16.msra.mxu0 %v12540_v1 }
 0xda5   : > { %12511 = vmatprep.subr.bf16.mxu1 %v12510_v25  ;;  %12543 = vmatprep.subr.bf16.mxu0 %v12542_v6  ;;  %v12586_v25 = vpack.c.bf16 %v3162_v50, %v3161_v46  ;;  %v3132_v6 = vld [vmem:[#allocation11 + $0x698] sm:$0xff] }
 0xda8   : > { %12513 = vmatpush3.bf16.msra.mxu1 %v12512_v15  ;;  %12545 = vmatpush3.bf16.msra.mxu0 %v12544_v2  ;;  %v3115_v15 = vld [vmem:[#allocation11 + $0x610] sm:$0xff] }
 0xda9   : > { %12515 = vmatprep.subr.bf16.mxu1 %v12514_v49  ;;  %12547 = vmatprep.subr.bf16.mxu0 %v12546_v19  ;;  %v12558_v19 = vpack.c.bf16 %v3132_v6, %v3131_v63  ;;  %v3168_v63 = vld [vmem:[#allocation11 + $0x7b8] sm:$0xff] }
 0xdaa   : > { %v12598_v6 = vpack.c.bf16 %v3168_v63, %v3167_v20  ;;  %v2244_v20 = vrot.slane %v15009_v8, %v14987_v53 }
 0xdac   : > { %v2647_v54 = vpop.f32.mrb[20].mxu1  ;;  %v2724_v55 = vpop.f32.mrb[22].mxu0  ;;  %12517 = vmatpush3.bf16.msra.mxu1 %v12516_v31  ;;  %12549 = vmatpush3.bf16.msra.mxu0 %v12548_v32 }
 0xdad   : > { %v2648_v0 = vadd.f32 %v2647_v54, %v2228_v30  ;;  %v2725_v1 = vadd.f32 %v2724_v55, %v2236_v36  ;;  %v2649_v3 = vpop.f32.mrb[21].mxu1  ;;  %v2726_v4 = vpop.f32.mrb[23].mxu0  ;;  %12519 = vmatprep.subr.bf16.mxu1 %v12518_v21  ;;  %12551 = vmatprep.subr.bf16.mxu0 %v12550_v38 }
 0xdae   : > { %v2650_v9 = vadd.f32 %v2649_v3, %v2232_v43  ;;  %v2727_v10 = vadd.f32 %v2726_v4, %v2240_v45  ;;  %v3119_v3 = vld [vmem:[#allocation11 + $0x630] sm:$0xff]  ;;  %v3120_v4 = vld [vmem:[#allocation11 + $0x638] sm:$0xff] }
 0xdaf   : > { %v2897_v47 = vmax.f32 %v2648_v0, 0.0  ;;  %v2899_v27 = vmax.f32 %v2725_v1, 0.0  ;;  %v12564_v0 = vpack.c.bf16 %v3118_v52, %v3117_v51  ;;  %v3125_v51 = vld [vmem:[#allocation11 + $0x660] sm:$0xff]  ;;  %v3126_v52 = vld [vmem:[#allocation11 + $0x668] sm:$0xff] }
 0xdb0   : > { %v2898_v2 = vmax.f32 %v2650_v9, 0.0  ;;  %v2900_v17 = vmax.f32 %v2727_v10, 0.0  ;;  %v2653_v18 = vpop.f32.mrb[22].mxu1  ;;  %v2730_v49 = vpop.f32.mrb[24].mxu0  ;;  %12521 = vmatpush3.bf16.msra.mxu1 %v12520_v56  ;;  %12553 = vmatpush3.bf16.msra.mxu0 %v12552_v57  ;;  %v3149_v56 = vld [vmem:[#allocation11 + $0x720] sm:$0xff]  ;;  %v3150_v57 = vld [vmem:[#allocation11 + $0x728] sm:$0xff]  ;;  %v12580_v63 = vpack.c.bf16 %v3126_v52, %v3125_v51 }
 0xdb1   : > { %v2654_v29 = vadd.f32 %v2653_v18, %v2228_v30  ;;  %v2731_v31 = vadd.f32 %v2730_v49, %v2236_v36  ;;  %v2655_v32 = vpop.f32.mrb[23].mxu1  ;;  %v2732_v33 = vpop.f32.mrb[25].mxu0  ;;  %12555 = vmatprep.subr.bf16.mxu1 %v12554_v59  ;;  %12587 = vmatprep.subr.bf16.mxu0 %v12586_v25  ;;  %v12560_v30 = vpack.c.bf16 %v3116_v14, %v3115_v15  ;;  %v3135_v59 = vld [vmem:[#allocation11 + $0x6b0] sm:$0xff]  ;;  %v3137_v9 = vld [vmem:[#allocation11 + $0x6c0] sm:$0xff]  ;;  %v3138_v10 = vld [vmem:[#allocation11 + $0x6c8] sm:$0xff] }
 0xdb2   : > { %v2656_v21 = vadd.f32 %v2655_v32, %v2232_v43  ;;  %v2733_v38 = vadd.f32 %v2732_v33, %v2240_v45  ;;  %3548 = vmatprep.mubr.f32.mxu1 %v2898_v2  ;;  %3623 = vmatprep.mubr.f32.mxu0 %v2900_v17  ;;  %v12592_v36 = vpack.c.bf16 %v3148_v34, %v3147_v37  ;;  %v3121_v17 = vld [vmem:[#allocation11 + $0x640] sm:$0xff]  ;;  %v3122_v18 = vld [vmem:[#allocation11 + $0x648] sm:$0xff]  ;;  %v3139_v37 = vld [vmem:[#allocation11 + $0x6d0] sm:$0xff] }
 0xdb3   : > { %3549 = vmatmul.mubr.f32.vlgmr.msra.gmra.mrb[36].mxu1 %v2897_v47  ;;  %3624 = vmatmul.mubr.f32.vlgmr.msra.gmra.mrb[38].mxu0 %v2899_v27  ;;  %v2913_v54 = vmax.f32 %v2654_v29, 0.0  ;;  %v2915_v55 = vmax.f32 %v2731_v31, 0.0  ;;  %v12562_v43 = vpack.c.bf16 %v3134_v39, %v3133_v35  ;;  %v12594_v45 = vpack.c.bf16 %v3166_v42, %v3165_v41  ;;  %v3154_v14 = vld [vmem:[#allocation11 + $0x748] sm:$0xff]  ;;  %v3140_v47 = vld [vmem:[#allocation11 + $0x6d8] sm:$0xff]  ;;  %v3171_v27 = vld [vmem:[#allocation11 + $0x7d0] sm:$0xff] }
 0xdb4   : > { %v2914_v46 = vmax.f32 %v2656_v21, 0.0  ;;  %v2916_v50 = vmax.f32 %v2733_v38, 0.0  ;;  %12557 = vmatpush3.bf16.msra.mxu1 %v12556_v11  ;;  %12589 = vmatpush3.bf16.msra.mxu0 %v12588_v12  ;;  %v12596_v1 = vpack.c.bf16 %v3150_v57, %v3149_v56  ;;  %v12566_v25 = vpack.c.bf16 %v3136_v44, %v3135_v59  ;;  %v3169_v11 = vld [vmem:[#allocation11 + $0x7c0] sm:$0xff]  ;;  %v3170_v12 = vld [vmem:[#allocation11 + $0x7c8] sm:$0xff]  ;;  %v3172_v29 = vld [vmem:[#allocation11 + $0x7d8] sm:$0xff] }
 0xdb5   : > { %12559 = vmatprep.subr.bf16.mxu1 %v12558_v19  ;;  %12591 = vmatprep.subr.bf16.mxu0 %v12590_v13  ;;  %v12568_v15 = vpack.c.bf16 %v3120_v4, %v3119_v3  ;;  %v12600_v2 = vpack.c.bf16 %v3152_v23, %v3151_v7  ;;  %v12570_v49 = vpack.c.bf16 %v3138_v10, %v3137_v9  ;;  %v3153_v13 = vld [vmem:[#allocation11 + $0x740] sm:$0xff]  ;;  %v3123_v33 = vld [vmem:[#allocation11 + $0x650] sm:$0xff]  ;;  %v3124_v34 = vld [vmem:[#allocation11 + $0x658] sm:$0xff] }
 0xdb6   : > { %3553 = vmatprep.mubr.f32.mxu1 %v2914_v46  ;;  %3628 = vmatprep.mubr.f32.mxu0 %v2916_v50  ;;  %v12602_v19 = vpack.c.bf16 %v3170_v12, %v3169_v11  ;;  %v12572_v31 = vpack.c.bf16 %v3122_v18, %v3121_v17  ;;  %v12604_v32 = vpack.c.bf16 %v3154_v14, %v3153_v13  ;;  %v3155_v38 = vld [vmem:[#allocation11 + $0x750] sm:$0xff]  ;;  %v3156_v39 = vld [vmem:[#allocation11 + $0x758] sm:$0xff]  ;;  %v3141_v41 = vld [vmem:[#allocation11 + $0x6e0] sm:$0xff] }
 0xdb7   : > { %3554 = vmatmul.mubr.f32.gmra.mrb[38].mxu1 %v2913_v54  ;;  %3629 = vmatmul.mubr.f32.gmra.mrb[40].mxu0 %v2915_v55  ;;  %v12574_v35 = vpack.c.bf16 %v3140_v47, %v3139_v37  ;;  %v12606_v21 = vpack.c.bf16 %v3172_v29, %v3171_v27  ;;  %v3142_v42 = vld [vmem:[#allocation11 + $0x6e8] sm:$0xff]  ;;  %v3173_v46 = vld [vmem:[#allocation11 + $0x7e0] sm:$0xff]  ;;  %v3143_v56 = vld [vmem:[#allocation11 + $0x6f0] sm:$0xff]  ;;  %v2252_v3 = vrot.slane %v15009_v8, %v14990_v58 }
 0xdb8   : > { %12561 = vmatpush3.bf16.msra.mxu1 %v12560_v30  ;;  %12593 = vmatpush3.bf16.msra.mxu0 %v12592_v36  ;;  %v3174_v50 = vld [vmem:[#allocation11 + $0x7e8] sm:$0xff]  ;;  %v12576_v30 = vpack.c.bf16 %v3124_v34, %v3123_v33  ;;  %v12608_v36 = vpack.c.bf16 %v3156_v39, %v3155_v38  ;;  %v12578_v54 = vpack.c.bf16 %v3142_v42, %v3141_v41  ;;  %v3144_v57 = vld [vmem:[#allocation11 + $0x6f8] sm:$0xff]  ;;  %v3175_v59 = vld [vmem:[#allocation11 + $0x7f0] sm:$0xff] }
 0xdb9   : > { %12563 = vmatprep.subr.bf16.mxu1 %v12562_v43  ;;  %12595 = vmatprep.subr.bf16.mxu0 %v12594_v45  ;;  %v12610_v55 = vpack.c.bf16 %v3174_v50, %v3173_v46  ;;  %v3157_v43 = vld [vmem:[#allocation11 + $0x760] sm:$0xff]  ;;  %v3158_v45 = vld [vmem:[#allocation11 + $0x768] sm:$0xff]  ;;  %v3176_v44 = vld [vmem:[#allocation11 + $0x7f8] sm:$0xff]  ;;  %v12582_v4 = vpack.c.bf16 %v3144_v57, %v3143_v56  ;;  %v2248_v9 = vrot.slane %v15009_v8, %v14993_v61 }
 0xdba   : > { %v3159_v7 = vld [vmem:[#allocation11 + $0x770] sm:$0xff]  ;;  %v3160_v23 = vld [vmem:[#allocation11 + $0x778] sm:$0xff]  ;;  %v2256_v10 = vrot.slane %v15009_v8, %v14996_v62 }
 0xdbc   : > { %12565 = vmatpush3.bf16.msra.mxu1 %v12564_v0  ;;  %12597 = vmatpush3.bf16.msra.mxu0 %v12596_v1  ;;  %v12612_v0 = vpack.c.bf16 %v3158_v45, %v3157_v43  ;;  %v3127_v1 = vld [vmem:[#allocation11 + $0x670] sm:$0xff] }
 0xdbd   : > { %12567 = vmatprep.subr.bf16.mxu1 %v12566_v25  ;;  %12599 = vmatprep.subr.bf16.mxu0 %v12598_v6  ;;  %v12614_v25 = vpack.c.bf16 %v3176_v44, %v3175_v59  ;;  %v3128_v6 = vld [vmem:[#allocation11 + $0x678] sm:$0xff] }
 0xdc0   : > { %12569 = vmatpush3.bf16.msra.mxu1 %v12568_v15  ;;  %12601 = vmatpush3.bf16.msra.mxu0 %v12600_v2  ;;  %v12584_v15 = vpack.c.bf16 %v3128_v6, %v3127_v1  ;;  %v12616_v2 = vpack.c.bf16 %v3160_v23, %v3159_v7 }
 0xdc1   : > { %12571 = vmatprep.subr.bf16.mxu1 %v12570_v49  ;;  %12603 = vmatprep.subr.bf16.mxu0 %v12602_v19 }
 0xdc4   : > { %12573 = vmatpush3.bf16.msra.mxu1 %v12572_v31  ;;  %12605 = vmatpush3.bf16.msra.mxu0 %v12604_v32 }
 0xdc5   : > { %12575 = vmatprep.subr.bf16.mxu1 %v12574_v35  ;;  %12607 = vmatprep.subr.bf16.mxu0 %v12606_v21 }
 0xdc8   : > { %12577 = vmatpush3.bf16.msra.mxu1 %v12576_v30  ;;  %12609 = vmatpush3.bf16.msra.mxu0 %v12608_v36  ;;  %v10296_v36 = vld [vmem:[%s15615_s12] ss:$0 sm:$0xff] }
 0xdc9   : > { %12579 = vmatprep.subr.bf16.mxu1 %v12578_v54  ;;  %12611 = vmatprep.subr.bf16.mxu0 %v12610_v55 }
 0xdcc   : > { %v2801_v11 = vpop.f32.mrb[24].mxu1  ;;  %v2878_v12 = vpop.f32.mrb[26].mxu0  ;;  %12581 = vmatpush3.bf16.msra.mxu1 %v12580_v63  ;;  %12613 = vmatpush3.bf16.msra.mxu0 %v12612_v0 }
 0xdcd   : > { %v2802_v17 = vadd.f32 %v2801_v11, %v2244_v20  ;;  %v2879_v18 = vadd.f32 %v2878_v12, %v2252_v3  ;;  %v2803_v49 = vpop.f32.mrb[25].mxu1  ;;  %v2880_v19 = vpop.f32.mrb[27].mxu0  ;;  %12583 = vmatprep.subr.bf16.mxu1 %v12582_v4  ;;  %12615 = vmatprep.subr.bf16.mxu0 %v12614_v25 }
 0xdce   : > { %v2804_v13 = vadd.f32 %v2803_v49, %v2248_v9  ;;  %v2881_v14 = vadd.f32 %v2880_v19, %v2256_v10 }
 0xdcf   : > { %v2901_v8 = vmax.f32 %v2802_v17, 0.0  ;;  %v2903_v31 = vmax.f32 %v2879_v18, 0.0 }
 0xdd0   : > { %v2902_v37 = vmax.f32 %v2804_v13, 0.0  ;;  %v2904_v47 = vmax.f32 %v2881_v14, 0.0  ;;  %v2807_v27 = vpop.f32.mrb[26].mxu1  ;;  %v2884_v29 = vpop.f32.mrb[28].mxu0  ;;  %12585 = vmatpush3.bf16.msra.mxu1 %v12584_v15  ;;  %12617 = vmatpush3.bf16.msra.mxu0 %v12616_v2 }
 0xdd1   : > { %v2808_v32 = vadd.f32 %v2807_v27, %v2244_v20  ;;  %v2885_v33 = vadd.f32 %v2884_v29, %v2252_v3  ;;  %v2809_v34 = vpop.f32.mrb[27].mxu1  ;;  %v2886_v35 = vpop.f32.mrb[29].mxu0 }
 0xdd2   : > { %v2810_v21 = vadd.f32 %v2809_v34, %v2248_v9  ;;  %v2887_v38 = vadd.f32 %v2886_v35, %v2256_v10  ;;  %3698 = vmatprep.mubr.f32.mxu1 %v2902_v37  ;;  %3773 = vmatprep.mubr.f32.mxu0 %v2904_v47 }
 0xdd3   : > { %3699 = vmatmul.mubr.f32.vlgmr.msra.gmra.mrb[40].mxu1 %v2901_v8  ;;  %3774 = vmatmul.mubr.f32.vlgmr.msra.gmra.mrb[42].mxu0 %v2903_v31  ;;  %v2917_v42 = vmax.f32 %v2808_v32, 0.0  ;;  %v2919_v46 = vmax.f32 %v2885_v33, 0.0 }
 0xdd4   : > { %v2918_v39 = vmax.f32 %v2810_v21, 0.0  ;;  %v2920_v41 = vmax.f32 %v2887_v38, 0.0 }
 0xdd6   : > { %3703 = vmatprep.mubr.f32.mxu1 %v2918_v39  ;;  %3778 = vmatprep.mubr.f32.mxu0 %v2920_v41 }
 0xdd7   : > { %3704 = vmatmul.mubr.f32.gmra.mrb[42].mxu1 %v2917_v42  ;;  %3779 = vmatmul.mubr.f32.gmra.mrb[44].mxu0 %v2919_v46 }
 0xdd8   : > { %3959 = vmatprep.mubr.f32.mxu1 %v14454_v16 }
 0xe46   : > { %v10496_v50 = vpop.f32.mrb[28].mxu1  ;;  %v10534_v30 = vpop.f32.mrb[30].mxu0 }
 0xe47   : > { %v10497_v51 = vpop.f32.mrb[29].mxu1  ;;  %v10535_v52 = vpop.f32.mrb[31].mxu0 }
 0xe48   : > { %v10498_v54 = vadd.f32 %v10497_v51, %v10496_v50  ;;  %v10536_v55 = vadd.f32 %v10535_v52, %v10534_v30 }
 0xe4a   : > { %v3251_v43 = vadd.f32 %v10498_v54, %v10296_v36  ;;  %v10499_v45 = vpop.f32.mrb[30].mxu1  ;;  %v10537_v56 = vpop.f32.mrb[32].mxu0 }
 0xe4b   : > { %v10500_v57 = vpop.f32.mrb[31].mxu1  ;;  %v10538_v59 = vpop.f32.mrb[33].mxu0 }
 0xe4c   : > { %v3326_v44 = vadd.f32 %v10536_v55, %v3251_v43  ;;  %v10501_v20 = vadd.f32 %v10500_v57, %v10499_v45  ;;  %v10539_v63 = vadd.f32 %v10538_v59, %v10537_v56 }
 0xe4e   : > { %v3256_v0 = vadd.f32 %v10501_v20, %v10296_v36 }
 0xe50   : > { %v3331_v1 = vadd.f32 %v10539_v63, %v3256_v0 }
 0xe66   : > { %v10572_v3 = vpop.f32.mrb[32].mxu1  ;;  %v10610_v4 = vpop.f32.mrb[34].mxu0 }
 0xe67   : > { %v10573_v25 = vpop.f32.mrb[33].mxu1  ;;  %v10611_v6 = vpop.f32.mrb[35].mxu0 }
 0xe68   : > { %v10574_v7 = vadd.f32 %v10573_v25, %v10572_v3  ;;  %v10612_v23 = vadd.f32 %v10611_v6, %v10610_v4  ;;  %v3830_v3 = vld [vmem:[#allocation7 + $0x188] sm:$0xff]  ;;  %v3833_v4 = vld [vmem:[#allocation7 + $0x1a0] sm:$0xff] }
 0xe69   : > { %v3829_v25 = vld [vmem:[#allocation7 + $0x180] sm:$0xff]  ;;  %v12618_v6 = vpack.c.bf16 %v3833_v4, %v3830_v3  ;;  %v3859_v4 = vld [vmem:[#allocation7 + $0x270] sm:$0xff] }
 0xe6a   : > { %v3401_v9 = vadd.f32 %v10574_v7, %v3326_v44  ;;  %v10575_v10 = vpop.f32.mrb[34].mxu1  ;;  %v10613_v11 = vpop.f32.mrb[36].mxu0  ;;  %v3832_v7 = vld [vmem:[#allocation7 + $0x198] sm:$0xff] }
 0xe6b   : > { %v10576_v12 = vpop.f32.mrb[35].mxu1  ;;  %v10614_v15 = vpop.f32.mrb[37].mxu0  ;;  %12619 = vmatprep.subr.bf16.mxu1 %v12618_v6 }
 0xe6c   : > { %v3476_v2 = vadd.f32 %v10612_v23, %v3401_v9  ;;  %v10577_v17 = vadd.f32 %v10576_v12, %v10575_v10  ;;  %v10615_v18 = vadd.f32 %v10614_v15, %v10613_v11  ;;  %v3836_v23 = vld [vmem:[#allocation7 + $0x1b8] sm:$0xff]  ;;  %v3839_v9 = vld [vmem:[#allocation7 + $0x1d0] sm:$0xff]  ;;  %v12620_v10 = vpack.c.bf16 %v3832_v7, %v3829_v25  ;;  %v3838_v15 = vld [vmem:[#allocation7 + $0x1c8] sm:$0xff] }
 0xe6d   : > { %v12622_v11 = vpack.c.bf16 %v3839_v9, %v3836_v23  ;;  %v3835_v12 = vld [vmem:[#allocation7 + $0x1b0] sm:$0xff]  ;;  %v3862_v25 = vld [vmem:[#allocation7 + $0x288] sm:$0xff] }
 0xe6e   : > { %v3406_v49 = vadd.f32 %v10577_v17, %v3331_v1  ;;  %v3842_v17 = vld [vmem:[#allocation7 + $0x1e8] sm:$0xff]  ;;  %12621 = vmatpush1.bf16.msra.mxu1 %v12620_v10  ;;  %v12640_v6 = vpack.c.bf16 %v3862_v25, %v3859_v4  ;;  %v3855_v7 = vld [vmem:[#allocation7 + $0x250] sm:$0xff] }
 0xe6f   : > { %12623 = vmatprep.subr.bf16.mxu1 %v12622_v11  ;;  %v3858_v23 = vld [vmem:[#allocation7 + $0x268] sm:$0xff]  ;;  %v3869_v11 = vld [vmem:[#allocation7 + $0x2c0] sm:$0xff] }
 0xe70   : > { %v3481_v19 = vadd.f32 %v10615_v18, %v3406_v49  ;;  %v3845_v18 = vld [vmem:[#allocation7 + $0x200] sm:$0xff]  ;;  %v12666_v9 = vpack.c.bf16 %v3858_v23, %v3855_v7  ;;  %v3866_v10 = vld [vmem:[#allocation7 + $0x2a8] sm:$0xff] }
 0xe86   : > { %v10648_v13 = vpop.f32.mrb[36].mxu1  ;;  %v10686_v14 = vpop.f32.mrb[38].mxu0 }
 0xe87   : > { %v10649_v37 = vpop.f32.mrb[37].mxu1  ;;  %v10687_v47 = vpop.f32.mrb[39].mxu0 }
 0xe88   : > { %v10650_v27 = vadd.f32 %v10649_v37, %v10648_v13  ;;  %v10688_v29 = vadd.f32 %v10687_v47, %v10686_v14  ;;  %v12626_v13 = vpack.c.bf16 %v3845_v18, %v3842_v17  ;;  %v3841_v14 = vld [vmem:[#allocation7 + $0x1e0] sm:$0xff]  ;;  %v3844_v37 = vld [vmem:[#allocation7 + $0x1f8] sm:$0xff] }
 0xe89   : > { %v3840_v47 = vld [vmem:[#allocation7 + $0x1d8] sm:$0xff]  ;;  %v3861_v17 = vld [vmem:[#allocation7 + $0x280] sm:$0xff] }
 0xe8a   : > { %v3551_v8 = vadd.f32 %v10650_v27, %v3476_v2  ;;  %v10651_v31 = vpop.f32.mrb[38].mxu1  ;;  %v10689_v32 = vpop.f32.mrb[40].mxu0  ;;  %v3831_v2 = vld [vmem:[#allocation7 + $0x190] sm:$0xff]  ;;  %v3864_v18 = vld [vmem:[#allocation7 + $0x298] sm:$0xff] }
 0xe8b   : > { %v10652_v33 = vpop.f32.mrb[39].mxu1  ;;  %v10690_v34 = vpop.f32.mrb[41].mxu0 }
 0xe8c   : > { %v3626_v35 = vadd.f32 %v10688_v29, %v3551_v8  ;;  %v10653_v21 = vadd.f32 %v10652_v33, %v10651_v31  ;;  %v10691_v38 = vadd.f32 %v10690_v34, %v10689_v32  ;;  %v12628_v29 = vpack.c.bf16 %v3844_v37, %v3841_v14  ;;  %v3871_v14 = vld [vmem:[#allocation7 + $0x2d0] sm:$0xff]  ;;  %v3874_v37 = vld [vmem:[#allocation7 + $0x2e8] sm:$0xff] }
 0xe8e   : > { %v3556_v39 = vadd.f32 %v10653_v21, %v3481_v19  ;;  %v3837_v19 = vld [vmem:[#allocation7 + $0x1c0] sm:$0xff] }
 0xe8f   : > { %v12654_v27 = vpack.c.bf16 %v3840_v47, %v3837_v19  ;;  %v3875_v19 = vld [vmem:[#allocation7 + $0x2f0] sm:$0xff] }
 0xe90   : > { %v3631_v41 = vadd.f32 %v10691_v38, %v3556_v39  ;;  %v3867_v47 = vld [vmem:[#allocation7 + $0x2b0] sm:$0xff] }
 0xea6   : > { %v10724_v42 = vpop.f32.mrb[40].mxu1  ;;  %v10762_v46 = vpop.f32.mrb[42].mxu0 }
 0xea7   : > { %v10725_v50 = vpop.f32.mrb[41].mxu1  ;;  %v10763_v30 = vpop.f32.mrb[43].mxu0 }
 0xea8   : > { %v10726_v36 = vadd.f32 %v10725_v50, %v10724_v42  ;;  %v10764_v51 = vadd.f32 %v10763_v30, %v10762_v46  ;;  %v3851_v42 = vld [vmem:[#allocation7 + $0x230] sm:$0xff]  ;;  %v3850_v30 = vld [vmem:[#allocation7 + $0x228] sm:$0xff] }
 0xea9   : > { %v3847_v50 = vld [vmem:[#allocation7 + $0x210] sm:$0xff] }
 0xeaa   : > { %v3701_v52 = vadd.f32 %v10726_v36, %v3626_v35  ;;  %v10727_v54 = vpop.f32.mrb[42].mxu1  ;;  %v10765_v55 = vpop.f32.mrb[44].mxu0  ;;  %v12632_v36 = vpack.c.bf16 %v3850_v30, %v3847_v50  ;;  %v10297_v30 = vld [vmem:[%s15616_s13] ss:$0 sm:$0xff] }
 0xeab   : > { %v10728_v43 = vpop.f32.mrb[43].mxu1  ;;  %v10766_v45 = vpop.f32.mrb[45].mxu0 }
 0xeac   : > { %v3776_v56 = vadd.f32 %v10764_v51, %v3701_v52  ;;  %v10729_v57 = vadd.f32 %v10728_v43, %v10727_v54  ;;  %v10767_v59 = vadd.f32 %v10766_v45, %v10765_v55  ;;  %v3843_v51 = vld [vmem:[#allocation7 + $0x1f0] sm:$0xff]  ;;  %v3846_v52 = vld [vmem:[#allocation7 + $0x208] sm:$0xff]  ;;  %v3857_v43 = vld [vmem:[#allocation7 + $0x260] sm:$0xff] }
 0xead   : > { %v12658_v54 = vpack.c.bf16 %v3846_v52, %v3843_v51  ;;  %v3854_v55 = vld [vmem:[#allocation7 + $0x248] sm:$0xff] }
 0xeae   : > { %v3706_v44 = vadd.f32 %v10729_v57, %v3631_v41  ;;  %v3784_v20 = vadd.f32 %v3776_v56, %v14935_v5  ;;  %v3834_v5 = vld [vmem:[#allocation7 + $0x1a8] sm:$0xff]  ;;  %v3848_v41 = vld [vmem:[#allocation7 + $0x218] sm:$0xff]  ;;  %v12634_v45 = vpack.c.bf16 %v3857_v43, %v3854_v55  ;;  %v3853_v56 = vld [vmem:[#allocation7 + $0x240] sm:$0xff] }
 0xeaf   : > { %v12650_v49 = vpack.c.bf16 %v3834_v5, %v3831_v2  ;;  %v12630_v46 = vpack.c.bf16 %v3851_v42, %v3848_v41  ;;  %v3856_v57 = vld [vmem:[#allocation7 + $0x258] sm:$0xff]  ;;  %v10298_v51 = vld [vmem:[%s15617_s14] ss:$0 sm:$0xff] }
 0xeb0   : > { %v3781_v63 = vadd.f32 %v10767_v59, %v3706_v44  ;;  %3786 = vadd.xlane.f32.xlu1 %v3784_v20  ;;  %v12636_v59 = vpack.c.bf16 %v3856_v57, %v3853_v56  ;;  %v3849_v44 = vld [vmem:[#allocation7 + $0x220] sm:$0xff]  ;;  %v3868_v2 = vld [vmem:[#allocation7 + $0x2b8] sm:$0xff] }
 0xeb1   : > { %12651 = vmatprep.subr.bf16.mxu0 %v12650_v49 }
 0xeb2   : > { %v3785_v0 = vadd.f32 %v3781_v63, %v14940_v22  ;;  %v12624_v22 = vpack.c.bf16 %v3838_v15, %v3835_v12  ;;  %12653 = vmatpush3.bf16.msra.mxu0 %v12650_v49  ;;  %v12642_v12 = vpack.c.bf16 %v3869_v11, %v3866_v10  ;;  %v3865_v15 = vld [vmem:[#allocation7 + $0x2a0] sm:$0xff]  ;;  %v3872_v49 = vld [vmem:[#allocation7 + $0x2d8] sm:$0xff] }
 0xeb3   : > { %12655 = vmatprep.subr.bf16.mxu0 %v12654_v27  ;;  %v12644_v5 = vpack.c.bf16 %v3868_v2, %v3865_v15 }
 0xeb4   : > { %v3788_v1 = vsel %vm1066_vm1, %v3785_v0, 0.0  ;;  %12625 = vmatpush1.bf16.msra.mxu1 %v12624_v22  ;;  %v12670_v22 = vpack.c.bf16 %v3864_v18, %v3861_v17 }
 0xeb5   : > { %3789 = vadd.xlane.f32.xlu0 %v3788_v1  ;;  %12627 = vmatprep.subr.bf16.mxu1 %v12626_v13  ;;  %v3863_v1 = vld [vmem:[#allocation7 + $0x290] sm:$0xff]  ;;  %v12646_v13 = vpack.c.bf16 %v3875_v19, %v3872_v49 }
 0xeb6   : > { %12657 = vmatpush3.bf16.msra.mxu0 %v12654_v27  ;;  %v12648_v27 = vpack.c.bf16 %v3874_v37, %v3871_v14 }
 0xeb7   : > { %12659 = vmatprep.subr.bf16.mxu0 %v12658_v54 }
 0xeb8   : > { %12629 = vmatpush1.bf16.msra.mxu1 %v12628_v29  ;;  %v3870_v29 = vld [vmem:[#allocation7 + $0x2c8] sm:$0xff] }
 0xeb9   : > { %12631 = vmatprep.subr.bf16.mxu1 %v12630_v46 }
 0xeba   : > { %12661 = vmatpush3.bf16.msra.mxu0 %v12658_v54 }
 0xebc   : > { %12633 = vmatpush1.bf16.msra.mxu1 %v12632_v36 }
 0xebd   : > { %12635 = vmatprep.subr.bf16.mxu1 %v12634_v45 }
 0xec0   : > { %12637 = vmatpush1.bf16.msra.mxu1 %v12636_v59 }
 0xf3d   : > { %v3787_v8 = vpop.xlane.xlu1 %3786 }
 0xf3e   : > { %v3791_v31 = vmul.f32 0.0078125, %v3787_v8  ;;  %v12674_v8 = vpack.c.bf16 %v3870_v29, %v3867_v47 }
 0xf40   : > { %v15034_v32 = vsub.f32 %v3784_v20, %v3791_v31  ;;  %v3852_v20 = vld [vmem:[#allocation7 + $0x238] sm:$0xff]  ;;  %v3873_v31 = vld [vmem:[#allocation7 + $0x2e0] sm:$0xff] }
 0xf41   : > { %v12662_v63 = vpack.c.bf16 %v3852_v20, %v3849_v44 }
 0xf42   : > { %v3790_v33 = vpop.xlane.xlu0 %3789  ;;  %v3795_v34 = vmul.f32 %v15034_v32, %v15034_v32 }
 0xf43   : > { %v3792_v35 = vmul.f32 0.0078125, %v3790_v33  ;;  %12663 = vmatprep.subr.bf16.mxu0 %v12662_v63  ;;  %v3876_v33 = vld [vmem:[#allocation7 + $0x2f8] sm:$0xff] }
 0xf44   : > { %3797 = vadd.xlane.f32.xlu1 %v3795_v34  ;;  %12665 = vmatpush3.bf16.msra.mxu0 %v12662_v63  ;;  %v12678_v34 = vpack.c.bf16 %v3876_v33, %v3873_v31 }
 0xf45   : > { %v15038_v21 = vsub.f32 %v3785_v0, %v3792_v35  ;;  %v3860_v0 = vld [vmem:[#allocation7 + $0x278] sm:$0xff]  ;;  %12667 = vmatprep.subr.bf16.mxu0 %v12666_v9 }
 0xf46   : > { %v12638_v3 = vpack.c.bf16 %v3863_v1, %v3860_v0 }
 0xf47   : > { %v3796_v38 = vmul.f32 %v15038_v21, %v15038_v21 }
 0xf48   : > { %12639 = vmatprep.subr.bf16.mxu1 %v12638_v3  ;;  %12669 = vmatpush3.bf16.msra.mxu0 %v12666_v9 }
 0xf49   : > { %v3799_v39 = vsel %vm1066_vm1, %v3796_v38, 0.0  ;;  %12641 = vmatpush1.bf16.msra.mxu1 %v12640_v6  ;;  %12671 = vmatprep.subr.bf16.mxu0 %v12670_v22 }
 0xf4a   : > { %3800 = vadd.xlane.f32.xlu0 %v3799_v39  ;;  %12643 = vmatprep.subr.bf16.mxu1 %v12642_v12 }
 0xf4c   : > { %12673 = vmatpush3.bf16.msra.mxu0 %v12670_v22 }
 0xf4d   : > { %12645 = vmatpush1.bf16.msra.mxu1 %v12644_v5  ;;  %12675 = vmatprep.subr.bf16.mxu0 %v12674_v8 }
 0xf4e   : > { %12647 = vmatprep.subr.bf16.mxu1 %v12646_v13 }
 0xf50   : > { %12677 = vmatpush3.bf16.msra.mxu0 %v12674_v8 }
 0xf51   : > { %12649 = vmatpush1.bf16.msra.mxu1 %v12648_v27  ;;  %12679 = vmatprep.subr.bf16.mxu0 %v12678_v34 }
 0xf54   : > { %12681 = vmatpush3.bf16.msra.mxu0 %v12678_v34 }
 0xfd1   : > { %v3798_v35 = vpop.xlane.xlu1 %3797 }
 0xfd2   : > { %v3802_v38 = vmul.f32 0.0078125, %v3798_v35 }
 0xfd4   : > { %v3804_v39 = vadd.f32 1e-05, %v3802_v38 }
 0xfd6   : > { %14167 = vrsqrt.f32 %v3804_v39 }
 0xfd7   : > { %v3801_v41 = vpop.xlane.xlu0 %3800 }
 0xfd8   : > { %v3803_v42 = vmul.f32 0.0078125, %v3801_v41 }
 0xfda   : > { %v3805_v46 = vadd.f32 1e-05, %v3803_v42 }
 0xfdc   : > { %14169 = vrsqrt.f32 %v3805_v46 }
 0xfe0   : > { %v14168_v50 = vpop.eup %14167 }
 0xfe1   : > { %v3808_v36 = vmul.f32 %v14168_v50, %v15034_v32  ;;  %v10299_v32 = vld [vmem:[%s15607_s4 + $0x3] sm:$0x7] }
 0xfe2   : > { %v3883_v57 = vrot.slane %v10299_v32, %v14768_v24  ;;  %v3887_v0 = vrot.slane %v10299_v32, %v14778_v28 }
 0xfe3   : > { %v3817_v52 = vmul.f32 %v10297_v30, %v3808_v36 }
 0xfe5   : > { %v15050_v54 = vadd.f32 %v10298_v51, %v3817_v52 }
 0xfe6   : > { %v14170_v55 = vpop.eup %14169 }
 0xfe7   : > { %3960 = vmatmul.mubr.f32.vlgmr.msra.gmra.mrb[44].mxu1 %v15050_v54  ;;  %11699 = vmatprep.mubr.f32.mxu0 %v15050_v54  ;;  %v3809_v43 = vmul.f32 %v14170_v55, %v15038_v21  ;;  %v3891_v21 = vrot.slane %v10299_v32, %v14774_v26 }
 0xfe8   : > { %3965 = vmatprep.mubr.f32.mxu1 %v14454_v16 }
 0xfe9   : > { %v3818_v45 = vmul.f32 %v10297_v30, %v3809_v43 }
 0xfeb   : > { %v15056_v56 = vadd.f32 %v10298_v51, %v3818_v45 }
 0xfed   : > { %3966 = vmatmul.mubr.f32.gmra.mrb[46].mxu1 %v15056_v56  ;;  %11700 = vmatmul.mubr.f32.vlgmr.msra.gmra.mrb[46].mxu0 %v15056_v56 }
0x10ba   : > { %v3961_v59 = vpop.f32.mrb[44].mxu1 }
0x10bb   : > { %v3962_v44 = vadd.f32 %v3961_v59, %v3883_v57  ;;  %v3963_v20 = vpop.f32.mrb[45].mxu1 }
0x10bc   : > { %v3964_v7 = vadd.f32 %v3963_v20, %v3887_v0 }
0x10bd   : > { %v15064_v63 = vmul.f32 0.17677669, %v3962_v44 }
0x10bf   : > { %11706 = vmatprep.mubr.msk.f32.mxu1 %vm648_vm0, %v15064_v63 }
0x10c0   : > { %v3967_v1 = vpop.f32.mrb[46].mxu1  ;;  %v11701_v3 = vpop.f32.mrb[46].mxu0 }
0x10c1   : > { %v4044_v4 = vadd.f32 %v11701_v3, %v3891_v21  ;;  %v3969_v25 = vpop.f32.mrb[47].mxu1  ;;  %v4038_v6 = vpop.f32.mrb[47].mxu0  ;;  %v3968_v2 = vadd.f32 %v3967_v1, %v3883_v57 }
0x10c2   : > { %v3970_v23 = vadd.f32 %v3969_v25, %v3887_v0  ;;  %v4039_v9 = vadd.f32 %v4038_v6, %v3891_v21 }
0x10c3   : > { %v15080_v5 = vmul.f32 0.17677669, %v3968_v2 }
0x10c4   : > { %v12682_v10 = vpack.c.bf16 %v3970_v23, %v3964_v7  ;;  %v12688_v11 = vpack.c.bf16 %v4044_v4, %v4039_v9  ;;  %v15070_v12 = vpack.i.bf16 %v3970_v23, %v3964_v7  ;;  %v15072_v15 = vpack.i.bf16 %v4044_v4, %v4039_v9 }
0x10c6   : > { %12684 = vmatprep.subr.msk.bf16.mxu1 %vm14799_vm4, %v12682_v10 }
0x10c7   : > { %12687 = vmatpush3.bf16.xpose.msk.msra.mxu1 %vm14799_vm4, %v12682_v10 }
0x10c8   : > { %12690 = vmatprep.subr.msk.bf16.mxu1 %vm14785_vm3, %v12688_v11 }
0x10ce   : > { %11707 = vmatmul.mubr.msk.f32.vlgmr.msra.gmra.mrb[48].mxu1 %vm648_vm0, %v15080_v5 }
0x10cf   : > { %12693 = vmatpush3.bf16.msk.msra.mxu1 %vm14785_vm3, %v12688_v11 }
0x11a1   : > { %v11708_v17 = vpop.f32.mrb[48].mxu1 }
0x11a2   : > { %v4127_v18 = vpop.f32.mrb[49].mxu1  ;;  %v4139_v22 = vsel %vm1040_vm5, %v11708_v17, -inf }
0x11a3   : > { %4140 = vmax.xlane.f32.xlu0 %v4139_v22  ;;  %v4136_v49 = vsel %vm1036_vm6, %v4127_v18, -inf }
0x11a4   : > { %4137 = vmax.xlane.f32.xlu1 %v4136_v49 }
0x11b5   : > { %14072 = vrot.lane.b32.xlu1 %v15070_v12, %s14456_s18 }
0x1230   : > { %v4141_v19 = vpop.xlane.xlu0 %4140 }
0x1231   : > { %v4143_v13 = vsub.f32 %v11708_v17, %v4141_v19  ;;  %v4138_v14 = vpop.xlane.xlu1 %4137 }
0x1232   : > { %v4142_v37 = vsub.f32 %v4127_v18, %v4138_v14 }
0x1233   : > { %v4146_v47 = vmul.f32 1.442695, %v4143_v13 }
0x1234   : > { %v4144_v27 = vmul.f32 1.442695, %v4142_v37 }
0x1235   : > { %14171 = vpow2.f32 %v4146_v47  ;;  %v14073_v29 = vpop.permute.xlu1 %14072 }
0x1236   : > { %14173 = vpow2.f32 %v4144_v27  ;;  %v14075_v8 = vunpack.i.h.bf16 %v14073_v29  ;;  %v14074_v31 = vunpack.i.l.bf16 %v14073_v29 }
0x1238   : > { %v12694_v33 = vpack.c.bf16 %v14075_v8, %v14074_v31 }
0x123a   : > { %12696 = vmatprep.subr.msk.bf16.mxu1 %vm14799_vm4, %v12694_v33 }
0x123f   : > { %v14172_v34 = vpop.eup %14171 }
0x1240   : > { %v14174_v35 = vpop.eup %14173  ;;  %v4151_v38 = vsel %vm1040_vm5, %v14172_v34, 0.0 }
0x1241   : > { %4152 = vadd.xlane.f32.xlu0 %v4151_v38  ;;  %v4148_v39 = vsel %vm1036_vm6, %v14174_v35, 0.0 }
0x1242   : > { %4149 = vadd.xlane.f32.xlu1 %v4148_v39 }
0x1253   : > { %4246 = vrot.lane.b32.xlu1 %v15080_v5, %s14456_s18 }
0x1257   : > { %4244 = vrot.lane.b32.xlu0 %v15064_v63, %s14456_s18 }
0x12ce   : > { %v4153_v41 = vpop.xlane.xlu0 %4152 }
0x12cf   : > { %14175 = vrcp.f32 %v4153_v41  ;;  %v4150_v42 = vpop.xlane.xlu1 %4149 }
0x12d0   : > { %14177 = vrcp.f32 %v4150_v42 }
0x12d2   : > { %v4245_v51 = vpop.permute.xlu0 %4244 }
0x12d3   : > { %v4247_v52 = vpop.permute.xlu1 %4246 }
0x12d9   : > { %v14176_v46 = vpop.eup %14175 }
0x12da   : > { %v14178_v50 = vpop.eup %14177  ;;  %v4157_v36 = vmul.f32 %v14176_v46, %v14172_v34 }
0x12db   : > { %v4156_v30 = vmul.f32 %v14178_v50, %v14174_v35 }
0x12dd   : > { %11713 = vmatprep.mubr.msk.f32.mxu1 %vm1036_vm6, %v4156_v30 }
0x12de   : > { %11714 = vmatmul.mubr.msk.f32.vlgmr.msra.gmra.mrb[50].mxu1 %vm1036_vm6, %v4157_v36 }
0x12df   : > { %12699 = vmatpush3.bf16.xpose.msk.msra.mxu1 %vm14799_vm4, %v12694_v33  ;;  %11720 = vmatprep.mubr.msk.f32.mxu1 %vm648_vm0, %v4245_v51 }
0x12e6   : > { %11721 = vmatmul.mubr.msk.f32.vlgmr.msra.gmra.mrb[52].mxu1 %vm648_vm0, %v4247_v52 }
0x13b1   : > { %v11715_v55 = vpop.f32.mrb[50].mxu1 }
0x13b2   : > { %4243 = vst.msk [vmem:[#allocation2 + $0x8] sm:$0x3f] %vm1146_vm7, %v11715_v55  ;;  %v4233_v43 = vpop.f32.mrb[51].mxu1 }
0x13b3   : > { %4242 = vst.msk [vmem:[#allocation2] sm:$0xff] %vm648_vm0, %v4233_v43 }
0x13b9   : > { %v11722_v45 = vpop.f32.mrb[52].mxu1 }
0x13ba   : > { %v4326_v32 = vpop.f32.mrb[53].mxu1  ;;  %v4338_v57 = vsel %vm1040_vm5, %v11722_v45, -inf }
0x13bb   : > { %4339 = vmax.xlane.f32.xlu0 %v4338_v57  ;;  %v4335_v59 = vsel %vm1036_vm6, %v4326_v32, -inf }
0x13bc   : > { %4336 = vmax.xlane.f32.xlu1 %v4335_v59 }
0x1448   : > { %v4340_v44 = vpop.xlane.xlu0 %4339 }
0x1449   : > { %v4342_v20 = vsub.f32 %v11722_v45, %v4340_v44  ;;  %v4337_v21 = vpop.xlane.xlu1 %4336 }
0x144a   : > { %v4341_v0 = vsub.f32 %v4326_v32, %v4337_v21 }
0x144b   : > { %v4345_v1 = vmul.f32 1.442695, %v4342_v20 }
0x144c   : > { %v4343_v3 = vmul.f32 1.442695, %v4341_v0 }
0x144d   : > { %14179 = vpow2.f32 %v4345_v1 }
0x144e   : > { %14181 = vpow2.f32 %v4343_v3 }
0x1457   : > { %v14180_v4 = vpop.eup %14179 }
0x1458   : > { %v14182_v25 = vpop.eup %14181  ;;  %v4350_v6 = vsel %vm1040_vm5, %v14180_v4, 0.0 }
0x1459   : > { %4351 = vadd.xlane.f32.xlu1 %v4350_v6  ;;  %v4347_v7 = vsel %vm1036_vm6, %v14182_v25, 0.0 }
0x145a   : > { %4348 = vadd.xlane.f32.xlu0 %v4347_v7 }
0x146a   : > { %14082 = vrot.lane.b32.xlu1 %v15070_v12, %s14457_s21 }
0x146e   : > { %14087 = vrot.lane.b32.xlu1 %v15070_v12, %s14458_s22 }
0x1470   : > { %14077 = vrot.lane.b32.xlu0 %v15072_v15, %s14456_s18 }
0x1472   : > { %4458 = vrot.lane.b32.xlu1 %v15080_v5, %s14457_s21 }
0x1474   : > { %4456 = vrot.lane.b32.xlu0 %v15064_v63, %s14457_s21 }
0x1476   : > { %4669 = vrot.lane.b32.xlu1 %v15080_v5, %s14458_s22 }
0x1478   : > { %4667 = vrot.lane.b32.xlu0 %v15064_v63, %s14458_s22 }
0x14e6   : > { %v4352_v23 = vpop.xlane.xlu1 %4351 }
0x14e7   : > { %14183 = vrcp.f32 %v4352_v23  ;;  %v4349_v9 = vpop.xlane.xlu0 %4348 }
0x14e8   : > { %14185 = vrcp.f32 %v4349_v9 }
0x14ea   : > { %v14083_v10 = vpop.permute.xlu1 %14082 }
0x14eb   : > { %v14078_v11 = vpop.permute.xlu0 %14077  ;;  %v14085_v12 = vunpack.i.h.bf16 %v14083_v10  ;;  %v14084_v2 = vunpack.i.l.bf16 %v14083_v10 }
0x14ec   : > { %v14080_v17 = vunpack.i.h.bf16 %v14078_v11  ;;  %v14079_v18 = vunpack.i.l.bf16 %v14078_v11 }
0x14ed   : > { %v12706_v49 = vpack.c.bf16 %v14085_v12, %v14084_v2 }
0x14ee   : > { %v12700_v22 = vpack.c.bf16 %v14080_v17, %v14079_v18  ;;  %v14088_v5 = vpop.permute.xlu1 %14087 }
0x14ef   : > { %v14090_v37 = vunpack.i.h.bf16 %v14088_v5  ;;  %v14089_v47 = vunpack.i.l.bf16 %v14088_v5  ;;  %v4457_v27 = vpop.permute.xlu0 %4456 }
0x14f0   : > { %12702 = vmatprep.subr.msk.bf16.mxu1 %vm14785_vm3, %v12700_v22 }
0x14f1   : > { %v14184_v19 = vpop.eup %14183  ;;  %12705 = vmatpush3.bf16.msk.msra.mxu1 %vm14785_vm3, %v12700_v22  ;;  %v12718_v29 = vpack.c.bf16 %v14090_v37, %v14089_v47 }
0x14f2   : > { %v14186_v63 = vpop.eup %14185  ;;  %12708 = vmatprep.subr.msk.bf16.mxu1 %vm14799_vm4, %v12706_v49  ;;  %v4356_v14 = vmul.f32 %v14184_v19, %v14180_v4  ;;  %v4459_v8 = vpop.permute.xlu1 %4458 }
0x14f3   : > { %v4355_v13 = vmul.f32 %v14186_v63, %v14182_v25  ;;  %v4668_v31 = vpop.permute.xlu0 %4667 }
0x14f5   : > { %11727 = vmatprep.mubr.msk.f32.mxu1 %vm1036_vm6, %v4355_v13 }
0x14f6   : > { %11728 = vmatmul.mubr.msk.f32.vlgmr.msra.gmra.mrb[54].mxu1 %vm1036_vm6, %v4356_v14  ;;  %v4670_v33 = vpop.permute.xlu1 %4669 }
0x14f7   : > { %11734 = vmatprep.mubr.msk.f32.mxu1 %vm648_vm0, %v4457_v27 }
0x14fa   : > { %12711 = vmatpush3.bf16.xpose.msk.msra.mxu1 %vm14799_vm4, %v12706_v49 }
0x14fb   : > { %12720 = vmatprep.subr.msk.bf16.mxu1 %vm14799_vm4, %v12718_v29 }
0x1501   : > { %11735 = vmatmul.mubr.msk.f32.vlgmr.msra.gmra.mrb[56].mxu1 %vm648_vm0, %v4459_v8 }
0x1502   : > { %12723 = vmatpush3.bf16.xpose.msk.msra.mxu1 %vm14799_vm4, %v12718_v29  ;;  %11748 = vmatprep.mubr.msk.f32.mxu1 %vm648_vm0, %v4668_v31 }
0x1509   : > { %11749 = vmatmul.mubr.msk.f32.vlgmr.msra.gmra.mrb[58].mxu1 %vm648_vm0, %v4670_v33 }
0x150a   : > { %5432 = vmatprep.mubr.f32.mxu1 %v14454_v16 }
0x15c9   : > { %v11729_v34 = vpop.f32.mrb[54].mxu1 }
0x15ca   : > { %v4437_v35 = vpop.f32.mrb[55].mxu1 }
0x15d4   : > { %v11736_v38 = vpop.f32.mrb[56].mxu1 }
0x15d5   : > { %v4538_v39 = vpop.f32.mrb[57].mxu1  ;;  %v4550_v41 = vsel %vm1040_vm5, %v11736_v38, -inf }
0x15d6   : > { %4551 = vmax.xlane.f32.xlu1 %v4550_v41  ;;  %v4547_v42 = vsel %vm1036_vm6, %v4538_v39, -inf }
0x15d7   : > { %4548 = vmax.xlane.f32.xlu0 %v4547_v42  ;;  %v4884_v42 = vld [vmem:[#allocation8 + $0x98] sm:$0xff] }
0x15dc   : > { %v11750_v46 = vpop.f32.mrb[58].mxu1 }
0x15dd   : > { %v4749_v50 = vpop.f32.mrb[59].mxu1  ;;  %v4761_v36 = vsel %vm1040_vm5, %v11750_v46, -inf }
0x15de   : > { %v4758_v30 = vsel %vm1036_vm6, %v4749_v50, -inf }
0x15df   : > { %4759 = vmax.xlane.f32.xlu0 %v4758_v30  ;;  %v4886_v30 = vld [vmem:[#allocation8 + $0xa8] sm:$0xff] }
0x15e3   : > { %4762 = vmax.xlane.f32.xlu0 %v4761_v36 }
0x1663   : > { %v4552_v51 = vpop.xlane.xlu1 %4551 }
0x1664   : > { %v4554_v52 = vsub.f32 %v11736_v38, %v4552_v51  ;;  %v4549_v55 = vpop.xlane.xlu0 %4548  ;;  %v4882_v38 = vld [vmem:[#allocation8 + $0x88] sm:$0xff]  ;;  %v4887_v51 = vld [vmem:[#allocation8 + $0xb0] sm:$0xff] }
0x1665   : > { %v4553_v43 = vsub.f32 %v4538_v39, %v4549_v55  ;;  %v4883_v39 = vld [vmem:[#allocation8 + $0x90] sm:$0xff] }
0x1666   : > { %v4557_v45 = vmul.f32 1.442695, %v4554_v52  ;;  %v4888_v52 = vld [vmem:[#allocation8 + $0xb8] sm:$0xff] }
0x1667   : > { %v4555_v32 = vmul.f32 1.442695, %v4553_v43  ;;  %v12742_v55 = vpack.c.bf16 %v4888_v52, %v4887_v51  ;;  %v4889_v43 = vld [vmem:[#allocation8 + $0xc0] sm:$0xff]  ;;  %v5061_v51 = vld [vmem:[#allocation10 + $0x910] sm:$0xff] }
0x1668   : > { %14187 = vpow2.f32 %v4557_v45  ;;  %v4890_v45 = vld [vmem:[#allocation8 + $0xc8] sm:$0xff] }
0x1669   : > { %14189 = vpow2.f32 %v4555_v32  ;;  %v12746_v32 = vpack.c.bf16 %v4890_v45, %v4889_v43  ;;  %v5092_v43 = vld [vmem:[#allocation10 + $0xa08] sm:$0xff] }
0x166a   : > { %v5108_v45 = vld [vmem:[#allocation10 + $0xa88] sm:$0xff] }
0x166c   : > { %v4760_v57 = vpop.xlane.xlu0 %4759 }
0x166d   : > { %v4764_v59 = vsub.f32 %v4749_v50, %v4760_v57  ;;  %v4885_v50 = vld [vmem:[#allocation8 + $0xa0] sm:$0xff]  ;;  %v4891_v57 = vld [vmem:[#allocation8 + $0xd0] sm:$0xff] }
0x166e   : > { %v12738_v36 = vpack.c.bf16 %v4886_v30, %v4885_v50  ;;  %v5059_v30 = vld [vmem:[#allocation10 + $0x900] sm:$0xff] }
0x166f   : > { %v4766_v44 = vmul.f32 1.442695, %v4764_v59  ;;  %v4892_v59 = vld [vmem:[#allocation8 + $0xd8] sm:$0xff] }
0x1670   : > { %v4763_v20 = vpop.xlane.xlu0 %4762 }
0x1671   : > { %14191 = vpow2.f32 %v4766_v44  ;;  %v4765_v21 = vsub.f32 %v11750_v46, %v4763_v20  ;;  %v12734_v46 = vpack.c.bf16 %v4884_v42, %v4883_v39  ;;  %v12750_v44 = vpack.c.bf16 %v4892_v59, %v4891_v57  ;;  %v4893_v20 = vld [vmem:[#allocation8 + $0xe0] sm:$0xff]  ;;  %v5060_v39 = vld [vmem:[#allocation10 + $0x908] sm:$0xff]  ;;  %v5078_v42 = vld [vmem:[#allocation10 + $0x998] sm:$0xff] }
0x1672   : > { %v14188_v0 = vpop.eup %14187  ;;  %v12770_v57 = vpack.c.bf16 %v5108_v45, %v5092_v43  ;;  %v5094_v59 = vld [vmem:[#allocation10 + $0xa18] sm:$0xff] }
0x1673   : > { %v14190_v1 = vpop.eup %14189  ;;  %v4768_v3 = vmul.f32 1.442695, %v4765_v21  ;;  %v4562_v4 = vsel %vm1040_vm5, %v14188_v0, 0.0  ;;  %v4894_v21 = vld [vmem:[#allocation8 + $0xe8] sm:$0xff] }
0x1674   : > { %4563 = vadd.xlane.f32.xlu0 %v4562_v4  ;;  %v4559_v25 = vsel %vm1036_vm6, %v14190_v1, 0.0 }
0x1675   : > { %14193 = vpow2.f32 %v4768_v3  ;;  %4560 = vadd.xlane.f32.xlu1 %v4559_v25  ;;  %v4896_v3 = vld [vmem:[#allocation8 + $0xf8] sm:$0xff] }
0x167b   : > { %v14192_v6 = vpop.eup %14191 }
0x167c   : > { %v4770_v7 = vsel %vm1036_vm6, %v14192_v6, 0.0 }
0x167d   : > { %4771 = vadd.xlane.f32.xlu1 %v4770_v7 }
0x167f   : > { %v14194_v23 = vpop.eup %14193 }
0x1680   : > { %v4773_v9 = vsel %vm1040_vm5, %v14194_v23, 0.0 }
0x1681   : > { %4774 = vadd.xlane.f32.xlu0 %v4773_v9 }
0x168e   : > { %14092 = vrot.lane.b32.xlu1 %v15072_v15, %s14457_s21 }
0x1692   : > { %4448 = vrot.lane.b32.xlu1 %v4437_v35, %s14458_s22  ;;  %v4881_v35 = vld [vmem:[#allocation8 + $0x80] sm:$0xff] }
0x1693   : > { %v12730_v41 = vpack.c.bf16 %v4882_v38, %v4881_v35  ;;  %v5029_v35 = vld [vmem:[#allocation10 + $0x810] sm:$0xff] }
0x1694   : > { %v5045_v38 = vld [vmem:[#allocation10 + $0x890] sm:$0xff] }
0x1696   : > { %4450 = vrot.lane.b32.xlu1 %v11729_v34, %s14458_s22 }
0x1697   : > { %14097 = vrot.lane.b32.xlu0 %v15072_v15, %s14458_s22 }
0x1701   : > { %v4564_v11 = vpop.xlane.xlu0 %4563 }
0x1702   : > { %v4561_v10 = vpop.xlane.xlu1 %4560 }
0x1703   : > { %14195 = vrcp.f32 %v4561_v10 }
0x1704   : > { %14197 = vrcp.f32 %v4564_v11 }
0x170a   : > { %v4772_v12 = vpop.xlane.xlu1 %4771 }
0x170b   : > { %14199 = vrcp.f32 %v4772_v12 }
0x170d   : > { %v14196_v2 = vpop.eup %14195 }
0x170e   : > { %v14093_v17 = vpop.permute.xlu1 %14092  ;;  %v4775_v18 = vpop.xlane.xlu0 %4774  ;;  %v4567_v22 = vmul.f32 %v14196_v2, %v14190_v1  ;;  %v4895_v1 = vld [vmem:[#allocation8 + $0xf0] sm:$0xff] }
0x170f   : > { %v14095_v49 = vunpack.i.h.bf16 %v14093_v17  ;;  %v14094_v19 = vunpack.i.l.bf16 %v14093_v17  ;;  %14201 = vrcp.f32 %v4775_v18  ;;  %v14198_v5 = vpop.eup %14197  ;;  %v12758_v4 = vpack.c.bf16 %v4896_v3, %v4895_v1  ;;  %v10329_v18 = vld [vmem:[%s15609_s6 + $0x1] ss:$0 sm:$0xff]  ;;  %v5093_v1 = vld [vmem:[#allocation10 + $0xa10] sm:$0xff] }
0x1710   : > { %11741 = vmatprep.mubr.msk.f32.mxu0 %vm1036_vm6, %v4567_v22  ;;  %v4568_v27 = vmul.f32 %v14198_v5, %v14188_v0  ;;  %v12754_v0 = vpack.c.bf16 %v4894_v21, %v4893_v20  ;;  %v5091_v20 = vld [vmem:[#allocation10 + $0xa00] sm:$0xff]  ;;  %v5109_v3 = vld [vmem:[#allocation10 + $0xa90] sm:$0xff] }
0x1711   : > { %v12712_v63 = vpack.c.bf16 %v14095_v49, %v14094_v19 }
0x1712   : > { %v4449_v13 = vpop.permute.xlu1 %4448  ;;  %v14098_v14 = vpop.permute.xlu0 %14097 }
0x1713   : > { %4454 = vst.msk [vmem:[#allocation2] sm:$0xff] %vm1358_vm8, %v4449_v13  ;;  %v14100_v15 = vunpack.i.h.bf16 %v14098_v14  ;;  %v14099_v37 = vunpack.i.l.bf16 %v14098_v14  ;;  %12714 = vmatprep.subr.msk.bf16.mxu0 %vm14785_vm3, %v12712_v63 }
0x1714   : > { %12717 = vmatpush3.bf16.msk.msra.mxu0 %vm14785_vm3, %v12712_v63 }
0x1715   : > { %v14200_v47 = vpop.eup %14199  ;;  %v12724_v29 = vpack.c.bf16 %v14100_v15, %v14099_v37  ;;  %v5028_v15 = vld [vmem:[#allocation10 + $0x808] sm:$0xff] }
0x1716   : > { %v4451_v8 = vpop.permute.xlu1 %4450  ;;  %v4778_v31 = vmul.f32 %v14200_v47, %v14192_v6  ;;  %v5044_v37 = vld [vmem:[#allocation10 + $0x888] sm:$0xff]  ;;  %v5030_v47 = vld [vmem:[#allocation10 + $0x818] sm:$0xff] }
0x1717   : > { %4455 = vst.msk [vmem:[#allocation2 + $0x8] sm:$0x3f] %vm1360_vm9, %v4451_v8  ;;  %11742 = vmatmul.mubr.msk.f32.vlgmr.msra.gmra.mrb[48].mxu0 %vm1036_vm6, %v4568_v27  ;;  %12726 = vmatprep.subr.msk.bf16.mxu0 %vm14785_vm3, %v12724_v29  ;;  %v12762_v27 = vpack.c.bf16 %v5044_v37, %v5028_v15  ;;  %v5027_v8 = vld [vmem:[#allocation10 + $0x800] sm:$0xff]  ;;  %v5125_v37 = vld [vmem:[#allocation10 + $0xb10] sm:$0xff] }
0x1718   : > { %12729 = vmatpush3.bf16.msk.msra.mxu0 %vm14785_vm3, %v12724_v29  ;;  %11755 = vmatprep.mubr.msk.f32.mxu0 %vm1036_vm6, %v4778_v31  ;;  %v5046_v29 = vld [vmem:[#allocation10 + $0x898] sm:$0xff]  ;;  %v5043_v31 = vld [vmem:[#allocation10 + $0x880] sm:$0xff] }
0x1719   : > { %v14202_v33 = vpop.eup %14201  ;;  %12731 = vmatprep.subr.bf16.mxu0 %v12730_v41  ;;  %12763 = vmatprep.subr.bf16.mxu1 %v12762_v27 }
0x171a   : > { %v4779_v34 = vmul.f32 %v14202_v33, %v14194_v23  ;;  %v12794_v33 = vpack.c.bf16 %v5046_v29, %v5030_v47  ;;  %v5141_v47 = vld [vmem:[#allocation10 + $0xb90] sm:$0xff]  ;;  %v5156_v29 = vld [vmem:[#allocation10 + $0xc08] sm:$0xff] }
0x171b   : > { %v12808_v27 = vpack.c.bf16 %v5141_v47, %v5125_v37  ;;  %v5032_v37 = vld [vmem:[#allocation10 + $0x828] sm:$0xff] }
0x171c   : > { %11756 = vmatmul.mubr.msk.f32.vlgmr.msra.gmra.mrb[50].mxu0 %vm1036_vm6, %v4779_v34  ;;  %v12764_v34 = vpack.c.bf16 %v5043_v31, %v5027_v8  ;;  %v5172_v8 = vld [vmem:[#allocation10 + $0xc88] sm:$0xff]  ;;  %v5158_v31 = vld [vmem:[#allocation10 + $0xc18] sm:$0xff] }
0x171d   : > { %12733 = vmatpush3.bf16.msra.mxu0 %v12730_v41  ;;  %v5076_v41 = vld [vmem:[#allocation10 + $0x988] sm:$0xff] }
0x171e   : > { %12735 = vmatprep.subr.bf16.mxu0 %v12734_v46  ;;  %12765 = vmatpush1.bf16.msra.mxu1 %v12764_v34  ;;  %v5174_v34 = vld [vmem:[#allocation10 + $0xc98] sm:$0xff]  ;;  %v5048_v47 = vld [vmem:[#allocation10 + $0x8a8] sm:$0xff] }
0x1721   : > { %12737 = vmatpush3.bf16.msra.mxu0 %v12734_v46  ;;  %v12766_v46 = vpack.c.bf16 %v5076_v41, %v5060_v39  ;;  %v12810_v39 = vpack.c.bf16 %v5174_v34, %v5158_v31  ;;  %v5157_v41 = vld [vmem:[#allocation10 + $0xc10] sm:$0xff] }
0x1722   : > { %12739 = vmatprep.subr.bf16.mxu0 %v12738_v36 }
0x1723   : > { %12767 = vmatprep.subr.bf16.mxu1 %v12766_v46  ;;  %v5188_v46 = vld [vmem:[#allocation10 + $0xd08] sm:$0xff] }
0x1725   : > { %12741 = vmatpush3.bf16.msra.mxu0 %v12738_v36  ;;  %v5075_v36 = vld [vmem:[#allocation10 + $0x980] sm:$0xff] }
0x1726   : > { %12743 = vmatprep.subr.bf16.mxu0 %v12742_v55  ;;  %v12768_v52 = vpack.c.bf16 %v5075_v36, %v5059_v30  ;;  %v5190_v30 = vld [vmem:[#allocation10 + $0xd18] sm:$0xff] }
0x1728   : > { %12769 = vmatpush1.bf16.msra.mxu1 %v12768_v52  ;;  %v5187_v52 = vld [vmem:[#allocation10 + $0xd00] sm:$0xff] }
0x1729   : > { %12745 = vmatpush3.bf16.msra.mxu0 %v12742_v55  ;;  %v5077_v55 = vld [vmem:[#allocation10 + $0x990] sm:$0xff]  ;;  %12771 = vmatprep.subr.bf16.mxu1 %v12770_v57 }
0x172a   : > { %12747 = vmatprep.subr.bf16.mxu0 %v12746_v32  ;;  %v5205_v57 = vld [vmem:[#allocation10 + $0xd90] sm:$0xff] }
0x172d   : > { %12749 = vmatpush3.bf16.msra.mxu0 %v12746_v32  ;;  %v12800_v32 = vpack.c.bf16 %v5077_v55, %v5061_v51  ;;  %v5206_v51 = vld [vmem:[#allocation10 + $0xd98] sm:$0xff]  ;;  %v5203_v55 = vld [vmem:[#allocation10 + $0xd80] sm:$0xff] }
0x172e   : > { %12751 = vmatprep.subr.bf16.mxu0 %v12750_v44  ;;  %v12814_v43 = vpack.c.bf16 %v5206_v51, %v5190_v30  ;;  %v12784_v45 = vpack.c.bf16 %v5203_v55, %v5187_v52  ;;  %v5033_v30 = vld [vmem:[#allocation10 + $0x830] sm:$0xff]  ;;  %v10333_v51 = vld [vmem:[%s15611_s8 + $0x1] ss:$0 sm:$0xff] }
0x172f   : > { %v5064_v52 = vld [vmem:[#allocation10 + $0x928] sm:$0xff] }
0x1731   : > { %12753 = vmatpush3.bf16.msra.mxu0 %v12750_v44  ;;  %v5110_v44 = vld [vmem:[#allocation10 + $0xa98] sm:$0xff] }
0x1732   : > { %12755 = vmatprep.subr.bf16.mxu0 %v12754_v0  ;;  %v12802_v21 = vpack.c.bf16 %v5110_v44, %v5094_v59  ;;  %v5220_v44 = vld [vmem:[#allocation10 + $0xe08] sm:$0xff] }
0x1735   : > { %12757 = vmatpush3.bf16.msra.mxu0 %v12754_v0  ;;  %v5107_v0 = vld [vmem:[#allocation10 + $0xa80] sm:$0xff] }
0x1736   : > { %12759 = vmatprep.subr.bf16.mxu0 %v12758_v4 }
0x1739   : > { %12761 = vmatpush3.bf16.msra.mxu0 %v12758_v4  ;;  %v12772_v4 = vpack.c.bf16 %v5107_v0, %v5091_v20  ;;  %v5236_v20 = vld [vmem:[#allocation10 + $0xe88] sm:$0xff] }
0x173a   : > { %12795 = vmatprep.subr.bf16.mxu0 %v12794_v33  ;;  %v12778_v33 = vpack.c.bf16 %v5172_v8, %v5156_v29  ;;  %v12786_v0 = vpack.c.bf16 %v5236_v20, %v5220_v44  ;;  %v12826_v29 = vpack.c.bf16 %v5048_v47, %v5032_v37  ;;  %v5050_v8 = vld [vmem:[#allocation10 + $0x8b8] sm:$0xff]  ;;  %v5063_v20 = vld [vmem:[#allocation10 + $0x920] sm:$0xff] }
0x173b   : > { %12773 = vmatpush1.bf16.msra.mxu1 %v12772_v4  ;;  %v5235_v4 = vld [vmem:[#allocation10 + $0xe80] sm:$0xff]  ;;  %v5146_v37 = vld [vmem:[#allocation10 + $0xbb8] sm:$0xff] }
0x17ea   : > { %v11743_v25 = vpop.f32.mrb[48].mxu0 }
0x17eb   : > { %4661 = vrot.lane.b32.xlu1 %v11743_v25, %s14457_s21  ;;  %v4648_v6 = vpop.f32.mrb[49].mxu0  ;;  %v12804_v25 = vpack.c.bf16 %v5109_v3, %v5093_v1  ;;  %v5238_v1 = vld [vmem:[#allocation10 + $0xe98] sm:$0xff]  ;;  %v5219_v3 = vld [vmem:[#allocation10 + $0xe00] sm:$0xff] }
0x17ec   : > { %4659 = vrot.lane.b32.xlu0 %v4648_v6, %s14457_s21 }
0x17ef   : > { %v11757_v7 = vpop.f32.mrb[50].mxu0 }
0x17f0   : > { %4872 = vrot.lane.b32.xlu1 %v11757_v7, %s14456_s18  ;;  %v4859_v23 = vpop.f32.mrb[51].mxu0 }
0x17f1   : > { %4870 = vrot.lane.b32.xlu0 %v4859_v23, %s14456_s18 }
0x185d   : > { %v4662_v9 = vpop.permute.xlu1 %4661 }
0x185e   : > { %4666 = vst.msk [vmem:[#allocation2 + $0x8] sm:$0x3f] %vm1573_vm11, %v4662_v9  ;;  %v4660_v10 = vpop.permute.xlu0 %4659 }
0x185f   : > { %4665 = vst.msk [vmem:[#allocation2] sm:$0xff] %vm1571_vm10, %v4660_v10 }
0x1862   : > { %v4873_v11 = vpop.permute.xlu1 %4872 }
0x1863   : > { %4877 = vst.msk [vmem:[#allocation2 + $0x8] sm:$0x3f] %vm1786_vm12, %v4873_v11  ;;  %v4871_v12 = vpop.permute.xlu0 %4870 }
0x1864   : > { %4876 = vst.msk [vmem:[#allocation2] sm:$0xff] %vm1784_vm13, %v4871_v12 }
0x186a   : > { %v4879_v17 = vld [vmem:[#allocation2 + $0x8] sm:$0x3f] }
0x186b   : > { %v4878_v2 = vld [vmem:[#allocation2] sm:$0xff] }
0x186c   : > { %11790 = vmatprep.mubr.f32.mxu0 %v4878_v2 }
0x186d   : > { %11791 = vmatmul.mubr.f32.vlgmr.msra.gmra.mrb[52].mxu0 %v4879_v17 }
0x186e   : > { %5509 = vmatprep.mubr.f32.mxu0 %v14454_v16 }
0x1940   : > { %v11792_v22 = vpop.f32.mrb[52].mxu0 }
0x1941   : > { %v4977_v49 = vadd.f32 %v11792_v22, %v10329_v18  ;;  %v4971_v19 = vpop.f32.mrb[53].mxu0  ;;  %v5140_v22 = vld [vmem:[#allocation10 + $0xb88] sm:$0xff] }
0x1942   : > { %v4972_v63 = vadd.f32 %v10329_v18, %v4971_v19  ;;  %v5124_v18 = vld [vmem:[#allocation10 + $0xb08] sm:$0xff] }
0x1943   : > { %v4981_v5 = vadd.f32 %v4977_v49, %v15056_v56  ;;  %v12796_v56 = vpack.c.bf16 %v5045_v38, %v5029_v35  ;;  %v5126_v49 = vld [vmem:[#allocation10 + $0xb18] sm:$0xff]  ;;  %v12774_v19 = vpack.c.bf16 %v5140_v22, %v5124_v18  ;;  %v5155_v35 = vld [vmem:[#allocation10 + $0xc00] sm:$0xff] }
0x1944   : > { %v4980_v13 = vadd.f32 %v4972_v63, %v15050_v54  ;;  %v5062_v54 = vld [vmem:[#allocation10 + $0x918] sm:$0xff]  ;;  %v5171_v38 = vld [vmem:[#allocation10 + $0xc80] sm:$0xff] }
0x1945   : > { %v4984_v14 = vsel %vm1066_vm1, %v4981_v5, 0.0  ;;  %v12798_v50 = vpack.c.bf16 %v5078_v42, %v5062_v54  ;;  %12797 = vmatpush1.bf16.msra.mxu0 %v12796_v56  ;;  %v5142_v63 = vld [vmem:[#allocation10 + $0xb98] sm:$0xff]  ;;  %12775 = vmatprep.subr.bf16.mxu1 %v12774_v19  ;;  %v12780_v56 = vpack.c.bf16 %v5171_v38, %v5155_v35  ;;  %v5173_v54 = vld [vmem:[#allocation10 + $0xc90] sm:$0xff]  ;;  %v5267_v19 = vld [vmem:[#allocation10 + $0xf80] sm:$0xff] }
0x1946   : > { %4985 = vadd.xlane.f32.xlu1 %v4984_v14  ;;  %4982 = vadd.xlane.f32.xlu0 %v4980_v13  ;;  %v5123_v14 = vld [vmem:[#allocation10 + $0xb00] sm:$0xff]  ;;  %v12806_v15 = vpack.c.bf16 %v5142_v63, %v5126_v49  ;;  %v12812_v42 = vpack.c.bf16 %v5173_v54, %v5157_v41  ;;  %v5270_v22 = vld [vmem:[#allocation10 + $0xf98] sm:$0xff]  ;;  %v10331_v54 = vld [vmem:[%s15610_s7 + $0x1] ss:$0 sm:$0xff] }
0x1947   : > { %12799 = vmatprep.subr.bf16.mxu0 %v12798_v50  ;;  %v5204_v50 = vld [vmem:[#allocation10 + $0xd88] sm:$0xff]  ;;  %v5251_v49 = vld [vmem:[#allocation10 + $0xf00] sm:$0xff] }
0x1948   : > { %v12782_v36 = vpack.c.bf16 %v5204_v50, %v5188_v46  ;;  %v5047_v50 = vld [vmem:[#allocation10 + $0x8a0] sm:$0xff] }
0x1949   : > { %12801 = vmatpush1.bf16.msra.mxu0 %v12800_v32  ;;  %v5189_v32 = vld [vmem:[#allocation10 + $0xd10] sm:$0xff] }
0x194a   : > { %12803 = vmatprep.subr.bf16.mxu0 %v12802_v21  ;;  %v12816_v59 = vpack.c.bf16 %v5205_v57, %v5189_v32  ;;  %v5222_v21 = vld [vmem:[#allocation10 + $0xe18] sm:$0xff] }
0x194b   : > { %v5082_v32 = vld [vmem:[#allocation10 + $0x9b8] sm:$0xff] }
0x194d   : > { %12805 = vmatpush1.bf16.msra.mxu0 %v12804_v25  ;;  %v12818_v25 = vpack.c.bf16 %v5238_v1, %v5222_v21  ;;  %v5079_v21 = vld [vmem:[#allocation10 + $0x9a0] sm:$0xff]  ;;  %v5065_v1 = vld [vmem:[#allocation10 + $0x930] sm:$0xff] }
0x194e   : > { %12807 = vmatprep.subr.bf16.mxu0 %v12806_v15  ;;  %v5269_v15 = vld [vmem:[#allocation10 + $0xf90] sm:$0xff] }
0x1951   : > { %12809 = vmatpush1.bf16.msra.mxu0 %v12808_v27  ;;  %v5034_v27 = vld [vmem:[#allocation10 + $0x838] sm:$0xff] }
0x1952   : > { %12811 = vmatprep.subr.bf16.mxu0 %v12810_v39  ;;  %v12858_v31 = vpack.c.bf16 %v5050_v8, %v5034_v27  ;;  %v5143_v8 = vld [vmem:[#allocation10 + $0xba0] sm:$0xff] }
0x1955   : > { %12813 = vmatpush1.bf16.msra.mxu0 %v12812_v42  ;;  %v5031_v42 = vld [vmem:[#allocation10 + $0x820] sm:$0xff] }
0x1956   : > { %12815 = vmatprep.subr.bf16.mxu0 %v12814_v43  ;;  %v5080_v43 = vld [vmem:[#allocation10 + $0x9a8] sm:$0xff] }
0x1959   : > { %12817 = vmatpush1.bf16.msra.mxu0 %v12816_v59  ;;  %v12828_v59 = vpack.c.bf16 %v5047_v50, %v5031_v42  ;;  %v5175_v50 = vld [vmem:[#allocation10 + $0xca0] sm:$0xff] }
0x195a   : > { %12819 = vmatprep.subr.bf16.mxu0 %v12818_v25  ;;  %v12830_v25 = vpack.c.bf16 %v5080_v43, %v5064_v52  ;;  %v5177_v52 = vld [vmem:[#allocation10 + $0xcb0] sm:$0xff]  ;;  %v5208_v43 = vld [vmem:[#allocation10 + $0xda8] sm:$0xff] }
0x19d3   : > { %v4986_v6 = vpop.xlane.xlu1 %4985  ;;  %v4983_v7 = vpop.xlane.xlu0 %4982 }
0x19d4   : > { %v4988_v23 = vmul.f32 0.0078125, %v4986_v6  ;;  %v4987_v9 = vmul.f32 0.0078125, %v4983_v7  ;;  %v12788_v6 = vpack.c.bf16 %v5235_v4, %v5219_v3  ;;  %v5221_v7 = vld [vmem:[#allocation10 + $0xe10] sm:$0xff]  ;;  %v5096_v4 = vld [vmem:[#allocation10 + $0xa28] sm:$0xff] }
0x19d5   : > { %v5081_v3 = vld [vmem:[#allocation10 + $0x9b0] sm:$0xff] }
0x19d6   : > { %v15186_v10 = vsub.f32 %v4981_v5, %v4988_v23  ;;  %v15188_v11 = vsub.f32 %v4980_v13, %v4987_v9  ;;  %v5139_v5 = vld [vmem:[#allocation10 + $0xb80] sm:$0xff]  ;;  %v5237_v23 = vld [vmem:[#allocation10 + $0xe90] sm:$0xff] }
0x19d7   : > { %v12776_v13 = vpack.c.bf16 %v5139_v5, %v5123_v14  ;;  %v12820_v9 = vpack.c.bf16 %v5237_v23, %v5221_v7  ;;  %v12792_v14 = vpack.c.bf16 %v5267_v19, %v5251_v49  ;;  %v5253_v5 = vld [vmem:[#allocation10 + $0xf10] sm:$0xff]  ;;  %v5112_v7 = vld [vmem:[#allocation10 + $0xaa8] sm:$0xff]  ;;  %v5098_v23 = vld [vmem:[#allocation10 + $0xa38] sm:$0xff] }
0x19d8   : > { %v4991_v12 = vmul.f32 %v15188_v11, %v15188_v11  ;;  %v4992_v2 = vmul.f32 %v15186_v10, %v15186_v10  ;;  %v12834_v49 = vpack.c.bf16 %v5112_v7, %v5096_v4  ;;  %v5224_v4 = vld [vmem:[#allocation10 + $0xe28] sm:$0xff]  ;;  %v5242_v7 = vld [vmem:[#allocation10 + $0xeb8] sm:$0xff] }
0x19d9   : > { %12777 = vmatpush1.bf16.msra.mxu1 %v12776_v13  ;;  %12821 = vmatpush1.bf16.msra.mxu0 %v12820_v9  ;;  %v12824_v13 = vpack.c.bf16 %v5269_v15, %v5253_v5  ;;  %v5114_v9 = vld [vmem:[#allocation10 + $0xab8] sm:$0xff]  ;;  %v5128_v5 = vld [vmem:[#allocation10 + $0xb28] sm:$0xff] }
0x19da   : > { %4993 = vadd.xlane.f32.xlu0 %v4991_v12  ;;  %v4995_v17 = vsel %vm1066_vm1, %v4992_v2, 0.0  ;;  %12779 = vmatprep.subr.bf16.mxu1 %v12778_v33  ;;  %v5252_v12 = vld [vmem:[#allocation10 + $0xf08] sm:$0xff]  ;;  %v12866_v19 = vpack.c.bf16 %v5114_v9, %v5098_v23 }
0x19db   : > { %v5268_v2 = vld [vmem:[#allocation10 + $0xf88] sm:$0xff] }
0x19dc   : > { %v12790_v18 = vpack.c.bf16 %v5268_v2, %v5252_v12  ;;  %v12832_v2 = vpack.c.bf16 %v5079_v21, %v5063_v20  ;;  %v5144_v15 = vld [vmem:[#allocation10 + $0xba8] sm:$0xff]  ;;  %v5207_v20 = vld [vmem:[#allocation10 + $0xda0] sm:$0xff] }
0x19dd   : > { %12781 = vmatpush1.bf16.msra.mxu1 %v12780_v56 }
0x19de   : > { %4996 = vadd.xlane.f32.xlu0 %v4995_v17  ;;  %12783 = vmatprep.subr.bf16.mxu1 %v12782_v36  ;;  %v5254_v17 = vld [vmem:[#allocation10 + $0xf18] sm:$0xff]  ;;  %v5049_v36 = vld [vmem:[#allocation10 + $0x8b0] sm:$0xff] }
0x19df   : > { %v12822_v63 = vpack.c.bf16 %v5270_v22, %v5254_v17  ;;  %v12860_v44 = vpack.c.bf16 %v5049_v36, %v5033_v30  ;;  %v12864_v17 = vpack.c.bf16 %v5081_v3, %v5065_v1  ;;  %v5111_v22 = vld [vmem:[#allocation10 + $0xaa0] sm:$0xff]  ;;  %v5193_v1 = vld [vmem:[#allocation10 + $0xd30] sm:$0xff] }
0x19e0   : > { %v5209_v3 = vld [vmem:[#allocation10 + $0xdb0] sm:$0xff] }
0x19e1   : > { %12785 = vmatpush1.bf16.msra.mxu1 %v12784_v45  ;;  %12823 = vmatprep.subr.bf16.mxu0 %v12822_v63  ;;  %v5066_v45 = vld [vmem:[#allocation10 + $0x938] sm:$0xff]  ;;  %v5097_v63 = vld [vmem:[#allocation10 + $0xa30] sm:$0xff]  ;;  %v12880_v9 = vpack.c.bf16 %v5209_v3, %v5193_v1  ;;  %v5116_v1 = vld [vmem:[#allocation10 + $0xac8] sm:$0xff] }
0x19e2   : > { %12787 = vmatprep.subr.bf16.mxu1 %v12786_v0  ;;  %12825 = vmatpush1.bf16.msra.mxu0 %v12824_v13  ;;  %v5130_v13 = vld [vmem:[#allocation10 + $0xb38] sm:$0xff] }
0x19e3   : > { %12859 = vmatprep.subr.bf16.mxu0 %v12858_v31  ;;  %v12838_v31 = vpack.c.bf16 %v5144_v15, %v5128_v5  ;;  %v5274_v5 = vld [vmem:[#allocation10 + $0xfb8] sm:$0xff] }
0x19e4   : > { %v5102_v3 = vld [vmem:[#allocation10 + $0xa58] sm:$0xff] }
0x19e5   : > { %12789 = vmatpush1.bf16.msra.mxu1 %v12788_v6  ;;  %v12862_v6 = vpack.c.bf16 %v5082_v32, %v5066_v45  ;;  %v5194_v45 = vld [vmem:[#allocation10 + $0xd38] sm:$0xff] }
0x19e6   : > { %12791 = vmatprep.subr.bf16.mxu1 %v12790_v18  ;;  %v5095_v18 = vld [vmem:[#allocation10 + $0xa20] sm:$0xff]  ;;  %v5210_v32 = vld [vmem:[#allocation10 + $0xdb8] sm:$0xff] }
0x19e7   : > { %v12836_v47 = vpack.c.bf16 %v5111_v22, %v5095_v18  ;;  %v5225_v22 = vld [vmem:[#allocation10 + $0xe30] sm:$0xff] }
0x19e9   : > { %12793 = vmatpush1.bf16.msra.mxu1 %v12792_v14  ;;  %v5113_v14 = vld [vmem:[#allocation10 + $0xab0] sm:$0xff] }
0x19ea   : > { %12827 = vmatprep.subr.bf16.mxu1 %v12826_v29  ;;  %v12868_v27 = vpack.c.bf16 %v5113_v14, %v5097_v63  ;;  %v5127_v29 = vld [vmem:[#allocation10 + $0xb20] sm:$0xff]  ;;  %v5272_v63 = vld [vmem:[#allocation10 + $0xfa8] sm:$0xff]  ;;  %v5258_v14 = vld [vmem:[#allocation10 + $0xf38] sm:$0xff] }
0x1a67   : > { %v4994_v33 = vpop.xlane.xlu0 %4993 }
0x1a68   : > { %v4998_v34 = vmul.f32 0.0078125, %v4994_v33  ;;  %v12870_v33 = vpack.c.bf16 %v5146_v37, %v5130_v13  ;;  %v5255_v37 = vld [vmem:[#allocation10 + $0xf20] sm:$0xff] }
0x1a6a   : > { %v5000_v35 = vadd.f32 1e-05, %v4998_v34  ;;  %v5129_v34 = vld [vmem:[#allocation10 + $0xb30] sm:$0xff] }
0x1a6b   : > { %v4997_v38 = vpop.xlane.xlu0 %4996 }
0x1a6c   : > { %14203 = vrsqrt.f32 %v5000_v35  ;;  %v4999_v39 = vmul.f32 0.0078125, %v4997_v38  ;;  %v5145_v35 = vld [vmem:[#allocation10 + $0xbb0] sm:$0xff]  ;;  %v5160_v38 = vld [vmem:[#allocation10 + $0xc28] sm:$0xff] }
0x1a6d   : > { %v12872_v42 = vpack.c.bf16 %v5145_v35, %v5129_v34  ;;  %v5052_v34 = vld [vmem:[#allocation10 + $0x8c8] sm:$0xff]  ;;  %v5038_v35 = vld [vmem:[#allocation10 + $0x858] sm:$0xff] }
0x1a6e   : > { %v5001_v56 = vadd.f32 1e-05, %v4999_v39  ;;  %v5176_v39 = vld [vmem:[#allocation10 + $0xca8] sm:$0xff] }
0x1a6f   : > { %v12842_v30 = vpack.c.bf16 %v5176_v39, %v5160_v38  ;;  %v5054_v38 = vld [vmem:[#allocation10 + $0x8d8] sm:$0xff] }
0x1a70   : > { %14205 = vrsqrt.f32 %v5001_v56  ;;  %v5162_v56 = vld [vmem:[#allocation10 + $0xc38] sm:$0xff] }
0x1a76   : > { %v14204_v41 = vpop.eup %14203 }
0x1a77   : > { %v5004_v46 = vmul.f32 %v14204_v41, %v15188_v11  ;;  %v5178_v41 = vld [vmem:[#allocation10 + $0xcb8] sm:$0xff] }
0x1a78   : > { %v12874_v36 = vpack.c.bf16 %v5178_v41, %v5162_v56  ;;  %v5035_v41 = vld [vmem:[#allocation10 + $0x840] sm:$0xff] }
0x1a79   : > { %v5014_v55 = vmul.f32 %v10331_v54, %v5004_v46  ;;  %v5159_v46 = vld [vmem:[#allocation10 + $0xc20] sm:$0xff] }
0x1a7a   : > { %v14206_v57 = vpop.eup %14205 }
0x1a7b   : > { %v15202_v0 = vadd.f32 %v10333_v51, %v5014_v55  ;;  %v5005_v11 = vmul.f32 %v14206_v57, %v15186_v10  ;;  %v5192_v55 = vld [vmem:[#allocation10 + $0xd28] sm:$0xff]  ;;  %v12844_v57 = vpack.c.bf16 %v5175_v50, %v5159_v46  ;;  %v5051_v46 = vld [vmem:[#allocation10 + $0x8c0] sm:$0xff]  ;;  %v5037_v50 = vld [vmem:[#allocation10 + $0x850] sm:$0xff] }
0x1a7c   : > { %v12846_v21 = vpack.c.bf16 %v5208_v43, %v5192_v55  ;;  %v5086_v55 = vld [vmem:[#allocation10 + $0x9d8] sm:$0xff]  ;;  %v12892_v43 = vpack.c.bf16 %v5051_v46, %v5035_v41  ;;  %v5196_v46 = vld [vmem:[#allocation10 + $0xd48] sm:$0xff] }
0x1a7d   : > { %v5015_v12 = vmul.f32 %v10331_v54, %v5005_v11  ;;  %5433 = vmatmul.mubr.f32.vlgmr.msra.gmra.mrb[60].mxu1 %v15202_v0  ;;  %5510 = vmatmul.mubr.f32.vlgmr.msra.gmra.mrb[54].mxu0 %v15202_v0  ;;  %v12840_v54 = vpack.c.bf16 %v5143_v8, %v5127_v29  ;;  %v12878_v11 = vpack.c.bf16 %v5210_v32, %v5194_v45  ;;  %v5257_v8 = vld [vmem:[#allocation10 + $0xf30] sm:$0xff]  ;;  %v5067_v32 = vld [vmem:[#allocation10 + $0x940] sm:$0xff] }
0x1a7e   : > { %12829 = vmatpush1.bf16.msra.mxu1 %v12828_v59  ;;  %12861 = vmatpush1.bf16.msra.mxu0 %v12860_v44  ;;  %v5191_v44 = vld [vmem:[#allocation10 + $0xd20] sm:$0xff]  ;;  %v12886_v29 = vpack.c.bf16 %v5274_v5, %v5258_v14 }
0x1a7f   : > { %v15207_v10 = vadd.f32 %v10333_v51, %v5015_v12  ;;  %5438 = vmatprep.mubr.f32.mxu1 %v14454_v16  ;;  %5515 = vmatprep.mubr.f32.mxu0 %v14454_v16  ;;  %v5161_v51 = vld [vmem:[#allocation10 + $0xc30] sm:$0xff]  ;;  %v12848_v23 = vpack.c.bf16 %v5207_v20, %v5191_v44  ;;  %v5223_v12 = vld [vmem:[#allocation10 + $0xe20] sm:$0xff]  ;;  %v5100_v20 = vld [vmem:[#allocation10 + $0xa48] sm:$0xff] }
0x1a80   : > { %12831 = vmatprep.subr.bf16.mxu1 %v12830_v25  ;;  %12863 = vmatprep.subr.bf16.mxu0 %v12862_v6  ;;  %v12876_v59 = vpack.c.bf16 %v5177_v52, %v5161_v51  ;;  %v5240_v25 = vld [vmem:[#allocation10 + $0xea8] sm:$0xff]  ;;  %v5226_v6 = vld [vmem:[#allocation10 + $0xe38] sm:$0xff]  ;;  %v5085_v44 = vld [vmem:[#allocation10 + $0x9d0] sm:$0xff] }
0x1a81   : > { %5439 = vmatmul.mubr.f32.gmra.mrb[62].mxu1 %v15207_v10  ;;  %5516 = vmatmul.mubr.f32.gmra.mrb[56].mxu0 %v15207_v10  ;;  %v12882_v18 = vpack.c.bf16 %v5242_v7, %v5226_v6  ;;  %v5084_v51 = vld [vmem:[#allocation10 + $0x9c8] sm:$0xff]  ;;  %v5070_v52 = vld [vmem:[#allocation10 + $0x958] sm:$0xff]  ;;  %v5099_v7 = vld [vmem:[#allocation10 + $0xa40] sm:$0xff] }
0x1a82   : > { %12833 = vmatpush1.bf16.msra.mxu1 %v12832_v2  ;;  %12865 = vmatpush1.bf16.msra.mxu0 %v12864_v17  ;;  %v5239_v2 = vld [vmem:[#allocation10 + $0xea0] sm:$0xff]  ;;  %v12850_v17 = vpack.c.bf16 %v5240_v25, %v5224_v4  ;;  %v5118_v4 = vld [vmem:[#allocation10 + $0xad8] sm:$0xff] }
0x1a83   : > { %12835 = vmatprep.subr.bf16.mxu1 %v12834_v49  ;;  %12867 = vmatprep.subr.bf16.mxu0 %v12866_v19  ;;  %v5241_v49 = vld [vmem:[#allocation10 + $0xeb0] sm:$0xff]  ;;  %v5256_v19 = vld [vmem:[#allocation10 + $0xf28] sm:$0xff]  ;;  %v12852_v15 = vpack.c.bf16 %v5239_v2, %v5223_v12  ;;  %v12930_v12 = vpack.c.bf16 %v5118_v4, %v5102_v3  ;;  %v5131_v5 = vld [vmem:[#allocation10 + $0xb40] sm:$0xff] }
0x1a84   : > { %5586 = vmatprep.mubr.f32.mxu1 %v14454_v16  ;;  %5663 = vmatprep.mubr.f32.mxu0 %v14454_v16  ;;  %v12884_v13 = vpack.c.bf16 %v5241_v49, %v5225_v22  ;;  %v5101_v2 = vld [vmem:[#allocation10 + $0xa50] sm:$0xff]  ;;  %v5148_v22 = vld [vmem:[#allocation10 + $0xbc8] sm:$0xff]  ;;  %v5134_v49 = vld [vmem:[#allocation10 + $0xb58] sm:$0xff] }
0x1a85   : > { %v5227_v4 = vld [vmem:[#allocation10 + $0xe40] sm:$0xff] }
0x1a86   : > { %12837 = vmatpush1.bf16.msra.mxu1 %v12836_v47  ;;  %12869 = vmatpush1.bf16.msra.mxu0 %v12868_v27  ;;  %v5271_v47 = vld [vmem:[#allocation10 + $0xfa0] sm:$0xff]  ;;  %v12854_v27 = vpack.c.bf16 %v5272_v63, %v5256_v19  ;;  %v5150_v19 = vld [vmem:[#allocation10 + $0xbd8] sm:$0xff] }
0x1a87   : > { %12839 = vmatprep.subr.bf16.mxu1 %v12838_v31  ;;  %12871 = vmatprep.subr.bf16.mxu0 %v12870_v33  ;;  %v5273_v31 = vld [vmem:[#allocation10 + $0xfb0] sm:$0xff]  ;;  %v5036_v33 = vld [vmem:[#allocation10 + $0x848] sm:$0xff]  ;;  %v12856_v39 = vpack.c.bf16 %v5271_v47, %v5255_v37  ;;  %v12934_v37 = vpack.c.bf16 %v5150_v19, %v5134_v49  ;;  %v5259_v19 = vld [vmem:[#allocation10 + $0xf40] sm:$0xff] }
0x1a88   : > { %v12888_v56 = vpack.c.bf16 %v5273_v31, %v5257_v8  ;;  %v5133_v47 = vld [vmem:[#allocation10 + $0xb50] sm:$0xff]  ;;  %v5180_v8 = vld [vmem:[#allocation10 + $0xcc8] sm:$0xff]  ;;  %v5166_v31 = vld [vmem:[#allocation10 + $0xc58] sm:$0xff] }
0x1a8a   : > { %12841 = vmatpush1.bf16.msra.mxu1 %v12840_v54  ;;  %12873 = vmatpush1.bf16.msra.mxu0 %v12872_v42  ;;  %v12890_v54 = vpack.c.bf16 %v5052_v34, %v5036_v33  ;;  %v12922_v42 = vpack.c.bf16 %v5054_v38, %v5038_v35  ;;  %v5182_v33 = vld [vmem:[#allocation10 + $0xcd8] sm:$0xff]  ;;  %v5163_v38 = vld [vmem:[#allocation10 + $0xc40] sm:$0xff] }
0x1a8b   : > { %12843 = vmatprep.subr.bf16.mxu1 %v12842_v30  ;;  %12875 = vmatprep.subr.bf16.mxu0 %v12874_v36  ;;  %v5053_v30 = vld [vmem:[#allocation10 + $0x8d0] sm:$0xff]  ;;  %v5068_v36 = vld [vmem:[#allocation10 + $0x948] sm:$0xff]  ;;  %v12938_v41 = vpack.c.bf16 %v5182_v33, %v5166_v31  ;;  %v5039_v33 = vld [vmem:[#allocation10 + $0x860] sm:$0xff] }
0x1a8c   : > { %v12924_v45 = vpack.c.bf16 %v5053_v30, %v5037_v50  ;;  %v5212_v50 = vld [vmem:[#allocation10 + $0xdc8] sm:$0xff]  ;;  %v5198_v30 = vld [vmem:[#allocation10 + $0xd58] sm:$0xff] }
0x1a8e   : > { %12845 = vmatpush1.bf16.msra.mxu1 %v12844_v57  ;;  %12877 = vmatpush1.bf16.msra.mxu0 %v12876_v59  ;;  %v5083_v57 = vld [vmem:[#allocation10 + $0x9c0] sm:$0xff]  ;;  %v5069_v59 = vld [vmem:[#allocation10 + $0x950] sm:$0xff] }
0x1a8f   : > { %12847 = vmatprep.subr.bf16.mxu1 %v12846_v21  ;;  %12879 = vmatprep.subr.bf16.mxu0 %v12878_v11  ;;  %v12894_v21 = vpack.c.bf16 %v5084_v51, %v5068_v36  ;;  %v12926_v11 = vpack.c.bf16 %v5086_v55, %v5070_v52  ;;  %v12896_v25 = vpack.c.bf16 %v5083_v57, %v5067_v32  ;;  %v5214_v36 = vld [vmem:[#allocation10 + $0xdd8] sm:$0xff]  ;;  %v5195_v55 = vld [vmem:[#allocation10 + $0xd40] sm:$0xff]  ;;  %v5197_v57 = vld [vmem:[#allocation10 + $0xd50] sm:$0xff] }
0x1a90   : > { %v12928_v6 = vpack.c.bf16 %v5085_v44, %v5069_v59  ;;  %v12942_v32 = vpack.c.bf16 %v5214_v36, %v5198_v30  ;;  %v5213_v59 = vld [vmem:[#allocation10 + $0xdd0] sm:$0xff]  ;;  %v5228_v44 = vld [vmem:[#allocation10 + $0xe48] sm:$0xff]  ;;  %v5071_v36 = vld [vmem:[#allocation10 + $0x960] sm:$0xff] }
0x1a91   : > { %v12944_v3 = vpack.c.bf16 %v5213_v59, %v5197_v57  ;;  %v5120_v57 = vld [vmem:[#allocation10 + $0xae8] sm:$0xff]  ;;  %v5106_v59 = vld [vmem:[#allocation10 + $0xa78] sm:$0xff] }
0x1a92   : > { %12849 = vmatpush1.bf16.msra.mxu1 %v12848_v23  ;;  %12881 = vmatpush1.bf16.msra.mxu0 %v12880_v9  ;;  %v5115_v23 = vld [vmem:[#allocation10 + $0xac0] sm:$0xff]  ;;  %v12898_v9 = vpack.c.bf16 %v5116_v1, %v5100_v20  ;;  %v5244_v20 = vld [vmem:[#allocation10 + $0xec8] sm:$0xff] }
0x1a93   : > { %12851 = vmatprep.subr.bf16.mxu1 %v12850_v17  ;;  %12883 = vmatprep.subr.bf16.mxu0 %v12882_v18  ;;  %v5117_v17 = vld [vmem:[#allocation10 + $0xad0] sm:$0xff]  ;;  %v5132_v18 = vld [vmem:[#allocation10 + $0xb48] sm:$0xff]  ;;  %v12900_v63 = vpack.c.bf16 %v5115_v23, %v5099_v7 }
0x1a94   : > { %v12932_v14 = vpack.c.bf16 %v5117_v17, %v5101_v2  ;;  %v5229_v23 = vld [vmem:[#allocation10 + $0xe50] sm:$0xff]  ;;  %v5276_v2 = vld [vmem:[#allocation10 + $0xfc8] sm:$0xff]  ;;  %v5262_v17 = vld [vmem:[#allocation10 + $0xf58] sm:$0xff] }
0x1a96   : > { %12853 = vmatpush1.bf16.msra.mxu1 %v12852_v15  ;;  %12885 = vmatpush1.bf16.msra.mxu0 %v12884_v13  ;;  %v5147_v15 = vld [vmem:[#allocation10 + $0xbc0] sm:$0xff]  ;;  %v12902_v13 = vpack.c.bf16 %v5148_v22, %v5132_v18  ;;  %v5278_v18 = vld [vmem:[#allocation10 + $0xfd8] sm:$0xff] }
0x1a97   : > { %12855 = vmatprep.subr.bf16.mxu1 %v12854_v27  ;;  %12887 = vmatprep.subr.bf16.mxu0 %v12886_v29  ;;  %v5149_v27 = vld [vmem:[#allocation10 + $0xbd0] sm:$0xff]  ;;  %v5164_v29 = vld [vmem:[#allocation10 + $0xc48] sm:$0xff]  ;;  %v12904_v34 = vpack.c.bf16 %v5147_v15, %v5131_v5  ;;  %v12950_v5 = vpack.c.bf16 %v5278_v18, %v5262_v17  ;;  %v5135_v18 = vld [vmem:[#allocation10 + $0xb60] sm:$0xff] }
0x1a98   : > { %v12936_v35 = vpack.c.bf16 %v5149_v27, %v5133_v47  ;;  %v5261_v15 = vld [vmem:[#allocation10 + $0xf50] sm:$0xff]  ;;  %v5056_v47 = vld [vmem:[#allocation10 + $0x8e8] sm:$0xff]  ;;  %v5042_v27 = vld [vmem:[#allocation10 + $0x878] sm:$0xff] }
0x1a9a   : > { %12857 = vmatpush1.bf16.msra.mxu1 %v12856_v39  ;;  %12889 = vmatpush1.bf16.msra.mxu0 %v12888_v56  ;;  %v5179_v39 = vld [vmem:[#allocation10 + $0xcc0] sm:$0xff]  ;;  %v12906_v56 = vpack.c.bf16 %v5180_v8, %v5164_v29  ;;  %v5058_v29 = vld [vmem:[#allocation10 + $0x8f8] sm:$0xff] }
0x1a9b   : > { %12891 = vmatprep.subr.bf16.mxu1 %v12890_v54  ;;  %12923 = vmatprep.subr.bf16.mxu0 %v12922_v42  ;;  %v5165_v54 = vld [vmem:[#allocation10 + $0xc50] sm:$0xff]  ;;  %v12908_v51 = vpack.c.bf16 %v5179_v39, %v5163_v38  ;;  %v5055_v38 = vld [vmem:[#allocation10 + $0x8e0] sm:$0xff] }
0x1a9c   : > { %v5181_v42 = vld [vmem:[#allocation10 + $0xcd0] sm:$0xff] }
0x1a9d   : > { %5587 = vmatmul.mubr.f32.vlgmr.msra.gmra.mrb[64].mxu1 %v15202_v0  ;;  %5664 = vmatmul.mubr.f32.vlgmr.msra.gmra.mrb[58].mxu0 %v15202_v0  ;;  %v12940_v52 = vpack.c.bf16 %v5181_v42, %v5165_v54  ;;  %v5041_v39 = vld [vmem:[#allocation10 + $0x870] sm:$0xff]  ;;  %v5088_v54 = vld [vmem:[#allocation10 + $0x9e8] sm:$0xff]  ;;  %v5074_v42 = vld [vmem:[#allocation10 + $0x978] sm:$0xff] }
0x1a9e   : > { %12893 = vmatpush1.bf16.msra.mxu1 %v12892_v43  ;;  %12925 = vmatpush1.bf16.msra.mxu0 %v12924_v45  ;;  %v5211_v43 = vld [vmem:[#allocation10 + $0xdc0] sm:$0xff]  ;;  %v12910_v45 = vpack.c.bf16 %v5212_v50, %v5196_v46  ;;  %v5090_v46 = vld [vmem:[#allocation10 + $0x9f8] sm:$0xff]  ;;  %v12956_v50 = vpack.c.bf16 %v5055_v38, %v5039_v33  ;;  %v5200_v38 = vld [vmem:[#allocation10 + $0xd68] sm:$0xff] }
0x1a9f   : > { %5592 = vmatprep.mubr.f32.mxu1 %v14454_v16  ;;  %5669 = vmatprep.mubr.f32.mxu0 %v14454_v16  ;;  %v12912_v1 = vpack.c.bf16 %v5211_v43, %v5195_v55  ;;  %v5089_v55 = vld [vmem:[#allocation10 + $0x9f0] sm:$0xff]  ;;  %v5104_v43 = vld [vmem:[#allocation10 + $0xa68] sm:$0xff] }
0x1aa0   : > { %12895 = vmatprep.subr.bf16.mxu1 %v12894_v21  ;;  %12927 = vmatprep.subr.bf16.mxu0 %v12926_v11  ;;  %v5230_v21 = vld [vmem:[#allocation10 + $0xe58] sm:$0xff] }
0x1aa1   : > { %5593 = vmatmul.mubr.f32.gmra.mrb[66].mxu1 %v15207_v10  ;;  %5670 = vmatmul.mubr.f32.gmra.mrb[60].mxu0 %v15207_v10  ;;  %v5246_v11 = vld [vmem:[#allocation10 + $0xed8] sm:$0xff] }
0x1aa2   : > { %12897 = vmatpush1.bf16.msra.mxu1 %v12896_v25  ;;  %12929 = vmatpush1.bf16.msra.mxu0 %v12928_v6  ;;  %v5243_v25 = vld [vmem:[#allocation10 + $0xec0] sm:$0xff]  ;;  %v12914_v6 = vpack.c.bf16 %v5244_v20, %v5228_v44  ;;  %v12946_v7 = vpack.c.bf16 %v5246_v11, %v5230_v21  ;;  %v5122_v44 = vld [vmem:[#allocation10 + $0xaf8] sm:$0xff] }
0x1aa3   : > { %12899 = vmatprep.subr.bf16.mxu1 %v12898_v9  ;;  %12931 = vmatprep.subr.bf16.mxu0 %v12930_v12  ;;  %v5245_v9 = vld [vmem:[#allocation10 + $0xed0] sm:$0xff]  ;;  %v5260_v12 = vld [vmem:[#allocation10 + $0xf48] sm:$0xff]  ;;  %v12916_v22 = vpack.c.bf16 %v5243_v25, %v5227_v4  ;;  %v5103_v11 = vld [vmem:[#allocation10 + $0xa60] sm:$0xff]  ;;  %v12994_v4 = vpack.c.bf16 %v5122_v44, %v5106_v59 }
0x1aa4   : > { %5740 = vmatprep.mubr.f32.mxu1 %v14454_v16  ;;  %5817 = vmatprep.mubr.f32.mxu0 %v14454_v16  ;;  %v12948_v49 = vpack.c.bf16 %v5245_v9, %v5229_v23  ;;  %v5105_v25 = vld [vmem:[#allocation10 + $0xa70] sm:$0xff]  ;;  %v5152_v23 = vld [vmem:[#allocation10 + $0xbe8] sm:$0xff]  ;;  %v5138_v9 = vld [vmem:[#allocation10 + $0xb78] sm:$0xff] }
0x1aa5   : > { %v5231_v44 = vld [vmem:[#allocation10 + $0xe60] sm:$0xff] }
0x1aa6   : > { %12901 = vmatpush1.bf16.msra.mxu1 %v12900_v63  ;;  %12933 = vmatpush1.bf16.msra.mxu0 %v12932_v14  ;;  %v5275_v63 = vld [vmem:[#allocation10 + $0xfc0] sm:$0xff]  ;;  %v12918_v14 = vpack.c.bf16 %v5276_v2, %v5260_v12  ;;  %v5154_v12 = vld [vmem:[#allocation10 + $0xbf8] sm:$0xff] }
0x1aa7   : > { %12903 = vmatprep.subr.bf16.mxu1 %v12902_v13  ;;  %12935 = vmatprep.subr.bf16.mxu0 %v12934_v37  ;;  %v5277_v13 = vld [vmem:[#allocation10 + $0xfd0] sm:$0xff]  ;;  %v5040_v37 = vld [vmem:[#allocation10 + $0x868] sm:$0xff]  ;;  %v12920_v8 = vpack.c.bf16 %v5275_v63, %v5259_v19  ;;  %v12998_v19 = vpack.c.bf16 %v5154_v12, %v5138_v9  ;;  %v5263_v12 = vld [vmem:[#allocation10 + $0xf60] sm:$0xff] }
0x1aa8   : > { %v12952_v31 = vpack.c.bf16 %v5277_v13, %v5261_v15  ;;  %v5137_v63 = vld [vmem:[#allocation10 + $0xb70] sm:$0xff]  ;;  %v5184_v15 = vld [vmem:[#allocation10 + $0xce8] sm:$0xff]  ;;  %v5170_v13 = vld [vmem:[#allocation10 + $0xc78] sm:$0xff] }
0x1aaa   : > { %12905 = vmatpush1.bf16.msra.mxu1 %v12904_v34  ;;  %12937 = vmatpush1.bf16.msra.mxu0 %v12936_v35  ;;  %v12954_v34 = vpack.c.bf16 %v5056_v47, %v5040_v37  ;;  %v12986_v35 = vpack.c.bf16 %v5058_v29, %v5042_v27  ;;  %v5186_v37 = vld [vmem:[#allocation10 + $0xcf8] sm:$0xff]  ;;  %v5167_v29 = vld [vmem:[#allocation10 + $0xc60] sm:$0xff] }
0x1aab   : > { %12907 = vmatprep.subr.bf16.mxu1 %v12906_v56  ;;  %12939 = vmatprep.subr.bf16.mxu0 %v12938_v41  ;;  %v5057_v56 = vld [vmem:[#allocation10 + $0x8f0] sm:$0xff]  ;;  %v5072_v41 = vld [vmem:[#allocation10 + $0x968] sm:$0xff]  ;;  %v13002_v33 = vpack.c.bf16 %v5186_v37, %v5170_v13 }
0x1aac   : > { %v12988_v30 = vpack.c.bf16 %v5057_v56, %v5041_v39  ;;  %v5216_v39 = vld [vmem:[#allocation10 + $0xde8] sm:$0xff]  ;;  %v5202_v56 = vld [vmem:[#allocation10 + $0xd78] sm:$0xff] }
0x1aae   : > { %12909 = vmatpush1.bf16.msra.mxu1 %v12908_v51  ;;  %12941 = vmatpush1.bf16.msra.mxu0 %v12940_v52  ;;  %v5087_v51 = vld [vmem:[#allocation10 + $0x9e0] sm:$0xff]  ;;  %v5073_v52 = vld [vmem:[#allocation10 + $0x970] sm:$0xff] }
0x1aaf   : > { %12911 = vmatprep.subr.bf16.mxu1 %v12910_v45  ;;  %12943 = vmatprep.subr.bf16.mxu0 %v12942_v32  ;;  %v12958_v45 = vpack.c.bf16 %v5088_v54, %v5072_v41  ;;  %v12990_v32 = vpack.c.bf16 %v5090_v46, %v5074_v42  ;;  %v12960_v20 = vpack.c.bf16 %v5087_v51, %v5071_v36  ;;  %v5218_v41 = vld [vmem:[#allocation10 + $0xdf8] sm:$0xff]  ;;  %v5199_v46 = vld [vmem:[#allocation10 + $0xd60] sm:$0xff]  ;;  %v5201_v51 = vld [vmem:[#allocation10 + $0xd70] sm:$0xff] }
0x1ab0   : > { %v12992_v21 = vpack.c.bf16 %v5089_v55, %v5073_v52  ;;  %v13006_v36 = vpack.c.bf16 %v5218_v41, %v5202_v56  ;;  %v5217_v52 = vld [vmem:[#allocation10 + $0xdf0] sm:$0xff]  ;;  %v5232_v55 = vld [vmem:[#allocation10 + $0xe68] sm:$0xff] }
0x1ab1   : > { %v13008_v59 = vpack.c.bf16 %v5217_v52, %v5201_v51  ;;  %v6019_v41 = vld [vmem:[#allocation11 + $0x810] sm:$0xff]  ;;  %v6038_v51 = vld [vmem:[#allocation11 + $0x8a8] sm:$0xff]  ;;  %v6069_v52 = vld [vmem:[#allocation11 + $0x9a0] sm:$0xff] }
0x1ab2   : > { %12913 = vmatpush1.bf16.msra.mxu1 %v12912_v1  ;;  %12945 = vmatpush1.bf16.msra.mxu0 %v12944_v3  ;;  %v5119_v1 = vld [vmem:[#allocation10 + $0xae0] sm:$0xff]  ;;  %v12962_v3 = vpack.c.bf16 %v5120_v57, %v5104_v43  ;;  %v5248_v43 = vld [vmem:[#allocation10 + $0xee8] sm:$0xff] }
0x1ab3   : > { %12915 = vmatprep.subr.bf16.mxu1 %v12914_v6  ;;  %12947 = vmatprep.subr.bf16.mxu0 %v12946_v7  ;;  %v5121_v6 = vld [vmem:[#allocation10 + $0xaf0] sm:$0xff]  ;;  %v5136_v7 = vld [vmem:[#allocation10 + $0xb68] sm:$0xff]  ;;  %v12964_v2 = vpack.c.bf16 %v5119_v1, %v5103_v11 }
0x1ab4   : > { %v12996_v17 = vpack.c.bf16 %v5121_v6, %v5105_v25  ;;  %v5233_v1 = vld [vmem:[#allocation10 + $0xe70] sm:$0xff]  ;;  %v5280_v25 = vld [vmem:[#allocation10 + $0xfe8] sm:$0xff]  ;;  %v5266_v6 = vld [vmem:[#allocation10 + $0xf78] sm:$0xff] }
0x1ab6   : > { %12917 = vmatpush1.bf16.msra.mxu1 %v12916_v22  ;;  %12949 = vmatpush1.bf16.msra.mxu0 %v12948_v49  ;;  %v5151_v22 = vld [vmem:[#allocation10 + $0xbe0] sm:$0xff]  ;;  %v12966_v49 = vpack.c.bf16 %v5152_v23, %v5136_v7  ;;  %v5282_v7 = vld [vmem:[#allocation10 + $0xff8] sm:$0xff] }
0x1ab7   : > { %12919 = vmatprep.subr.bf16.mxu1 %v12918_v14  ;;  %12951 = vmatprep.subr.bf16.mxu0 %v12950_v5  ;;  %v5153_v14 = vld [vmem:[#allocation10 + $0xbf0] sm:$0xff]  ;;  %v5168_v5 = vld [vmem:[#allocation10 + $0xc68] sm:$0xff]  ;;  %v12968_v47 = vpack.c.bf16 %v5151_v22, %v5135_v18  ;;  %v13014_v18 = vpack.c.bf16 %v5282_v7, %v5266_v6 }
0x1ab8   : > { %v13000_v27 = vpack.c.bf16 %v5153_v14, %v5137_v63  ;;  %v5265_v22 = vld [vmem:[#allocation10 + $0xf70] sm:$0xff]  ;;  %v6034_v63 = vld [vmem:[#allocation11 + $0x888] sm:$0xff]  ;;  %v6065_v14 = vld [vmem:[#allocation11 + $0x980] sm:$0xff] }
0x1ab9   : > { %v6023_v7 = vld [vmem:[#allocation11 + $0x830] sm:$0xff] }
0x1aba   : > { %12921 = vmatpush1.bf16.msra.mxu1 %v12920_v8  ;;  %12953 = vmatpush1.bf16.msra.mxu0 %v12952_v31  ;;  %v5183_v8 = vld [vmem:[#allocation10 + $0xce0] sm:$0xff]  ;;  %v12970_v31 = vpack.c.bf16 %v5184_v15, %v5168_v5  ;;  %v6066_v5 = vld [vmem:[#allocation11 + $0x988] sm:$0xff] }
0x1abb   : > { %12955 = vmatprep.subr.bf16.mxu1 %v12954_v34  ;;  %12987 = vmatprep.subr.bf16.mxu0 %v12986_v35  ;;  %v5169_v34 = vld [vmem:[#allocation10 + $0xc70] sm:$0xff]  ;;  %v12972_v54 = vpack.c.bf16 %v5183_v8, %v5167_v29  ;;  %v6018_v29 = vld [vmem:[#allocation11 + $0x808] sm:$0xff]  ;;  %v6049_v8 = vld [vmem:[#allocation11 + $0x900] sm:$0xff] }
0x1abc   : > { %v5185_v35 = vld [vmem:[#allocation10 + $0xcf0] sm:$0xff] }
0x1abd   : > { %5741 = vmatmul.mubr.f32.vlgmr.msra.gmra.mrb[68].mxu1 %v15202_v0  ;;  %5818 = vmatmul.mubr.f32.vlgmr.msra.gmra.mrb[62].mxu0 %v15202_v0  ;;  %v13004_v42 = vpack.c.bf16 %v5185_v35, %v5169_v34  ;;  %v6036_v34 = vld [vmem:[#allocation11 + $0x898] sm:$0xff]  ;;  %v6067_v35 = vld [vmem:[#allocation11 + $0x990] sm:$0xff] }
0x1abe   : > { %12957 = vmatpush1.bf16.msra.mxu1 %v12956_v50  ;;  %12989 = vmatpush1.bf16.msra.mxu0 %v12988_v30  ;;  %v5215_v50 = vld [vmem:[#allocation10 + $0xde0] sm:$0xff]  ;;  %v12974_v30 = vpack.c.bf16 %v5216_v39, %v5200_v38  ;;  %v6068_v38 = vld [vmem:[#allocation11 + $0x998] sm:$0xff] }
0x1abf   : > { %5746 = vmatprep.mubr.f32.mxu1 %v14454_v16  ;;  %5823 = vmatprep.mubr.f32.mxu0 %v14454_v16  ;;  %v12976_v57 = vpack.c.bf16 %v5215_v50, %v5199_v46  ;;  %v13054_v46 = vpack.c.bf16 %v6068_v38, %v6067_v35  ;;  %v6051_v50 = vld [vmem:[#allocation11 + $0x910] sm:$0xff] }
0x1ac0   : > { %12959 = vmatprep.subr.bf16.mxu1 %v12958_v45  ;;  %12991 = vmatprep.subr.bf16.mxu0 %v12990_v32  ;;  %v5234_v45 = vld [vmem:[#allocation10 + $0xe78] sm:$0xff]  ;;  %v6027_v38 = vld [vmem:[#allocation11 + $0x850] sm:$0xff] }
0x1ac1   : > { %5747 = vmatmul.mubr.f32.gmra.mrb[70].mxu1 %v15207_v10  ;;  %5824 = vmatmul.mubr.f32.gmra.mrb[64].mxu0 %v15207_v10  ;;  %v5250_v32 = vld [vmem:[#allocation10 + $0xef8] sm:$0xff] }
0x1ac2   : > { %12961 = vmatpush1.bf16.msra.mxu1 %v12960_v20  ;;  %12993 = vmatpush1.bf16.msra.mxu0 %v12992_v21  ;;  %v5247_v20 = vld [vmem:[#allocation10 + $0xee0] sm:$0xff]  ;;  %v12978_v21 = vpack.c.bf16 %v5248_v43, %v5232_v55  ;;  %v13010_v11 = vpack.c.bf16 %v5250_v32, %v5234_v45  ;;  %v6070_v55 = vld [vmem:[#allocation11 + $0x9a8] sm:$0xff] }
0x1ac3   : > { %12963 = vmatprep.subr.bf16.mxu1 %v12962_v3  ;;  %12995 = vmatprep.subr.bf16.mxu0 %v12994_v4  ;;  %v5249_v3 = vld [vmem:[#allocation10 + $0xef0] sm:$0xff]  ;;  %v5264_v4 = vld [vmem:[#allocation10 + $0xf68] sm:$0xff]  ;;  %v12980_v23 = vpack.c.bf16 %v5247_v20, %v5231_v44  ;;  %v6021_v32 = vld [vmem:[#allocation11 + $0x820] sm:$0xff]  ;;  %v13058_v44 = vpack.c.bf16 %v6070_v55, %v6069_v52 }
0x1ac4   : > { %5894 = vmatprep.mubr.f32.mxu1 %v14454_v16  ;;  %5971 = vmatprep.mubr.f32.mxu0 %v14454_v16  ;;  %v13012_v9 = vpack.c.bf16 %v5249_v3, %v5233_v1  ;;  %v6053_v20 = vld [vmem:[#allocation11 + $0x920] sm:$0xff]  ;;  %v6040_v1 = vld [vmem:[#allocation11 + $0x8b8] sm:$0xff]  ;;  %v6071_v3 = vld [vmem:[#allocation11 + $0x9b0] sm:$0xff] }
0x1ac5   : > { %v6029_v55 = vld [vmem:[#allocation11 + $0x860] sm:$0xff] }
0x1ac6   : > { %12965 = vmatpush1.bf16.msra.mxu1 %v12964_v2  ;;  %12997 = vmatpush1.bf16.msra.mxu0 %v12996_v17  ;;  %v5279_v2 = vld [vmem:[#allocation10 + $0xfe0] sm:$0xff]  ;;  %v12982_v17 = vpack.c.bf16 %v5280_v25, %v5264_v4  ;;  %v6072_v4 = vld [vmem:[#allocation11 + $0x9b8] sm:$0xff] }
0x1ac7   : > { %12967 = vmatprep.subr.bf16.mxu1 %v12966_v49  ;;  %12999 = vmatprep.subr.bf16.mxu0 %v12998_v19  ;;  %v5281_v49 = vld [vmem:[#allocation10 + $0xff0] sm:$0xff]  ;;  %v6033_v19 = vld [vmem:[#allocation11 + $0x880] sm:$0xff]  ;;  %v12984_v15 = vpack.c.bf16 %v5279_v2, %v5263_v12  ;;  %v13062_v12 = vpack.c.bf16 %v6072_v4, %v6071_v3 }
0x1ac8   : > { %v13016_v13 = vpack.c.bf16 %v5281_v49, %v5265_v22  ;;  %v13018_v37 = vpack.c.bf16 %v6034_v63, %v6033_v19  ;;  %v6055_v2 = vld [vmem:[#allocation11 + $0x930] sm:$0xff]  ;;  %v6042_v22 = vld [vmem:[#allocation11 + $0x8c8] sm:$0xff]  ;;  %v6073_v49 = vld [vmem:[#allocation11 + $0x9c0] sm:$0xff] }
0x1ac9   : > { %v6074_v19 = vld [vmem:[#allocation11 + $0x9c8] sm:$0xff]  ;;  %v6031_v4 = vld [vmem:[#allocation11 + $0x870] sm:$0xff] }
0x1aca   : > { %12969 = vmatpush1.bf16.msra.mxu1 %v12968_v47  ;;  %13001 = vmatpush1.bf16.msra.mxu0 %v13000_v27  ;;  %v13050_v47 = vpack.c.bf16 %v6066_v5, %v6065_v14  ;;  %v6017_v27 = vld [vmem:[#allocation11 + $0x800] sm:$0xff] }
0x1acb   : > { %12971 = vmatprep.subr.bf16.mxu1 %v12970_v31  ;;  %13003 = vmatprep.subr.bf16.mxu0 %v13002_v33  ;;  %v6050_v31 = vld [vmem:[#allocation11 + $0x908] sm:$0xff]  ;;  %v6035_v33 = vld [vmem:[#allocation11 + $0x890] sm:$0xff]  ;;  %v13020_v39 = vpack.c.bf16 %v6018_v29, %v6017_v27  ;;  %v6025_v5 = vld [vmem:[#allocation11 + $0x840] sm:$0xff] }
0x1acc   : > { %v13052_v56 = vpack.c.bf16 %v6050_v31, %v6049_v8  ;;  %v6058_v27 = vld [vmem:[#allocation11 + $0x948] sm:$0xff]  ;;  %v6043_v29 = vld [vmem:[#allocation11 + $0x8d0] sm:$0xff]  ;;  %v6044_v8 = vld [vmem:[#allocation11 + $0x8d8] sm:$0xff] }
0x1acd   : > { %v6075_v31 = vld [vmem:[#allocation11 + $0x9d0] sm:$0xff] }
0x1ace   : > { %12973 = vmatpush1.bf16.msra.mxu1 %v12972_v54  ;;  %13005 = vmatpush1.bf16.msra.mxu0 %v13004_v42  ;;  %v6020_v54 = vld [vmem:[#allocation11 + $0x818] sm:$0xff]  ;;  %v13022_v42 = vpack.c.bf16 %v6036_v34, %v6035_v33 }
0x1acf   : > { %12975 = vmatprep.subr.bf16.mxu1 %v12974_v30  ;;  %13007 = vmatprep.subr.bf16.mxu0 %v13006_v36  ;;  %v6052_v30 = vld [vmem:[#allocation11 + $0x918] sm:$0xff]  ;;  %v6037_v36 = vld [vmem:[#allocation11 + $0x8a0] sm:$0xff]  ;;  %v13024_v43 = vpack.c.bf16 %v6020_v54, %v6019_v41  ;;  %v6059_v54 = vld [vmem:[#allocation11 + $0x950] sm:$0xff] }
0x1ad0   : > { %v13056_v45 = vpack.c.bf16 %v6052_v30, %v6051_v50  ;;  %v6076_v33 = vld [vmem:[#allocation11 + $0x9d8] sm:$0xff]  ;;  %v6046_v50 = vld [vmem:[#allocation11 + $0x8e8] sm:$0xff]  ;;  %v6077_v30 = vld [vmem:[#allocation11 + $0x9e0] sm:$0xff] }
0x1ad1   : > { %v13070_v41 = vpack.c.bf16 %v6076_v33, %v6075_v31  ;;  %v6113_v31 = vld [vmem:[#allocation11 + $0xb00] sm:$0xff]  ;;  %v6114_v33 = vld [vmem:[#allocation11 + $0xb08] sm:$0xff] }
0x1ad2   : > { %12977 = vmatpush1.bf16.msra.mxu1 %v12976_v57  ;;  %13009 = vmatpush1.bf16.msra.mxu0 %v13008_v59  ;;  %v6022_v57 = vld [vmem:[#allocation11 + $0x828] sm:$0xff]  ;;  %v13026_v59 = vpack.c.bf16 %v6038_v51, %v6037_v36 }
0x1ad3   : > { %12979 = vmatprep.subr.bf16.mxu1 %v12978_v21  ;;  %13011 = vmatprep.subr.bf16.mxu0 %v13010_v11  ;;  %v6054_v21 = vld [vmem:[#allocation11 + $0x928] sm:$0xff]  ;;  %v6039_v11 = vld [vmem:[#allocation11 + $0x8b0] sm:$0xff]  ;;  %v13028_v25 = vpack.c.bf16 %v6022_v57, %v6021_v32  ;;  %v6061_v57 = vld [vmem:[#allocation11 + $0x960] sm:$0xff] }
0x1ad4   : > { %v13060_v6 = vpack.c.bf16 %v6054_v21, %v6053_v20  ;;  %v6078_v36 = vld [vmem:[#allocation11 + $0x9e8] sm:$0xff]  ;;  %v6048_v20 = vld [vmem:[#allocation11 + $0x8f8] sm:$0xff]  ;;  %v6079_v21 = vld [vmem:[#allocation11 + $0x9f0] sm:$0xff] }
0x1ad5   : > { %v13074_v32 = vpack.c.bf16 %v6078_v36, %v6077_v30  ;;  %v13116_v36 = vpack.c.bf16 %v6114_v33, %v6113_v31  ;;  %v6135_v31 = vld [vmem:[#allocation11 + $0xbb0] sm:$0xff]  ;;  %v6136_v33 = vld [vmem:[#allocation11 + $0xbb8] sm:$0xff] }
0x1ad6   : > { %12981 = vmatpush1.bf16.msra.mxu1 %v12980_v23  ;;  %13013 = vmatpush1.bf16.msra.mxu0 %v13012_v9  ;;  %v6024_v23 = vld [vmem:[#allocation11 + $0x838] sm:$0xff]  ;;  %v13030_v9 = vpack.c.bf16 %v6040_v1, %v6039_v11 }
0x1ad7   : > { %12983 = vmatprep.subr.bf16.mxu1 %v12982_v17  ;;  %13015 = vmatprep.subr.bf16.mxu0 %v13014_v18  ;;  %v6056_v17 = vld [vmem:[#allocation11 + $0x938] sm:$0xff]  ;;  %v6041_v18 = vld [vmem:[#allocation11 + $0x8c0] sm:$0xff]  ;;  %v13032_v63 = vpack.c.bf16 %v6024_v23, %v6023_v7  ;;  %v6063_v23 = vld [vmem:[#allocation11 + $0x970] sm:$0xff] }
0x1ad8   : > { %v13064_v14 = vpack.c.bf16 %v6056_v17, %v6055_v2  ;;  %v6080_v11 = vld [vmem:[#allocation11 + $0x9f8] sm:$0xff]  ;;  %v6098_v2 = vld [vmem:[#allocation11 + $0xa88] sm:$0xff]  ;;  %v6129_v17 = vld [vmem:[#allocation11 + $0xb80] sm:$0xff] }
0x1ad9   : > { %v13078_v7 = vpack.c.bf16 %v6080_v11, %v6079_v21 }
0x1ada   : > { %12985 = vmatpush1.bf16.msra.mxu1 %v12984_v15  ;;  %13017 = vmatpush1.bf16.msra.mxu0 %v13016_v13  ;;  %v6026_v15 = vld [vmem:[#allocation11 + $0x848] sm:$0xff]  ;;  %v13034_v13 = vpack.c.bf16 %v6042_v22, %v6041_v18 }
0x1adb   : > { %13019 = vmatprep.subr.bf16.mxu1 %v13018_v37  ;;  %13051 = vmatprep.subr.bf16.mxu0 %v13050_v47  ;;  %v13066_v37 = vpack.c.bf16 %v6074_v19, %v6073_v49  ;;  %v6057_v47 = vld [vmem:[#allocation11 + $0x940] sm:$0xff]  ;;  %v13036_v34 = vpack.c.bf16 %v6026_v15, %v6025_v5  ;;  %v6130_v18 = vld [vmem:[#allocation11 + $0xb88] sm:$0xff] }
0x1adc   : > { %v13068_v35 = vpack.c.bf16 %v6058_v27, %v6057_v47  ;;  %v6081_v47 = vld [vmem:[#allocation11 + $0xa00] sm:$0xff]  ;;  %v6082_v27 = vld [vmem:[#allocation11 + $0xa08] sm:$0xff] }
0x1add   : > { %5895 = vmatmul.mubr.f32.vlgmr.msra.gmra.mrb[72].mxu1 %v15202_v0  ;;  %5972 = vmatmul.mubr.f32.vlgmr.msra.gmra.mrb[66].mxu0 %v15202_v0  ;;  %v13084_v30 = vpack.c.bf16 %v6082_v27, %v6081_v47  ;;  %v6117_v47 = vld [vmem:[#allocation11 + $0xb20] sm:$0xff]  ;;  %v6118_v27 = vld [vmem:[#allocation11 + $0xb28] sm:$0xff] }
0x1ade   : > { %5900 = vmatprep.mubr.f32.mxu1 %v14454_v16  ;;  %5977 = vmatprep.mubr.f32.mxu0 %v14454_v16 }
0x1adf   : > { %13021 = vmatpush3.bf16.msra.mxu1 %v13020_v39  ;;  %13053 = vmatpush3.bf16.msra.mxu0 %v13052_v56  ;;  %v6028_v39 = vld [vmem:[#allocation11 + $0x858] sm:$0xff]  ;;  %v13038_v56 = vpack.c.bf16 %v6044_v8, %v6043_v29 }
0x1ae0   : > { %13023 = vmatprep.subr.bf16.mxu1 %v13022_v42  ;;  %13055 = vmatprep.subr.bf16.mxu0 %v13054_v46  ;;  %v6060_v42 = vld [vmem:[#allocation11 + $0x958] sm:$0xff]  ;;  %v6045_v46 = vld [vmem:[#allocation11 + $0x8e0] sm:$0xff]  ;;  %v13040_v51 = vpack.c.bf16 %v6028_v39, %v6027_v38 }
0x1ae1   : > { %5901 = vmatmul.mubr.f32.gmra.mrb[74].mxu1 %v15207_v10  ;;  %5978 = vmatmul.mubr.f32.gmra.mrb[68].mxu0 %v15207_v10  ;;  %v13072_v52 = vpack.c.bf16 %v6060_v42, %v6059_v54  ;;  %v6131_v54 = vld [vmem:[#allocation11 + $0xb90] sm:$0xff]  ;;  %v6132_v42 = vld [vmem:[#allocation11 + $0xb98] sm:$0xff] }
0x1ae3   : > { %13025 = vmatpush3.bf16.msra.mxu1 %v13024_v43  ;;  %13057 = vmatpush3.bf16.msra.mxu0 %v13056_v45  ;;  %v6030_v43 = vld [vmem:[#allocation11 + $0x868] sm:$0xff]  ;;  %v13042_v45 = vpack.c.bf16 %v6046_v50, %v6045_v46 }
0x1ae4   : > { %13027 = vmatprep.subr.bf16.mxu1 %v13026_v59  ;;  %13059 = vmatprep.subr.bf16.mxu0 %v13058_v44  ;;  %v6062_v59 = vld [vmem:[#allocation11 + $0x968] sm:$0xff]  ;;  %v6047_v44 = vld [vmem:[#allocation11 + $0x8f0] sm:$0xff]  ;;  %v13044_v1 = vpack.c.bf16 %v6030_v43, %v6029_v55 }
0x1ae5   : > { %v13076_v3 = vpack.c.bf16 %v6062_v59, %v6061_v57  ;;  %v13118_v57 = vpack.c.bf16 %v6132_v42, %v6131_v54  ;;  %v6084_v59 = vld [vmem:[#allocation11 + $0xa18] sm:$0xff]  ;;  %v6119_v54 = vld [vmem:[#allocation11 + $0xb30] sm:$0xff] }
0x1ae6   : > { %v6120_v42 = vld [vmem:[#allocation11 + $0xb38] sm:$0xff] }
0x1ae7   : > { %13029 = vmatpush3.bf16.msra.mxu1 %v13028_v25  ;;  %13061 = vmatpush3.bf16.msra.mxu0 %v13060_v6  ;;  %v6032_v25 = vld [vmem:[#allocation11 + $0x878] sm:$0xff]  ;;  %v13046_v6 = vpack.c.bf16 %v6048_v20, %v6047_v44  ;;  %v6115_v44 = vld [vmem:[#allocation11 + $0xb10] sm:$0xff] }
0x1ae8   : > { %13031 = vmatprep.subr.bf16.mxu1 %v13030_v9  ;;  %13063 = vmatprep.subr.bf16.mxu0 %v13062_v12  ;;  %v6064_v9 = vld [vmem:[#allocation11 + $0x978] sm:$0xff]  ;;  %v6097_v12 = vld [vmem:[#allocation11 + $0xa80] sm:$0xff]  ;;  %v13048_v22 = vpack.c.bf16 %v6032_v25, %v6031_v4 }
0x1ae9   : > { %v13080_v49 = vpack.c.bf16 %v6064_v9, %v6063_v23  ;;  %v13082_v19 = vpack.c.bf16 %v6098_v2, %v6097_v12  ;;  %v6116_v25 = vld [vmem:[#allocation11 + $0xb18] sm:$0xff]  ;;  %v6102_v9 = vld [vmem:[#allocation11 + $0xaa8] sm:$0xff]  ;;  %v6133_v12 = vld [vmem:[#allocation11 + $0xba0] sm:$0xff] }
0x1aea   : > { %v6134_v2 = vld [vmem:[#allocation11 + $0xba8] sm:$0xff] }
0x1aeb   : > { %13033 = vmatpush3.bf16.msra.mxu1 %v13032_v63  ;;  %13065 = vmatpush3.bf16.msra.mxu0 %v13064_v14  ;;  %v13114_v63 = vpack.c.bf16 %v6130_v18, %v6129_v17  ;;  %v15240_v14 = vld [vmem:[%s15613_s10 + $0x10] sm:$0xff] }
0x1aec   : > { %13035 = vmatprep.subr.bf16.mxu1 %v13034_v13  ;;  %13067 = vmatprep.subr.bf16.mxu0 %v13066_v37  ;;  %v5291_v5 = vrot.slane %v15240_v14, %v14768_v24  ;;  %v5299_v15 = vrot.slane %v15240_v14, %v14774_v26  ;;  %v5295_v13 = vrot.slane %v15240_v14, %v14778_v28 }
0x1aed   : > { %v5303_v37 = vrot.slane %v15240_v14, %v14976_v60 }
0x1aef   : > { %13037 = vmatpush3.bf16.msra.mxu1 %v13036_v34  ;;  %13069 = vmatpush3.bf16.msra.mxu0 %v13068_v35  ;;  %v6099_v34 = vld [vmem:[#allocation11 + $0xa90] sm:$0xff] }
0x1af0   : > { %13039 = vmatprep.subr.bf16.mxu1 %v13038_v56  ;;  %13071 = vmatprep.subr.bf16.mxu0 %v13070_v41  ;;  %v6100_v41 = vld [vmem:[#allocation11 + $0xa98] sm:$0xff] }
0x1af3   : > { %13041 = vmatpush3.bf16.msra.mxu1 %v13040_v51  ;;  %13073 = vmatpush3.bf16.msra.mxu0 %v13072_v52  ;;  %v6083_v51 = vld [vmem:[#allocation11 + $0xa10] sm:$0xff] }
0x1af4   : > { %13043 = vmatprep.subr.bf16.mxu1 %v13042_v45  ;;  %13075 = vmatprep.subr.bf16.mxu0 %v13074_v32  ;;  %v13086_v32 = vpack.c.bf16 %v6100_v41, %v6099_v34  ;;  %v13126_v41 = vpack.c.bf16 %v6136_v33, %v6135_v31  ;;  %v5307_v31 = vrot.slane %v15240_v14, %v14987_v53 }
0x1af7   : > { %13045 = vmatpush3.bf16.msra.mxu1 %v13044_v1  ;;  %13077 = vmatpush3.bf16.msra.mxu0 %v13076_v3 }
0x1af8   : > { %13047 = vmatprep.subr.bf16.mxu1 %v13046_v6  ;;  %13079 = vmatprep.subr.bf16.mxu0 %v13078_v7  ;;  %v6101_v6 = vld [vmem:[#allocation11 + $0xaa0] sm:$0xff] }
0x1afb   : > { %13049 = vmatpush3.bf16.msra.mxu1 %v13048_v22  ;;  %13081 = vmatpush3.bf16.msra.mxu0 %v13080_v49  ;;  %v13088_v22 = vpack.c.bf16 %v6084_v59, %v6083_v51  ;;  %v13120_v49 = vpack.c.bf16 %v6116_v25, %v6115_v44  ;;  %v6122_v59 = vld [vmem:[#allocation11 + $0xb48] sm:$0xff]  ;;  %v6107_v44 = vld [vmem:[#allocation11 + $0xad0] sm:$0xff]  ;;  %v6092_v25 = vld [vmem:[#allocation11 + $0xa58] sm:$0xff] }
0x1afc   : > { %13083 = vmatprep.subr.bf16.mxu1 %v13082_v19  ;;  %13115 = vmatprep.subr.bf16.mxu0 %v13114_v63  ;;  %v6085_v19 = vld [vmem:[#allocation11 + $0xa20] sm:$0xff]  ;;  %v6086_v63 = vld [vmem:[#allocation11 + $0xa28] sm:$0xff] }
0x1afd   : > { %v13092_v34 = vpack.c.bf16 %v6086_v63, %v6085_v19  ;;  %v6093_v19 = vld [vmem:[#allocation11 + $0xa60] sm:$0xff]  ;;  %v6094_v63 = vld [vmem:[#allocation11 + $0xa68] sm:$0xff] }
0x1afe   : > { %v13108_v33 = vpack.c.bf16 %v6094_v63, %v6093_v19 }
0x1b50   : > { %v5434_v29 = vpop.f32.mrb[60].mxu1  ;;  %v5511_v8 = vpop.f32.mrb[54].mxu0 }
0x1b51   : > { %v5435_v35 = vadd.f32 %v5434_v29, %v5291_v5  ;;  %v5512_v38 = vadd.f32 %v5511_v8, %v5299_v15  ;;  %v5436_v39 = vpop.f32.mrb[61].mxu1  ;;  %v5513_v56 = vpop.f32.mrb[55].mxu0  ;;  %v6103_v29 = vld [vmem:[#allocation11 + $0xab0] sm:$0xff]  ;;  %v6104_v8 = vld [vmem:[#allocation11 + $0xab8] sm:$0xff] }
0x1b52   : > { %v5437_v46 = vadd.f32 %v5436_v39, %v5295_v13  ;;  %v5514_v50 = vadd.f32 %v5513_v56, %v5303_v37  ;;  %v6088_v39 = vld [vmem:[#allocation11 + $0xa38] sm:$0xff]  ;;  %v13094_v56 = vpack.c.bf16 %v6104_v8, %v6103_v29  ;;  %v6143_v29 = vld [vmem:[#allocation11 + $0xbf0] sm:$0xff] }
0x1b53   : > { %v5984_v20 = vmax.f32 %v5435_v35, 0.0  ;;  %v5986_v21 = vmax.f32 %v5512_v38, 0.0  ;;  %v13124_v35 = vpack.c.bf16 %v6118_v27, %v6117_v47  ;;  %v6087_v38 = vld [vmem:[#allocation11 + $0xa30] sm:$0xff]  ;;  %v6112_v27 = vld [vmem:[#allocation11 + $0xaf8] sm:$0xff] }
0x1b54   : > { %v5985_v52 = vmax.f32 %v5437_v46, 0.0  ;;  %v5987_v55 = vmax.f32 %v5514_v50, 0.0  ;;  %v5440_v43 = vpop.f32.mrb[62].mxu1  ;;  %v5517_v45 = vpop.f32.mrb[56].mxu0  ;;  %v6105_v46 = vld [vmem:[#allocation11 + $0xac0] sm:$0xff]  ;;  %v6106_v50 = vld [vmem:[#allocation11 + $0xac8] sm:$0xff]  ;;  %v13096_v51 = vpack.c.bf16 %v6088_v39, %v6087_v38 }
0x1b55   : > { %v5441_v11 = vadd.f32 %v5440_v43, %v5291_v5  ;;  %v5518_v1 = vadd.f32 %v5517_v45, %v5299_v15  ;;  %v5442_v3 = vpop.f32.mrb[63].mxu1  ;;  %v5519_v4 = vpop.f32.mrb[57].mxu0  ;;  %v6090_v43 = vld [vmem:[#allocation11 + $0xa48] sm:$0xff]  ;;  %v13098_v45 = vpack.c.bf16 %v6106_v50, %v6105_v46  ;;  %v6111_v47 = vld [vmem:[#allocation11 + $0xaf0] sm:$0xff]  ;;  %v6144_v8 = vld [vmem:[#allocation11 + $0xbf8] sm:$0xff] }
0x1b56   : > { %v5443_v7 = vadd.f32 %v5442_v3, %v5295_v13  ;;  %v5520_v23 = vadd.f32 %v5519_v4, %v5303_v37  ;;  %6345 = vmatprep.mubr.f32.mxu1 %v5985_v52  ;;  %6420 = vmatprep.mubr.f32.mxu0 %v5987_v55  ;;  %v13090_v13 = vpack.c.bf16 %v6102_v9, %v6101_v6  ;;  %v6089_v55 = vld [vmem:[#allocation11 + $0xa40] sm:$0xff]  ;;  %v6091_v4 = vld [vmem:[#allocation11 + $0xa50] sm:$0xff]  ;;  %v6124_v9 = vld [vmem:[#allocation11 + $0xb58] sm:$0xff] }
0x1b57   : > { %6346 = vmatmul.mubr.f32.vlgmr.msra.gmra.mrb[76].mxu1 %v5984_v20  ;;  %6421 = vmatmul.mubr.f32.vlgmr.msra.gmra.mrb[70].mxu0 %v5986_v21  ;;  %v6000_v5 = vmax.f32 %v5441_v11, 0.0  ;;  %v6002_v15 = vmax.f32 %v5518_v1, 0.0  ;;  %v13122_v37 = vpack.c.bf16 %v6134_v2, %v6133_v12  ;;  %v13128_v52 = vpack.c.bf16 %v6120_v42, %v6119_v54  ;;  %v6108_v20 = vld [vmem:[#allocation11 + $0xad8] sm:$0xff]  ;;  %v6139_v21 = vld [vmem:[#allocation11 + $0xbd0] sm:$0xff]  ;;  %v6109_v12 = vld [vmem:[#allocation11 + $0xae0] sm:$0xff] }
0x1b58   : > { %v6001_v17 = vmax.f32 %v5443_v7, 0.0  ;;  %v6003_v18 = vmax.f32 %v5520_v23, 0.0  ;;  %13085 = vmatpush3.bf16.msra.mxu1 %v13084_v30  ;;  %13117 = vmatpush3.bf16.msra.mxu0 %v13116_v36  ;;  %v6137_v30 = vld [vmem:[#allocation11 + $0xbc0] sm:$0xff]  ;;  %v6138_v36 = vld [vmem:[#allocation11 + $0xbc8] sm:$0xff]  ;;  %v6140_v11 = vld [vmem:[#allocation11 + $0xbd8] sm:$0xff]  ;;  %v13100_v1 = vpack.c.bf16 %v6090_v43, %v6089_v55  ;;  %v13102_v6 = vpack.c.bf16 %v6108_v20, %v6107_v44 }
0x1b59   : > { %13087 = vmatprep.subr.bf16.mxu1 %v13086_v32  ;;  %13119 = vmatprep.subr.bf16.mxu0 %v13118_v57  ;;  %v13130_v32 = vpack.c.bf16 %v6138_v36, %v6137_v30  ;;  %v6121_v57 = vld [vmem:[#allocation11 + $0xb40] sm:$0xff]  ;;  %v13134_v7 = vpack.c.bf16 %v6140_v11, %v6139_v21  ;;  %v6123_v23 = vld [vmem:[#allocation11 + $0xb50] sm:$0xff]  ;;  %v6110_v2 = vld [vmem:[#allocation11 + $0xae8] sm:$0xff]  ;;  %v13142_v54 = vpack.c.bf16 %v6144_v8, %v6143_v29 }
0x1b5a   : > { %6350 = vmatprep.mubr.f32.mxu1 %v6001_v17  ;;  %6425 = vmatprep.mubr.f32.mxu0 %v6003_v18  ;;  %v13132_v3 = vpack.c.bf16 %v6122_v59, %v6121_v57  ;;  %v6141_v17 = vld [vmem:[#allocation11 + $0xbe0] sm:$0xff]  ;;  %v6142_v18 = vld [vmem:[#allocation11 + $0xbe8] sm:$0xff]  ;;  %v6096_v38 = vld [vmem:[#allocation11 + $0xa78] sm:$0xff]  ;;  %v5311_v30 = vrot.slane %v15240_v14, %v14993_v61  ;;  %v5319_v36 = vrot.slane %v15240_v14, %v14996_v62 }
0x1b5b   : > { %6351 = vmatmul.mubr.f32.gmra.mrb[78].mxu1 %v6000_v5  ;;  %6426 = vmatmul.mubr.f32.gmra.mrb[72].mxu0 %v6002_v15  ;;  %v13106_v5 = vpack.c.bf16 %v6110_v2, %v6109_v12  ;;  %v13138_v15 = vpack.c.bf16 %v6142_v18, %v6141_v17  ;;  %v6127_v39 = vld [vmem:[#allocation11 + $0xb70] sm:$0xff]  ;;  %v6128_v42 = vld [vmem:[#allocation11 + $0xb78] sm:$0xff]  ;;  %v6161_v46 = vld [vmem:[#allocation11 + $0xc80] sm:$0xff] }
0x1b5c   : > { %13089 = vmatpush3.bf16.msra.mxu1 %v13088_v22  ;;  %13121 = vmatpush3.bf16.msra.mxu0 %v13120_v49  ;;  %v13104_v22 = vpack.c.bf16 %v6092_v25, %v6091_v4  ;;  %v13136_v49 = vpack.c.bf16 %v6124_v9, %v6123_v23  ;;  %v6162_v50 = vld [vmem:[#allocation11 + $0xc88] sm:$0xff]  ;;  %v6145_v55 = vld [vmem:[#allocation11 + $0xc00] sm:$0xff]  ;;  %v13144_v59 = vpack.c.bf16 %v6128_v42, %v6127_v39  ;;  %v6163_v11 = vld [vmem:[#allocation11 + $0xc90] sm:$0xff] }
0x1b5d   : > { %13091 = vmatprep.subr.bf16.mxu1 %v13090_v13  ;;  %13123 = vmatprep.subr.bf16.mxu0 %v13122_v37  ;;  %v6125_v13 = vld [vmem:[#allocation11 + $0xb60] sm:$0xff]  ;;  %v6126_v37 = vld [vmem:[#allocation11 + $0xb68] sm:$0xff]  ;;  %v13146_v44 = vpack.c.bf16 %v6162_v50, %v6161_v46  ;;  %v6196_v23 = vld [vmem:[#allocation11 + $0xd98] sm:$0xff] }
0x1b5e   : > { %v6146_v43 = vld [vmem:[#allocation11 + $0xc08] sm:$0xff]  ;;  %v6177_v20 = vld [vmem:[#allocation11 + $0xd00] sm:$0xff]  ;;  %v6147_v18 = vld [vmem:[#allocation11 + $0xc10] sm:$0xff] }
0x1b5f   : > { %v6178_v21 = vld [vmem:[#allocation11 + $0xd08] sm:$0xff]  ;;  %v13148_v2 = vpack.c.bf16 %v6146_v43, %v6145_v55  ;;  %v6197_v42 = vld [vmem:[#allocation11 + $0xda0] sm:$0xff] }
0x1b60   : > { %13093 = vmatpush3.bf16.msra.mxu1 %v13092_v34  ;;  %13125 = vmatpush3.bf16.msra.mxu0 %v13124_v35  ;;  %v13140_v34 = vpack.c.bf16 %v6126_v37, %v6125_v13  ;;  %v6095_v35 = vld [vmem:[#allocation11 + $0xa70] sm:$0xff]  ;;  %v13180_v17 = vpack.c.bf16 %v6178_v21, %v6177_v20  ;;  %v6148_v13 = vld [vmem:[#allocation11 + $0xc18] sm:$0xff]  ;;  %v6198_v46 = vld [vmem:[#allocation11 + $0xda8] sm:$0xff] }
0x1b61   : > { %13095 = vmatprep.subr.bf16.mxu1 %v13094_v56  ;;  %13127 = vmatprep.subr.bf16.mxu0 %v13126_v41  ;;  %v5315_v56 = vrot.slane %v15240_v14, %v14990_v58  ;;  %v13110_v41 = vpack.c.bf16 %v6112_v27, %v6111_v47  ;;  %v13112_v57 = vpack.c.bf16 %v6096_v38, %v6095_v35  ;;  %v6179_v37 = vld [vmem:[#allocation11 + $0xd10] sm:$0xff]  ;;  %v6180_v35 = vld [vmem:[#allocation11 + $0xd18] sm:$0xff]  ;;  %v6165_v38 = vld [vmem:[#allocation11 + $0xca0] sm:$0xff] }
0x1b62   : > { %v6150_v55 = vld [vmem:[#allocation11 + $0xc28] sm:$0xff]  ;;  %v6199_v20 = vld [vmem:[#allocation11 + $0xdb0] sm:$0xff]  ;;  %v6200_v21 = vld [vmem:[#allocation11 + $0xdb8] sm:$0xff] }
0x1b64   : > { %13097 = vmatpush3.bf16.msra.mxu1 %v13096_v51  ;;  %13129 = vmatpush3.bf16.msra.mxu0 %v13128_v52  ;;  %v6193_v51 = vld [vmem:[#allocation11 + $0xd80] sm:$0xff]  ;;  %v6194_v52 = vld [vmem:[#allocation11 + $0xd88] sm:$0xff] }
0x1b65   : > { %13099 = vmatprep.subr.bf16.mxu1 %v13098_v45  ;;  %13131 = vmatprep.subr.bf16.mxu0 %v13130_v32  ;;  %v13178_v14 = vpack.c.bf16 %v6194_v52, %v6193_v51  ;;  %v6149_v52 = vld [vmem:[#allocation11 + $0xc20] sm:$0xff] }
0x1b68   : > { %13101 = vmatpush3.bf16.msra.mxu1 %v13100_v1  ;;  %13133 = vmatpush3.bf16.msra.mxu0 %v13132_v3 }
0x1b69   : > { %13103 = vmatprep.subr.bf16.mxu1 %v13102_v6  ;;  %13135 = vmatprep.subr.bf16.mxu0 %v13134_v7  ;;  %v6164_v6 = vld [vmem:[#allocation11 + $0xc98] sm:$0xff]  ;;  %v6195_v7 = vld [vmem:[#allocation11 + $0xd90] sm:$0xff] }
0x1b6c   : > { %13105 = vmatpush3.bf16.msra.mxu1 %v13104_v22  ;;  %13137 = vmatpush3.bf16.msra.mxu0 %v13136_v49 }
0x1b6d   : > { %13107 = vmatprep.subr.bf16.mxu1 %v13106_v5  ;;  %13139 = vmatprep.subr.bf16.mxu0 %v13138_v15  ;;  %v13150_v5 = vpack.c.bf16 %v6164_v6, %v6163_v11  ;;  %v13182_v15 = vpack.c.bf16 %v6196_v23, %v6195_v7  ;;  %v13156_v11 = vpack.c.bf16 %v6150_v55, %v6149_v52  ;;  %v6183_v6 = vld [vmem:[#allocation11 + $0xd30] sm:$0xff]  ;;  %v6184_v7 = vld [vmem:[#allocation11 + $0xd38] sm:$0xff]  ;;  %v6169_v23 = vld [vmem:[#allocation11 + $0xcc0] sm:$0xff] }
0x1b6e   : > { %v6157_v52 = vld [vmem:[#allocation11 + $0xc60] sm:$0xff]  ;;  %v6158_v55 = vld [vmem:[#allocation11 + $0xc68] sm:$0xff] }
0x1b70   : > { %v5588_v45 = vpop.f32.mrb[64].mxu1  ;;  %v5665_v32 = vpop.f32.mrb[58].mxu0  ;;  %13109 = vmatpush3.bf16.msra.mxu1 %v13108_v33  ;;  %13141 = vmatpush3.bf16.msra.mxu0 %v13140_v34 }
0x1b71   : > { %v5589_v1 = vadd.f32 %v5588_v45, %v5307_v31  ;;  %v5666_v3 = vadd.f32 %v5665_v32, %v5315_v56  ;;  %v5590_v4 = vpop.f32.mrb[65].mxu1  ;;  %v5667_v25 = vpop.f32.mrb[59].mxu0  ;;  %13111 = vmatprep.subr.bf16.mxu1 %v13110_v41  ;;  %13143 = vmatprep.subr.bf16.mxu0 %v13142_v54  ;;  %v6166_v54 = vld [vmem:[#allocation11 + $0xca8] sm:$0xff]  ;;  %v6181_v32 = vld [vmem:[#allocation11 + $0xd20] sm:$0xff] }
0x1b72   : > { %v5591_v9 = vadd.f32 %v5590_v4, %v5311_v30  ;;  %v5668_v12 = vadd.f32 %v5667_v25, %v5319_v36  ;;  %v6152_v4 = vld [vmem:[#allocation11 + $0xc38] sm:$0xff] }
0x1b73   : > { %v5988_v47 = vmax.f32 %v5589_v1, 0.0  ;;  %v5990_v27 = vmax.f32 %v5666_v3, 0.0  ;;  %v6151_v3 = vld [vmem:[#allocation11 + $0xc30] sm:$0xff] }
0x1b74   : > { %v5989_v22 = vmax.f32 %v5591_v9, 0.0  ;;  %v5991_v49 = vmax.f32 %v5668_v12, 0.0  ;;  %v5594_v19 = vpop.f32.mrb[66].mxu1  ;;  %v5671_v63 = vpop.f32.mrb[60].mxu0  ;;  %13113 = vmatpush3.bf16.msra.mxu1 %v13112_v57  ;;  %13145 = vmatpush3.bf16.msra.mxu0 %v13144_v59  ;;  %v6182_v57 = vld [vmem:[#allocation11 + $0xd28] sm:$0xff]  ;;  %v6167_v59 = vld [vmem:[#allocation11 + $0xcb0] sm:$0xff] }
0x1b75   : > { %v5595_v29 = vadd.f32 %v5594_v19, %v5307_v31  ;;  %v5672_v8 = vadd.f32 %v5671_v63, %v5315_v56  ;;  %v5596_v33 = vpop.f32.mrb[67].mxu1  ;;  %v5673_v34 = vpop.f32.mrb[61].mxu0  ;;  %13147 = vmatprep.subr.bf16.mxu1 %v13146_v44  ;;  %13179 = vmatprep.subr.bf16.mxu0 %v13178_v14  ;;  %v13152_v31 = vpack.c.bf16 %v6148_v13, %v6147_v18  ;;  %v6168_v44 = vld [vmem:[#allocation11 + $0xcb8] sm:$0xff]  ;;  %v6170_v9 = vld [vmem:[#allocation11 + $0xcc8] sm:$0xff]  ;;  %v6201_v12 = vld [vmem:[#allocation11 + $0xdc0] sm:$0xff] }
0x1b76   : > { %v5597_v39 = vadd.f32 %v5596_v33, %v5311_v30  ;;  %v5674_v41 = vadd.f32 %v5673_v34, %v5319_v36  ;;  %6495 = vmatprep.mubr.f32.mxu1 %v5989_v22  ;;  %6570 = vmatprep.mubr.f32.mxu0 %v5991_v49  ;;  %v13184_v56 = vpack.c.bf16 %v6180_v35, %v6179_v37  ;;  %v6153_v22 = vld [vmem:[#allocation11 + $0xc40] sm:$0xff]  ;;  %v6154_v49 = vld [vmem:[#allocation11 + $0xc48] sm:$0xff]  ;;  %v6171_v13 = vld [vmem:[#allocation11 + $0xcd0] sm:$0xff] }
0x1b77   : > { %6496 = vmatmul.mubr.f32.vlgmr.msra.gmra.mrb[80].mxu1 %v5988_v47  ;;  %6571 = vmatmul.mubr.f32.vlgmr.msra.gmra.mrb[74].mxu0 %v5990_v27  ;;  %v6004_v43 = vmax.f32 %v5595_v29, 0.0  ;;  %v6006_v45 = vmax.f32 %v5672_v8, 0.0  ;;  %v13154_v30 = vpack.c.bf16 %v6166_v54, %v6165_v38  ;;  %v13186_v36 = vpack.c.bf16 %v6198_v46, %v6197_v42  ;;  %v6172_v37 = vld [vmem:[#allocation11 + $0xcd8] sm:$0xff]  ;;  %v6203_v47 = vld [vmem:[#allocation11 + $0xdd0] sm:$0xff]  ;;  %v6173_v54 = vld [vmem:[#allocation11 + $0xce0] sm:$0xff] }
0x1b78   : > { %v6005_v50 = vmax.f32 %v5597_v39, 0.0  ;;  %v6007_v51 = vmax.f32 %v5674_v41, 0.0  ;;  %13149 = vmatpush3.bf16.msra.mxu1 %v13148_v2  ;;  %13181 = vmatpush3.bf16.msra.mxu0 %v13180_v17  ;;  %v13188_v1 = vpack.c.bf16 %v6182_v57, %v6181_v32  ;;  %v13158_v25 = vpack.c.bf16 %v6168_v44, %v6167_v59  ;;  %v6202_v2 = vld [vmem:[#allocation11 + $0xdc8] sm:$0xff]  ;;  %v6204_v27 = vld [vmem:[#allocation11 + $0xdd8] sm:$0xff]  ;;  %v6155_v33 = vld [vmem:[#allocation11 + $0xc50] sm:$0xff] }
0x1b79   : > { %13151 = vmatprep.subr.bf16.mxu1 %v13150_v5  ;;  %13183 = vmatprep.subr.bf16.mxu0 %v13182_v15  ;;  %v13190_v14 = vpack.c.bf16 %v6200_v21, %v6199_v20  ;;  %v13160_v17 = vpack.c.bf16 %v6152_v4, %v6151_v3  ;;  %v13192_v18 = vpack.c.bf16 %v6184_v7, %v6183_v6  ;;  %v6185_v5 = vld [vmem:[#allocation11 + $0xd40] sm:$0xff]  ;;  %v6186_v15 = vld [vmem:[#allocation11 + $0xd48] sm:$0xff]  ;;  %v6156_v34 = vld [vmem:[#allocation11 + $0xc58] sm:$0xff] }
0x1b7a   : > { %6500 = vmatprep.mubr.f32.mxu1 %v6005_v50  ;;  %6575 = vmatprep.mubr.f32.mxu0 %v6007_v51  ;;  %v13162_v19 = vpack.c.bf16 %v6170_v9, %v6169_v23  ;;  %v13194_v63 = vpack.c.bf16 %v6202_v2, %v6201_v12  ;;  %v13164_v29 = vpack.c.bf16 %v6154_v49, %v6153_v22  ;;  %v6187_v39 = vld [vmem:[#allocation11 + $0xd50] sm:$0xff]  ;;  %v6188_v41 = vld [vmem:[#allocation11 + $0xd58] sm:$0xff]  ;;  %v6174_v42 = vld [vmem:[#allocation11 + $0xce8] sm:$0xff] }
0x1b7b   : > { %6501 = vmatmul.mubr.f32.gmra.mrb[82].mxu1 %v6004_v43  ;;  %6576 = vmatmul.mubr.f32.gmra.mrb[76].mxu0 %v6006_v45  ;;  %v13196_v8 = vpack.c.bf16 %v6186_v15, %v6185_v5  ;;  %v13166_v35 = vpack.c.bf16 %v6172_v37, %v6171_v13  ;;  %v13198_v38 = vpack.c.bf16 %v6204_v27, %v6203_v47  ;;  %v6205_v46 = vld [vmem:[#allocation11 + $0xde0] sm:$0xff]  ;;  %v6206_v50 = vld [vmem:[#allocation11 + $0xde8] sm:$0xff]  ;;  %v6175_v32 = vld [vmem:[#allocation11 + $0xcf0] sm:$0xff] }
0x1b7c   : > { %13153 = vmatpush3.bf16.msra.mxu1 %v13152_v31  ;;  %13185 = vmatpush3.bf16.msra.mxu0 %v13184_v56  ;;  %v13168_v51 = vpack.c.bf16 %v6156_v34, %v6155_v33  ;;  %v13200_v31 = vpack.c.bf16 %v6188_v41, %v6187_v39  ;;  %v15261_v56 = vld [vmem:[%s15613_s10 + $0x18] sm:$0xff]  ;;  %v13170_v43 = vpack.c.bf16 %v6174_v42, %v6173_v54  ;;  %v6176_v57 = vld [vmem:[#allocation11 + $0xcf8] sm:$0xff]  ;;  %v6207_v59 = vld [vmem:[#allocation11 + $0xdf0] sm:$0xff] }
0x1b7d   : > { %13155 = vmatprep.subr.bf16.mxu1 %v13154_v30  ;;  %13187 = vmatprep.subr.bf16.mxu0 %v13186_v36  ;;  %v13202_v45 = vpack.c.bf16 %v6206_v50, %v6205_v46  ;;  %v6189_v30 = vld [vmem:[#allocation11 + $0xd60] sm:$0xff]  ;;  %v6190_v36 = vld [vmem:[#allocation11 + $0xd68] sm:$0xff]  ;;  %v6208_v44 = vld [vmem:[#allocation11 + $0xdf8] sm:$0xff]  ;;  %v5323_v20 = vrot.slane %v15261_v56, %v14768_v24  ;;  %v13172_v21 = vpack.c.bf16 %v6158_v55, %v6157_v52 }
0x1b7e   : > { %v6160_v3 = vld [vmem:[#allocation11 + $0xc78] sm:$0xff]  ;;  %v6191_v4 = vld [vmem:[#allocation11 + $0xd70] sm:$0xff]  ;;  %v13206_v6 = vpack.c.bf16 %v6208_v44, %v6207_v59  ;;  %v6225_v23 = vld [vmem:[#allocation11 + $0xe80] sm:$0xff]  ;;  %v5327_v12 = vrot.slane %v15261_v56, %v14778_v28  ;;  %v5335_v2 = vrot.slane %v15261_v56, %v14976_v60 }
0x1b7f   : > { %v6192_v7 = vld [vmem:[#allocation11 + $0xd78] sm:$0xff]  ;;  %v6226_v9 = vld [vmem:[#allocation11 + $0xe88] sm:$0xff]  ;;  %v6209_v22 = vld [vmem:[#allocation11 + $0xe00] sm:$0xff] }
0x1b80   : > { %13157 = vmatpush3.bf16.msra.mxu1 %v13156_v11  ;;  %13189 = vmatpush3.bf16.msra.mxu0 %v13188_v1  ;;  %v13204_v11 = vpack.c.bf16 %v6190_v36, %v6189_v30  ;;  %v6159_v1 = vld [vmem:[#allocation11 + $0xc70] sm:$0xff]  ;;  %v6210_v49 = vld [vmem:[#allocation11 + $0xe08] sm:$0xff]  ;;  %v13208_v15 = vpack.c.bf16 %v6192_v7, %v6191_v4  ;;  %v13210_v13 = vpack.c.bf16 %v6226_v9, %v6225_v23  ;;  %v6241_v37 = vld [vmem:[#allocation11 + $0xf00] sm:$0xff] }
0x1b81   : > { %13159 = vmatprep.subr.bf16.mxu1 %v13158_v25  ;;  %13191 = vmatprep.subr.bf16.mxu0 %v13190_v14  ;;  %v5331_v25 = vrot.slane %v15261_v56, %v14774_v26  ;;  %v13174_v14 = vpack.c.bf16 %v6176_v57, %v6175_v32  ;;  %v13176_v5 = vpack.c.bf16 %v6160_v3, %v6159_v1  ;;  %v6242_v47 = vld [vmem:[#allocation11 + $0xf08] sm:$0xff]  ;;  %v6227_v27 = vld [vmem:[#allocation11 + $0xe90] sm:$0xff]  ;;  %v6260_v41 = vld [vmem:[#allocation11 + $0xf98] sm:$0xff] }
0x1b82   : > { %v6259_v39 = vld [vmem:[#allocation11 + $0xf90] sm:$0xff]  ;;  %v13212_v46 = vpack.c.bf16 %v6210_v49, %v6209_v22  ;;  %v13244_v50 = vpack.c.bf16 %v6242_v47, %v6241_v37  ;;  %v6212_v36 = vld [vmem:[#allocation11 + $0xe18] sm:$0xff]  ;;  %v6229_v4 = vld [vmem:[#allocation11 + $0xea0] sm:$0xff] }
0x1b83   : > { %v13246_v30 = vpack.c.bf16 %v6260_v41, %v6259_v39  ;;  %v6243_v32 = vld [vmem:[#allocation11 + $0xf10] sm:$0xff]  ;;  %v6244_v3 = vld [vmem:[#allocation11 + $0xf18] sm:$0xff]  ;;  %v6230_v7 = vld [vmem:[#allocation11 + $0xea8] sm:$0xff] }
0x1b84   : > { %13161 = vmatpush3.bf16.msra.mxu1 %v13160_v17  ;;  %13193 = vmatpush3.bf16.msra.mxu0 %v13192_v18  ;;  %v6257_v17 = vld [vmem:[#allocation11 + $0xf80] sm:$0xff]  ;;  %v6258_v18 = vld [vmem:[#allocation11 + $0xf88] sm:$0xff]  ;;  %v6232_v37 = vld [vmem:[#allocation11 + $0xeb8] sm:$0xff] }
0x1b85   : > { %13163 = vmatprep.subr.bf16.mxu1 %v13162_v19  ;;  %13195 = vmatprep.subr.bf16.mxu0 %v13194_v63  ;;  %v6261_v23 = vld [vmem:[#allocation11 + $0xfa0] sm:$0xff]  ;;  %v6262_v9 = vld [vmem:[#allocation11 + $0xfa8] sm:$0xff]  ;;  %v6263_v47 = vld [vmem:[#allocation11 + $0xfb0] sm:$0xff] }
0x1b86   : > { %v6213_v22 = vld [vmem:[#allocation11 + $0xe20] sm:$0xff]  ;;  %v6214_v49 = vld [vmem:[#allocation11 + $0xe28] sm:$0xff]  ;;  %v6247_v39 = vld [vmem:[#allocation11 + $0xf30] sm:$0xff] }
0x1b87   : > { %v6248_v41 = vld [vmem:[#allocation11 + $0xf38] sm:$0xff] }
0x1b88   : > { %13165 = vmatpush3.bf16.msra.mxu1 %v13164_v29  ;;  %13197 = vmatpush3.bf16.msra.mxu0 %v13196_v8 }
0x1b89   : > { %13167 = vmatprep.subr.bf16.mxu1 %v13166_v35  ;;  %13199 = vmatprep.subr.bf16.mxu0 %v13198_v38  ;;  %v13242_v35 = vpack.c.bf16 %v6258_v18, %v6257_v17  ;;  %v6228_v38 = vld [vmem:[#allocation11 + $0xe98] sm:$0xff] }
0x1b8c   : > { %13169 = vmatpush3.bf16.msra.mxu1 %v13168_v51  ;;  %13201 = vmatpush3.bf16.msra.mxu0 %v13200_v31  ;;  %v6211_v51 = vld [vmem:[#allocation11 + $0xe10] sm:$0xff] }
0x1b8d   : > { %13171 = vmatprep.subr.bf16.mxu1 %v13170_v43  ;;  %13203 = vmatprep.subr.bf16.mxu0 %v13202_v45  ;;  %v13214_v45 = vpack.c.bf16 %v6228_v38, %v6227_v27  ;;  %v6264_v27 = vld [vmem:[#allocation11 + $0xfb8] sm:$0xff] }
0x1b8e   : > { %v13254_v38 = vpack.c.bf16 %v6264_v27, %v6263_v47  ;;  %v5339_v47 = vrot.slane %v15261_v56, %v14987_v53 }
0x1b90   : > { %v5742_v19 = vpop.f32.mrb[68].mxu1  ;;  %v5819_v63 = vpop.f32.mrb[62].mxu0  ;;  %13173 = vmatpush3.bf16.msra.mxu1 %v13172_v21  ;;  %13205 = vmatpush3.bf16.msra.mxu0 %v13204_v11 }
0x1b91   : > { %v5743_v29 = vadd.f32 %v5742_v19, %v5323_v20  ;;  %v5820_v8 = vadd.f32 %v5819_v63, %v5331_v25  ;;  %v5744_v33 = vpop.f32.mrb[69].mxu1  ;;  %v5821_v34 = vpop.f32.mrb[63].mxu0  ;;  %13175 = vmatprep.subr.bf16.mxu1 %v13174_v14  ;;  %13207 = vmatprep.subr.bf16.mxu0 %v13206_v6 }
0x1b92   : > { %v5745_v54 = vadd.f32 %v5744_v33, %v5327_v12  ;;  %v5822_v42 = vadd.f32 %v5821_v34, %v5335_v2  ;;  %v6215_v33 = vld [vmem:[#allocation11 + $0xe30] sm:$0xff]  ;;  %v6216_v34 = vld [vmem:[#allocation11 + $0xe38] sm:$0xff] }
0x1b93   : > { %v5992_v57 = vmax.f32 %v5743_v29, 0.0  ;;  %v5994_v59 = vmax.f32 %v5820_v8, 0.0  ;;  %v13220_v29 = vpack.c.bf16 %v6214_v49, %v6213_v22  ;;  %v6221_v22 = vld [vmem:[#allocation11 + $0xe60] sm:$0xff]  ;;  %v6222_v49 = vld [vmem:[#allocation11 + $0xe68] sm:$0xff] }
0x1b94   : > { %v5993_v31 = vmax.f32 %v5745_v54, 0.0  ;;  %v5995_v52 = vmax.f32 %v5822_v42, 0.0  ;;  %v5748_v55 = vpop.f32.mrb[70].mxu1  ;;  %v5825_v43 = vpop.f32.mrb[64].mxu0  ;;  %13177 = vmatpush3.bf16.msra.mxu1 %v13176_v5  ;;  %13209 = vmatpush3.bf16.msra.mxu0 %v13208_v15  ;;  %v6245_v5 = vld [vmem:[#allocation11 + $0xf20] sm:$0xff]  ;;  %v6246_v15 = vld [vmem:[#allocation11 + $0xf28] sm:$0xff]  ;;  %v13236_v27 = vpack.c.bf16 %v6222_v49, %v6221_v22 }
0x1b95   : > { %v5749_v44 = vadd.f32 %v5748_v55, %v5323_v20  ;;  %v5826_v21 = vadd.f32 %v5825_v43, %v5331_v25  ;;  %v5750_v11 = vpop.f32.mrb[71].mxu1  ;;  %v5827_v1 = vpop.f32.mrb[65].mxu0  ;;  %13211 = vmatprep.subr.bf16.mxu1 %v13210_v13  ;;  %13243 = vmatprep.subr.bf16.mxu0 %v13242_v35  ;;  %v13216_v20 = vpack.c.bf16 %v6212_v36, %v6211_v51  ;;  %v6231_v13 = vld [vmem:[#allocation11 + $0xeb0] sm:$0xff]  ;;  %v6233_v54 = vld [vmem:[#allocation11 + $0xec0] sm:$0xff]  ;;  %v6234_v42 = vld [vmem:[#allocation11 + $0xec8] sm:$0xff] }
0x1b96   : > { %v5751_v14 = vadd.f32 %v5750_v11, %v5327_v12  ;;  %v5828_v6 = vadd.f32 %v5827_v1, %v5335_v2  ;;  %6645 = vmatprep.mubr.f32.mxu1 %v5993_v31  ;;  %6720 = vmatprep.mubr.f32.mxu0 %v5995_v52  ;;  %v13248_v25 = vpack.c.bf16 %v6244_v3, %v6243_v32  ;;  %v6217_v52 = vld [vmem:[#allocation11 + $0xe40] sm:$0xff]  ;;  %v6218_v55 = vld [vmem:[#allocation11 + $0xe48] sm:$0xff]  ;;  %v6235_v32 = vld [vmem:[#allocation11 + $0xed0] sm:$0xff] }
0x1b97   : > { %6646 = vmatmul.mubr.f32.vlgmr.msra.gmra.mrb[84].mxu1 %v5992_v57  ;;  %6721 = vmatmul.mubr.f32.vlgmr.msra.gmra.mrb[78].mxu0 %v5994_v59  ;;  %v6008_v19 = vmax.f32 %v5749_v44, 0.0  ;;  %v6010_v63 = vmax.f32 %v5826_v21, 0.0  ;;  %v13218_v12 = vpack.c.bf16 %v6230_v7, %v6229_v4  ;;  %v13250_v2 = vpack.c.bf16 %v6262_v9, %v6261_v23  ;;  %v6250_v36 = vld [vmem:[#allocation11 + $0xf48] sm:$0xff]  ;;  %v6236_v57 = vld [vmem:[#allocation11 + $0xed8] sm:$0xff]  ;;  %v6267_v59 = vld [vmem:[#allocation11 + $0xfd0] sm:$0xff] }
0x1b98   : > { %v6009_v17 = vmax.f32 %v5751_v14, 0.0  ;;  %v6011_v18 = vmax.f32 %v5828_v6, 0.0  ;;  %13213 = vmatpush3.bf16.msra.mxu1 %v13212_v46  ;;  %13245 = vmatpush3.bf16.msra.mxu0 %v13244_v50  ;;  %v13252_v8 = vpack.c.bf16 %v6246_v15, %v6245_v5  ;;  %v13222_v35 = vpack.c.bf16 %v6232_v37, %v6231_v13  ;;  %v6265_v46 = vld [vmem:[#allocation11 + $0xfc0] sm:$0xff]  ;;  %v6266_v50 = vld [vmem:[#allocation11 + $0xfc8] sm:$0xff]  ;;  %v6268_v44 = vld [vmem:[#allocation11 + $0xfd8] sm:$0xff] }
0x1b99   : > { %13215 = vmatprep.subr.bf16.mxu1 %v13214_v45  ;;  %13247 = vmatprep.subr.bf16.mxu0 %v13246_v30  ;;  %v13224_v51 = vpack.c.bf16 %v6216_v34, %v6215_v33  ;;  %v13256_v31 = vpack.c.bf16 %v6248_v41, %v6247_v39  ;;  %v13226_v43 = vpack.c.bf16 %v6234_v42, %v6233_v54  ;;  %v6249_v30 = vld [vmem:[#allocation11 + $0xf40] sm:$0xff]  ;;  %v6219_v1 = vld [vmem:[#allocation11 + $0xe50] sm:$0xff]  ;;  %v6220_v3 = vld [vmem:[#allocation11 + $0xe58] sm:$0xff] }
0x1b9a   : > { %6650 = vmatprep.mubr.f32.mxu1 %v6009_v17  ;;  %6725 = vmatprep.mubr.f32.mxu0 %v6011_v18  ;;  %v13258_v45 = vpack.c.bf16 %v6266_v50, %v6265_v46  ;;  %v13228_v21 = vpack.c.bf16 %v6218_v55, %v6217_v52  ;;  %v13260_v11 = vpack.c.bf16 %v6250_v36, %v6249_v30  ;;  %v6251_v6 = vld [vmem:[#allocation11 + $0xf50] sm:$0xff]  ;;  %v6252_v7 = vld [vmem:[#allocation11 + $0xf58] sm:$0xff]  ;;  %v6237_v23 = vld [vmem:[#allocation11 + $0xee0] sm:$0xff] }
0x1b9b   : > { %6651 = vmatmul.mubr.f32.gmra.mrb[86].mxu1 %v6008_v19  ;;  %6726 = vmatmul.mubr.f32.gmra.mrb[80].mxu0 %v6010_v63  ;;  %v13230_v4 = vpack.c.bf16 %v6236_v57, %v6235_v32  ;;  %v13262_v14 = vpack.c.bf16 %v6268_v44, %v6267_v59  ;;  %v6238_v9 = vld [vmem:[#allocation11 + $0xee8] sm:$0xff]  ;;  %v6269_v17 = vld [vmem:[#allocation11 + $0xfe0] sm:$0xff]  ;;  %v6239_v5 = vld [vmem:[#allocation11 + $0xef0] sm:$0xff]  ;;  %v5347_v33 = vrot.slane %v15261_v56, %v14990_v58 }
0x1b9c   : > { %13217 = vmatpush3.bf16.msra.mxu1 %v13216_v20  ;;  %13249 = vmatpush3.bf16.msra.mxu0 %v13248_v25  ;;  %v6270_v18 = vld [vmem:[#allocation11 + $0xfe8] sm:$0xff]  ;;  %v13232_v20 = vpack.c.bf16 %v6220_v3, %v6219_v1  ;;  %v13264_v25 = vpack.c.bf16 %v6252_v7, %v6251_v6  ;;  %v13234_v19 = vpack.c.bf16 %v6238_v9, %v6237_v23  ;;  %v6240_v15 = vld [vmem:[#allocation11 + $0xef8] sm:$0xff]  ;;  %v6271_v13 = vld [vmem:[#allocation11 + $0xff0] sm:$0xff] }
0x1b9d   : > { %13219 = vmatprep.subr.bf16.mxu1 %v13218_v12  ;;  %13251 = vmatprep.subr.bf16.mxu0 %v13250_v2  ;;  %v13266_v63 = vpack.c.bf16 %v6270_v18, %v6269_v17  ;;  %v6253_v12 = vld [vmem:[#allocation11 + $0xf60] sm:$0xff]  ;;  %v6254_v2 = vld [vmem:[#allocation11 + $0xf68] sm:$0xff]  ;;  %v6272_v37 = vld [vmem:[#allocation11 + $0xff8] sm:$0xff]  ;;  %v13238_v34 = vpack.c.bf16 %v6240_v15, %v6239_v5  ;;  %v5343_v54 = vrot.slane %v15261_v56, %v14993_v61 }
0x1b9e   : > { %v6255_v39 = vld [vmem:[#allocation11 + $0xf70] sm:$0xff]  ;;  %v6256_v41 = vld [vmem:[#allocation11 + $0xf78] sm:$0xff]  ;;  %v5351_v42 = vrot.slane %v15261_v56, %v14996_v62 }
0x1ba0   : > { %13221 = vmatpush3.bf16.msra.mxu1 %v13220_v29  ;;  %13253 = vmatpush3.bf16.msra.mxu0 %v13252_v8  ;;  %v13268_v29 = vpack.c.bf16 %v6254_v2, %v6253_v12  ;;  %v6223_v8 = vld [vmem:[#allocation11 + $0xe70] sm:$0xff] }
0x1ba1   : > { %13223 = vmatprep.subr.bf16.mxu1 %v13222_v35  ;;  %13255 = vmatprep.subr.bf16.mxu0 %v13254_v38  ;;  %v13270_v35 = vpack.c.bf16 %v6272_v37, %v6271_v13  ;;  %v6224_v38 = vld [vmem:[#allocation11 + $0xe78] sm:$0xff] }
0x1ba4   : > { %13225 = vmatpush3.bf16.msra.mxu1 %v13224_v51  ;;  %13257 = vmatpush3.bf16.msra.mxu0 %v13256_v31  ;;  %v13240_v51 = vpack.c.bf16 %v6224_v38, %v6223_v8  ;;  %v13272_v31 = vpack.c.bf16 %v6256_v41, %v6255_v39 }
0x1ba5   : > { %13227 = vmatprep.subr.bf16.mxu1 %v13226_v43  ;;  %13259 = vmatprep.subr.bf16.mxu0 %v13258_v45 }
0x1ba8   : > { %13229 = vmatpush3.bf16.msra.mxu1 %v13228_v21  ;;  %13261 = vmatpush3.bf16.msra.mxu0 %v13260_v11 }
0x1ba9   : > { %13231 = vmatprep.subr.bf16.mxu1 %v13230_v4  ;;  %13263 = vmatprep.subr.bf16.mxu0 %v13262_v14 }
0x1bac   : > { %13233 = vmatpush3.bf16.msra.mxu1 %v13232_v20  ;;  %13265 = vmatpush3.bf16.msra.mxu0 %v13264_v25  ;;  %v10337_v25 = vld [vmem:[%s15615_s12 + $0x1] ss:$0 sm:$0xff] }
0x1bad   : > { %13235 = vmatprep.subr.bf16.mxu1 %v13234_v19  ;;  %13267 = vmatprep.subr.bf16.mxu0 %v13266_v63 }
0x1bb0   : > { %v5896_v46 = vpop.f32.mrb[72].mxu1  ;;  %v5973_v50 = vpop.f32.mrb[66].mxu0  ;;  %13237 = vmatpush3.bf16.msra.mxu1 %v13236_v27  ;;  %13269 = vmatpush3.bf16.msra.mxu0 %v13268_v29 }
0x1bb1   : > { %v5897_v52 = vadd.f32 %v5896_v46, %v5339_v47  ;;  %v5974_v55 = vadd.f32 %v5973_v50, %v5347_v33  ;;  %v5898_v43 = vpop.f32.mrb[73].mxu1  ;;  %v5975_v45 = vpop.f32.mrb[67].mxu0  ;;  %13239 = vmatprep.subr.bf16.mxu1 %v13238_v34  ;;  %13271 = vmatprep.subr.bf16.mxu0 %v13270_v35 }
0x1bb2   : > { %v5899_v30 = vadd.f32 %v5898_v43, %v5343_v54  ;;  %v5976_v36 = vadd.f32 %v5975_v45, %v5351_v42 }
0x1bb3   : > { %v5996_v56 = vmax.f32 %v5897_v52, 0.0  ;;  %v5998_v21 = vmax.f32 %v5974_v55, 0.0 }
0x1bb4   : > { %v5997_v32 = vmax.f32 %v5899_v30, 0.0  ;;  %v5999_v57 = vmax.f32 %v5976_v36, 0.0  ;;  %v5902_v59 = vpop.f32.mrb[74].mxu1  ;;  %v5979_v44 = vpop.f32.mrb[68].mxu0  ;;  %13241 = vmatpush3.bf16.msra.mxu1 %v13240_v51  ;;  %13273 = vmatpush3.bf16.msra.mxu0 %v13272_v31 }
0x1bb5   : > { %v5903_v11 = vadd.f32 %v5902_v59, %v5339_v47  ;;  %v5980_v1 = vadd.f32 %v5979_v44, %v5347_v33  ;;  %v5904_v3 = vpop.f32.mrb[75].mxu1  ;;  %v5981_v4 = vpop.f32.mrb[69].mxu0 }
0x1bb6   : > { %v5905_v14 = vadd.f32 %v5904_v3, %v5343_v54  ;;  %v5982_v6 = vadd.f32 %v5981_v4, %v5351_v42  ;;  %6795 = vmatprep.mubr.f32.mxu1 %v5997_v32  ;;  %6870 = vmatprep.mubr.f32.mxu0 %v5999_v57 }
0x1bb7   : > { %6796 = vmatmul.mubr.f32.vlgmr.msra.gmra.mrb[88].mxu1 %v5996_v56  ;;  %6871 = vmatmul.mubr.f32.vlgmr.msra.gmra.mrb[82].mxu0 %v5998_v21  ;;  %v6012_v9 = vmax.f32 %v5903_v11, 0.0  ;;  %v6014_v17 = vmax.f32 %v5980_v1, 0.0 }
0x1bb8   : > { %v6013_v7 = vmax.f32 %v5905_v14, 0.0  ;;  %v6015_v23 = vmax.f32 %v5982_v6, 0.0 }
0x1bba   : > { %6800 = vmatprep.mubr.f32.mxu1 %v6013_v7  ;;  %6875 = vmatprep.mubr.f32.mxu0 %v6015_v23 }
0x1bbb   : > { %6801 = vmatmul.mubr.f32.gmra.mrb[90].mxu1 %v6012_v9  ;;  %6876 = vmatmul.mubr.f32.gmra.mrb[84].mxu0 %v6014_v17 }
0x1bbc   : > { %7058 = vmatprep.mubr.f32.mxu1 %v14454_v16 }
0x1c2a   : > { %v10868_v18 = vpop.f32.mrb[76].mxu1  ;;  %v10906_v20 = vpop.f32.mrb[70].mxu0 }
0x1c2b   : > { %v10869_v22 = vpop.f32.mrb[77].mxu1  ;;  %v10907_v49 = vpop.f32.mrb[71].mxu0 }
0x1c2c   : > { %v10870_v19 = vadd.f32 %v10869_v22, %v10868_v18  ;;  %v10908_v63 = vadd.f32 %v10907_v49, %v10906_v20 }
0x1c2e   : > { %v6348_v12 = vadd.f32 %v10870_v19, %v10337_v25  ;;  %v10871_v2 = vpop.f32.mrb[78].mxu1  ;;  %v10909_v5 = vpop.f32.mrb[72].mxu0 }
0x1c2f   : > { %v10872_v15 = vpop.f32.mrb[79].mxu1  ;;  %v10910_v13 = vpop.f32.mrb[73].mxu0 }
0x1c30   : > { %v6423_v37 = vadd.f32 %v10908_v63, %v6348_v12  ;;  %v10873_v47 = vadd.f32 %v10872_v15, %v10871_v2  ;;  %v10911_v27 = vadd.f32 %v10910_v13, %v10909_v5 }
0x1c32   : > { %v6353_v29 = vadd.f32 %v10873_v47, %v10337_v25 }
0x1c34   : > { %v6428_v8 = vadd.f32 %v10911_v27, %v6353_v29 }
0x1c4a   : > { %v10944_v33 = vpop.f32.mrb[80].mxu1  ;;  %v10982_v34 = vpop.f32.mrb[74].mxu0 }
0x1c4b   : > { %v10945_v35 = vpop.f32.mrb[81].mxu1  ;;  %v10983_v38 = vpop.f32.mrb[75].mxu0 }
0x1c4c   : > { %v10946_v39 = vadd.f32 %v10945_v35, %v10944_v33  ;;  %v10984_v41 = vadd.f32 %v10983_v38, %v10982_v34  ;;  %v6929_v33 = vld [vmem:[#allocation7 + $0x308] sm:$0xff]  ;;  %v6932_v34 = vld [vmem:[#allocation7 + $0x320] sm:$0xff] }
0x1c4d   : > { %v6928_v35 = vld [vmem:[#allocation7 + $0x300] sm:$0xff]  ;;  %v13274_v38 = vpack.c.bf16 %v6932_v34, %v6929_v33  ;;  %v6958_v34 = vld [vmem:[#allocation7 + $0x3f0] sm:$0xff] }
0x1c4e   : > { %v6498_v54 = vadd.f32 %v10946_v39, %v6423_v37  ;;  %v10947_v42 = vpop.f32.mrb[82].mxu1  ;;  %v10985_v46 = vpop.f32.mrb[76].mxu0  ;;  %v6931_v39 = vld [vmem:[#allocation7 + $0x318] sm:$0xff] }
0x1c4f   : > { %v10948_v50 = vpop.f32.mrb[83].mxu1  ;;  %v10986_v51 = vpop.f32.mrb[77].mxu0  ;;  %13275 = vmatprep.subr.bf16.mxu1 %v13274_v38 }
0x1c50   : > { %v6573_v31 = vadd.f32 %v10984_v41, %v6498_v54  ;;  %v10949_v52 = vadd.f32 %v10948_v50, %v10947_v42  ;;  %v10987_v55 = vadd.f32 %v10986_v51, %v10985_v46  ;;  %v6935_v41 = vld [vmem:[#allocation7 + $0x338] sm:$0xff]  ;;  %v6938_v54 = vld [vmem:[#allocation7 + $0x350] sm:$0xff]  ;;  %v13276_v42 = vpack.c.bf16 %v6931_v39, %v6928_v35  ;;  %v6937_v51 = vld [vmem:[#allocation7 + $0x348] sm:$0xff] }
0x1c51   : > { %v13278_v46 = vpack.c.bf16 %v6938_v54, %v6935_v41  ;;  %v6934_v50 = vld [vmem:[#allocation7 + $0x330] sm:$0xff]  ;;  %v6961_v35 = vld [vmem:[#allocation7 + $0x408] sm:$0xff] }
0x1c52   : > { %v6503_v43 = vadd.f32 %v10949_v52, %v6428_v8  ;;  %v6941_v52 = vld [vmem:[#allocation7 + $0x368] sm:$0xff]  ;;  %13277 = vmatpush1.bf16.msra.mxu1 %v13276_v42  ;;  %v13296_v38 = vpack.c.bf16 %v6961_v35, %v6958_v34  ;;  %v6954_v39 = vld [vmem:[#allocation7 + $0x3d0] sm:$0xff] }
0x1c53   : > { %13279 = vmatprep.subr.bf16.mxu1 %v13278_v46  ;;  %v6957_v41 = vld [vmem:[#allocation7 + $0x3e8] sm:$0xff]  ;;  %v6968_v46 = vld [vmem:[#allocation7 + $0x440] sm:$0xff] }
0x1c54   : > { %v6578_v45 = vadd.f32 %v10987_v55, %v6503_v43  ;;  %v6944_v55 = vld [vmem:[#allocation7 + $0x380] sm:$0xff]  ;;  %v13322_v54 = vpack.c.bf16 %v6957_v41, %v6954_v39  ;;  %v6965_v42 = vld [vmem:[#allocation7 + $0x428] sm:$0xff] }
0x1c6a   : > { %v11020_v30 = vpop.f32.mrb[84].mxu1  ;;  %v11058_v36 = vpop.f32.mrb[78].mxu0 }
0x1c6b   : > { %v11021_v32 = vpop.f32.mrb[85].mxu1  ;;  %v11059_v57 = vpop.f32.mrb[79].mxu0 }
0x1c6c   : > { %v11022_v59 = vadd.f32 %v11021_v32, %v11020_v30  ;;  %v11060_v44 = vadd.f32 %v11059_v57, %v11058_v36  ;;  %v13282_v30 = vpack.c.bf16 %v6944_v55, %v6941_v52  ;;  %v6940_v36 = vld [vmem:[#allocation7 + $0x360] sm:$0xff]  ;;  %v6943_v32 = vld [vmem:[#allocation7 + $0x378] sm:$0xff] }
0x1c6d   : > { %v6939_v57 = vld [vmem:[#allocation7 + $0x358] sm:$0xff]  ;;  %v6960_v52 = vld [vmem:[#allocation7 + $0x400] sm:$0xff] }
0x1c6e   : > { %v6648_v56 = vadd.f32 %v11022_v59, %v6573_v31  ;;  %v11023_v21 = vpop.f32.mrb[86].mxu1  ;;  %v11061_v11 = vpop.f32.mrb[80].mxu0  ;;  %v6930_v31 = vld [vmem:[#allocation7 + $0x310] sm:$0xff]  ;;  %v6963_v55 = vld [vmem:[#allocation7 + $0x418] sm:$0xff] }
0x1c6f   : > { %v11024_v1 = vpop.f32.mrb[87].mxu1  ;;  %v11062_v3 = vpop.f32.mrb[81].mxu0 }
0x1c70   : > { %v6723_v4 = vadd.f32 %v11060_v44, %v6648_v56  ;;  %v11025_v14 = vadd.f32 %v11024_v1, %v11023_v21  ;;  %v11063_v6 = vadd.f32 %v11062_v3, %v11061_v11  ;;  %v13284_v44 = vpack.c.bf16 %v6943_v32, %v6940_v36  ;;  %v6970_v36 = vld [vmem:[#allocation7 + $0x450] sm:$0xff]  ;;  %v6973_v32 = vld [vmem:[#allocation7 + $0x468] sm:$0xff] }
0x1c72   : > { %v6653_v7 = vadd.f32 %v11025_v14, %v6578_v45  ;;  %v6936_v45 = vld [vmem:[#allocation7 + $0x340] sm:$0xff] }
0x1c73   : > { %v13310_v59 = vpack.c.bf16 %v6939_v57, %v6936_v45  ;;  %v6974_v45 = vld [vmem:[#allocation7 + $0x470] sm:$0xff] }
0x1c74   : > { %v6728_v23 = vadd.f32 %v11063_v6, %v6653_v7  ;;  %v6966_v57 = vld [vmem:[#allocation7 + $0x430] sm:$0xff] }
0x1c8a   : > { %v11096_v9 = vpop.f32.mrb[88].mxu1  ;;  %v11134_v17 = vpop.f32.mrb[82].mxu0 }
0x1c8b   : > { %v11097_v18 = vpop.f32.mrb[89].mxu1  ;;  %v11135_v20 = vpop.f32.mrb[83].mxu0 }
0x1c8c   : > { %v11098_v25 = vadd.f32 %v11097_v18, %v11096_v9  ;;  %v11136_v22 = vadd.f32 %v11135_v20, %v11134_v17  ;;  %v6950_v9 = vld [vmem:[#allocation7 + $0x3b0] sm:$0xff]  ;;  %v6949_v20 = vld [vmem:[#allocation7 + $0x3a8] sm:$0xff] }
0x1c8d   : > { %v6946_v18 = vld [vmem:[#allocation7 + $0x390] sm:$0xff] }
0x1c8e   : > { %v6798_v49 = vadd.f32 %v11098_v25, %v6723_v4  ;;  %v11099_v19 = vpop.f32.mrb[90].mxu1  ;;  %v11137_v63 = vpop.f32.mrb[84].mxu0  ;;  %v13288_v25 = vpack.c.bf16 %v6949_v20, %v6946_v18  ;;  %v10339_v20 = vld [vmem:[%s15616_s13 + $0x1] ss:$0 sm:$0xff] }
0x1c8f   : > { %v11100_v12 = vpop.f32.mrb[91].mxu1  ;;  %v11138_v2 = vpop.f32.mrb[85].mxu0 }
0x1c90   : > { %v6873_v5 = vadd.f32 %v11136_v22, %v6798_v49  ;;  %v11101_v15 = vadd.f32 %v11100_v12, %v11099_v19  ;;  %v11139_v13 = vadd.f32 %v11138_v2, %v11137_v63  ;;  %v6942_v22 = vld [vmem:[#allocation7 + $0x370] sm:$0xff]  ;;  %v6945_v49 = vld [vmem:[#allocation7 + $0x388] sm:$0xff]  ;;  %v6956_v12 = vld [vmem:[#allocation7 + $0x3e0] sm:$0xff] }
0x1c91   : > { %v13314_v19 = vpack.c.bf16 %v6945_v49, %v6942_v22  ;;  %v6953_v63 = vld [vmem:[#allocation7 + $0x3c8] sm:$0xff] }
0x1c92   : > { %v6803_v37 = vadd.f32 %v11101_v15, %v6728_v23  ;;  %v6881_v47 = vadd.f32 %v6873_v5, %v15202_v0  ;;  %v6933_v0 = vld [vmem:[#allocation7 + $0x328] sm:$0xff]  ;;  %v6947_v23 = vld [vmem:[#allocation7 + $0x398] sm:$0xff]  ;;  %v13290_v2 = vpack.c.bf16 %v6956_v12, %v6953_v63  ;;  %v6952_v5 = vld [vmem:[#allocation7 + $0x3c0] sm:$0xff] }
0x1c93   : > { %v13306_v43 = vpack.c.bf16 %v6933_v0, %v6930_v31  ;;  %v13286_v17 = vpack.c.bf16 %v6950_v9, %v6947_v23  ;;  %v6955_v15 = vld [vmem:[#allocation7 + $0x3d8] sm:$0xff]  ;;  %v10341_v22 = vld [vmem:[%s15617_s14 + $0x1] ss:$0 sm:$0xff] }
0x1c94   : > { %v6878_v27 = vadd.f32 %v11139_v13, %v6803_v37  ;;  %6883 = vadd.xlane.f32.xlu1 %v6881_v47  ;;  %v13292_v13 = vpack.c.bf16 %v6955_v15, %v6952_v5  ;;  %v6948_v37 = vld [vmem:[#allocation7 + $0x3a0] sm:$0xff]  ;;  %v6967_v31 = vld [vmem:[#allocation7 + $0x438] sm:$0xff] }
0x1c95   : > { %13307 = vmatprep.subr.bf16.mxu0 %v13306_v43 }
0x1c96   : > { %v6882_v29 = vadd.f32 %v6878_v27, %v15207_v10  ;;  %v13280_v10 = vpack.c.bf16 %v6937_v51, %v6934_v50  ;;  %13309 = vmatpush3.bf16.msra.mxu0 %v13306_v43  ;;  %v13298_v50 = vpack.c.bf16 %v6968_v46, %v6965_v42  ;;  %v6964_v51 = vld [vmem:[#allocation7 + $0x420] sm:$0xff]  ;;  %v6971_v43 = vld [vmem:[#allocation7 + $0x458] sm:$0xff] }
0x1c97   : > { %13311 = vmatprep.subr.bf16.mxu0 %v13310_v59  ;;  %v13300_v0 = vpack.c.bf16 %v6967_v31, %v6964_v51 }
0x1c98   : > { %v6885_v8 = vsel %vm1066_vm1, %v6882_v29, 0.0  ;;  %13281 = vmatpush1.bf16.msra.mxu1 %v13280_v10  ;;  %v13326_v10 = vpack.c.bf16 %v6963_v55, %v6960_v52 }
0x1c99   : > { %6886 = vadd.xlane.f32.xlu0 %v6885_v8  ;;  %13283 = vmatprep.subr.bf16.mxu1 %v13282_v30  ;;  %v6962_v8 = vld [vmem:[#allocation7 + $0x410] sm:$0xff]  ;;  %v13302_v30 = vpack.c.bf16 %v6974_v45, %v6971_v43 }
0x1c9a   : > { %13313 = vmatpush3.bf16.msra.mxu0 %v13310_v59  ;;  %v13304_v59 = vpack.c.bf16 %v6973_v32, %v6970_v36 }
0x1c9b   : > { %13315 = vmatprep.subr.bf16.mxu0 %v13314_v19 }
0x1c9c   : > { %13285 = vmatpush1.bf16.msra.mxu1 %v13284_v44  ;;  %v6969_v44 = vld [vmem:[#allocation7 + $0x448] sm:$0xff] }
0x1c9d   : > { %13287 = vmatprep.subr.bf16.mxu1 %v13286_v17 }
0x1c9e   : > { %13317 = vmatpush3.bf16.msra.mxu0 %v13314_v19 }
0x1ca0   : > { %13289 = vmatpush1.bf16.msra.mxu1 %v13288_v25 }
0x1ca1   : > { %13291 = vmatprep.subr.bf16.mxu1 %v13290_v2 }
0x1ca4   : > { %13293 = vmatpush1.bf16.msra.mxu1 %v13292_v13 }
0x1d21   : > { %v6884_v56 = vpop.xlane.xlu1 %6883 }
0x1d22   : > { %v6888_v21 = vmul.f32 0.0078125, %v6884_v56  ;;  %v13330_v56 = vpack.c.bf16 %v6969_v44, %v6966_v57 }
0x1d24   : > { %v15286_v11 = vsub.f32 %v6881_v47, %v6888_v21  ;;  %v6951_v47 = vld [vmem:[#allocation7 + $0x3b8] sm:$0xff]  ;;  %v6972_v21 = vld [vmem:[#allocation7 + $0x460] sm:$0xff] }
0x1d25   : > { %v13318_v27 = vpack.c.bf16 %v6951_v47, %v6948_v37 }
0x1d26   : > { %v6887_v1 = vpop.xlane.xlu0 %6886  ;;  %v6892_v3 = vmul.f32 %v15286_v11, %v15286_v11 }
0x1d27   : > { %v6889_v4 = vmul.f32 0.0078125, %v6887_v1  ;;  %13319 = vmatprep.subr.bf16.mxu0 %v13318_v27  ;;  %v6975_v1 = vld [vmem:[#allocation7 + $0x478] sm:$0xff] }
0x1d28   : > { %6894 = vadd.xlane.f32.xlu1 %v6892_v3  ;;  %13321 = vmatpush3.bf16.msra.mxu0 %v13318_v27  ;;  %v13334_v3 = vpack.c.bf16 %v6975_v1, %v6972_v21 }
0x1d29   : > { %v15290_v14 = vsub.f32 %v6882_v29, %v6889_v4  ;;  %v6959_v29 = vld [vmem:[#allocation7 + $0x3f8] sm:$0xff]  ;;  %13323 = vmatprep.subr.bf16.mxu0 %v13322_v54 }
0x1d2a   : > { %v13294_v33 = vpack.c.bf16 %v6962_v8, %v6959_v29 }
0x1d2b   : > { %v6893_v6 = vmul.f32 %v15290_v14, %v15290_v14 }
0x1d2c   : > { %13295 = vmatprep.subr.bf16.mxu1 %v13294_v33  ;;  %13325 = vmatpush3.bf16.msra.mxu0 %v13322_v54 }
0x1d2d   : > { %v6896_v7 = vsel %vm1066_vm1, %v6893_v6, 0.0  ;;  %13297 = vmatpush1.bf16.msra.mxu1 %v13296_v38  ;;  %13327 = vmatprep.subr.bf16.mxu0 %v13326_v10 }
0x1d2e   : > { %6897 = vadd.xlane.f32.xlu0 %v6896_v7  ;;  %13299 = vmatprep.subr.bf16.mxu1 %v13298_v50 }
0x1d30   : > { %13329 = vmatpush3.bf16.msra.mxu0 %v13326_v10 }
0x1d31   : > { %13301 = vmatpush1.bf16.msra.mxu1 %v13300_v0  ;;  %13331 = vmatprep.subr.bf16.mxu0 %v13330_v56 }
0x1d32   : > { %13303 = vmatprep.subr.bf16.mxu1 %v13302_v30 }
0x1d34   : > { %13333 = vmatpush3.bf16.msra.mxu0 %v13330_v56 }
0x1d35   : > { %13305 = vmatpush1.bf16.msra.mxu1 %v13304_v59  ;;  %13335 = vmatprep.subr.bf16.mxu0 %v13334_v3 }
0x1d38   : > { %13337 = vmatpush3.bf16.msra.mxu0 %v13334_v3 }
0x1db5   : > { %v6895_v4 = vpop.xlane.xlu1 %6894 }
0x1db6   : > { %v6899_v6 = vmul.f32 0.0078125, %v6895_v4 }
0x1db8   : > { %v6901_v7 = vadd.f32 1e-05, %v6899_v6 }
0x1dba   : > { %14207 = vrsqrt.f32 %v6901_v7 }
0x1dbb   : > { %v6898_v23 = vpop.xlane.xlu0 %6897 }
0x1dbc   : > { %v6900_v9 = vmul.f32 0.0078125, %v6898_v23 }
0x1dbe   : > { %v6902_v17 = vadd.f32 1e-05, %v6900_v9 }
0x1dc0   : > { %14209 = vrsqrt.f32 %v6902_v17 }
0x1dc4   : > { %v14208_v18 = vpop.eup %14207 }
0x1dc5   : > { %v6905_v25 = vmul.f32 %v14208_v18, %v15286_v11  ;;  %v10342_v11 = vld [vmem:[%s15607_s4 + $0x6] sm:$0x7] }
0x1dc6   : > { %v6982_v15 = vrot.slane %v10342_v11, %v14768_v24  ;;  %v6986_v29 = vrot.slane %v10342_v11, %v14778_v28 }
0x1dc7   : > { %v6915_v49 = vmul.f32 %v10339_v20, %v6905_v25 }
0x1dc9   : > { %v15302_v19 = vadd.f32 %v10341_v22, %v6915_v49 }
0x1dca   : > { %v14210_v63 = vpop.eup %14209 }
0x1dcb   : > { %7059 = vmatmul.mubr.f32.vlgmr.msra.gmra.mrb[92].mxu1 %v15302_v19  ;;  %11825 = vmatprep.mubr.f32.mxu0 %v15302_v19  ;;  %v6906_v12 = vmul.f32 %v14210_v63, %v15290_v14  ;;  %v6990_v14 = vrot.slane %v10342_v11, %v14774_v26 }
0x1dcc   : > { %7064 = vmatprep.mubr.f32.mxu1 %v14454_v16 }
0x1dcd   : > { %v6916_v2 = vmul.f32 %v10339_v20, %v6906_v12 }
0x1dcf   : > { %v15308_v5 = vadd.f32 %v10341_v22, %v6916_v2 }
0x1dd1   : > { %7065 = vmatmul.mubr.f32.gmra.mrb[94].mxu1 %v15308_v5  ;;  %11826 = vmatmul.mubr.f32.vlgmr.msra.gmra.mrb[86].mxu0 %v15308_v5 }
0x1e9e   : > { %v7060_v13 = vpop.f32.mrb[92].mxu1 }
0x1e9f   : > { %v7061_v37 = vadd.f32 %v7060_v13, %v6982_v15  ;;  %v7062_v47 = vpop.f32.mrb[93].mxu1 }
0x1ea0   : > { %v7063_v39 = vadd.f32 %v7062_v47, %v6986_v29 }
0x1ea1   : > { %v15316_v27 = vmul.f32 0.17677669, %v7061_v37 }
0x1ea3   : > { %11832 = vmatprep.mubr.msk.f32.mxu1 %vm648_vm0, %v15316_v27 }
0x1ea4   : > { %v7066_v8 = vpop.f32.mrb[94].mxu1  ;;  %v11827_v33 = vpop.f32.mrb[86].mxu0 }
0x1ea5   : > { %v7143_v34 = vadd.f32 %v11827_v33, %v6990_v14  ;;  %v7068_v35 = vpop.f32.mrb[95].mxu1  ;;  %v7137_v38 = vpop.f32.mrb[87].mxu0  ;;  %v7067_v31 = vadd.f32 %v7066_v8, %v6982_v15 }
0x1ea6   : > { %v7069_v41 = vadd.f32 %v7068_v35, %v6986_v29  ;;  %v7138_v54 = vadd.f32 %v7137_v38, %v6990_v14 }
0x1ea7   : > { %v15332_v0 = vmul.f32 0.17677669, %v7067_v31 }
0x1ea8   : > { %v13338_v42 = vpack.c.bf16 %v7069_v41, %v7063_v39  ;;  %v13344_v46 = vpack.c.bf16 %v7143_v34, %v7138_v54  ;;  %v15322_v50 = vpack.i.bf16 %v7069_v41, %v7063_v39  ;;  %v15324_v51 = vpack.i.bf16 %v7143_v34, %v7138_v54 }
0x1eaa   : > { %13340 = vmatprep.subr.msk.bf16.mxu1 %vm14799_vm4, %v13338_v42 }
0x1eab   : > { %13343 = vmatpush3.bf16.xpose.msk.msra.mxu1 %vm14799_vm4, %v13338_v42 }
0x1eac   : > { %13346 = vmatprep.subr.msk.bf16.mxu1 %vm14785_vm3, %v13344_v46 }
0x1eb2   : > { %11833 = vmatmul.mubr.msk.f32.vlgmr.msra.gmra.mrb[96].mxu1 %vm648_vm0, %v15332_v0 }
0x1eb3   : > { %13349 = vmatpush3.bf16.msk.msra.mxu1 %vm14785_vm3, %v13344_v46 }
0x1f85   : > { %v11834_v52 = vpop.f32.mrb[96].mxu1 }
0x1f86   : > { %v7226_v55 = vpop.f32.mrb[97].mxu1  ;;  %v7238_v10 = vsel %vm1040_vm5, %v11834_v52, -inf }
0x1f87   : > { %7239 = vmax.xlane.f32.xlu0 %v7238_v10  ;;  %v7235_v43 = vsel %vm1036_vm6, %v7226_v55, -inf }
0x1f88   : > { %7236 = vmax.xlane.f32.xlu1 %v7235_v43 }
0x1f99   : > { %14102 = vrot.lane.b32.xlu1 %v15322_v50, %s14456_s18 }
0x2014   : > { %v7240_v45 = vpop.xlane.xlu0 %7239 }
0x2015   : > { %v7242_v30 = vsub.f32 %v11834_v52, %v7240_v45  ;;  %v7237_v36 = vpop.xlane.xlu1 %7236 }
0x2016   : > { %v7241_v32 = vsub.f32 %v7226_v55, %v7237_v36 }
0x2017   : > { %v7245_v57 = vmul.f32 1.442695, %v7242_v30 }
0x2018   : > { %v7243_v59 = vmul.f32 1.442695, %v7241_v32 }
0x2019   : > { %14211 = vpow2.f32 %v7245_v57  ;;  %v14103_v44 = vpop.permute.xlu1 %14102 }
0x201a   : > { %14213 = vpow2.f32 %v7243_v59  ;;  %v14105_v56 = vunpack.i.h.bf16 %v14103_v44  ;;  %v14104_v21 = vunpack.i.l.bf16 %v14103_v44 }
0x201c   : > { %v13350_v1 = vpack.c.bf16 %v14105_v56, %v14104_v21 }
0x201e   : > { %13352 = vmatprep.subr.msk.bf16.mxu1 %vm14799_vm4, %v13350_v1 }
0x2023   : > { %v14212_v3 = vpop.eup %14211 }
0x2024   : > { %v14214_v4 = vpop.eup %14213  ;;  %v7250_v6 = vsel %vm1040_vm5, %v14212_v3, 0.0 }
0x2025   : > { %7251 = vadd.xlane.f32.xlu0 %v7250_v6  ;;  %v7247_v7 = vsel %vm1036_vm6, %v14214_v4, 0.0 }
0x2026   : > { %7248 = vadd.xlane.f32.xlu1 %v7247_v7 }
0x2037   : > { %7345 = vrot.lane.b32.xlu1 %v15332_v0, %s14456_s18 }
0x203b   : > { %7343 = vrot.lane.b32.xlu0 %v15316_v27, %s14456_s18 }
0x20b2   : > { %v7252_v23 = vpop.xlane.xlu0 %7251 }
0x20b3   : > { %14215 = vrcp.f32 %v7252_v23  ;;  %v7249_v9 = vpop.xlane.xlu1 %7248 }
0x20b4   : > { %14217 = vrcp.f32 %v7249_v9 }
0x20b6   : > { %v7344_v22 = vpop.permute.xlu0 %7343 }
0x20b7   : > { %v7346_v49 = vpop.permute.xlu1 %7345 }
0x20bd   : > { %v14216_v17 = vpop.eup %14215 }
0x20be   : > { %v14218_v18 = vpop.eup %14217  ;;  %v7256_v25 = vmul.f32 %v14216_v17, %v14212_v3 }
0x20bf   : > { %v7255_v20 = vmul.f32 %v14218_v18, %v14214_v4 }
0x20c1   : > { %11839 = vmatprep.mubr.msk.f32.mxu1 %vm1036_vm6, %v7255_v20 }
0x20c2   : > { %11840 = vmatmul.mubr.msk.f32.vlgmr.msra.gmra.mrb[98].mxu1 %vm1036_vm6, %v7256_v25 }
0x20c3   : > { %13355 = vmatpush3.bf16.xpose.msk.msra.mxu1 %vm14799_vm4, %v13350_v1  ;;  %11846 = vmatprep.mubr.msk.f32.mxu1 %vm648_vm0, %v7344_v22 }
0x20ca   : > { %11847 = vmatmul.mubr.msk.f32.vlgmr.msra.gmra.mrb[100].mxu1 %vm648_vm0, %v7346_v49 }
0x2195   : > { %v11841_v63 = vpop.f32.mrb[98].mxu1 }
0x2196   : > { %7342 = vst.msk [vmem:[#allocation2 + $0x8] sm:$0x3f] %vm1146_vm7, %v11841_v63  ;;  %v7332_v12 = vpop.f32.mrb[99].mxu1 }
0x2197   : > { %7341 = vst.msk [vmem:[#allocation2] sm:$0xff] %vm648_vm0, %v7332_v12 }
0x219d   : > { %v11848_v2 = vpop.f32.mrb[100].mxu1 }
0x219e   : > { %v7425_v11 = vpop.f32.mrb[101].mxu1  ;;  %v7437_v15 = vsel %vm1040_vm5, %v11848_v2, -inf }
0x219f   : > { %7438 = vmax.xlane.f32.xlu0 %v7437_v15  ;;  %v7434_v13 = vsel %vm1036_vm6, %v7425_v11, -inf }
0x21a0   : > { %7435 = vmax.xlane.f32.xlu1 %v7434_v13 }
0x222c   : > { %v7439_v37 = vpop.xlane.xlu0 %7438 }
0x222d   : > { %v7441_v47 = vsub.f32 %v11848_v2, %v7439_v37  ;;  %v7436_v14 = vpop.xlane.xlu1 %7435 }
0x222e   : > { %v7440_v29 = vsub.f32 %v7425_v11, %v7436_v14 }
0x222f   : > { %v7444_v8 = vmul.f32 1.442695, %v7441_v47 }
0x2230   : > { %v7442_v33 = vmul.f32 1.442695, %v7440_v29 }
0x2231   : > { %14219 = vpow2.f32 %v7444_v8 }
0x2232   : > { %14221 = vpow2.f32 %v7442_v33 }
0x223b   : > { %v14220_v34 = vpop.eup %14219 }
0x223c   : > { %v14222_v35 = vpop.eup %14221  ;;  %v7449_v38 = vsel %vm1040_vm5, %v14220_v34, 0.0 }
0x223d   : > { %7450 = vadd.xlane.f32.xlu1 %v7449_v38  ;;  %v7446_v39 = vsel %vm1036_vm6, %v14222_v35, 0.0 }
0x223e   : > { %7447 = vadd.xlane.f32.xlu0 %v7446_v39 }
0x224e   : > { %14112 = vrot.lane.b32.xlu1 %v15322_v50, %s14457_s21 }
0x2252   : > { %14117 = vrot.lane.b32.xlu1 %v15322_v50, %s14458_s22 }
0x2254   : > { %14107 = vrot.lane.b32.xlu0 %v15324_v51, %s14456_s18 }
0x2256   : > { %7557 = vrot.lane.b32.xlu1 %v15332_v0, %s14457_s21 }
0x2258   : > { %7555 = vrot.lane.b32.xlu0 %v15316_v27, %s14457_s21 }
0x225a   : > { %7768 = vrot.lane.b32.xlu1 %v15332_v0, %s14458_s22 }
0x225c   : > { %7766 = vrot.lane.b32.xlu0 %v15316_v27, %s14458_s22 }
0x22ca   : > { %v7451_v41 = vpop.xlane.xlu1 %7450 }
0x22cb   : > { %14223 = vrcp.f32 %v7451_v41  ;;  %v7448_v54 = vpop.xlane.xlu0 %7447 }
0x22cc   : > { %14225 = vrcp.f32 %v7448_v54 }
0x22ce   : > { %v14113_v42 = vpop.permute.xlu1 %14112 }
0x22cf   : > { %v14108_v46 = vpop.permute.xlu0 %14107  ;;  %v14115_v50 = vunpack.i.h.bf16 %v14113_v42  ;;  %v14114_v31 = vunpack.i.l.bf16 %v14113_v42 }
0x22d0   : > { %v14110_v52 = vunpack.i.h.bf16 %v14108_v46  ;;  %v14109_v55 = vunpack.i.l.bf16 %v14108_v46 }
0x22d1   : > { %v13362_v43 = vpack.c.bf16 %v14115_v50, %v14114_v31 }
0x22d2   : > { %v13356_v10 = vpack.c.bf16 %v14110_v52, %v14109_v55  ;;  %v14118_v0 = vpop.permute.xlu1 %14117 }
0x22d3   : > { %v14120_v32 = vunpack.i.h.bf16 %v14118_v0  ;;  %v14119_v57 = vunpack.i.l.bf16 %v14118_v0  ;;  %v7556_v59 = vpop.permute.xlu0 %7555 }
0x22d4   : > { %13358 = vmatprep.subr.msk.bf16.mxu1 %vm14785_vm3, %v13356_v10 }
0x22d5   : > { %v14224_v45 = vpop.eup %14223  ;;  %13361 = vmatpush3.bf16.msk.msra.mxu1 %vm14785_vm3, %v13356_v10  ;;  %v13374_v44 = vpack.c.bf16 %v14120_v32, %v14119_v57 }
0x22d6   : > { %v14226_v27 = vpop.eup %14225  ;;  %13364 = vmatprep.subr.msk.bf16.mxu1 %vm14799_vm4, %v13362_v43  ;;  %v7455_v36 = vmul.f32 %v14224_v45, %v14220_v34  ;;  %v7558_v56 = vpop.permute.xlu1 %7557 }
0x22d7   : > { %v7454_v30 = vmul.f32 %v14226_v27, %v14222_v35  ;;  %v7767_v21 = vpop.permute.xlu0 %7766 }
0x22d9   : > { %11853 = vmatprep.mubr.msk.f32.mxu1 %vm1036_vm6, %v7454_v30 }
0x22da   : > { %11854 = vmatmul.mubr.msk.f32.vlgmr.msra.gmra.mrb[102].mxu1 %vm1036_vm6, %v7455_v36  ;;  %v7769_v1 = vpop.permute.xlu1 %7768 }
0x22db   : > { %11860 = vmatprep.mubr.msk.f32.mxu1 %vm648_vm0, %v7556_v59 }
0x22de   : > { %13367 = vmatpush3.bf16.xpose.msk.msra.mxu1 %vm14799_vm4, %v13362_v43 }
0x22df   : > { %13376 = vmatprep.subr.msk.bf16.mxu1 %vm14799_vm4, %v13374_v44 }
0x22e5   : > { %11861 = vmatmul.mubr.msk.f32.vlgmr.msra.gmra.mrb[104].mxu1 %vm648_vm0, %v7558_v56 }
0x22e6   : > { %13379 = vmatpush3.bf16.xpose.msk.msra.mxu1 %vm14799_vm4, %v13374_v44  ;;  %11874 = vmatprep.mubr.msk.f32.mxu1 %vm648_vm0, %v7767_v21 }
0x22ed   : > { %11875 = vmatmul.mubr.msk.f32.vlgmr.msra.gmra.mrb[106].mxu1 %vm648_vm0, %v7769_v1 }
0x22ee   : > { %8531 = vmatprep.mubr.f32.mxu1 %v14454_v16 }
0x23ad   : > { %v11855_v3 = vpop.f32.mrb[102].mxu1 }
0x23ae   : > { %v7536_v4 = vpop.f32.mrb[103].mxu1 }
0x23b8   : > { %v11862_v6 = vpop.f32.mrb[104].mxu1 }
0x23b9   : > { %v7637_v7 = vpop.f32.mrb[105].mxu1  ;;  %v7649_v23 = vsel %vm1040_vm5, %v11862_v6, -inf }
0x23ba   : > { %7650 = vmax.xlane.f32.xlu1 %v7649_v23  ;;  %v7646_v9 = vsel %vm1036_vm6, %v7637_v7, -inf  ;;  %v7983_v23 = vld [vmem:[#allocation8 + $0x118] sm:$0xff] }
0x23bb   : > { %7647 = vmax.xlane.f32.xlu0 %v7646_v9 }
0x23c0   : > { %v11876_v17 = vpop.f32.mrb[106].mxu1 }
0x23c1   : > { %v7848_v48 = vpop.f32.mrb[107].mxu1  ;;  %v7860_v20 = vsel %vm1040_vm5, %v11876_v17, -inf }
0x23c2   : > { %v7857_v18 = vsel %vm1036_vm6, %v7848_v48, -inf }
0x23c3   : > { %7858 = vmax.xlane.f32.xlu0 %v7857_v18 }
0x23c7   : > { %7861 = vmax.xlane.f32.xlu0 %v7860_v20  ;;  %v7987_v20 = vld [vmem:[#allocation8 + $0x138] sm:$0xff] }
0x2447   : > { %v7651_v25 = vpop.xlane.xlu1 %7650 }
0x2448   : > { %v7653_v22 = vsub.f32 %v11862_v6, %v7651_v25  ;;  %v7648_v49 = vpop.xlane.xlu0 %7647  ;;  %v7982_v6 = vld [vmem:[#allocation8 + $0x110] sm:$0xff]  ;;  %v13398_v25 = vpack.c.bf16 %v7987_v20, %v7986_v40  ;;  %v8191_v20 = vld [vmem:[#allocation10 + $0x1208] sm:$0xff] }
0x2449   : > { %v7652_v63 = vsub.f32 %v7637_v7, %v7648_v49  ;;  %v13390_v9 = vpack.c.bf16 %v7983_v23, %v7982_v6  ;;  %v7989_v49 = vld [vmem:[#allocation8 + $0x148] sm:$0xff]  ;;  %v8177_v6 = vld [vmem:[#allocation10 + $0x1198] sm:$0xff]  ;;  %v8176_v40 = vld [vmem:[#allocation10 + $0x1190] sm:$0xff] }
0x244a   : > { %v7656_v12 = vmul.f32 1.442695, %v7653_v22  ;;  %v7988_v22 = vld [vmem:[#allocation8 + $0x140] sm:$0xff] }
0x244b   : > { %v7654_v2 = vmul.f32 1.442695, %v7652_v63  ;;  %v13402_v63 = vpack.c.bf16 %v7989_v49, %v7988_v22 }
0x244c   : > { %14227 = vpow2.f32 %v7656_v12  ;;  %v7990_v12 = vld [vmem:[#allocation8 + $0x150] sm:$0xff] }
0x244d   : > { %14229 = vpow2.f32 %v7654_v2  ;;  %v7991_v2 = vld [vmem:[#allocation8 + $0x158] sm:$0xff] }
0x2450   : > { %v7859_v11 = vpop.xlane.xlu0 %7858 }
0x2451   : > { %v7863_v15 = vsub.f32 %v7848_v48, %v7859_v11  ;;  %v7985_v48 = vld [vmem:[#allocation8 + $0x128] sm:$0xff]  ;;  %v13406_v11 = vpack.c.bf16 %v7991_v2, %v7990_v12  ;;  %v8209_v12 = vld [vmem:[#allocation10 + $0x1298] sm:$0xff]  ;;  %v8190_v2 = vld [vmem:[#allocation10 + $0x1200] sm:$0xff] }
0x2453   : > { %v7865_v13 = vmul.f32 1.442695, %v7863_v15  ;;  %v7992_v15 = vld [vmem:[#allocation8 + $0x160] sm:$0xff] }
0x2454   : > { %v7862_v37 = vpop.xlane.xlu0 %7861 }
0x2455   : > { %14231 = vpow2.f32 %v7865_v13  ;;  %v7864_v47 = vsub.f32 %v11876_v17, %v7862_v37  ;;  %v7984_v17 = vld [vmem:[#allocation8 + $0x120] sm:$0xff]  ;;  %v7993_v13 = vld [vmem:[#allocation8 + $0x168] sm:$0xff] }
0x2456   : > { %v14228_v14 = vpop.eup %14227  ;;  %v13394_v18 = vpack.c.bf16 %v7985_v48, %v7984_v17  ;;  %v13410_v37 = vpack.c.bf16 %v7993_v13, %v7992_v15  ;;  %v8174_v17 = vld [vmem:[#allocation10 + $0x1180] sm:$0xff]  ;;  %v8160_v48 = vld [vmem:[#allocation10 + $0x1110] sm:$0xff] }
0x2457   : > { %v14230_v29 = vpop.eup %14229  ;;  %v7867_v8 = vmul.f32 1.442695, %v7864_v47  ;;  %v7661_v33 = vsel %vm1040_vm5, %v14228_v14, 0.0  ;;  %v7994_v47 = vld [vmem:[#allocation8 + $0x170] sm:$0xff]  ;;  %v13456_v22 = vpack.c.bf16 %v8176_v40, %v8160_v48  ;;  %v8206_v15 = vld [vmem:[#allocation10 + $0x1280] sm:$0xff] }
0x2458   : > { %7662 = vadd.xlane.f32.xlu0 %v7661_v33  ;;  %v7658_v34 = vsel %vm1036_vm6, %v14230_v29, 0.0  ;;  %v8192_v13 = vld [vmem:[#allocation10 + $0x1210] sm:$0xff]  ;;  %v8302_v48 = vld [vmem:[#allocation10 + $0x1580] sm:$0xff] }
0x2459   : > { %14233 = vpow2.f32 %v7867_v8  ;;  %7659 = vadd.xlane.f32.xlu1 %v7658_v34 }
0x245f   : > { %v14232_v35 = vpop.eup %14231 }
0x2460   : > { %v7869_v38 = vsel %vm1036_vm6, %v14232_v35, 0.0 }
0x2461   : > { %7870 = vadd.xlane.f32.xlu1 %v7869_v38 }
0x2463   : > { %v14234_v39 = vpop.eup %14233 }
0x2464   : > { %v7872_v41 = vsel %vm1040_vm5, %v14234_v39, 0.0 }
0x2465   : > { %7873 = vadd.xlane.f32.xlu0 %v7872_v41 }
0x2472   : > { %14122 = vrot.lane.b32.xlu1 %v15324_v51, %s14457_s21 }
0x2476   : > { %7547 = vrot.lane.b32.xlu1 %v7536_v4, %s14458_s22  ;;  %v7981_v4 = vld [vmem:[#allocation8 + $0x108] sm:$0xff] }
0x247a   : > { %7549 = vrot.lane.b32.xlu1 %v11855_v3, %s14458_s22  ;;  %v7980_v3 = vld [vmem:[#allocation8 + $0x100] sm:$0xff] }
0x247b   : > { %14127 = vrot.lane.b32.xlu0 %v15324_v51, %s14458_s22  ;;  %v13386_v7 = vpack.c.bf16 %v7981_v4, %v7980_v3  ;;  %v8159_v3 = vld [vmem:[#allocation10 + $0x1108] sm:$0xff] }
0x247c   : > { %v8175_v4 = vld [vmem:[#allocation10 + $0x1188] sm:$0xff] }
0x24e5   : > { %v7663_v42 = vpop.xlane.xlu0 %7662 }
0x24e6   : > { %v7660_v54 = vpop.xlane.xlu1 %7659 }
0x24e7   : > { %14235 = vrcp.f32 %v7660_v54 }
0x24e8   : > { %14237 = vrcp.f32 %v7663_v42 }
0x24ee   : > { %v7871_v46 = vpop.xlane.xlu1 %7870 }
0x24ef   : > { %14239 = vrcp.f32 %v7871_v46 }
0x24f1   : > { %v14236_v50 = vpop.eup %14235 }
0x24f2   : > { %v14123_v31 = vpop.permute.xlu1 %14122  ;;  %v7874_v52 = vpop.xlane.xlu0 %7873  ;;  %v7666_v55 = vmul.f32 %v14236_v50, %v14230_v29  ;;  %v10372_v50 = vld [vmem:[%s15609_s6 + $0x2] ss:$0 sm:$0xff] }
0x24f3   : > { %v14125_v10 = vunpack.i.h.bf16 %v14123_v31  ;;  %v14124_v43 = vunpack.i.l.bf16 %v14123_v31  ;;  %14241 = vrcp.f32 %v7874_v52  ;;  %v14238_v27 = vpop.eup %14237 }
0x24f4   : > { %11867 = vmatprep.mubr.msk.f32.mxu0 %vm1036_vm6, %v7666_v55  ;;  %v7667_v57 = vmul.f32 %v14238_v27, %v14228_v14  ;;  %v7995_v14 = vld [vmem:[#allocation8 + $0x178] sm:$0xff] }
0x24f5   : > { %v13368_v45 = vpack.c.bf16 %v14125_v10, %v14124_v43  ;;  %v13414_v29 = vpack.c.bf16 %v7995_v14, %v7994_v47  ;;  %v13428_v47 = vpack.c.bf16 %v8206_v15, %v8190_v2  ;;  %v8318_v15 = vld [vmem:[#allocation10 + $0x1600] sm:$0xff] }
0x24f6   : > { %v7548_v0 = vpop.permute.xlu1 %7547  ;;  %v14128_v30 = vpop.permute.xlu0 %14127 }
0x24f7   : > { %7553 = vst.msk [vmem:[#allocation2] sm:$0xff] %vm1358_vm8, %v7548_v0  ;;  %v14130_v51 = vunpack.i.h.bf16 %v14128_v30  ;;  %v14129_v36 = vunpack.i.l.bf16 %v14128_v30  ;;  %13370 = vmatprep.subr.msk.bf16.mxu0 %vm14785_vm3, %v13368_v45  ;;  %v8127_v0 = vld [vmem:[#allocation10 + $0x1008] sm:$0xff] }
0x24f8   : > { %13373 = vmatpush3.bf16.msk.msra.mxu0 %vm14785_vm3, %v13368_v45  ;;  %v8143_v30 = vld [vmem:[#allocation10 + $0x1088] sm:$0xff] }
0x24f9   : > { %v14240_v32 = vpop.eup %14239  ;;  %v13380_v59 = vpack.c.bf16 %v14130_v51, %v14129_v36  ;;  %v8129_v51 = vld [vmem:[#allocation10 + $0x1018] sm:$0xff]  ;;  %v13418_v36 = vpack.c.bf16 %v8143_v30, %v8127_v0  ;;  %v8240_v0 = vld [vmem:[#allocation10 + $0x1390] sm:$0xff] }
0x24fa   : > { %v7550_v44 = vpop.permute.xlu1 %7549  ;;  %v7877_v56 = vmul.f32 %v14240_v32, %v14232_v35  ;;  %v8145_v32 = vld [vmem:[#allocation10 + $0x1098] sm:$0xff] }
0x24fb   : > { %7554 = vst.msk [vmem:[#allocation2 + $0x8] sm:$0x3f] %vm1360_vm9, %v7550_v44  ;;  %11868 = vmatmul.mubr.msk.f32.vlgmr.msra.gmra.mrb[88].mxu0 %vm1036_vm6, %v7667_v57  ;;  %13382 = vmatprep.subr.msk.bf16.mxu0 %vm14785_vm3, %v13380_v59  ;;  %v8126_v57 = vld [vmem:[#allocation10 + $0x1000] sm:$0xff]  ;;  %v13450_v44 = vpack.c.bf16 %v8145_v32, %v8129_v51  ;;  %v8255_v51 = vld [vmem:[#allocation10 + $0x1408] sm:$0xff]  ;;  %v8257_v32 = vld [vmem:[#allocation10 + $0x1418] sm:$0xff] }
0x24fc   : > { %13385 = vmatpush3.bf16.msk.msra.mxu0 %vm14785_vm3, %v13380_v59  ;;  %11881 = vmatprep.mubr.msk.f32.mxu0 %vm1036_vm6, %v7877_v56  ;;  %v8142_v59 = vld [vmem:[#allocation10 + $0x1080] sm:$0xff] }
0x24fd   : > { %v14242_v21 = vpop.eup %14241  ;;  %13387 = vmatprep.subr.bf16.mxu0 %v13386_v7  ;;  %v13420_v56 = vpack.c.bf16 %v8142_v59, %v8126_v57  ;;  %13419 = vmatprep.subr.bf16.mxu1 %v13418_v36  ;;  %v8271_v36 = vld [vmem:[#allocation10 + $0x1488] sm:$0xff]  ;;  %v8273_v59 = vld [vmem:[#allocation10 + $0x1498] sm:$0xff] }
0x24fe   : > { %v7878_v1 = vmul.f32 %v14242_v21, %v14234_v39  ;;  %v8128_v21 = vld [vmem:[#allocation10 + $0x1010] sm:$0xff]  ;;  %v13434_v57 = vpack.c.bf16 %v8271_v36, %v8255_v51 }
0x24ff   : > { %13421 = vmatpush1.bf16.msra.mxu1 %v13420_v56  ;;  %v8270_v56 = vld [vmem:[#allocation10 + $0x1480] sm:$0xff] }
0x2500   : > { %11882 = vmatmul.mubr.msk.f32.vlgmr.msra.gmra.mrb[90].mxu0 %vm1036_vm6, %v7878_v1  ;;  %v8144_v1 = vld [vmem:[#allocation10 + $0x1090] sm:$0xff] }
0x2501   : > { %13389 = vmatpush3.bf16.msra.mxu0 %v13386_v7  ;;  %v13422_v7 = vpack.c.bf16 %v8175_v4, %v8159_v3  ;;  %v8256_v3 = vld [vmem:[#allocation10 + $0x1410] sm:$0xff] }
0x2502   : > { %13391 = vmatprep.subr.bf16.mxu0 %v13390_v9 }
0x2503   : > { %13423 = vmatprep.subr.bf16.mxu1 %v13422_v7  ;;  %v8289_v7 = vld [vmem:[#allocation10 + $0x1518] sm:$0xff] }
0x2505   : > { %13393 = vmatpush3.bf16.msra.mxu0 %v13390_v9  ;;  %v8158_v9 = vld [vmem:[#allocation10 + $0x1100] sm:$0xff] }
0x2506   : > { %13395 = vmatprep.subr.bf16.mxu0 %v13394_v18 }
0x2509   : > { %13397 = vmatpush3.bf16.msra.mxu0 %v13394_v18  ;;  %v13424_v18 = vpack.c.bf16 %v8174_v17, %v8158_v9  ;;  %v8305_v9 = vld [vmem:[#allocation10 + $0x1598] sm:$0xff]  ;;  %v8286_v17 = vld [vmem:[#allocation10 + $0x1500] sm:$0xff] }
0x250a   : > { %13399 = vmatprep.subr.bf16.mxu0 %v13398_v25  ;;  %v13440_v40 = vpack.c.bf16 %v8302_v48, %v8286_v17  ;;  %v8179_v17 = vld [vmem:[#allocation10 + $0x11a8] sm:$0xff]  ;;  %v8165_v48 = vld [vmem:[#allocation10 + $0x1138] sm:$0xff] }
0x250b   : > { %13425 = vmatpush1.bf16.msra.mxu1 %v13424_v18  ;;  %v13470_v18 = vpack.c.bf16 %v8305_v9, %v8289_v7  ;;  %v10376_v7 = vld [vmem:[%s15611_s8 + $0x2] ss:$0 sm:$0xff] }
0x250d   : > { %13401 = vmatpush3.bf16.msra.mxu0 %v13398_v25  ;;  %v8207_v25 = vld [vmem:[#allocation10 + $0x1288] sm:$0xff] }
0x250e   : > { %13403 = vmatprep.subr.bf16.mxu0 %v13402_v63  ;;  %v13426_v49 = vpack.c.bf16 %v8207_v25, %v8191_v20  ;;  %v8288_v20 = vld [vmem:[#allocation10 + $0x1510] sm:$0xff] }
0x250f   : > { %v8304_v25 = vld [vmem:[#allocation10 + $0x1590] sm:$0xff] }
0x2510   : > { %13427 = vmatprep.subr.bf16.mxu1 %v13426_v49  ;;  %v8319_v49 = vld [vmem:[#allocation10 + $0x1608] sm:$0xff] }
0x2511   : > { %13405 = vmatpush3.bf16.msra.mxu0 %v13402_v63  ;;  %v8193_v63 = vld [vmem:[#allocation10 + $0x1218] sm:$0xff]  ;;  %13429 = vmatpush1.bf16.msra.mxu1 %v13428_v47 }
0x2512   : > { %13407 = vmatprep.subr.bf16.mxu0 %v13406_v11 }
0x2515   : > { %13409 = vmatpush3.bf16.msra.mxu0 %v13406_v11  ;;  %v13458_v11 = vpack.c.bf16 %v8209_v12, %v8193_v63  ;;  %v8335_v63 = vld [vmem:[#allocation10 + $0x1688] sm:$0xff]  ;;  %v8321_v12 = vld [vmem:[#allocation10 + $0x1618] sm:$0xff] }
0x2516   : > { %13411 = vmatprep.subr.bf16.mxu0 %v13410_v37  ;;  %v13442_v2 = vpack.c.bf16 %v8335_v63, %v8319_v49  ;;  %v8178_v49 = vld [vmem:[#allocation10 + $0x11a0] sm:$0xff] }
0x2519   : > { %13413 = vmatpush3.bf16.msra.mxu0 %v13410_v37  ;;  %v8208_v37 = vld [vmem:[#allocation10 + $0x1290] sm:$0xff] }
0x251a   : > { %13415 = vmatprep.subr.bf16.mxu0 %v13414_v29  ;;  %v13460_v14 = vpack.c.bf16 %v8208_v37, %v8192_v13  ;;  %v8334_v13 = vld [vmem:[#allocation10 + $0x1680] sm:$0xff] }
0x251b   : > { %v13444_v47 = vpack.c.bf16 %v8334_v13, %v8318_v15 }
0x251d   : > { %13417 = vmatpush3.bf16.msra.mxu0 %v13414_v29 }
0x251e   : > { %13451 = vmatprep.subr.bf16.mxu0 %v13450_v44  ;;  %v8254_v44 = vld [vmem:[#allocation10 + $0x1400] sm:$0xff] }
0x25ce   : > { %v11869_v8 = vpop.f32.mrb[88].mxu0 }
0x25cf   : > { %7760 = vrot.lane.b32.xlu1 %v11869_v8, %s14457_s21  ;;  %v7747_v33 = vpop.f32.mrb[89].mxu0 }
0x25d0   : > { %7758 = vrot.lane.b32.xlu0 %v7747_v33, %s14457_s21 }
0x25d3   : > { %v11883_v34 = vpop.f32.mrb[90].mxu0 }
0x25d4   : > { %7971 = vrot.lane.b32.xlu1 %v11883_v34, %s14456_s18  ;;  %v7958_v35 = vpop.f32.mrb[91].mxu0 }
0x25d5   : > { %7969 = vrot.lane.b32.xlu0 %v7958_v35, %s14456_s18 }
0x2641   : > { %v7761_v38 = vpop.permute.xlu1 %7760 }
0x2642   : > { %7765 = vst.msk [vmem:[#allocation2 + $0x8] sm:$0x3f] %vm1573_vm11, %v7761_v38  ;;  %v7759_v39 = vpop.permute.xlu0 %7758 }
0x2643   : > { %7764 = vst.msk [vmem:[#allocation2] sm:$0xff] %vm1571_vm10, %v7759_v39 }
0x2646   : > { %v7972_v41 = vpop.permute.xlu1 %7971 }
0x2647   : > { %7976 = vst.msk [vmem:[#allocation2 + $0x8] sm:$0x3f] %vm1786_vm12, %v7972_v41  ;;  %v7970_v54 = vpop.permute.xlu0 %7969 }
0x2648   : > { %7975 = vst.msk [vmem:[#allocation2] sm:$0xff] %vm1784_vm13, %v7970_v54 }
0x264e   : > { %v7978_v46 = vld [vmem:[#allocation2 + $0x8] sm:$0x3f] }
0x264f   : > { %v7977_v42 = vld [vmem:[#allocation2] sm:$0xff] }
0x2650   : > { %11916 = vmatprep.mubr.f32.mxu0 %v7977_v42  ;;  %v8223_v42 = vld [vmem:[#allocation10 + $0x1308] sm:$0xff] }
0x2651   : > { %11917 = vmatmul.mubr.f32.vlgmr.msra.gmra.mrb[92].mxu0 %v7978_v46  ;;  %v8239_v46 = vld [vmem:[#allocation10 + $0x1388] sm:$0xff] }
0x2652   : > { %8608 = vmatprep.mubr.f32.mxu0 %v14454_v16 }
0x2724   : > { %v11918_v31 = vpop.f32.mrb[92].mxu0 }
0x2725   : > { %v8076_v52 = vadd.f32 %v11918_v31, %v10372_v50  ;;  %v8070_v55 = vpop.f32.mrb[93].mxu0  ;;  %v13430_v31 = vpack.c.bf16 %v8239_v46, %v8223_v42  ;;  %v8350_v42 = vld [vmem:[#allocation10 + $0x1700] sm:$0xff] }
0x2726   : > { %v8071_v10 = vadd.f32 %v10372_v50, %v8070_v55  ;;  %v8225_v50 = vld [vmem:[#allocation10 + $0x1318] sm:$0xff]  ;;  %v8222_v55 = vld [vmem:[#allocation10 + $0x1300] sm:$0xff] }
0x2727   : > { %v8080_v43 = vadd.f32 %v8076_v52, %v15308_v5  ;;  %v13452_v5 = vpack.c.bf16 %v8144_v1, %v8128_v21  ;;  %v8241_v52 = vld [vmem:[#allocation10 + $0x1398] sm:$0xff]  ;;  %13431 = vmatprep.subr.bf16.mxu1 %v13430_v31  ;;  %v13466_v21 = vpack.c.bf16 %v8273_v59, %v8257_v32  ;;  %v13436_v1 = vpack.c.bf16 %v8270_v56, %v8254_v44  ;;  %v8366_v46 = vld [vmem:[#allocation10 + $0x1780] sm:$0xff] }
0x2728   : > { %v8079_v45 = vadd.f32 %v8071_v10, %v15302_v19  ;;  %v8161_v19 = vld [vmem:[#allocation10 + $0x1118] sm:$0xff]  ;;  %v8238_v10 = vld [vmem:[#allocation10 + $0x1380] sm:$0xff]  ;;  %v13448_v31 = vpack.c.bf16 %v8366_v46, %v8350_v42  ;;  %v8196_v42 = vld [vmem:[#allocation10 + $0x1230] sm:$0xff] }
0x2729   : > { %v8083_v27 = vsel %vm1066_vm1, %v8080_v43, 0.0  ;;  %v13454_v23 = vpack.c.bf16 %v8177_v6, %v8161_v19  ;;  %13453 = vmatpush1.bf16.msra.mxu0 %v13452_v5  ;;  %v8272_v5 = vld [vmem:[#allocation10 + $0x1490] sm:$0xff]  ;;  %v8287_v19 = vld [vmem:[#allocation10 + $0x1508] sm:$0xff] }
0x272a   : > { %8084 = vadd.xlane.f32.xlu1 %v8083_v27  ;;  %8081 = vadd.xlane.f32.xlu0 %v8079_v45  ;;  %v8224_v27 = vld [vmem:[#allocation10 + $0x1310] sm:$0xff]  ;;  %v13468_v4 = vpack.c.bf16 %v8272_v5, %v8256_v3  ;;  %v8303_v6 = vld [vmem:[#allocation10 + $0x1588] sm:$0xff]  ;;  %v8130_v3 = vld [vmem:[#allocation10 + $0x1020] sm:$0xff] }
0x272b   : > { %13455 = vmatprep.subr.bf16.mxu0 %v13454_v23  ;;  %v13464_v30 = vpack.c.bf16 %v8240_v0, %v8224_v27  ;;  %v13438_v23 = vpack.c.bf16 %v8303_v6, %v8287_v19  ;;  %v8133_v27 = vld [vmem:[#allocation10 + $0x1038] sm:$0xff]  ;;  %v8132_v19 = vld [vmem:[#allocation10 + $0x1030] sm:$0xff] }
0x272c   : > { %v8148_v6 = vld [vmem:[#allocation10 + $0x10b0] sm:$0xff] }
0x272d   : > { %13457 = vmatpush1.bf16.msra.mxu0 %v13456_v22  ;;  %v13472_v22 = vpack.c.bf16 %v8304_v25, %v8288_v20  ;;  %v13516_v25 = vpack.c.bf16 %v8148_v6, %v8132_v19  ;;  %v8212_v46 = vld [vmem:[#allocation10 + $0x12b0] sm:$0xff] }
0x272e   : > { %13459 = vmatprep.subr.bf16.mxu0 %v13458_v11  ;;  %v8337_v11 = vld [vmem:[#allocation10 + $0x1698] sm:$0xff]  ;;  %v8260_v19 = vld [vmem:[#allocation10 + $0x1430] sm:$0xff] }
0x272f   : > { %v13474_v37 = vpack.c.bf16 %v8337_v11, %v8321_v12  ;;  %v8164_v12 = vld [vmem:[#allocation10 + $0x1130] sm:$0xff]  ;;  %v8195_v11 = vld [vmem:[#allocation10 + $0x1228] sm:$0xff] }
0x2730   : > { %v8276_v6 = vld [vmem:[#allocation10 + $0x14b0] sm:$0xff] }
0x2731   : > { %13461 = vmatpush1.bf16.msra.mxu0 %v13460_v14  ;;  %v8320_v14 = vld [vmem:[#allocation10 + $0x1610] sm:$0xff] }
0x27b7   : > { %v8085_v29 = vpop.xlane.xlu1 %8084  ;;  %v8082_v8 = vpop.xlane.xlu0 %8081 }
0x27b8   : > { %v8087_v33 = vmul.f32 0.0078125, %v8085_v29  ;;  %v8086_v34 = vmul.f32 0.0078125, %v8082_v8  ;;  %v8336_v29 = vld [vmem:[#allocation10 + $0x1690] sm:$0xff] }
0x27b9   : > { %v13476_v8 = vpack.c.bf16 %v8336_v29, %v8320_v14  ;;  %v8213_v14 = vld [vmem:[#allocation10 + $0x12b8] sm:$0xff] }
0x27ba   : > { %v15438_v35 = vsub.f32 %v8080_v43, %v8087_v33  ;;  %v15440_v38 = vsub.f32 %v8079_v45, %v8086_v34  ;;  %v13462_v43 = vpack.c.bf16 %v8241_v52, %v8225_v50  ;;  %v13432_v45 = vpack.c.bf16 %v8238_v10, %v8222_v55  ;;  %v8351_v33 = vld [vmem:[#allocation10 + $0x1708] sm:$0xff]  ;;  %v8352_v52 = vld [vmem:[#allocation10 + $0x1710] sm:$0xff] }
0x27bb   : > { %v8367_v34 = vld [vmem:[#allocation10 + $0x1788] sm:$0xff]  ;;  %v8368_v55 = vld [vmem:[#allocation10 + $0x1790] sm:$0xff] }
0x27bc   : > { %v8090_v39 = vmul.f32 %v15440_v38, %v15440_v38  ;;  %v8091_v41 = vmul.f32 %v15438_v35, %v15438_v35  ;;  %13463 = vmatprep.subr.bf16.mxu0 %v13462_v43  ;;  %13433 = vmatpush1.bf16.msra.mxu1 %v13432_v45  ;;  %v13480_v10 = vpack.c.bf16 %v8368_v55, %v8352_v52  ;;  %v8131_v43 = vld [vmem:[#allocation10 + $0x1028] sm:$0xff]  ;;  %v8229_v52 = vld [vmem:[#allocation10 + $0x1338] sm:$0xff] }
0x27bd   : > { %13465 = vmatpush1.bf16.msra.mxu0 %v13464_v30  ;;  %13435 = vmatprep.subr.bf16.mxu1 %v13434_v57  ;;  %v8147_v45 = vld [vmem:[#allocation10 + $0x10a8] sm:$0xff]  ;;  %v8149_v30 = vld [vmem:[#allocation10 + $0x10b8] sm:$0xff] }
0x27be   : > { %8092 = vadd.xlane.f32.xlu0 %v8090_v39  ;;  %v8094_v54 = vsel %vm1066_vm1, %v8091_v41, 0.0  ;;  %13467 = vmatprep.subr.bf16.mxu0 %v13466_v21  ;;  %v8353_v39 = vld [vmem:[#allocation10 + $0x1718] sm:$0xff]  ;;  %v13446_v41 = vpack.c.bf16 %v8367_v34, %v8351_v33  ;;  %v13482_v0 = vpack.c.bf16 %v8147_v45, %v8131_v43  ;;  %v13514_v51 = vpack.c.bf16 %v8149_v30, %v8133_v27  ;;  %v8194_v34 = vld [vmem:[#allocation10 + $0x1220] sm:$0xff] }
0x27bf   : > { %v8245_v55 = vld [vmem:[#allocation10 + $0x13b8] sm:$0xff]  ;;  %v13524_v43 = vpack.c.bf16 %v8212_v46, %v8196_v42  ;;  %v8226_v45 = vld [vmem:[#allocation10 + $0x1320] sm:$0xff] }
0x27c0   : > { %13437 = vmatpush1.bf16.msra.mxu1 %v13436_v1  ;;  %v10374_v1 = vld [vmem:[%s15610_s7 + $0x2] ss:$0 sm:$0xff]  ;;  %v8242_v27 = vld [vmem:[#allocation10 + $0x13a0] sm:$0xff]  ;;  %v13526_v30 = vpack.c.bf16 %v8245_v55, %v8229_v52  ;;  %v8373_v42 = vld [vmem:[#allocation10 + $0x17b8] sm:$0xff] }
0x27c1   : > { %13469 = vmatpush1.bf16.msra.mxu0 %v13468_v4  ;;  %13439 = vmatprep.subr.bf16.mxu1 %v13438_v23  ;;  %v8146_v4 = vld [vmem:[#allocation10 + $0x10a0] sm:$0xff]  ;;  %v8163_v23 = vld [vmem:[#allocation10 + $0x1128] sm:$0xff] }
0x27c2   : > { %8095 = vadd.xlane.f32.xlu0 %v8094_v54  ;;  %13471 = vmatprep.subr.bf16.mxu0 %v13470_v18  ;;  %v8369_v54 = vld [vmem:[#allocation10 + $0x1798] sm:$0xff]  ;;  %v13484_v20 = vpack.c.bf16 %v8146_v4, %v8130_v3  ;;  %v13486_v15 = vpack.c.bf16 %v8179_v17, %v8163_v23  ;;  %v8274_v3 = vld [vmem:[#allocation10 + $0x14a0] sm:$0xff]  ;;  %v8307_v23 = vld [vmem:[#allocation10 + $0x15a8] sm:$0xff] }
0x27c3   : > { %v13478_v50 = vpack.c.bf16 %v8369_v54, %v8353_v39  ;;  %v8181_v18 = vld [vmem:[#allocation10 + $0x11b8] sm:$0xff]  ;;  %v8210_v39 = vld [vmem:[#allocation10 + $0x12a0] sm:$0xff] }
0x27c4   : > { %13441 = vmatpush1.bf16.msra.mxu1 %v13440_v40  ;;  %v13518_v13 = vpack.c.bf16 %v8181_v18, %v8165_v48  ;;  %v8309_v17 = vld [vmem:[#allocation10 + $0x15b8] sm:$0xff]  ;;  %v13532_v18 = vpack.c.bf16 %v8276_v6, %v8260_v19  ;;  %v8370_v52 = vld [vmem:[#allocation10 + $0x17a0] sm:$0xff] }
0x27c5   : > { %13473 = vmatpush1.bf16.msra.mxu0 %v13472_v22  ;;  %13443 = vmatprep.subr.bf16.mxu1 %v13442_v2  ;;  %v8162_v22 = vld [vmem:[#allocation10 + $0x1120] sm:$0xff]  ;;  %v8180_v2 = vld [vmem:[#allocation10 + $0x11b0] sm:$0xff]  ;;  %v8185_v19 = vld [vmem:[#allocation10 + $0x11d8] sm:$0xff] }
0x27c6   : > { %13475 = vmatprep.subr.bf16.mxu0 %v13474_v37  ;;  %v8211_v37 = vld [vmem:[#allocation10 + $0x12a8] sm:$0xff]  ;;  %v13520_v33 = vpack.c.bf16 %v8180_v2, %v8164_v12 }
0x27c7   : > { %v8323_v12 = vld [vmem:[#allocation10 + $0x1628] sm:$0xff] }
0x27c8   : > { %13445 = vmatpush1.bf16.msra.mxu1 %v13444_v47  ;;  %v8197_v47 = vld [vmem:[#allocation10 + $0x1238] sm:$0xff]  ;;  %v8339_v2 = vld [vmem:[#allocation10 + $0x16a8] sm:$0xff] }
0x27c9   : > { %13477 = vmatpush1.bf16.msra.mxu0 %v13476_v8  ;;  %13447 = vmatprep.subr.bf16.mxu1 %v13446_v41  ;;  %v13488_v8 = vpack.c.bf16 %v8178_v49, %v8162_v22  ;;  %v13490_v41 = vpack.c.bf16 %v8211_v37, %v8195_v11  ;;  %v13522_v54 = vpack.c.bf16 %v8213_v14, %v8197_v47  ;;  %v8292_v49 = vld [vmem:[#allocation10 + $0x1530] sm:$0xff]  ;;  %v8325_v11 = vld [vmem:[#allocation10 + $0x1638] sm:$0xff]  ;;  %v8322_v47 = vld [vmem:[#allocation10 + $0x1620] sm:$0xff] }
0x27ca   : > { %13479 = vmatprep.subr.bf16.mxu0 %v13478_v50  ;;  %v8227_v50 = vld [vmem:[#allocation10 + $0x1328] sm:$0xff]  ;;  %v8338_v14 = vld [vmem:[#allocation10 + $0x16a0] sm:$0xff] }
0x27cb   : > { %v13508_v46 = vpack.c.bf16 %v8338_v14, %v8322_v47  ;;  %v8216_v47 = vld [vmem:[#allocation10 + $0x12d0] sm:$0xff]  ;;  %v8231_v14 = vld [vmem:[#allocation10 + $0x1348] sm:$0xff] }
0x27cc   : > { %13449 = vmatpush1.bf16.msra.mxu1 %v13448_v31  ;;  %v8243_v31 = vld [vmem:[#allocation10 + $0x13a8] sm:$0xff] }
0x27cd   : > { %13481 = vmatpush1.bf16.msra.mxu0 %v13480_v10  ;;  %13483 = vmatprep.subr.bf16.mxu1 %v13482_v0  ;;  %v13492_v10 = vpack.c.bf16 %v8210_v39, %v8194_v34  ;;  %v13494_v0 = vpack.c.bf16 %v8243_v31, %v8227_v50  ;;  %v8340_v34 = vld [vmem:[#allocation10 + $0x16b0] sm:$0xff]  ;;  %v8355_v39 = vld [vmem:[#allocation10 + $0x1728] sm:$0xff]  ;;  %v8354_v31 = vld [vmem:[#allocation10 + $0x1720] sm:$0xff] }
0x27ce   : > { %13515 = vmatprep.subr.bf16.mxu0 %v13514_v51  ;;  %v8228_v51 = vld [vmem:[#allocation10 + $0x1330] sm:$0xff] }
0x284b   : > { %v8093_v36 = vpop.xlane.xlu0 %8092 }
0x284c   : > { %v8097_v32 = vmul.f32 0.0078125, %v8093_v36  ;;  %v8244_v36 = vld [vmem:[#allocation10 + $0x13b0] sm:$0xff] }
0x284e   : > { %v8099_v57 = vadd.f32 1e-05, %v8097_v32  ;;  %v8259_v32 = vld [vmem:[#allocation10 + $0x1428] sm:$0xff] }
0x284f   : > { %v8096_v59 = vpop.xlane.xlu0 %8095 }
0x2850   : > { %14243 = vrsqrt.f32 %v8099_v57  ;;  %v8098_v44 = vmul.f32 0.0078125, %v8096_v59  ;;  %v8275_v57 = vld [vmem:[#allocation10 + $0x14a8] sm:$0xff]  ;;  %v8261_v59 = vld [vmem:[#allocation10 + $0x1438] sm:$0xff] }
0x2852   : > { %v8100_v56 = vadd.f32 1e-05, %v8098_v44  ;;  %v8277_v44 = vld [vmem:[#allocation10 + $0x14b8] sm:$0xff] }
0x2853   : > { %v13530_v4 = vpack.c.bf16 %v8277_v44, %v8261_v59 }
0x2854   : > { %14245 = vrsqrt.f32 %v8100_v56  ;;  %v13496_v56 = vpack.c.bf16 %v8242_v27, %v8226_v45  ;;  %v8372_v45 = vld [vmem:[#allocation10 + $0x17b0] sm:$0xff]  ;;  %v8135_v27 = vld [vmem:[#allocation10 + $0x1048] sm:$0xff] }
0x285a   : > { %v14244_v21 = vpop.eup %14243 }
0x285b   : > { %v8103_v5 = vmul.f32 %v14244_v21, %v15440_v38  ;;  %v13528_v21 = vpack.c.bf16 %v8244_v36, %v8228_v51  ;;  %v8153_v51 = vld [vmem:[#allocation10 + $0x10d8] sm:$0xff]  ;;  %v13512_v36 = vpack.c.bf16 %v8370_v52, %v8354_v31  ;;  %v8248_v31 = vld [vmem:[#allocation10 + $0x13d0] sm:$0xff]  ;;  %v8263_v52 = vld [vmem:[#allocation10 + $0x1448] sm:$0xff] }
0x285d   : > { %v8113_v9 = vmul.f32 %v10374_v1, %v8103_v5  ;;  %v13498_v5 = vpack.c.bf16 %v8275_v57, %v8259_v32  ;;  %v8134_v57 = vld [vmem:[#allocation10 + $0x1040] sm:$0xff] }
0x285e   : > { %v14246_v40 = vpop.eup %14245 }
0x285f   : > { %v15454_v63 = vadd.f32 %v10376_v7, %v8113_v9  ;;  %v8104_v38 = vmul.f32 %v14246_v40, %v15438_v35  ;;  %v8293_v9 = vld [vmem:[#allocation10 + $0x1538] sm:$0xff]  ;;  %v8290_v40 = vld [vmem:[#allocation10 + $0x1520] sm:$0xff] }
0x2860   : > { %v13534_v22 = vpack.c.bf16 %v8309_v17, %v8293_v9  ;;  %v8182_v9 = vld [vmem:[#allocation10 + $0x11c0] sm:$0xff]  ;;  %v8168_v17 = vld [vmem:[#allocation10 + $0x1150] sm:$0xff] }
0x2861   : > { %v8114_v29 = vmul.f32 %v10374_v1, %v8104_v38  ;;  %8532 = vmatmul.mubr.f32.vlgmr.msra.gmra.mrb[108].mxu1 %v15454_v63  ;;  %8609 = vmatmul.mubr.f32.vlgmr.msra.gmra.mrb[94].mxu0 %v15454_v63  ;;  %v8258_v1 = vld [vmem:[#allocation10 + $0x1420] sm:$0xff]  ;;  %v8308_v38 = vld [vmem:[#allocation10 + $0x15b0] sm:$0xff] }
0x2862   : > { %13485 = vmatpush1.bf16.msra.mxu1 %v13484_v20  ;;  %13517 = vmatpush1.bf16.msra.mxu0 %v13516_v25  ;;  %v13500_v48 = vpack.c.bf16 %v8274_v3, %v8258_v1  ;;  %v8306_v20 = vld [vmem:[#allocation10 + $0x15a0] sm:$0xff]  ;;  %v13536_v37 = vpack.c.bf16 %v8308_v38, %v8292_v49  ;;  %v8152_v1 = vld [vmem:[#allocation10 + $0x10d0] sm:$0xff]  ;;  %v8167_v3 = vld [vmem:[#allocation10 + $0x1148] sm:$0xff] }
0x2863   : > { %v15459_v35 = vadd.f32 %v10376_v7, %v8114_v29  ;;  %8537 = vmatprep.mubr.f32.mxu1 %v14454_v16  ;;  %8614 = vmatprep.mubr.f32.mxu0 %v14454_v16  ;;  %v8291_v7 = vld [vmem:[#allocation10 + $0x1528] sm:$0xff]  ;;  %v13506_v29 = vpack.c.bf16 %v8339_v2, %v8323_v12  ;;  %v8217_v49 = vld [vmem:[#allocation10 + $0x12d8] sm:$0xff]  ;;  %v8198_v2 = vld [vmem:[#allocation10 + $0x1240] sm:$0xff] }
0x2864   : > { %13487 = vmatprep.subr.bf16.mxu1 %v13486_v15  ;;  %13519 = vmatprep.subr.bf16.mxu0 %v13518_v13  ;;  %v13502_v25 = vpack.c.bf16 %v8307_v23, %v8291_v7  ;;  %v8341_v15 = vld [vmem:[#allocation10 + $0x16b8] sm:$0xff]  ;;  %v13504_v13 = vpack.c.bf16 %v8306_v20, %v8290_v40  ;;  %v8166_v23 = vld [vmem:[#allocation10 + $0x1140] sm:$0xff] }
0x2865   : > { %8538 = vmatmul.mubr.f32.gmra.mrb[110].mxu1 %v15459_v35  ;;  %8615 = vmatmul.mubr.f32.gmra.mrb[96].mxu0 %v15459_v35  ;;  %v13552_v38 = vpack.c.bf16 %v8182_v9, %v8166_v23  ;;  %v8312_v23 = vld [vmem:[#allocation10 + $0x15d0] sm:$0xff]  ;;  %v8327_v9 = vld [vmem:[#allocation10 + $0x1648] sm:$0xff] }
0x2866   : > { %13489 = vmatpush1.bf16.msra.mxu1 %v13488_v8  ;;  %13521 = vmatpush1.bf16.msra.mxu0 %v13520_v33  ;;  %v13538_v8 = vpack.c.bf16 %v8341_v15, %v8325_v11  ;;  %v8324_v33 = vld [vmem:[#allocation10 + $0x1630] sm:$0xff]  ;;  %v8214_v11 = vld [vmem:[#allocation10 + $0x12c0] sm:$0xff] }
0x2867   : > { %13491 = vmatprep.subr.bf16.mxu1 %v13490_v41  ;;  %13523 = vmatprep.subr.bf16.mxu0 %v13522_v54  ;;  %v8371_v41 = vld [vmem:[#allocation10 + $0x17a8] sm:$0xff]  ;;  %v8357_v54 = vld [vmem:[#allocation10 + $0x1738] sm:$0xff]  ;;  %v13540_v50 = vpack.c.bf16 %v8340_v34, %v8324_v33  ;;  %v13556_v34 = vpack.c.bf16 %v8214_v11, %v8198_v2  ;;  %v8344_v2 = vld [vmem:[#allocation10 + $0x16d0] sm:$0xff] }
0x2868   : > { %8685 = vmatprep.mubr.f32.mxu1 %v14454_v16  ;;  %8762 = vmatprep.mubr.f32.mxu0 %v14454_v16  ;;  %v13510_v55 = vpack.c.bf16 %v8371_v41, %v8355_v39  ;;  %v8249_v33 = vld [vmem:[#allocation10 + $0x13d8] sm:$0xff]  ;;  %v8230_v41 = vld [vmem:[#allocation10 + $0x1340] sm:$0xff]  ;;  %v8359_v11 = vld [vmem:[#allocation10 + $0x1748] sm:$0xff] }
0x286a   : > { %13493 = vmatpush1.bf16.msra.mxu1 %v13492_v10  ;;  %13525 = vmatpush1.bf16.msra.mxu0 %v13524_v43  ;;  %v13542_v10 = vpack.c.bf16 %v8373_v42, %v8357_v54  ;;  %v8356_v43 = vld [vmem:[#allocation10 + $0x1730] sm:$0xff]  ;;  %v8246_v54 = vld [vmem:[#allocation10 + $0x13c0] sm:$0xff] }
0x286b   : > { %13495 = vmatprep.subr.bf16.mxu1 %v13494_v0  ;;  %13527 = vmatprep.subr.bf16.mxu0 %v13526_v30  ;;  %v8151_v0 = vld [vmem:[#allocation10 + $0x10c8] sm:$0xff]  ;;  %v8137_v30 = vld [vmem:[#allocation10 + $0x1058] sm:$0xff]  ;;  %v13544_v32 = vpack.c.bf16 %v8372_v45, %v8356_v43  ;;  %v13560_v45 = vpack.c.bf16 %v8246_v54, %v8230_v41  ;;  %v8376_v41 = vld [vmem:[#allocation10 + $0x17d0] sm:$0xff] }
0x286c   : > { %v13546_v59 = vpack.c.bf16 %v8151_v0, %v8135_v27  ;;  %v13578_v44 = vpack.c.bf16 %v8153_v51, %v8137_v30  ;;  %v8281_v43 = vld [vmem:[#allocation10 + $0x14d8] sm:$0xff]  ;;  %v8262_v0 = vld [vmem:[#allocation10 + $0x1440] sm:$0xff]  ;;  %v8139_v54 = vld [vmem:[#allocation10 + $0x1068] sm:$0xff] }
0x286d   : > { %v8278_v30 = vld [vmem:[#allocation10 + $0x14c0] sm:$0xff] }
0x286e   : > { %13497 = vmatpush1.bf16.msra.mxu1 %v13496_v56  ;;  %13529 = vmatpush1.bf16.msra.mxu0 %v13528_v21  ;;  %v8150_v56 = vld [vmem:[#allocation10 + $0x10c0] sm:$0xff]  ;;  %v8136_v21 = vld [vmem:[#allocation10 + $0x1050] sm:$0xff] }
0x286f   : > { %13499 = vmatprep.subr.bf16.mxu1 %v13498_v5  ;;  %13531 = vmatprep.subr.bf16.mxu0 %v13530_v4  ;;  %v8183_v5 = vld [vmem:[#allocation10 + $0x11c8] sm:$0xff]  ;;  %v8169_v4 = vld [vmem:[#allocation10 + $0x1158] sm:$0xff]  ;;  %v13548_v6 = vpack.c.bf16 %v8150_v56, %v8134_v57  ;;  %v13580_v7 = vpack.c.bf16 %v8152_v1, %v8136_v21  ;;  %v8280_v57 = vld [vmem:[#allocation10 + $0x14d0] sm:$0xff]  ;;  %v13564_v1 = vpack.c.bf16 %v8278_v30, %v8262_v0 }
0x2870   : > { %v13550_v40 = vpack.c.bf16 %v8183_v5, %v8167_v3  ;;  %v13582_v20 = vpack.c.bf16 %v8185_v19, %v8169_v4  ;;  %v8297_v56 = vld [vmem:[#allocation10 + $0x1558] sm:$0xff]  ;;  %v8294_v5 = vld [vmem:[#allocation10 + $0x1540] sm:$0xff]  ;;  %v8156_v0 = vld [vmem:[#allocation10 + $0x10f0] sm:$0xff] }
0x2871   : > { %v8313_v21 = vld [vmem:[#allocation10 + $0x15d8] sm:$0xff]  ;;  %v8310_v4 = vld [vmem:[#allocation10 + $0x15c0] sm:$0xff]  ;;  %v8171_v30 = vld [vmem:[#allocation10 + $0x1168] sm:$0xff] }
0x2872   : > { %13501 = vmatpush1.bf16.msra.mxu1 %v13500_v48  ;;  %13533 = vmatpush1.bf16.msra.mxu0 %v13532_v18  ;;  %v8184_v48 = vld [vmem:[#allocation10 + $0x11d0] sm:$0xff]  ;;  %v8199_v18 = vld [vmem:[#allocation10 + $0x1248] sm:$0xff] }
0x2873   : > { %13503 = vmatprep.subr.bf16.mxu1 %v13502_v25  ;;  %13535 = vmatprep.subr.bf16.mxu0 %v13534_v22  ;;  %v8215_v25 = vld [vmem:[#allocation10 + $0x12c8] sm:$0xff]  ;;  %v8201_v22 = vld [vmem:[#allocation10 + $0x1258] sm:$0xff]  ;;  %v13584_v12 = vpack.c.bf16 %v8184_v48, %v8168_v17 }
0x2874   : > { %v13554_v15 = vpack.c.bf16 %v8215_v25, %v8199_v18  ;;  %v8343_v17 = vld [vmem:[#allocation10 + $0x16c8] sm:$0xff]  ;;  %v8329_v48 = vld [vmem:[#allocation10 + $0x1658] sm:$0xff]  ;;  %v8326_v25 = vld [vmem:[#allocation10 + $0x1640] sm:$0xff] }
0x2875   : > { %v8345_v18 = vld [vmem:[#allocation10 + $0x16d8] sm:$0xff] }
0x2876   : > { %13505 = vmatpush1.bf16.msra.mxu1 %v13504_v13  ;;  %13537 = vmatpush1.bf16.msra.mxu0 %v13536_v37  ;;  %v13586_v13 = vpack.c.bf16 %v8217_v49, %v8201_v22  ;;  %v8200_v37 = vld [vmem:[#allocation10 + $0x1250] sm:$0xff]  ;;  %v8342_v22 = vld [vmem:[#allocation10 + $0x16c0] sm:$0xff]  ;;  %v13570_v49 = vpack.c.bf16 %v8343_v17, %v8327_v9 }
0x2877   : > { %13507 = vmatprep.subr.bf16.mxu1 %v13506_v29  ;;  %13539 = vmatprep.subr.bf16.mxu0 %v13538_v8  ;;  %v8247_v29 = vld [vmem:[#allocation10 + $0x13c8] sm:$0xff]  ;;  %v8233_v8 = vld [vmem:[#allocation10 + $0x1358] sm:$0xff]  ;;  %v13588_v39 = vpack.c.bf16 %v8216_v47, %v8200_v37  ;;  %v13572_v47 = vpack.c.bf16 %v8342_v22, %v8326_v25  ;;  %v8202_v17 = vld [vmem:[#allocation10 + $0x1260] sm:$0xff] }
0x2878   : > { %v13558_v42 = vpack.c.bf16 %v8247_v29, %v8231_v14  ;;  %v8377_v37 = vld [vmem:[#allocation10 + $0x17d8] sm:$0xff]  ;;  %v8358_v29 = vld [vmem:[#allocation10 + $0x1740] sm:$0xff]  ;;  %v8220_v25 = vld [vmem:[#allocation10 + $0x12f0] sm:$0xff] }
0x2879   : > { %v8235_v22 = vld [vmem:[#allocation10 + $0x1368] sm:$0xff] }
0x287a   : > { %13509 = vmatpush1.bf16.msra.mxu1 %v13508_v46  ;;  %13541 = vmatpush1.bf16.msra.mxu0 %v13540_v50  ;;  %v13590_v46 = vpack.c.bf16 %v8249_v33, %v8233_v8  ;;  %v8232_v50 = vld [vmem:[#allocation10 + $0x1350] sm:$0xff]  ;;  %v8374_v8 = vld [vmem:[#allocation10 + $0x17c0] sm:$0xff] }
0x287b   : > { %13511 = vmatprep.subr.bf16.mxu1 %v13510_v55  ;;  %13543 = vmatprep.subr.bf16.mxu0 %v13542_v10  ;;  %v8279_v55 = vld [vmem:[#allocation10 + $0x14c8] sm:$0xff]  ;;  %v8265_v10 = vld [vmem:[#allocation10 + $0x1458] sm:$0xff]  ;;  %v13592_v27 = vpack.c.bf16 %v8248_v31, %v8232_v50  ;;  %v13576_v31 = vpack.c.bf16 %v8374_v8, %v8358_v29  ;;  %v8252_v29 = vld [vmem:[#allocation10 + $0x13f0] sm:$0xff] }
0x287c   : > { %v13562_v51 = vpack.c.bf16 %v8279_v55, %v8263_v52  ;;  %v8157_v50 = vld [vmem:[#allocation10 + $0x10f8] sm:$0xff]  ;;  %v8138_v55 = vld [vmem:[#allocation10 + $0x1060] sm:$0xff]  ;;  %v8267_v8 = vld [vmem:[#allocation10 + $0x1468] sm:$0xff] }
0x287e   : > { %13513 = vmatpush1.bf16.msra.mxu1 %v13512_v36  ;;  %13545 = vmatpush1.bf16.msra.mxu0 %v13544_v32  ;;  %v13594_v36 = vpack.c.bf16 %v8281_v43, %v8265_v10  ;;  %v8264_v32 = vld [vmem:[#allocation10 + $0x1450] sm:$0xff] }
0x287f   : > { %13547 = vmatprep.subr.bf16.mxu1 %v13546_v59  ;;  %13579 = vmatprep.subr.bf16.mxu0 %v13578_v44  ;;  %v8295_v59 = vld [vmem:[#allocation10 + $0x1548] sm:$0xff]  ;;  %v13596_v3 = vpack.c.bf16 %v8280_v57, %v8264_v32  ;;  %v8189_v32 = vld [vmem:[#allocation10 + $0x11f8] sm:$0xff] }
0x2880   : > { %v8311_v44 = vld [vmem:[#allocation10 + $0x15c8] sm:$0xff] }
0x2881   : > { %8686 = vmatmul.mubr.f32.vlgmr.msra.gmra.mrb[112].mxu1 %v15454_v63  ;;  %8763 = vmatmul.mubr.f32.vlgmr.msra.gmra.mrb[98].mxu0 %v15454_v63  ;;  %v13566_v19 = vpack.c.bf16 %v8311_v44, %v8295_v59  ;;  %v8170_v44 = vld [vmem:[#allocation10 + $0x1160] sm:$0xff] }
0x2882   : > { %13549 = vmatpush1.bf16.msra.mxu1 %v13548_v6  ;;  %13581 = vmatpush1.bf16.msra.mxu0 %v13580_v7  ;;  %v13598_v6 = vpack.c.bf16 %v8313_v21, %v8297_v56  ;;  %v8296_v7 = vld [vmem:[#allocation10 + $0x1550] sm:$0xff]  ;;  %v8186_v56 = vld [vmem:[#allocation10 + $0x11e0] sm:$0xff] }
0x2883   : > { %8691 = vmatprep.mubr.f32.mxu1 %v14454_v16  ;;  %8768 = vmatprep.mubr.f32.mxu0 %v14454_v16  ;;  %v8172_v21 = vld [vmem:[#allocation10 + $0x1170] sm:$0xff] }
0x2884   : > { %13551 = vmatprep.subr.bf16.mxu1 %v13550_v40  ;;  %13583 = vmatprep.subr.bf16.mxu0 %v13582_v20  ;;  %v13568_v40 = vpack.c.bf16 %v8310_v4, %v8294_v5  ;;  %v13600_v20 = vpack.c.bf16 %v8312_v23, %v8296_v7  ;;  %v8221_v7 = vld [vmem:[#allocation10 + $0x12f8] sm:$0xff]  ;;  %v13616_v23 = vpack.c.bf16 %v8186_v56, %v8170_v44  ;;  %v8316_v44 = vld [vmem:[#allocation10 + $0x15f0] sm:$0xff]  ;;  %v8331_v56 = vld [vmem:[#allocation10 + $0x1668] sm:$0xff] }
0x2885   : > { %8692 = vmatmul.mubr.f32.gmra.mrb[114].mxu1 %v15459_v35  ;;  %8769 = vmatmul.mubr.f32.gmra.mrb[100].mxu0 %v15459_v35 }
0x2886   : > { %13553 = vmatpush1.bf16.msra.mxu1 %v13552_v38  ;;  %13585 = vmatpush1.bf16.msra.mxu0 %v13584_v12  ;;  %v13602_v38 = vpack.c.bf16 %v8345_v18, %v8329_v48  ;;  %v8328_v12 = vld [vmem:[#allocation10 + $0x1650] sm:$0xff]  ;;  %v8218_v48 = vld [vmem:[#allocation10 + $0x12e0] sm:$0xff] }
0x2887   : > { %13555 = vmatprep.subr.bf16.mxu1 %v13554_v15  ;;  %13587 = vmatprep.subr.bf16.mxu0 %v13586_v13  ;;  %v8375_v15 = vld [vmem:[#allocation10 + $0x17c8] sm:$0xff]  ;;  %v8361_v13 = vld [vmem:[#allocation10 + $0x1758] sm:$0xff]  ;;  %v13604_v14 = vpack.c.bf16 %v8344_v2, %v8328_v12  ;;  %v13620_v2 = vpack.c.bf16 %v8218_v48, %v8202_v17  ;;  %v8348_v17 = vld [vmem:[#allocation10 + $0x16f0] sm:$0xff] }
0x2888   : > { %8839 = vmatprep.mubr.f32.mxu1 %v14454_v16  ;;  %8916 = vmatprep.mubr.f32.mxu0 %v14454_v16  ;;  %v13574_v33 = vpack.c.bf16 %v8375_v15, %v8359_v11  ;;  %v8253_v12 = vld [vmem:[#allocation10 + $0x13f8] sm:$0xff]  ;;  %v8234_v15 = vld [vmem:[#allocation10 + $0x1360] sm:$0xff]  ;;  %v8363_v48 = vld [vmem:[#allocation10 + $0x1768] sm:$0xff] }
0x288a   : > { %13557 = vmatpush1.bf16.msra.mxu1 %v13556_v34  ;;  %13589 = vmatpush1.bf16.msra.mxu0 %v13588_v39  ;;  %v13606_v34 = vpack.c.bf16 %v8377_v37, %v8361_v13  ;;  %v8360_v39 = vld [vmem:[#allocation10 + $0x1750] sm:$0xff]  ;;  %v8250_v13 = vld [vmem:[#allocation10 + $0x13e0] sm:$0xff] }
0x288b   : > { %13559 = vmatprep.subr.bf16.mxu1 %v13558_v42  ;;  %13591 = vmatprep.subr.bf16.mxu0 %v13590_v46  ;;  %v8155_v42 = vld [vmem:[#allocation10 + $0x10e8] sm:$0xff]  ;;  %v8141_v46 = vld [vmem:[#allocation10 + $0x1078] sm:$0xff]  ;;  %v13608_v52 = vpack.c.bf16 %v8376_v41, %v8360_v39  ;;  %v13624_v41 = vpack.c.bf16 %v8250_v13, %v8234_v15  ;;  %v8380_v15 = vld [vmem:[#allocation10 + $0x17f0] sm:$0xff] }
0x288c   : > { %v13610_v10 = vpack.c.bf16 %v8155_v42, %v8139_v54  ;;  %v13642_v43 = vpack.c.bf16 %v8157_v50, %v8141_v46  ;;  %v8285_v39 = vld [vmem:[#allocation10 + $0x14f8] sm:$0xff]  ;;  %v8266_v42 = vld [vmem:[#allocation10 + $0x1460] sm:$0xff] }
0x288d   : > { %v8282_v46 = vld [vmem:[#allocation10 + $0x14e0] sm:$0xff] }
0x288e   : > { %13561 = vmatpush1.bf16.msra.mxu1 %v13560_v45  ;;  %13593 = vmatpush1.bf16.msra.mxu0 %v13592_v27  ;;  %v8154_v45 = vld [vmem:[#allocation10 + $0x10e0] sm:$0xff]  ;;  %v8140_v27 = vld [vmem:[#allocation10 + $0x1070] sm:$0xff] }
0x288f   : > { %13563 = vmatprep.subr.bf16.mxu1 %v13562_v51  ;;  %13595 = vmatprep.subr.bf16.mxu0 %v13594_v36  ;;  %v8187_v51 = vld [vmem:[#allocation10 + $0x11e8] sm:$0xff]  ;;  %v8173_v36 = vld [vmem:[#allocation10 + $0x1178] sm:$0xff]  ;;  %v13612_v57 = vpack.c.bf16 %v8154_v45, %v8138_v55  ;;  %v13644_v59 = vpack.c.bf16 %v8156_v0, %v8140_v27  ;;  %v8284_v55 = vld [vmem:[#allocation10 + $0x14f0] sm:$0xff]  ;;  %v13628_v0 = vpack.c.bf16 %v8282_v46, %v8266_v42 }
0x2890   : > { %v13614_v5 = vpack.c.bf16 %v8187_v51, %v8171_v30  ;;  %v13646_v4 = vpack.c.bf16 %v8189_v32, %v8173_v36  ;;  %v8301_v45 = vld [vmem:[#allocation10 + $0x1578] sm:$0xff]  ;;  %v8298_v51 = vld [vmem:[#allocation10 + $0x1560] sm:$0xff]  ;;  %v9149_v42 = vld [vmem:[#allocation11 + $0x1108] sm:$0xff] }
0x2891   : > { %v8317_v27 = vld [vmem:[#allocation10 + $0x15f8] sm:$0xff]  ;;  %v8314_v36 = vld [vmem:[#allocation10 + $0x15e0] sm:$0xff]  ;;  %v9134_v46 = vld [vmem:[#allocation11 + $0x1090] sm:$0xff] }
0x2892   : > { %13565 = vmatpush1.bf16.msra.mxu1 %v13564_v1  ;;  %13597 = vmatpush1.bf16.msra.mxu0 %v13596_v3  ;;  %v8188_v1 = vld [vmem:[#allocation10 + $0x11f0] sm:$0xff]  ;;  %v8203_v3 = vld [vmem:[#allocation10 + $0x1268] sm:$0xff]  ;;  %v9132_v13 = vld [vmem:[#allocation11 + $0x1080] sm:$0xff] }
0x2893   : > { %13567 = vmatprep.subr.bf16.mxu1 %v13566_v19  ;;  %13599 = vmatprep.subr.bf16.mxu0 %v13598_v6  ;;  %v8219_v19 = vld [vmem:[#allocation10 + $0x12e8] sm:$0xff]  ;;  %v8205_v6 = vld [vmem:[#allocation10 + $0x1278] sm:$0xff]  ;;  %v13648_v9 = vpack.c.bf16 %v8188_v1, %v8172_v21 }
0x2894   : > { %v13618_v18 = vpack.c.bf16 %v8219_v19, %v8203_v3  ;;  %v8347_v21 = vld [vmem:[#allocation10 + $0x16e8] sm:$0xff]  ;;  %v8333_v1 = vld [vmem:[#allocation10 + $0x1678] sm:$0xff]  ;;  %v8330_v19 = vld [vmem:[#allocation10 + $0x1660] sm:$0xff] }
0x2895   : > { %v8349_v3 = vld [vmem:[#allocation10 + $0x16f8] sm:$0xff] }
0x2896   : > { %13569 = vmatpush1.bf16.msra.mxu1 %v13568_v40  ;;  %13601 = vmatpush1.bf16.msra.mxu0 %v13600_v20  ;;  %v13650_v40 = vpack.c.bf16 %v8221_v7, %v8205_v6  ;;  %v8204_v20 = vld [vmem:[#allocation10 + $0x1270] sm:$0xff]  ;;  %v8346_v6 = vld [vmem:[#allocation10 + $0x16e0] sm:$0xff]  ;;  %v13634_v7 = vpack.c.bf16 %v8347_v21, %v8331_v56 }
0x2897   : > { %13571 = vmatprep.subr.bf16.mxu1 %v13570_v49  ;;  %13603 = vmatprep.subr.bf16.mxu0 %v13602_v38  ;;  %v8251_v49 = vld [vmem:[#allocation10 + $0x13e8] sm:$0xff]  ;;  %v8237_v38 = vld [vmem:[#allocation10 + $0x1378] sm:$0xff]  ;;  %v13652_v11 = vpack.c.bf16 %v8220_v25, %v8204_v20  ;;  %v13636_v25 = vpack.c.bf16 %v8346_v6, %v8330_v19  ;;  %v9120_v21 = vld [vmem:[#allocation11 + $0x1020] sm:$0xff] }
0x2898   : > { %v13622_v37 = vpack.c.bf16 %v8251_v49, %v8235_v22  ;;  %v8381_v20 = vld [vmem:[#allocation10 + $0x17f8] sm:$0xff]  ;;  %v8362_v49 = vld [vmem:[#allocation10 + $0x1760] sm:$0xff]  ;;  %v9153_v19 = vld [vmem:[#allocation11 + $0x1128] sm:$0xff] }
0x2899   : > { %v9138_v6 = vld [vmem:[#allocation11 + $0x10b0] sm:$0xff] }
0x289a   : > { %13573 = vmatpush1.bf16.msra.mxu1 %v13572_v47  ;;  %13605 = vmatpush1.bf16.msra.mxu0 %v13604_v14  ;;  %v13654_v47 = vpack.c.bf16 %v8253_v12, %v8237_v38  ;;  %v8236_v14 = vld [vmem:[#allocation10 + $0x1370] sm:$0xff]  ;;  %v8378_v38 = vld [vmem:[#allocation10 + $0x17e0] sm:$0xff] }
0x289b   : > { %13575 = vmatprep.subr.bf16.mxu1 %v13574_v33  ;;  %13607 = vmatprep.subr.bf16.mxu0 %v13606_v34  ;;  %v8283_v33 = vld [vmem:[#allocation10 + $0x14e8] sm:$0xff]  ;;  %v8269_v34 = vld [vmem:[#allocation10 + $0x1478] sm:$0xff]  ;;  %v13656_v54 = vpack.c.bf16 %v8252_v29, %v8236_v14  ;;  %v13640_v29 = vpack.c.bf16 %v8378_v38, %v8362_v49  ;;  %v9140_v49 = vld [vmem:[#allocation11 + $0x10c0] sm:$0xff] }
0x289c   : > { %v13626_v50 = vpack.c.bf16 %v8283_v33, %v8267_v8  ;;  %v9165_v14 = vld [vmem:[#allocation11 + $0x1188] sm:$0xff] }
0x289d   : > { %v9141_v38 = vld [vmem:[#allocation11 + $0x10c8] sm:$0xff] }
0x289e   : > { %13577 = vmatpush1.bf16.msra.mxu1 %v13576_v31  ;;  %13609 = vmatpush1.bf16.msra.mxu0 %v13608_v52  ;;  %v13658_v31 = vpack.c.bf16 %v8285_v39, %v8269_v34  ;;  %v8268_v52 = vld [vmem:[#allocation10 + $0x1470] sm:$0xff]  ;;  %v9116_v39 = vld [vmem:[#allocation11 + $0x1000] sm:$0xff] }
0x289f   : > { %13611 = vmatprep.subr.bf16.mxu1 %v13610_v10  ;;  %13643 = vmatprep.subr.bf16.mxu0 %v13642_v43  ;;  %v8299_v10 = vld [vmem:[#allocation10 + $0x1568] sm:$0xff]  ;;  %v13660_v30 = vpack.c.bf16 %v8284_v55, %v8268_v52  ;;  %v9167_v52 = vld [vmem:[#allocation11 + $0x1198] sm:$0xff] }
0x28a0   : > { %v8315_v43 = vld [vmem:[#allocation10 + $0x15e8] sm:$0xff] }
0x28a1   : > { %8840 = vmatmul.mubr.f32.vlgmr.msra.gmra.mrb[116].mxu1 %v15454_v63  ;;  %8917 = vmatmul.mubr.f32.vlgmr.msra.gmra.mrb[102].mxu0 %v15454_v63  ;;  %v13630_v32 = vpack.c.bf16 %v8315_v43, %v8299_v10  ;;  %v9118_v43 = vld [vmem:[#allocation11 + $0x1010] sm:$0xff] }
0x28a2   : > { %13613 = vmatpush1.bf16.msra.mxu1 %v13612_v57  ;;  %13645 = vmatpush1.bf16.msra.mxu0 %v13644_v59  ;;  %v13662_v57 = vpack.c.bf16 %v8317_v27, %v8301_v45  ;;  %v8300_v59 = vld [vmem:[#allocation10 + $0x1570] sm:$0xff]  ;;  %v9119_v45 = vld [vmem:[#allocation11 + $0x1018] sm:$0xff] }
0x28a3   : > { %8845 = vmatprep.mubr.f32.mxu1 %v14454_v16  ;;  %8922 = vmatprep.mubr.f32.mxu0 %v14454_v16 }
0x28a4   : > { %13615 = vmatprep.subr.bf16.mxu1 %v13614_v5  ;;  %13647 = vmatprep.subr.bf16.mxu0 %v13646_v4  ;;  %v13632_v5 = vpack.c.bf16 %v8314_v36, %v8298_v51  ;;  %v13664_v4 = vpack.c.bf16 %v8316_v44, %v8300_v59  ;;  %v9151_v51 = vld [vmem:[#allocation11 + $0x1118] sm:$0xff]  ;;  %v9136_v36 = vld [vmem:[#allocation11 + $0x10a0] sm:$0xff]  ;;  %v9169_v59 = vld [vmem:[#allocation11 + $0x11a8] sm:$0xff]  ;;  %v13680_v44 = vpack.c.bf16 %v9119_v45, %v9118_v43 }
0x28a5   : > { %8846 = vmatmul.mubr.f32.gmra.mrb[118].mxu1 %v15459_v35  ;;  %8923 = vmatmul.mubr.f32.gmra.mrb[104].mxu0 %v15459_v35  ;;  %v9144_v43 = vld [vmem:[#allocation11 + $0x10e0] sm:$0xff]  ;;  %v9145_v45 = vld [vmem:[#allocation11 + $0x10e8] sm:$0xff] }
0x28a6   : > { %13617 = vmatpush1.bf16.msra.mxu1 %v13616_v23  ;;  %13649 = vmatpush1.bf16.msra.mxu0 %v13648_v9  ;;  %v13666_v23 = vpack.c.bf16 %v8349_v3, %v8333_v1  ;;  %v8332_v9 = vld [vmem:[#allocation10 + $0x1670] sm:$0xff]  ;;  %v9121_v1 = vld [vmem:[#allocation11 + $0x1028] sm:$0xff] }
0x28a7   : > { %13619 = vmatprep.subr.bf16.mxu1 %v13618_v18  ;;  %13651 = vmatprep.subr.bf16.mxu0 %v13650_v40  ;;  %v8379_v18 = vld [vmem:[#allocation10 + $0x17e8] sm:$0xff]  ;;  %v8365_v40 = vld [vmem:[#allocation10 + $0x1778] sm:$0xff]  ;;  %v13668_v22 = vpack.c.bf16 %v8348_v17, %v8332_v9  ;;  %v13684_v9 = vpack.c.bf16 %v9121_v1, %v9120_v21  ;;  %v9146_v21 = vld [vmem:[#allocation11 + $0x10f0] sm:$0xff] }
0x28a8   : > { %8993 = vmatprep.mubr.f32.mxu1 %v14454_v16  ;;  %9070 = vmatprep.mubr.f32.mxu0 %v14454_v16  ;;  %v13638_v12 = vpack.c.bf16 %v8379_v18, %v8363_v48  ;;  %v9122_v48 = vld [vmem:[#allocation11 + $0x1030] sm:$0xff]  ;;  %v9123_v18 = vld [vmem:[#allocation11 + $0x1038] sm:$0xff] }
0x28a9   : > { %v9147_v1 = vld [vmem:[#allocation11 + $0x10f8] sm:$0xff] }
0x28aa   : > { %13621 = vmatpush1.bf16.msra.mxu1 %v13620_v2  ;;  %13653 = vmatpush1.bf16.msra.mxu0 %v13652_v11  ;;  %v13670_v2 = vpack.c.bf16 %v8381_v20, %v8365_v40  ;;  %v8364_v11 = vld [vmem:[#allocation10 + $0x1770] sm:$0xff] }
0x28ab   : > { %13623 = vmatprep.subr.bf16.mxu1 %v13622_v37  ;;  %13655 = vmatprep.subr.bf16.mxu0 %v13654_v47  ;;  %v9133_v37 = vld [vmem:[#allocation11 + $0x1088] sm:$0xff]  ;;  %v9164_v47 = vld [vmem:[#allocation11 + $0x1180] sm:$0xff]  ;;  %v13672_v8 = vpack.c.bf16 %v8380_v15, %v8364_v11  ;;  %v13688_v11 = vpack.c.bf16 %v9123_v18, %v9122_v48 }
0x28ac   : > { %v13674_v33 = vpack.c.bf16 %v9133_v37, %v9132_v13  ;;  %v13706_v34 = vpack.c.bf16 %v9165_v14, %v9164_v47  ;;  %v9124_v13 = vld [vmem:[#allocation11 + $0x1040] sm:$0xff]  ;;  %v9125_v37 = vld [vmem:[#allocation11 + $0x1048] sm:$0xff]  ;;  %v13690_v47 = vpack.c.bf16 %v9141_v38, %v9140_v49 }
0x28ad   : > { %v9196_v48 = vld [vmem:[#allocation11 + $0x1280] sm:$0xff]  ;;  %v9197_v18 = vld [vmem:[#allocation11 + $0x1288] sm:$0xff] }
0x28ae   : > { %13625 = vmatpush1.bf16.msra.mxu1 %v13624_v41  ;;  %13657 = vmatpush1.bf16.msra.mxu0 %v13656_v54  ;;  %v9117_v41 = vld [vmem:[#allocation11 + $0x1008] sm:$0xff]  ;;  %v9148_v54 = vld [vmem:[#allocation11 + $0x1100] sm:$0xff]  ;;  %v13738_v49 = vpack.c.bf16 %v9197_v18, %v9196_v48 }
0x28af   : > { %13627 = vmatprep.subr.bf16.mxu1 %v13626_v50  ;;  %13659 = vmatprep.subr.bf16.mxu0 %v13658_v31  ;;  %v9135_v50 = vld [vmem:[#allocation11 + $0x1098] sm:$0xff]  ;;  %v9166_v31 = vld [vmem:[#allocation11 + $0x1190] sm:$0xff]  ;;  %v13676_v55 = vpack.c.bf16 %v9117_v41, %v9116_v39  ;;  %v13708_v10 = vpack.c.bf16 %v9149_v42, %v9148_v54  ;;  %v13692_v54 = vpack.c.bf16 %v9125_v37, %v9124_v13  ;;  %v9180_v37 = vld [vmem:[#allocation11 + $0x1200] sm:$0xff] }
0x28b0   : > { %v13678_v27 = vpack.c.bf16 %v9135_v50, %v9134_v46  ;;  %v9174_v39 = vld [vmem:[#allocation11 + $0x11d0] sm:$0xff]  ;;  %v9175_v41 = vld [vmem:[#allocation11 + $0x11d8] sm:$0xff] }
0x28b1   : > { %v9126_v46 = vld [vmem:[#allocation11 + $0x1050] sm:$0xff]  ;;  %v9127_v50 = vld [vmem:[#allocation11 + $0x1058] sm:$0xff] }
0x28b2   : > { %13629 = vmatpush1.bf16.msra.mxu1 %v13628_v0  ;;  %13661 = vmatpush1.bf16.msra.mxu0 %v13660_v30  ;;  %v13710_v0 = vpack.c.bf16 %v9167_v52, %v9166_v31  ;;  %v9150_v30 = vld [vmem:[#allocation11 + $0x1110] sm:$0xff]  ;;  %v13726_v52 = vpack.c.bf16 %v9175_v41, %v9174_v39 }
0x28b3   : > { %13631 = vmatprep.subr.bf16.mxu1 %v13630_v32  ;;  %13663 = vmatprep.subr.bf16.mxu0 %v13662_v57  ;;  %v9137_v32 = vld [vmem:[#allocation11 + $0x10a8] sm:$0xff]  ;;  %v9168_v57 = vld [vmem:[#allocation11 + $0x11a0] sm:$0xff]  ;;  %v13712_v56 = vpack.c.bf16 %v9151_v51, %v9150_v30  ;;  %v13696_v30 = vpack.c.bf16 %v9127_v50, %v9126_v46  ;;  %v9199_v46 = vld [vmem:[#allocation11 + $0x1298] sm:$0xff] }
0x28b4   : > { %v13682_v3 = vpack.c.bf16 %v9137_v32, %v9136_v36  ;;  %v9128_v36 = vld [vmem:[#allocation11 + $0x1060] sm:$0xff]  ;;  %v9129_v32 = vld [vmem:[#allocation11 + $0x1068] sm:$0xff]  ;;  %v9230_v50 = vld [vmem:[#allocation11 + $0x1390] sm:$0xff] }
0x28b6   : > { %13633 = vmatpush1.bf16.msra.mxu1 %v13632_v5  ;;  %13665 = vmatpush1.bf16.msra.mxu0 %v13664_v4  ;;  %v13714_v5 = vpack.c.bf16 %v9169_v59, %v9168_v57  ;;  %v9152_v4 = vld [vmem:[#allocation11 + $0x1120] sm:$0xff]  ;;  %v13698_v57 = vpack.c.bf16 %v9145_v45, %v9144_v43  ;;  %v9182_v45 = vld [vmem:[#allocation11 + $0x1210] sm:$0xff] }
0x28b7   : > { %13635 = vmatprep.subr.bf16.mxu1 %v13634_v7  ;;  %13667 = vmatprep.subr.bf16.mxu0 %v13666_v23  ;;  %v9139_v7 = vld [vmem:[#allocation11 + $0x10b8] sm:$0xff]  ;;  %v9170_v23 = vld [vmem:[#allocation11 + $0x11b0] sm:$0xff]  ;;  %v13716_v17 = vpack.c.bf16 %v9153_v19, %v9152_v4  ;;  %v13700_v4 = vpack.c.bf16 %v9129_v32, %v9128_v36 }
0x28b8   : > { %v13686_v40 = vpack.c.bf16 %v9139_v7, %v9138_v6  ;;  %v9130_v6 = vld [vmem:[#allocation11 + $0x1070] sm:$0xff]  ;;  %v9131_v7 = vld [vmem:[#allocation11 + $0x1078] sm:$0xff] }
0x28ba   : > { %13637 = vmatpush1.bf16.msra.mxu1 %v13636_v25  ;;  %13669 = vmatpush1.bf16.msra.mxu0 %v13668_v22  ;;  %v9154_v25 = vld [vmem:[#allocation11 + $0x1130] sm:$0xff]  ;;  %v9155_v22 = vld [vmem:[#allocation11 + $0x1138] sm:$0xff] }
0x28bb   : > { %13639 = vmatprep.subr.bf16.mxu1 %v13638_v12  ;;  %13671 = vmatprep.subr.bf16.mxu0 %v13670_v2  ;;  %v9172_v12 = vld [vmem:[#allocation11 + $0x11c0] sm:$0xff]  ;;  %v9173_v2 = vld [vmem:[#allocation11 + $0x11c8] sm:$0xff]  ;;  %v13720_v15 = vpack.c.bf16 %v9155_v22, %v9154_v25  ;;  %v13704_v25 = vpack.c.bf16 %v9131_v7, %v9130_v6 }
0x28bc   : > { %v13722_v14 = vpack.c.bf16 %v9173_v2, %v9172_v12  ;;  %v15492_v12 = vld [vmem:[%s15613_s10 + $0x20] sm:$0xff] }
0x28bd   : > { %v8390_v2 = vrot.slane %v15492_v12, %v14768_v24  ;;  %v8402_v13 = vrot.slane %v15492_v12, %v14976_v60 }
0x28be   : > { %13641 = vmatpush1.bf16.msra.mxu1 %v13640_v29  ;;  %13673 = vmatpush1.bf16.msra.mxu0 %v13672_v8  ;;  %v9156_v29 = vld [vmem:[#allocation11 + $0x1140] sm:$0xff]  ;;  %v9157_v8 = vld [vmem:[#allocation11 + $0x1148] sm:$0xff] }
0x28bf   : > { %13675 = vmatprep.subr.bf16.mxu1 %v13674_v33  ;;  %13707 = vmatprep.subr.bf16.mxu0 %v13706_v34  ;;  %v9142_v33 = vld [vmem:[#allocation11 + $0x10d0] sm:$0xff]  ;;  %v9143_v34 = vld [vmem:[#allocation11 + $0x10d8] sm:$0xff]  ;;  %v13724_v42 = vpack.c.bf16 %v9157_v8, %v9156_v29  ;;  %v9212_v8 = vld [vmem:[#allocation11 + $0x1300] sm:$0xff] }
0x28c0   : > { %v13694_v31 = vpack.c.bf16 %v9143_v34, %v9142_v33  ;;  %v9213_v33 = vld [vmem:[#allocation11 + $0x1308] sm:$0xff]  ;;  %v9198_v34 = vld [vmem:[#allocation11 + $0x1290] sm:$0xff] }
0x28c1   : > { %8994 = vmatmul.mubr.f32.vlgmr.msra.gmra.mrb[120].mxu1 %v15454_v63  ;;  %9071 = vmatmul.mubr.f32.vlgmr.msra.gmra.mrb[106].mxu0 %v15454_v63  ;;  %v13772_v43 = vpack.c.bf16 %v9213_v33, %v9212_v8  ;;  %v13742_v36 = vpack.c.bf16 %v9199_v46, %v9198_v34  ;;  %v9186_v33 = vld [vmem:[#allocation11 + $0x1230] sm:$0xff]  ;;  %v9187_v34 = vld [vmem:[#allocation11 + $0x1238] sm:$0xff]  ;;  %v9204_v46 = vld [vmem:[#allocation11 + $0x12c0] sm:$0xff] }
0x28c2   : > { %8999 = vmatprep.mubr.f32.mxu1 %v14454_v16  ;;  %9076 = vmatprep.mubr.f32.mxu0 %v14454_v16  ;;  %v9171_v16 = vld [vmem:[#allocation11 + $0x11b8] sm:$0xff] }
0x28c3   : > { %13677 = vmatpush3.bf16.msra.mxu1 %v13676_v55  ;;  %13709 = vmatpush3.bf16.msra.mxu0 %v13708_v10  ;;  %v13718_v20 = vpack.c.bf16 %v9171_v16, %v9170_v23  ;;  %v9158_v55 = vld [vmem:[#allocation11 + $0x1150] sm:$0xff]  ;;  %v9159_v10 = vld [vmem:[#allocation11 + $0x1158] sm:$0xff]  ;;  %v13702_v23 = vpack.c.bf16 %v9147_v1, %v9146_v21 }
0x28c4   : > { %13679 = vmatprep.subr.bf16.mxu1 %v13678_v27  ;;  %13711 = vmatprep.subr.bf16.mxu0 %v13710_v0  ;;  %v9176_v27 = vld [vmem:[#allocation11 + $0x11e0] sm:$0xff]  ;;  %v9177_v0 = vld [vmem:[#allocation11 + $0x11e8] sm:$0xff]  ;;  %v13728_v51 = vpack.c.bf16 %v9159_v10, %v9158_v55 }
0x28c5   : > { %9000 = vmatmul.mubr.f32.gmra.mrb[122].mxu1 %v15459_v35  ;;  %9077 = vmatmul.mubr.f32.gmra.mrb[108].mxu0 %v15459_v35  ;;  %v13730_v59 = vpack.c.bf16 %v9177_v0, %v9176_v27 }
0x28c7   : > { %13681 = vmatpush3.bf16.msra.mxu1 %v13680_v44  ;;  %13713 = vmatpush3.bf16.msra.mxu0 %v13712_v56  ;;  %v9160_v44 = vld [vmem:[#allocation11 + $0x1160] sm:$0xff]  ;;  %v9161_v56 = vld [vmem:[#allocation11 + $0x1168] sm:$0xff] }
0x28c8   : > { %13683 = vmatprep.subr.bf16.mxu1 %v13682_v3  ;;  %13715 = vmatprep.subr.bf16.mxu0 %v13714_v5  ;;  %v9178_v3 = vld [vmem:[#allocation11 + $0x11f0] sm:$0xff]  ;;  %v9179_v5 = vld [vmem:[#allocation11 + $0x11f8] sm:$0xff]  ;;  %v13732_v19 = vpack.c.bf16 %v9161_v56, %v9160_v44 }
0x28c9   : > { %v13734_v16 = vpack.c.bf16 %v9179_v5, %v9178_v3 }
0x28cb   : > { %13685 = vmatpush3.bf16.msra.mxu1 %v13684_v9  ;;  %13717 = vmatpush3.bf16.msra.mxu0 %v13716_v17  ;;  %v9162_v9 = vld [vmem:[#allocation11 + $0x1170] sm:$0xff]  ;;  %v9163_v17 = vld [vmem:[#allocation11 + $0x1178] sm:$0xff] }
0x28cc   : > { %13687 = vmatprep.subr.bf16.mxu1 %v13686_v40  ;;  %13719 = vmatprep.subr.bf16.mxu0 %v13718_v20  ;;  %v9228_v40 = vld [vmem:[#allocation11 + $0x1380] sm:$0xff]  ;;  %v9229_v20 = vld [vmem:[#allocation11 + $0x1388] sm:$0xff]  ;;  %v13736_v22 = vpack.c.bf16 %v9163_v17, %v9162_v9 }
0x28cd   : > { %v13770_v38 = vpack.c.bf16 %v9229_v20, %v9228_v40  ;;  %v9233_v9 = vld [vmem:[#allocation11 + $0x13a8] sm:$0xff]  ;;  %v9184_v20 = vld [vmem:[#allocation11 + $0x1220] sm:$0xff] }
0x28cf   : > { %13689 = vmatpush3.bf16.msra.mxu1 %v13688_v11  ;;  %13721 = vmatpush3.bf16.msra.mxu0 %v13720_v15  ;;  %v8398_v11 = vrot.slane %v15492_v12, %v14774_v26  ;;  %v8394_v15 = vrot.slane %v15492_v12, %v14778_v28 }
0x28d0   : > { %13691 = vmatprep.subr.bf16.mxu1 %v13690_v47  ;;  %13723 = vmatprep.subr.bf16.mxu0 %v13722_v14  ;;  %v9181_v47 = vld [vmem:[#allocation11 + $0x1208] sm:$0xff] }
0x28d1   : > { %v13740_v10 = vpack.c.bf16 %v9181_v47, %v9180_v37  ;;  %v9203_v37 = vld [vmem:[#allocation11 + $0x12b8] sm:$0xff]  ;;  %v9234_v47 = vld [vmem:[#allocation11 + $0x13b0] sm:$0xff] }
0x28d3   : > { %13693 = vmatpush3.bf16.msra.mxu1 %v13692_v54  ;;  %13725 = vmatpush3.bf16.msra.mxu0 %v13724_v42 }
0x28d4   : > { %13695 = vmatprep.subr.bf16.mxu1 %v13694_v31  ;;  %13727 = vmatprep.subr.bf16.mxu0 %v13726_v52  ;;  %v9231_v31 = vld [vmem:[#allocation11 + $0x1398] sm:$0xff] }
0x28d5   : > { %v13774_v32 = vpack.c.bf16 %v9231_v31, %v9230_v50  ;;  %v9205_v50 = vld [vmem:[#allocation11 + $0x12c8] sm:$0xff]  ;;  %v9236_v31 = vld [vmem:[#allocation11 + $0x13c0] sm:$0xff] }
0x28d7   : > { %13697 = vmatpush3.bf16.msra.mxu1 %v13696_v30  ;;  %13729 = vmatpush3.bf16.msra.mxu0 %v13728_v51 }
0x28d8   : > { %13699 = vmatprep.subr.bf16.mxu1 %v13698_v57  ;;  %13731 = vmatprep.subr.bf16.mxu0 %v13730_v59  ;;  %v9183_v57 = vld [vmem:[#allocation11 + $0x1218] sm:$0xff]  ;;  %v9214_v59 = vld [vmem:[#allocation11 + $0x1310] sm:$0xff] }
0x28d9   : > { %v13744_v18 = vpack.c.bf16 %v9183_v57, %v9182_v45  ;;  %v9189_v45 = vld [vmem:[#allocation11 + $0x1248] sm:$0xff]  ;;  %v9238_v57 = vld [vmem:[#allocation11 + $0x13d0] sm:$0xff] }
0x28db   : > { %13701 = vmatpush3.bf16.msra.mxu1 %v13700_v4  ;;  %13733 = vmatpush3.bf16.msra.mxu0 %v13732_v19  ;;  %v9215_v4 = vld [vmem:[#allocation11 + $0x1318] sm:$0xff]  ;;  %v9200_v19 = vld [vmem:[#allocation11 + $0x12a0] sm:$0xff] }
0x28dc   : > { %13703 = vmatprep.subr.bf16.mxu1 %v13702_v23  ;;  %13735 = vmatprep.subr.bf16.mxu0 %v13734_v16  ;;  %v9201_v23 = vld [vmem:[#allocation11 + $0x12a8] sm:$0xff]  ;;  %v9232_v16 = vld [vmem:[#allocation11 + $0x13a0] sm:$0xff]  ;;  %v13776_v40 = vpack.c.bf16 %v9215_v4, %v9214_v59  ;;  %v9239_v59 = vld [vmem:[#allocation11 + $0x13d8] sm:$0xff] }
0x28dd   : > { %v9222_v4 = vld [vmem:[#allocation11 + $0x1350] sm:$0xff] }
0x28df   : > { %13705 = vmatpush3.bf16.msra.mxu1 %v13704_v25  ;;  %13737 = vmatpush3.bf16.msra.mxu0 %v13736_v22  ;;  %v9185_v25 = vld [vmem:[#allocation11 + $0x1228] sm:$0xff] }
0x28e0   : > { %13739 = vmatprep.subr.bf16.mxu1 %v13738_v49  ;;  %13771 = vmatprep.subr.bf16.mxu0 %v13770_v38  ;;  %v13746_v38 = vpack.c.bf16 %v9201_v23, %v9200_v19  ;;  %v9223_v19 = vld [vmem:[#allocation11 + $0x1358] sm:$0xff]  ;;  %v9240_v23 = vld [vmem:[#allocation11 + $0x13e0] sm:$0xff] }
0x2934   : > { %v8533_v14 = vpop.f32.mrb[108].mxu1  ;;  %v8610_v29 = vpop.f32.mrb[94].mxu0 }
0x2935   : > { %v8534_v39 = vadd.f32 %v8533_v14, %v8390_v2  ;;  %v8611_v41 = vadd.f32 %v8610_v29, %v8398_v11  ;;  %v8535_v54 = vpop.f32.mrb[109].mxu1  ;;  %v8612_v42 = vpop.f32.mrb[95].mxu0  ;;  %v9235_v14 = vld [vmem:[#allocation11 + $0x13b8] sm:$0xff]  ;;  %v13748_v29 = vpack.c.bf16 %v9185_v25, %v9184_v20  ;;  %v9224_v25 = vld [vmem:[#allocation11 + $0x1360] sm:$0xff] }
0x2936   : > { %v8536_v52 = vadd.f32 %v8535_v54, %v8394_v15  ;;  %v8613_v55 = vadd.f32 %v8612_v42, %v8402_v13  ;;  %v9218_v54 = vld [vmem:[#allocation11 + $0x1330] sm:$0xff]  ;;  %v9219_v42 = vld [vmem:[#allocation11 + $0x1338] sm:$0xff] }
0x2937   : > { %v9083_v44 = vmax.f32 %v8534_v39, 0.0  ;;  %v9085_v56 = vmax.f32 %v8611_v41, 0.0  ;;  %v13782_v41 = vpack.c.bf16 %v9235_v14, %v9234_v47  ;;  %v9194_v47 = vld [vmem:[#allocation11 + $0x1270] sm:$0xff]  ;;  %v9195_v14 = vld [vmem:[#allocation11 + $0x1278] sm:$0xff] }
0x2938   : > { %v9084_v27 = vmax.f32 %v8536_v52, 0.0  ;;  %v9086_v0 = vmax.f32 %v8613_v55, 0.0  ;;  %v8539_v30 = vpop.f32.mrb[110].mxu1  ;;  %v8616_v51 = vpop.f32.mrb[96].mxu0  ;;  %v9237_v52 = vld [vmem:[#allocation11 + $0x13c8] sm:$0xff]  ;;  %v13752_v55 = vpack.c.bf16 %v9187_v34, %v9186_v33 }
0x2939   : > { %v8540_v21 = vadd.f32 %v8539_v30, %v8390_v2  ;;  %v8617_v1 = vadd.f32 %v8616_v51, %v8398_v11  ;;  %v8541_v3 = vpop.f32.mrb[111].mxu1  ;;  %v8618_v5 = vpop.f32.mrb[97].mxu0  ;;  %v13778_v2 = vpack.c.bf16 %v9233_v9, %v9232_v16  ;;  %v9216_v11 = vld [vmem:[#allocation11 + $0x1320] sm:$0xff]  ;;  %v9221_v51 = vld [vmem:[#allocation11 + $0x1348] sm:$0xff] }
0x293a   : > { %v8542_v6 = vadd.f32 %v8541_v3, %v8394_v15  ;;  %v8619_v7 = vadd.f32 %v8618_v5, %v8402_v13  ;;  %9444 = vmatprep.mubr.f32.mxu1 %v9084_v27  ;;  %9519 = vmatprep.mubr.f32.mxu0 %v9086_v0  ;;  %v9217_v15 = vld [vmem:[#allocation11 + $0x1328] sm:$0xff]  ;;  %v9202_v13 = vld [vmem:[#allocation11 + $0x12b0] sm:$0xff]  ;;  %v13754_v27 = vpack.c.bf16 %v9205_v50, %v9204_v46  ;;  %v9220_v30 = vld [vmem:[#allocation11 + $0x1340] sm:$0xff] }
0x293b   : > { %9445 = vmatmul.mubr.f32.vlgmr.msra.gmra.mrb[124].mxu1 %v9083_v44  ;;  %9520 = vmatmul.mubr.f32.vlgmr.msra.gmra.mrb[110].mxu0 %v9085_v56  ;;  %v9099_v22 = vmax.f32 %v8540_v21, 0.0  ;;  %v9101_v49 = vmax.f32 %v8617_v1, 0.0  ;;  %v13780_v8 = vpack.c.bf16 %v9217_v15, %v9216_v11  ;;  %v13750_v39 = vpack.c.bf16 %v9203_v37, %v9202_v13  ;;  %v9190_v21 = vld [vmem:[#allocation11 + $0x1250] sm:$0xff]  ;;  %v9191_v1 = vld [vmem:[#allocation11 + $0x1258] sm:$0xff]  ;;  %v9241_v16 = vld [vmem:[#allocation11 + $0x13e8] sm:$0xff] }
0x293c   : > { %v9100_v17 = vmax.f32 %v8542_v6, 0.0  ;;  %v9102_v48 = vmax.f32 %v8619_v7, 0.0  ;;  %13741 = vmatpush3.bf16.msra.mxu1 %v13740_v10  ;;  %13773 = vmatpush3.bf16.msra.mxu0 %v13772_v43  ;;  %v13784_v10 = vpack.c.bf16 %v9219_v42, %v9218_v54  ;;  %v9188_v43 = vld [vmem:[#allocation11 + $0x1240] sm:$0xff]  ;;  %v13786_v0 = vpack.c.bf16 %v9237_v52, %v9236_v31  ;;  %v9209_v7 = vld [vmem:[#allocation11 + $0x12e8] sm:$0xff]  ;;  %v9243_v11 = vld [vmem:[#allocation11 + $0x13f8] sm:$0xff] }
0x293d   : > { %13743 = vmatprep.subr.bf16.mxu1 %v13742_v36  ;;  %13775 = vmatprep.subr.bf16.mxu0 %v13774_v32  ;;  %v9206_v36 = vld [vmem:[#allocation11 + $0x12d0] sm:$0xff]  ;;  %v9207_v32 = vld [vmem:[#allocation11 + $0x12d8] sm:$0xff]  ;;  %v13756_v44 = vpack.c.bf16 %v9189_v45, %v9188_v43  ;;  %v13788_v56 = vpack.c.bf16 %v9221_v51, %v9220_v30  ;;  %v13790_v5 = vpack.c.bf16 %v9239_v59, %v9238_v57  ;;  %v9208_v6 = vld [vmem:[#allocation11 + $0x12e0] sm:$0xff] }
0x293e   : > { %9449 = vmatprep.mubr.f32.mxu1 %v9100_v17  ;;  %9524 = vmatprep.mubr.f32.mxu0 %v9102_v48  ;;  %v13758_v3 = vpack.c.bf16 %v9207_v32, %v9206_v36  ;;  %v13760_v9 = vpack.c.bf16 %v9191_v1, %v9190_v21  ;;  %v13792_v17 = vpack.c.bf16 %v9223_v19, %v9222_v4  ;;  %v9192_v48 = vld [vmem:[#allocation11 + $0x1260] sm:$0xff]  ;;  %v9261_v54 = vld [vmem:[#allocation11 + $0x1488] sm:$0xff]  ;;  %v9262_v36 = vld [vmem:[#allocation11 + $0x1490] sm:$0xff] }
0x293f   : > { %9450 = vmatmul.mubr.f32.gmra.mrb[126].mxu1 %v9099_v22  ;;  %9525 = vmatmul.mubr.f32.gmra.mrb[112].mxu0 %v9101_v49  ;;  %v13794_v20 = vpack.c.bf16 %v9241_v16, %v9240_v23  ;;  %v9225_v22 = vld [vmem:[#allocation11 + $0x1368] sm:$0xff]  ;;  %v9210_v49 = vld [vmem:[#allocation11 + $0x12f0] sm:$0xff]  ;;  %v8406_v15 = vrot.slane %v15492_v12, %v14987_v53  ;;  %v8410_v42 = vrot.slane %v15492_v12, %v14993_v61  ;;  %v9292_v50 = vld [vmem:[#allocation11 + $0x1580] sm:$0xff] }
0x2940   : > { %13745 = vmatpush3.bf16.msra.mxu1 %v13744_v18  ;;  %13777 = vmatpush3.bf16.msra.mxu0 %v13776_v40  ;;  %v9193_v18 = vld [vmem:[#allocation11 + $0x1268] sm:$0xff]  ;;  %v13762_v40 = vpack.c.bf16 %v9209_v7, %v9208_v6  ;;  %v13796_v37 = vpack.c.bf16 %v9225_v22, %v9224_v25  ;;  %v8418_v46 = vrot.slane %v15492_v12, %v14996_v62  ;;  %v9244_v52 = vld [vmem:[#allocation11 + $0x1400] sm:$0xff]  ;;  %v9294_v21 = vld [vmem:[#allocation11 + $0x1590] sm:$0xff] }
0x2941   : > { %13747 = vmatprep.subr.bf16.mxu1 %v13746_v38  ;;  %13779 = vmatprep.subr.bf16.mxu0 %v13778_v2  ;;  %v9211_v38 = vld [vmem:[#allocation11 + $0x12f8] sm:$0xff]  ;;  %v9242_v2 = vld [vmem:[#allocation11 + $0x13f0] sm:$0xff]  ;;  %v13764_v13 = vpack.c.bf16 %v9193_v18, %v9192_v48  ;;  %v9293_v31 = vld [vmem:[#allocation11 + $0x1588] sm:$0xff]  ;;  %v13768_v45 = vpack.c.bf16 %v9195_v14, %v9194_v47 }
0x2942   : > { %v13766_v33 = vpack.c.bf16 %v9211_v38, %v9210_v49  ;;  %v13798_v34 = vpack.c.bf16 %v9243_v11, %v9242_v2  ;;  %v9276_v30 = vld [vmem:[#allocation11 + $0x1500] sm:$0xff]  ;;  %v9277_v51 = vld [vmem:[#allocation11 + $0x1508] sm:$0xff]  ;;  %v9295_v1 = vld [vmem:[#allocation11 + $0x1598] sm:$0xff] }
0x2943   : > { %v13836_v19 = vpack.c.bf16 %v9277_v51, %v9276_v30  ;;  %v9246_v6 = vld [vmem:[#allocation11 + $0x1410] sm:$0xff]  ;;  %v13838_v48 = vpack.c.bf16 %v9295_v1, %v9294_v21  ;;  %v9247_v18 = vld [vmem:[#allocation11 + $0x1418] sm:$0xff]  ;;  %v9265_v14 = vld [vmem:[#allocation11 + $0x14a8] sm:$0xff] }
0x2944   : > { %13749 = vmatpush3.bf16.msra.mxu1 %v13748_v29  ;;  %13781 = vmatpush3.bf16.msra.mxu0 %v13780_v8  ;;  %v9226_v29 = vld [vmem:[#allocation11 + $0x1370] sm:$0xff]  ;;  %v8414_v8 = vrot.slane %v15492_v12, %v14990_v58  ;;  %v13834_v12 = vpack.c.bf16 %v9293_v31, %v9292_v50  ;;  %v9279_v11 = vld [vmem:[#allocation11 + $0x1518] sm:$0xff]  ;;  %v9300_v21 = vld [vmem:[#allocation11 + $0x15c0] sm:$0xff] }
0x2945   : > { %13751 = vmatprep.subr.bf16.mxu1 %v13750_v39  ;;  %13783 = vmatprep.subr.bf16.mxu0 %v13782_v41  ;;  %v9227_v39 = vld [vmem:[#allocation11 + $0x1378] sm:$0xff]  ;;  %v9260_v41 = vld [vmem:[#allocation11 + $0x1480] sm:$0xff]  ;;  %v9250_v51 = vld [vmem:[#allocation11 + $0x1430] sm:$0xff] }
0x2946   : > { %v9301_v1 = vld [vmem:[#allocation11 + $0x15c8] sm:$0xff] }
0x2948   : > { %13753 = vmatpush3.bf16.msra.mxu1 %v13752_v55  ;;  %13785 = vmatpush3.bf16.msra.mxu0 %v13784_v10  ;;  %v9245_v55 = vld [vmem:[#allocation11 + $0x1408] sm:$0xff] }
0x2949   : > { %13755 = vmatprep.subr.bf16.mxu1 %v13754_v27  ;;  %13787 = vmatprep.subr.bf16.mxu0 %v13786_v0  ;;  %v13800_v27 = vpack.c.bf16 %v9227_v39, %v9226_v29  ;;  %v13802_v0 = vpack.c.bf16 %v9261_v54, %v9260_v41  ;;  %v13804_v4 = vpack.c.bf16 %v9245_v55, %v9244_v52  ;;  %v9296_v29 = vld [vmem:[#allocation11 + $0x15a0] sm:$0xff]  ;;  %v9249_v54 = vld [vmem:[#allocation11 + $0x1428] sm:$0xff] }
0x294a   : > { %v9248_v41 = vld [vmem:[#allocation11 + $0x1420] sm:$0xff]  ;;  %v9281_v55 = vld [vmem:[#allocation11 + $0x1528] sm:$0xff] }
0x294b   : > { %v9280_v52 = vld [vmem:[#allocation11 + $0x1520] sm:$0xff] }
0x294c   : > { %13757 = vmatpush3.bf16.msra.mxu1 %v13756_v44  ;;  %13789 = vmatpush3.bf16.msra.mxu0 %v13788_v56  ;;  %v9263_v56 = vld [vmem:[#allocation11 + $0x1498] sm:$0xff]  ;;  %v13844_v30 = vpack.c.bf16 %v9281_v55, %v9280_v52 }
0x294d   : > { %13759 = vmatprep.subr.bf16.mxu1 %v13758_v3  ;;  %13791 = vmatprep.subr.bf16.mxu0 %v13790_v5  ;;  %v9307_v52 = vld [vmem:[#allocation11 + $0x15f8] sm:$0xff] }
0x2950   : > { %13761 = vmatpush3.bf16.msra.mxu1 %v13760_v9  ;;  %13793 = vmatpush3.bf16.msra.mxu0 %v13792_v17  ;;  %v13806_v17 = vpack.c.bf16 %v9263_v56, %v9262_v36  ;;  %v9251_v36 = vld [vmem:[#allocation11 + $0x1438] sm:$0xff]  ;;  %v9269_v56 = vld [vmem:[#allocation11 + $0x14c8] sm:$0xff] }
0x2951   : > { %13763 = vmatprep.subr.bf16.mxu1 %v13762_v40  ;;  %13795 = vmatprep.subr.bf16.mxu0 %v13794_v20  ;;  %v9278_v40 = vld [vmem:[#allocation11 + $0x1510] sm:$0xff] }
0x2954   : > { %v8687_v10 = vpop.f32.mrb[112].mxu1  ;;  %v8764_v43 = vpop.f32.mrb[98].mxu0  ;;  %13765 = vmatpush3.bf16.msra.mxu1 %v13764_v13  ;;  %13797 = vmatpush3.bf16.msra.mxu0 %v13796_v37  ;;  %v9264_v13 = vld [vmem:[#allocation11 + $0x14a0] sm:$0xff] }
0x2955   : > { %v8688_v32 = vadd.f32 %v8687_v10, %v8406_v15  ;;  %v8765_v57 = vadd.f32 %v8764_v43, %v8414_v8  ;;  %v8689_v59 = vpop.f32.mrb[113].mxu1  ;;  %v8766_v44 = vpop.f32.mrb[99].mxu0  ;;  %13767 = vmatprep.subr.bf16.mxu1 %v13766_v33  ;;  %13799 = vmatprep.subr.bf16.mxu0 %v13798_v34  ;;  %v9297_v33 = vld [vmem:[#allocation11 + $0x15a8] sm:$0xff]  ;;  %v9266_v10 = vld [vmem:[#allocation11 + $0x14b0] sm:$0xff]  ;;  %v9267_v43 = vld [vmem:[#allocation11 + $0x14b8] sm:$0xff] }
0x2956   : > { %v8690_v3 = vadd.f32 %v8689_v59, %v8410_v42  ;;  %v8767_v5 = vadd.f32 %v8766_v44, %v8418_v46  ;;  %v9282_v59 = vld [vmem:[#allocation11 + $0x1530] sm:$0xff]  ;;  %v9283_v44 = vld [vmem:[#allocation11 + $0x1538] sm:$0xff] }
0x2957   : > { %v9087_v20 = vmax.f32 %v8688_v32, 0.0  ;;  %v9089_v25 = vmax.f32 %v8765_v57, 0.0  ;;  %v13814_v32 = vpack.c.bf16 %v9267_v43, %v9266_v10 }
0x2958   : > { %v9088_v7 = vmax.f32 %v8690_v3, 0.0  ;;  %v9090_v23 = vmax.f32 %v8767_v5, 0.0  ;;  %v8693_v16 = vpop.f32.mrb[114].mxu1  ;;  %v8770_v9 = vpop.f32.mrb[100].mxu0  ;;  %13769 = vmatpush3.bf16.msra.mxu1 %v13768_v45  ;;  %13801 = vmatpush3.bf16.msra.mxu0 %v13800_v27  ;;  %v9298_v45 = vld [vmem:[#allocation11 + $0x15b0] sm:$0xff]  ;;  %v9299_v27 = vld [vmem:[#allocation11 + $0x15b8] sm:$0xff]  ;;  %v13816_v3 = vpack.c.bf16 %v9251_v36, %v9250_v51  ;;  %v13848_v5 = vpack.c.bf16 %v9283_v44, %v9282_v59 }
0x2959   : > { %v8694_v22 = vadd.f32 %v8693_v16, %v8406_v15  ;;  %v8771_v49 = vadd.f32 %v8770_v9, %v8414_v8  ;;  %v8695_v38 = vpop.f32.mrb[115].mxu1  ;;  %v8772_v2 = vpop.f32.mrb[101].mxu0  ;;  %13803 = vmatprep.subr.bf16.mxu1 %v13802_v0  ;;  %13835 = vmatprep.subr.bf16.mxu0 %v13834_v12  ;;  %v13808_v15 = vpack.c.bf16 %v9247_v18, %v9246_v6  ;;  %v9268_v12 = vld [vmem:[#allocation11 + $0x14c0] sm:$0xff]  ;;  %v9285_v16 = vld [vmem:[#allocation11 + $0x1548] sm:$0xff]  ;;  %v9270_v9 = vld [vmem:[#allocation11 + $0x14d0] sm:$0xff] }
0x295a   : > { %v8696_v37 = vadd.f32 %v8695_v38, %v8410_v42  ;;  %v8773_v47 = vadd.f32 %v8772_v2, %v8418_v46  ;;  %9594 = vmatprep.mubr.f32.mxu1 %v9088_v7  ;;  %9669 = vmatprep.mubr.f32.mxu0 %v9090_v23  ;;  %v13840_v8 = vpack.c.bf16 %v9279_v11, %v9278_v40  ;;  %v9284_v23 = vld [vmem:[#allocation11 + $0x1540] sm:$0xff]  ;;  %v9303_v18 = vld [vmem:[#allocation11 + $0x15d8] sm:$0xff]  ;;  %v9286_v2 = vld [vmem:[#allocation11 + $0x1550] sm:$0xff] }
0x295b   : > { %9595 = vmatmul.mubr.f32.vlgmr.msra.gmra.mrb[128].mxu1 %v9087_v20  ;;  %9670 = vmatmul.mubr.f32.vlgmr.msra.gmra.mrb[114].mxu0 %v9089_v25  ;;  %v9103_v50 = vmax.f32 %v8694_v22, 0.0  ;;  %v9105_v31 = vmax.f32 %v8771_v49, 0.0  ;;  %v13810_v42 = vpack.c.bf16 %v9265_v14, %v9264_v13  ;;  %v13842_v46 = vpack.c.bf16 %v9297_v33, %v9296_v29  ;;  %v9254_v25 = vld [vmem:[#allocation11 + $0x1450] sm:$0xff]  ;;  %v9255_v22 = vld [vmem:[#allocation11 + $0x1458] sm:$0xff]  ;;  %v9272_v13 = vld [vmem:[#allocation11 + $0x14e0] sm:$0xff] }
0x295c   : > { %v9104_v34 = vmax.f32 %v8696_v37, 0.0  ;;  %v9106_v39 = vmax.f32 %v8773_v47, 0.0  ;;  %13805 = vmatpush3.bf16.msra.mxu1 %v13804_v4  ;;  %13837 = vmatpush3.bf16.msra.mxu0 %v13836_v19  ;;  %v13812_v0 = vpack.c.bf16 %v9249_v54, %v9248_v41  ;;  %v13846_v57 = vpack.c.bf16 %v9299_v27, %v9298_v45  ;;  %v9252_v4 = vld [vmem:[#allocation11 + $0x1440] sm:$0xff]  ;;  %v9253_v19 = vld [vmem:[#allocation11 + $0x1448] sm:$0xff]  ;;  %v9287_v11 = vld [vmem:[#allocation11 + $0x1558] sm:$0xff] }
0x295d   : > { %13807 = vmatprep.subr.bf16.mxu1 %v13806_v17  ;;  %13839 = vmatprep.subr.bf16.mxu0 %v13838_v48  ;;  %v13818_v6 = vpack.c.bf16 %v9269_v56, %v9268_v12  ;;  %v13850_v7 = vpack.c.bf16 %v9301_v1, %v9300_v21  ;;  %v9271_v17 = vld [vmem:[#allocation11 + $0x14d8] sm:$0xff]  ;;  %v9302_v48 = vld [vmem:[#allocation11 + $0x15d0] sm:$0xff]  ;;  %v13820_v40 = vpack.c.bf16 %v9253_v19, %v9252_v4  ;;  %v9273_v37 = vld [vmem:[#allocation11 + $0x14e8] sm:$0xff] }
0x295e   : > { %9599 = vmatprep.mubr.f32.mxu1 %v9104_v34  ;;  %9674 = vmatprep.mubr.f32.mxu0 %v9106_v39  ;;  %v13852_v20 = vpack.c.bf16 %v9285_v16, %v9284_v23  ;;  %v13822_v49 = vpack.c.bf16 %v9271_v17, %v9270_v9  ;;  %v13854_v38 = vpack.c.bf16 %v9303_v18, %v9302_v48  ;;  %v9304_v47 = vld [vmem:[#allocation11 + $0x15e0] sm:$0xff]  ;;  %v9305_v14 = vld [vmem:[#allocation11 + $0x15e8] sm:$0xff]  ;;  %v15513_v34 = vld [vmem:[%s15613_s10 + $0x28] sm:$0xff] }
0x295f   : > { %9600 = vmatmul.mubr.f32.gmra.mrb[130].mxu1 %v9103_v50  ;;  %9675 = vmatmul.mubr.f32.gmra.mrb[116].mxu0 %v9105_v31  ;;  %v13824_v29 = vpack.c.bf16 %v9255_v22, %v9254_v25  ;;  %v13856_v33 = vpack.c.bf16 %v9287_v11, %v9286_v2  ;;  %v9256_v39 = vld [vmem:[#allocation11 + $0x1460] sm:$0xff]  ;;  %v13858_v41 = vpack.c.bf16 %v9305_v14, %v9304_v47  ;;  %v9289_v50 = vld [vmem:[#allocation11 + $0x1568] sm:$0xff]  ;;  %v9274_v31 = vld [vmem:[#allocation11 + $0x14f0] sm:$0xff] }
0x2960   : > { %13809 = vmatpush3.bf16.msra.mxu1 %v13808_v15  ;;  %13841 = vmatpush3.bf16.msra.mxu0 %v13840_v8  ;;  %v9257_v15 = vld [vmem:[#allocation11 + $0x1468] sm:$0xff]  ;;  %v13826_v8 = vpack.c.bf16 %v9273_v37, %v9272_v13  ;;  %v9288_v54 = vld [vmem:[#allocation11 + $0x1560] sm:$0xff]  ;;  %v8422_v55 = vrot.slane %v15513_v34, %v14768_v24  ;;  %v9258_v45 = vld [vmem:[#allocation11 + $0x1470] sm:$0xff]  ;;  %v8426_v44 = vrot.slane %v15513_v34, %v14778_v28 }
0x2961   : > { %13811 = vmatprep.subr.bf16.mxu1 %v13810_v42  ;;  %13843 = vmatprep.subr.bf16.mxu0 %v13842_v46  ;;  %v9275_v42 = vld [vmem:[#allocation11 + $0x14f8] sm:$0xff]  ;;  %v9306_v46 = vld [vmem:[#allocation11 + $0x15f0] sm:$0xff]  ;;  %v13828_v10 = vpack.c.bf16 %v9257_v15, %v9256_v39  ;;  %v13860_v43 = vpack.c.bf16 %v9289_v50, %v9288_v54  ;;  %v9325_v59 = vld [vmem:[#allocation11 + $0x1688] sm:$0xff]  ;;  %v8434_v24 = vrot.slane %v15513_v34, %v14976_v60 }
0x2962   : > { %v9259_v27 = vld [vmem:[#allocation11 + $0x1478] sm:$0xff]  ;;  %v13830_v51 = vpack.c.bf16 %v9275_v42, %v9274_v31  ;;  %v13862_v36 = vpack.c.bf16 %v9307_v52, %v9306_v46  ;;  %v9356_v12 = vld [vmem:[#allocation11 + $0x1780] sm:$0xff]  ;;  %v9357_v56 = vld [vmem:[#allocation11 + $0x1788] sm:$0xff] }
0x2963   : > { %v9308_v21 = vld [vmem:[#allocation11 + $0x1600] sm:$0xff]  ;;  %v9309_v1 = vld [vmem:[#allocation11 + $0x1608] sm:$0xff]  ;;  %v9326_v23 = vld [vmem:[#allocation11 + $0x1690] sm:$0xff]  ;;  %v13898_v60 = vpack.c.bf16 %v9357_v56, %v9356_v12 }
0x2964   : > { %13813 = vmatpush3.bf16.msra.mxu1 %v13812_v0  ;;  %13845 = vmatpush3.bf16.msra.mxu0 %v13844_v30  ;;  %v9290_v0 = vld [vmem:[#allocation11 + $0x1570] sm:$0xff]  ;;  %v8430_v30 = vrot.slane %v15513_v34, %v14774_v26  ;;  %v13832_v26 = vpack.c.bf16 %v9259_v27, %v9258_v45  ;;  %v9327_v48 = vld [vmem:[#allocation11 + $0x1698] sm:$0xff]  ;;  %v13868_v22 = vpack.c.bf16 %v9309_v1, %v9308_v21  ;;  %v9328_v42 = vld [vmem:[#allocation11 + $0x16a0] sm:$0xff] }
0x2965   : > { %13815 = vmatprep.subr.bf16.mxu1 %v13814_v32  ;;  %13847 = vmatprep.subr.bf16.mxu0 %v13846_v57  ;;  %v9291_v32 = vld [vmem:[#allocation11 + $0x1578] sm:$0xff]  ;;  %v9324_v57 = vld [vmem:[#allocation11 + $0x1680] sm:$0xff]  ;;  %v9358_v18 = vld [vmem:[#allocation11 + $0x1790] sm:$0xff]  ;;  %v13870_v47 = vpack.c.bf16 %v9327_v48, %v9326_v23 }
0x2966   : > { %v13864_v4 = vpack.c.bf16 %v9291_v32, %v9290_v0  ;;  %v13866_v19 = vpack.c.bf16 %v9325_v59, %v9324_v57  ;;  %v9343_v31 = vld [vmem:[#allocation11 + $0x1718] sm:$0xff]  ;;  %v9361_v45 = vld [vmem:[#allocation11 + $0x17a8] sm:$0xff]  ;;  %v9330_v56 = vld [vmem:[#allocation11 + $0x16b0] sm:$0xff] }
0x2967   : > { %v9345_v12 = vld [vmem:[#allocation11 + $0x1728] sm:$0xff]  ;;  %v9331_v21 = vld [vmem:[#allocation11 + $0x16b8] sm:$0xff]  ;;  %v9362_v1 = vld [vmem:[#allocation11 + $0x17b0] sm:$0xff] }
0x2968   : > { %13817 = vmatpush3.bf16.msra.mxu1 %v13816_v3  ;;  %13849 = vmatpush3.bf16.msra.mxu0 %v13848_v5  ;;  %v9346_v23 = vld [vmem:[#allocation11 + $0x1730] sm:$0xff] }
0x2969   : > { %13819 = vmatprep.subr.bf16.mxu1 %v13818_v6  ;;  %13851 = vmatprep.subr.bf16.mxu0 %v13850_v7  ;;  %v9340_v6 = vld [vmem:[#allocation11 + $0x1700] sm:$0xff]  ;;  %v9341_v7 = vld [vmem:[#allocation11 + $0x1708] sm:$0xff] }
0x296c   : > { %13821 = vmatpush3.bf16.msra.mxu1 %v13820_v40  ;;  %13853 = vmatpush3.bf16.msra.mxu0 %v13852_v20  ;;  %v9359_v40 = vld [vmem:[#allocation11 + $0x1798] sm:$0xff] }
0x296d   : > { %13823 = vmatprep.subr.bf16.mxu1 %v13822_v49  ;;  %13855 = vmatprep.subr.bf16.mxu0 %v13854_v38  ;;  %v13900_v49 = vpack.c.bf16 %v9341_v7, %v9340_v6  ;;  %v9310_v38 = vld [vmem:[#allocation11 + $0x1610] sm:$0xff]  ;;  %v13902_v14 = vpack.c.bf16 %v9359_v40, %v9358_v18  ;;  %v13878_v6 = vpack.c.bf16 %v9331_v21, %v9330_v56  ;;  %v9316_v40 = vld [vmem:[#allocation11 + $0x1640] sm:$0xff] }
0x2970   : > { %13825 = vmatpush3.bf16.msra.mxu1 %v13824_v29  ;;  %13857 = vmatpush3.bf16.msra.mxu0 %v13856_v33  ;;  %v9311_v29 = vld [vmem:[#allocation11 + $0x1618] sm:$0xff]  ;;  %v9342_v33 = vld [vmem:[#allocation11 + $0x1710] sm:$0xff] }
0x2971   : > { %13827 = vmatprep.subr.bf16.mxu1 %v13826_v8  ;;  %13859 = vmatprep.subr.bf16.mxu0 %v13858_v41 }
0x2974   : > { %v8841_v3 = vpop.f32.mrb[116].mxu1  ;;  %v8918_v5 = vpop.f32.mrb[102].mxu0  ;;  %13829 = vmatpush3.bf16.msra.mxu1 %v13828_v10  ;;  %13861 = vmatpush3.bf16.msra.mxu0 %v13860_v43  ;;  %v9329_v10 = vld [vmem:[#allocation11 + $0x16a8] sm:$0xff]  ;;  %v9360_v43 = vld [vmem:[#allocation11 + $0x17a0] sm:$0xff] }
0x2975   : > { %v8842_v16 = vadd.f32 %v8841_v3, %v8422_v55  ;;  %v8919_v9 = vadd.f32 %v8918_v5, %v8430_v30  ;;  %v8843_v28 = vpop.f32.mrb[117].mxu1  ;;  %v8920_v17 = vpop.f32.mrb[103].mxu0  ;;  %13831 = vmatprep.subr.bf16.mxu1 %v13830_v51  ;;  %13863 = vmatprep.subr.bf16.mxu0 %v13862_v36  ;;  %v9312_v51 = vld [vmem:[#allocation11 + $0x1620] sm:$0xff]  ;;  %v9313_v36 = vld [vmem:[#allocation11 + $0x1628] sm:$0xff]  ;;  %v13874_v59 = vpack.c.bf16 %v9329_v10, %v9328_v42  ;;  %v9363_v3 = vld [vmem:[#allocation11 + $0x17b8] sm:$0xff] }
0x2976   : > { %v8844_v20 = vadd.f32 %v8843_v28, %v8426_v44  ;;  %v8921_v25 = vadd.f32 %v8920_v17, %v8434_v24  ;;  %v13876_v5 = vpack.c.bf16 %v9313_v36, %v9312_v51  ;;  %v13910_v7 = vpack.c.bf16 %v9363_v3, %v9362_v1  ;;  %v9333_v28 = vld [vmem:[#allocation11 + $0x16c8] sm:$0xff]  ;;  %v9364_v17 = vld [vmem:[#allocation11 + $0x17c0] sm:$0xff]  ;;  %v9339_v51 = vld [vmem:[#allocation11 + $0x16f8] sm:$0xff] }
0x2977   : > { %v9091_v39 = vmax.f32 %v8842_v16, 0.0  ;;  %v9093_v15 = vmax.f32 %v8919_v9, 0.0  ;;  %v9347_v16 = vld [vmem:[#allocation11 + $0x1738] sm:$0xff]  ;;  %v9332_v9 = vld [vmem:[#allocation11 + $0x16c0] sm:$0xff]  ;;  %v9369_v42 = vld [vmem:[#allocation11 + $0x17e8] sm:$0xff] }
0x2978   : > { %v9092_v2 = vmax.f32 %v8844_v20, 0.0  ;;  %v9094_v11 = vmax.f32 %v8921_v25, 0.0  ;;  %v8847_v13 = vpop.f32.mrb[118].mxu1  ;;  %v8924_v37 = vpop.f32.mrb[104].mxu0  ;;  %13833 = vmatpush3.bf16.msra.mxu1 %v13832_v26  ;;  %13865 = vmatpush3.bf16.msra.mxu0 %v13864_v4  ;;  %v9314_v4 = vld [vmem:[#allocation11 + $0x1630] sm:$0xff]  ;;  %v13912_v18 = vpack.c.bf16 %v9347_v16, %v9346_v23  ;;  %v9317_v20 = vld [vmem:[#allocation11 + $0x1648] sm:$0xff]  ;;  %v13882_v25 = vpack.c.bf16 %v9333_v28, %v9332_v9 }
0x2979   : > { %v8848_v8 = vadd.f32 %v8847_v13, %v8422_v55  ;;  %v8925_v41 = vadd.f32 %v8924_v37, %v8430_v30  ;;  %v8849_v54 = vpop.f32.mrb[119].mxu1  ;;  %v8926_v50 = vpop.f32.mrb[105].mxu0  ;;  %13867 = vmatprep.subr.bf16.mxu1 %v13866_v19  ;;  %13899 = vmatprep.subr.bf16.mxu0 %v13898_v60  ;;  %v13872_v55 = vpack.c.bf16 %v9311_v29, %v9310_v38  ;;  %v9315_v19 = vld [vmem:[#allocation11 + $0x1638] sm:$0xff]  ;;  %v9365_v60 = vld [vmem:[#allocation11 + $0x17c8] sm:$0xff]  ;;  %v9366_v13 = vld [vmem:[#allocation11 + $0x17d0] sm:$0xff] }
0x297a   : > { %v8850_v46 = vadd.f32 %v8849_v54, %v8426_v44  ;;  %v8927_v52 = vadd.f32 %v8926_v50, %v8434_v24  ;;  %9744 = vmatprep.mubr.f32.mxu1 %v9092_v2  ;;  %9819 = vmatprep.mubr.f32.mxu0 %v9094_v11  ;;  %v13904_v30 = vpack.c.bf16 %v9343_v31, %v9342_v33  ;;  %v9344_v24 = vld [vmem:[#allocation11 + $0x1720] sm:$0xff]  ;;  %v9349_v38 = vld [vmem:[#allocation11 + $0x1748] sm:$0xff]  ;;  %v9334_v2 = vld [vmem:[#allocation11 + $0x16d0] sm:$0xff] }
0x297b   : > { %9745 = vmatmul.mubr.f32.vlgmr.msra.gmra.mrb[132].mxu1 %v9091_v39  ;;  %9820 = vmatmul.mubr.f32.vlgmr.msra.gmra.mrb[118].mxu0 %v9093_v15  ;;  %v9107_v32 = vmax.f32 %v8848_v8, 0.0  ;;  %v9109_v57 = vmax.f32 %v8925_v41, 0.0  ;;  %v13906_v44 = vpack.c.bf16 %v9361_v45, %v9360_v43  ;;  %v13908_v26 = vpack.c.bf16 %v9345_v12, %v9344_v24  ;;  %v9335_v11 = vld [vmem:[#allocation11 + $0x16d8] sm:$0xff]  ;;  %v9318_v29 = vld [vmem:[#allocation11 + $0x1650] sm:$0xff]  ;;  %v9336_v54 = vld [vmem:[#allocation11 + $0x16e0] sm:$0xff] }
0x297c   : > { %v9108_v27 = vmax.f32 %v8850_v46, 0.0  ;;  %v9110_v0 = vmax.f32 %v8927_v52, 0.0  ;;  %13869 = vmatpush3.bf16.msra.mxu1 %v13868_v22  ;;  %13901 = vmatpush3.bf16.msra.mxu0 %v13900_v49  ;;  %v13880_v48 = vpack.c.bf16 %v9315_v19, %v9314_v4  ;;  %v13914_v22 = vpack.c.bf16 %v9365_v60, %v9364_v17  ;;  %v9348_v49 = vld [vmem:[#allocation11 + $0x1740] sm:$0xff]  ;;  %v9367_v37 = vld [vmem:[#allocation11 + $0x17d8] sm:$0xff]  ;;  %v9350_v8 = vld [vmem:[#allocation11 + $0x1750] sm:$0xff] }
0x297d   : > { %13871 = vmatprep.subr.bf16.mxu1 %v13870_v47  ;;  %13903 = vmatprep.subr.bf16.mxu0 %v13902_v14  ;;  %v13884_v47 = vpack.c.bf16 %v9317_v20, %v9316_v40  ;;  %v13916_v14 = vpack.c.bf16 %v9349_v38, %v9348_v49  ;;  %v9319_v33 = vld [vmem:[#allocation11 + $0x1658] sm:$0xff]  ;;  %v13886_v39 = vpack.c.bf16 %v9335_v11, %v9334_v2  ;;  %v9337_v50 = vld [vmem:[#allocation11 + $0x16e8] sm:$0xff]  ;;  %v9368_v31 = vld [vmem:[#allocation11 + $0x17e0] sm:$0xff] }
0x297e   : > { %9749 = vmatprep.mubr.f32.mxu1 %v9108_v27  ;;  %9824 = vmatprep.mubr.f32.mxu0 %v9110_v0  ;;  %v13918_v15 = vpack.c.bf16 %v9367_v37, %v9366_v13  ;;  %v9351_v41 = vld [vmem:[#allocation11 + $0x1758] sm:$0xff]  ;;  %v13888_v46 = vpack.c.bf16 %v9319_v33, %v9318_v29  ;;  %v9320_v10 = vld [vmem:[#allocation11 + $0x1660] sm:$0xff]  ;;  %v9321_v43 = vld [vmem:[#allocation11 + $0x1668] sm:$0xff]  ;;  %v13890_v45 = vpack.c.bf16 %v9337_v50, %v9336_v54 }
0x297f   : > { %9750 = vmatmul.mubr.f32.gmra.mrb[134].mxu1 %v9107_v32  ;;  %9825 = vmatmul.mubr.f32.gmra.mrb[120].mxu0 %v9109_v57  ;;  %v13920_v52 = vpack.c.bf16 %v9351_v41, %v9350_v8  ;;  %v13922_v27 = vpack.c.bf16 %v9369_v42, %v9368_v31  ;;  %v9352_v0 = vld [vmem:[#allocation11 + $0x1760] sm:$0xff]  ;;  %v9370_v36 = vld [vmem:[#allocation11 + $0x17f0] sm:$0xff]  ;;  %v9371_v32 = vld [vmem:[#allocation11 + $0x17f8] sm:$0xff]  ;;  %v8438_v57 = vrot.slane %v15513_v34, %v14987_v53 }
0x2980   : > { %13873 = vmatpush3.bf16.msra.mxu1 %v13872_v55  ;;  %13905 = vmatpush3.bf16.msra.mxu0 %v13904_v30  ;;  %v9353_v55 = vld [vmem:[#allocation11 + $0x1768] sm:$0xff]  ;;  %v9338_v30 = vld [vmem:[#allocation11 + $0x16f0] sm:$0xff]  ;;  %v8446_v12 = vrot.slane %v15513_v34, %v14990_v58  ;;  %v13926_v21 = vpack.c.bf16 %v9371_v32, %v9370_v36  ;;  %v9323_v1 = vld [vmem:[#allocation11 + $0x1678] sm:$0xff]  ;;  %v8450_v4 = vrot.slane %v15513_v34, %v14996_v62 }
0x2981   : > { %13875 = vmatprep.subr.bf16.mxu1 %v13874_v59  ;;  %13907 = vmatprep.subr.bf16.mxu0 %v13906_v44  ;;  %v13892_v59 = vpack.c.bf16 %v9321_v43, %v9320_v10  ;;  %v13924_v44 = vpack.c.bf16 %v9353_v55, %v9352_v0  ;;  %v9322_v24 = vld [vmem:[#allocation11 + $0x1670] sm:$0xff]  ;;  %v13894_v56 = vpack.c.bf16 %v9339_v51, %v9338_v30 }
0x2982   : > { %v9354_v3 = vld [vmem:[#allocation11 + $0x1770] sm:$0xff] }
0x2983   : > { %v10380_v29 = vld [vmem:[%s15615_s12 + $0x2] ss:$0 sm:$0xff] }
0x2984   : > { %13877 = vmatpush3.bf16.msra.mxu1 %v13876_v5  ;;  %13909 = vmatpush3.bf16.msra.mxu0 %v13908_v26  ;;  %v9355_v5 = vld [vmem:[#allocation11 + $0x1778] sm:$0xff]  ;;  %v8442_v26 = vrot.slane %v15513_v34, %v14993_v61 }
0x2985   : > { %13879 = vmatprep.subr.bf16.mxu1 %v13878_v6  ;;  %13911 = vmatprep.subr.bf16.mxu0 %v13910_v7  ;;  %v13896_v6 = vpack.c.bf16 %v9323_v1, %v9322_v24  ;;  %v13928_v7 = vpack.c.bf16 %v9355_v5, %v9354_v3 }
0x2988   : > { %13881 = vmatpush3.bf16.msra.mxu1 %v13880_v48  ;;  %13913 = vmatpush3.bf16.msra.mxu0 %v13912_v18 }
0x2989   : > { %13883 = vmatprep.subr.bf16.mxu1 %v13882_v25  ;;  %13915 = vmatprep.subr.bf16.mxu0 %v13914_v22 }
0x298c   : > { %13885 = vmatpush3.bf16.msra.mxu1 %v13884_v47  ;;  %13917 = vmatpush3.bf16.msra.mxu0 %v13916_v14 }
0x298d   : > { %13887 = vmatprep.subr.bf16.mxu1 %v13886_v39  ;;  %13919 = vmatprep.subr.bf16.mxu0 %v13918_v15 }
0x2990   : > { %13889 = vmatpush3.bf16.msra.mxu1 %v13888_v46  ;;  %13921 = vmatpush3.bf16.msra.mxu0 %v13920_v52 }
0x2991   : > { %13891 = vmatprep.subr.bf16.mxu1 %v13890_v45  ;;  %13923 = vmatprep.subr.bf16.mxu0 %v13922_v27 }
0x2994   : > { %v8995_v53 = vpop.f32.mrb[120].mxu1  ;;  %v9072_v19 = vpop.f32.mrb[106].mxu0  ;;  %13893 = vmatpush3.bf16.msra.mxu1 %v13892_v59  ;;  %13925 = vmatpush3.bf16.msra.mxu0 %v13924_v44 }
0x2995   : > { %v8996_v23 = vadd.f32 %v8995_v53, %v8438_v57  ;;  %v9073_v16 = vadd.f32 %v9072_v19, %v8446_v12  ;;  %v8997_v58 = vpop.f32.mrb[121].mxu1  ;;  %v9074_v9 = vpop.f32.mrb[107].mxu0  ;;  %13895 = vmatprep.subr.bf16.mxu1 %v13894_v56  ;;  %13927 = vmatprep.subr.bf16.mxu0 %v13926_v21 }
0x2996   : > { %v8998_v28 = vadd.f32 %v8997_v58, %v8442_v26  ;;  %v9075_v17 = vadd.f32 %v9074_v9, %v8450_v4 }
0x2997   : > { %v9095_v62 = vmax.f32 %v8996_v23, 0.0  ;;  %v9097_v34 = vmax.f32 %v9073_v16, 0.0 }
0x2998   : > { %v9096_v60 = vmax.f32 %v8998_v28, 0.0  ;;  %v9098_v48 = vmax.f32 %v9075_v17, 0.0  ;;  %v9001_v61 = vpop.f32.mrb[122].mxu1  ;;  %v9078_v18 = vpop.f32.mrb[108].mxu0  ;;  %13897 = vmatpush3.bf16.msra.mxu1 %v13896_v6  ;;  %13929 = vmatpush3.bf16.msra.mxu0 %v13928_v7 }
0x2999   : > { %v9002_v40 = vadd.f32 %v9001_v61, %v8438_v57  ;;  %v9079_v20 = vadd.f32 %v9078_v18, %v8446_v12  ;;  %v9003_v25 = vpop.f32.mrb[123].mxu1  ;;  %v9080_v22 = vpop.f32.mrb[109].mxu0 }
0x299a   : > { %v9004_v49 = vadd.f32 %v9003_v25, %v8442_v26  ;;  %v9081_v38 = vadd.f32 %v9080_v22, %v8450_v4  ;;  %9894 = vmatprep.mubr.f32.mxu1 %v9096_v60  ;;  %9969 = vmatprep.mubr.f32.mxu0 %v9098_v48 }
0x299b   : > { %9895 = vmatmul.mubr.f32.vlgmr.msra.gmra.mrb[136].mxu1 %v9095_v62  ;;  %9970 = vmatmul.mubr.f32.vlgmr.msra.gmra.mrb[122].mxu0 %v9097_v34  ;;  %v9111_v13 = vmax.f32 %v9002_v40, 0.0  ;;  %v9113_v37 = vmax.f32 %v9079_v20, 0.0 }
0x299c   : > { %v9112_v2 = vmax.f32 %v9004_v49, 0.0  ;;  %v9114_v11 = vmax.f32 %v9081_v38, 0.0 }
0x299e   : > { %9899 = vmatprep.mubr.f32.mxu1 %v9112_v2  ;;  %9974 = vmatprep.mubr.f32.mxu0 %v9114_v11 }
0x299f   : > { %9900 = vmatmul.mubr.f32.gmra.mrb[138].mxu1 %v9111_v13  ;;  %9975 = vmatmul.mubr.f32.gmra.mrb[124].mxu0 %v9113_v37 }
0x2a0e   : > { %v11240_v47 = vpop.f32.mrb[124].mxu1  ;;  %v11278_v14 = vpop.f32.mrb[110].mxu0 }
0x2a0f   : > { %v11241_v33 = vpop.f32.mrb[125].mxu1  ;;  %v11279_v39 = vpop.f32.mrb[111].mxu0 }
0x2a10   : > { %v11242_v15 = vadd.f32 %v11241_v33, %v11240_v47  ;;  %v11280_v8 = vadd.f32 %v11279_v39, %v11278_v14 }
0x2a12   : > { %v9447_v41 = vadd.f32 %v11242_v15, %v10380_v29  ;;  %v11243_v54 = vpop.f32.mrb[126].mxu1  ;;  %v11281_v50 = vpop.f32.mrb[112].mxu0 }
0x2a13   : > { %v11244_v31 = vpop.f32.mrb[127].mxu1  ;;  %v11282_v42 = vpop.f32.mrb[113].mxu0 }
0x2a14   : > { %v9522_v46 = vadd.f32 %v11280_v8, %v9447_v41  ;;  %v11245_v52 = vadd.f32 %v11244_v31, %v11243_v54  ;;  %v11283_v10 = vadd.f32 %v11282_v42, %v11281_v50  ;;  %v10026_v8 = vld [vmem:[%s15657_s30] sm:$0xff]  ;;  %v10027_v41 = vld [vmem:[%s15657_s30 + $0x8] sm:$0xff]  ;;  %v10028_v54 = vld [vmem:[%s15657_s30 + $0x10] sm:$0xff] }
0x2a16   : > { %v9452_v43 = vadd.f32 %v11245_v52, %v10380_v29 }
0x2a18   : > { %v9527_v45 = vadd.f32 %v11283_v10, %v9452_v43 }
0x2a2e   : > { %v11316_v27 = vpop.f32.mrb[128].mxu1  ;;  %v11354_v0 = vpop.f32.mrb[114].mxu0 }
0x2a2f   : > { %v11317_v55 = vpop.f32.mrb[129].mxu1  ;;  %v11355_v30 = vpop.f32.mrb[115].mxu0 }
0x2a30   : > { %v11318_v51 = vadd.f32 %v11317_v55, %v11316_v27  ;;  %v11356_v36 = vadd.f32 %v11355_v30, %v11354_v0  ;;  %v10030_v55 = vld [vmem:[%s15657_s30 + $0x20] sm:$0xff]  ;;  %v10031_v30 = vld [vmem:[%s15657_s30 + $0x28] sm:$0xff] }
0x2a32   : > { %v9597_v32 = vadd.f32 %v11318_v51, %v9522_v46  ;;  %v11319_v57 = vpop.f32.mrb[130].mxu1  ;;  %v11357_v59 = vpop.f32.mrb[116].mxu0  ;;  %v13938_v51 = vpack.c.bf16 %v10031_v30, %v10030_v55 }
0x2a33   : > { %v11320_v44 = vpop.f32.mrb[131].mxu1  ;;  %v11358_v24 = vpop.f32.mrb[117].mxu0 }
0x2a34   : > { %v9672_v12 = vadd.f32 %v11356_v36, %v9597_v32  ;;  %v11321_v56 = vadd.f32 %v11320_v44, %v11319_v57  ;;  %v11359_v21 = vadd.f32 %v11358_v24, %v11357_v59  ;;  %v10032_v36 = vld [vmem:[%s15657_s30 + $0x30] sm:$0xff]  ;;  %v10033_v32 = vld [vmem:[%s15657_s30 + $0x38] sm:$0xff]  ;;  %v10034_v59 = vld [vmem:[%s15657_s30 + $0x40] sm:$0xff] }
0x2a35   : > { %v13942_v57 = vpack.c.bf16 %v10033_v32, %v10032_v36  ;;  %v10035_v44 = vld [vmem:[%s15657_s30 + $0x48] sm:$0xff] }
0x2a36   : > { %v9602_v1 = vadd.f32 %v11321_v56, %v9527_v45  ;;  %v13946_v24 = vpack.c.bf16 %v10035_v44, %v10034_v59  ;;  %v10037_v56 = vld [vmem:[%s15657_s30 + $0x58] sm:$0xff] }
0x2a38   : > { %v9677_v3 = vadd.f32 %v11359_v21, %v9602_v1  ;;  %v10038_v21 = vld [vmem:[%s15657_s30 + $0x60] sm:$0xff] }
0x2a4e   : > { %v11392_v5 = vpop.f32.mrb[132].mxu1  ;;  %v11430_v26 = vpop.f32.mrb[118].mxu0 }
0x2a4f   : > { %v11393_v4 = vpop.f32.mrb[133].mxu1  ;;  %v11431_v53 = vpop.f32.mrb[119].mxu0 }
0x2a50   : > { %v11394_v19 = vadd.f32 %v11393_v4, %v11392_v5  ;;  %v11432_v6 = vadd.f32 %v11431_v53, %v11430_v26  ;;  %v10040_v26 = vld [vmem:[%s15657_s30 + $0x70] sm:$0xff]  ;;  %v10041_v4 = vld [vmem:[%s15657_s30 + $0x78] sm:$0xff] }
0x2a51   : > { %v13958_v53 = vpack.c.bf16 %v10041_v4, %v10040_v26 }
0x2a52   : > { %v9747_v7 = vadd.f32 %v11394_v19, %v9672_v12  ;;  %v11395_v23 = vpop.f32.mrb[134].mxu1  ;;  %v11433_v16 = vpop.f32.mrb[120].mxu0  ;;  %v10036_v12 = vld [vmem:[%s15657_s30 + $0x50] sm:$0xff] }
0x2a53   : > { %v11396_v58 = vpop.f32.mrb[135].mxu1  ;;  %v11434_v9 = vpop.f32.mrb[121].mxu0  ;;  %v13950_v1 = vpack.c.bf16 %v10037_v56, %v10036_v12 }
0x2a54   : > { %v9822_v28 = vadd.f32 %v11432_v6, %v9747_v7  ;;  %v11397_v17 = vadd.f32 %v11396_v58, %v11395_v23  ;;  %v11435_v60 = vadd.f32 %v11434_v9, %v11433_v16 }
0x2a56   : > { %v9752_v48 = vadd.f32 %v11397_v17, %v9677_v3  ;;  %v10039_v3 = vld [vmem:[%s15657_s30 + $0x68] sm:$0xff] }
0x2a57   : > { %v13954_v5 = vpack.c.bf16 %v10039_v3, %v10038_v21 }
0x2a58   : > { %v9827_v61 = vadd.f32 %v11435_v60, %v9752_v48  ;;  %v10384_v60 = vld [vmem:[%s15617_s14 + $0x2] ss:$0 sm:$0xff] }
0x2a6e   : > { %v11468_v18 = vpop.f32.mrb[136].mxu1  ;;  %v11506_v62 = vpop.f32.mrb[122].mxu0 }
0x2a6f   : > { %v11469_v34 = vpop.f32.mrb[137].mxu1  ;;  %v11507_v40 = vpop.f32.mrb[123].mxu0 }
0x2a70   : > { %v11470_v20 = vadd.f32 %v11469_v34, %v11468_v18  ;;  %v11508_v25 = vadd.f32 %v11507_v40, %v11506_v62 }
0x2a72   : > { %v9897_v22 = vadd.f32 %v11470_v20, %v9822_v28  ;;  %v11471_v49 = vpop.f32.mrb[138].mxu1  ;;  %v11509_v38 = vpop.f32.mrb[124].mxu0  ;;  %v10382_v28 = vld [vmem:[%s15616_s13 + $0x2] ss:$0 sm:$0xff]  ;;  %v10385_v20 = vld [vmem:[%s15658_s25] ss:$0 sm:$0xff] }
0x2a73   : > { %v11472_v2 = vpop.f32.mrb[139].mxu1  ;;  %v11510_v11 = vpop.f32.mrb[125].mxu0 }
0x2a74   : > { %v9972_v13 = vadd.f32 %v11508_v25, %v9897_v22  ;;  %v11473_v37 = vadd.f32 %v11472_v2, %v11471_v49  ;;  %v11511_v47 = vadd.f32 %v11510_v11, %v11509_v38 }
0x2a76   : > { %v9902_v14 = vadd.f32 %v11473_v37, %v9827_v61  ;;  %v9980_v29 = vadd.f32 %v9972_v13, %v15454_v63  ;;  %v13930_v63 = vpack.c.bf16 %v10027_v41, %v10026_v8 }
0x2a78   : > { %v9977_v33 = vadd.f32 %v11511_v47, %v9902_v14  ;;  %9982 = vadd.xlane.f32.xlu1 %v9980_v29  ;;  %13931 = vmatprep.subr.bf16.mxu1 %v13930_v63 }
0x2a79   : > { %13933 = vmatpush3.bf16.msra.mxu1 %v13930_v63 }
0x2a7a   : > { %v9981_v39 = vadd.f32 %v9977_v33, %v15459_v35  ;;  %v10029_v35 = vld [vmem:[%s15657_s30 + $0x18] sm:$0xff] }
0x2a7b   : > { %v13934_v50 = vpack.c.bf16 %v10029_v35, %v10028_v54 }
0x2a7c   : > { %v9984_v15 = vsel %vm1066_vm1, %v9981_v39, 0.0 }
0x2a7d   : > { %9985 = vadd.xlane.f32.xlu0 %v9984_v15  ;;  %13935 = vmatprep.subr.bf16.mxu1 %v13934_v50 }
0x2a7e   : > { %13937 = vmatpush3.bf16.msra.mxu1 %v13934_v50 }
0x2a7f   : > { %13939 = vmatprep.subr.bf16.mxu1 %v13938_v51 }
0x2a82   : > { %13941 = vmatpush3.bf16.msra.mxu1 %v13938_v51 }
0x2a83   : > { %13943 = vmatprep.subr.bf16.mxu1 %v13942_v57 }
0x2a86   : > { %13945 = vmatpush3.bf16.msra.mxu1 %v13942_v57 }
0x2a87   : > { %13947 = vmatprep.subr.bf16.mxu1 %v13946_v24 }
0x2a8a   : > { %13949 = vmatpush3.bf16.msra.mxu1 %v13946_v24 }
0x2a8b   : > { %13951 = vmatprep.subr.bf16.mxu1 %v13950_v1 }
0x2a8e   : > { %13953 = vmatpush3.bf16.msra.mxu1 %v13950_v1 }
0x2a8f   : > { %13955 = vmatprep.subr.bf16.mxu1 %v13954_v5 }
0x2a92   : > { %13957 = vmatpush3.bf16.msra.mxu1 %v13954_v5 }
0x2a93   : > { %13959 = vmatprep.subr.bf16.mxu1 %v13958_v53 }
0x2a96   : > { %13961 = vmatpush3.bf16.msra.mxu1 %v13958_v53 }
0x2b05   : > { %v9983_v31 = vpop.xlane.xlu1 %9982 }
0x2b06   : > { %v9987_v42 = vmul.f32 0.0078125, %v9983_v31 }
0x2b08   : > { %v9989_v46 = vsub.f32 %v9980_v29, %v9987_v42 }
0x2b0a   : > { %v9986_v52 = vpop.xlane.xlu0 %9985  ;;  %v9991_v10 = vmul.f32 %v9989_v46, %v9989_v46 }
0x2b0b   : > { %v9988_v43 = vmul.f32 0.0078125, %v9986_v52 }
0x2b0c   : > { %9993 = vadd.xlane.f32.xlu1 %v9991_v10 }
0x2b0d   : > { %v9990_v45 = vsub.f32 %v9981_v39, %v9988_v43 }
0x2b0f   : > { %v9992_v27 = vmul.f32 %v9990_v45, %v9990_v45 }
0x2b11   : > { %v9995_v0 = vsel %vm1066_vm1, %v9992_v27, 0.0 }
0x2b12   : > { %9996 = vadd.xlane.f32.xlu0 %v9995_v0 }
0x2b99   : > { %v9994_v19 = vpop.xlane.xlu1 %9993 }
0x2b9a   : > { %v9998_v6 = vmul.f32 0.0078125, %v9994_v19 }
0x2b9c   : > { %v10000_v7 = vadd.f32 1e-05, %v9998_v6 }
0x2b9e   : > { %14247 = vrsqrt.f32 %v10000_v7 }
0x2b9f   : > { %v9997_v23 = vpop.xlane.xlu0 %9996 }
0x2ba0   : > { %v9999_v16 = vmul.f32 0.0078125, %v9997_v23 }
0x2ba2   : > { %v10001_v58 = vadd.f32 1e-05, %v9999_v16 }
0x2ba4   : > { %14249 = vrsqrt.f32 %v10001_v58 }
0x2ba8   : > { %v14248_v9 = vpop.eup %14247 }
0x2ba9   : > { %v10004_v17 = vmul.f32 %v14248_v9, %v9989_v46 }
0x2bab   : > { %v10014_v48 = vmul.f32 %v10382_v28, %v10004_v17 }
0x2bad   : > { %v10024_v61 = vadd.f32 %v10384_v60, %v10014_v48 }
0x2bae   : > { %v14250_v18 = vpop.eup %14249 }
0x2baf   : > { %v10005_v62 = vmul.f32 %v14250_v18, %v9990_v45  ;;  %11951 = vmatprep.mubr.f32.mxu1 %v10024_v61 }
0x2bb1   : > { %v10015_v34 = vmul.f32 %v10382_v28, %v10005_v62 }
0x2bb3   : > { %v10025_v40 = vadd.f32 %v10384_v60, %v10015_v34 }
0x2bb5   : > { %11952 = vmatmul.mubr.f32.vlgmr.msra.gmra.mrb[140].mxu1 %v10025_v40 }
0x2c88   : > { %v11953_v25 = vpop.f32.mrb[140].mxu1 }
0x2c89   : > { %v10121_v22 = vadd.f32 %v11953_v25, %v10385_v20  ;;  %v10115_v49 = vpop.f32.mrb[141].mxu1 }
0x2c8a   : > { %v10116_v38 = vadd.f32 %v10385_v20, %v10115_v49 }
0x2c8b   : > { %10125 = vst [vmem:[%s634_s29 + $0x8] sm:$0x3f] %v10121_v22 }
0x2c8c   : > { %10124 = vst [vmem:[%s634_s29] sm:$0xff] %v10116_v38 }
0x2c8d PF: > { %s15660_s19 = sld [smem:[#allocation17_spill]] }
0x2c93   : > { %s31_s24 = sadd.s32 1, %s15660_s19  }
0x2c94   : > { %p28_p9 = scmp.ge.s32.totalorder %s31_s24, 4  }
0x2c96   :  { %30 = sbr.rel (!%p28_p9) target bundleno = 11 (0xb), region = 167 }
0x2c9d   :  { %10147 = vsyncpa [#allocation4], 1 }
0x2c9e   :  { %10149 = vsyncpa [#allocation4 + $0x1], 1 }
0x2c9f   :  { %10150 = vsyncpa [#allocation6], 1 }
0x2ca0   :  { %10151 = vsyncpa [#allocation9], 1 }
0x2ca1   :  { %10152 = vsyncpa [#allocation12], 1 }

</bundles_post_ra>
